<compile_context>
chip_gen: v6e
topology: v6e:2x2x1
jax: 0.10.0
libtpu: 0.0.40
codegen_flags: <defaults>
</compile_context>

<pallas_src>
import math

import jax
import jax.numpy as jnp
from jax import lax
from jax.experimental import pallas as pl
from jax.experimental.pallas import tpu as pltpu


def _round_up(x, m):
    return (x + m - 1) // m * m


# ----------------------------- fused Pallas kernel ----------------------------- #

def _make_fused_cnn_kernel(B, C, K, F, Ws, Qc, Qv, hidden, nc):
    """Kernel processing B images per grid step."""
    CKK = C * K * K

    def kernel(x_ref, wc_ref, bc_ref, w1_ref, b1_ref, w2_ref, b2_ref,
               o_ref, patch_ref):
        # x_ref:     (B, C, Lz)      zero-padded images, flattened with row stride Ws
        # wc_ref:    (F, CKK)        conv weight, columns ordered (kh, kw, c)
        # bc_ref:    (F, 1)          conv bias
        # w1_ref:    (F*Qv, hidden)  fc1 weight with pool-compaction + NCHW flatten folded in
        # patch_ref: (B, CKK, Qc)    transposed im2col scratch (pixels on lanes)

        # ---- im2col (transposed): each tap is one contiguous lane-offset slice ----
        xv = x_ref[...]
        for kh in range(K):
            for kw in range(K):
                t = kh * K + kw
                off = kh * Ws + kw
                patch_ref[:, t * C:(t + 1) * C, :] = xv[:, :, off:off + Qc]

        # ---- conv: one batched MXU matmul, F on sublanes, pixels on lanes ----
        wcb = jnp.broadcast_to(wc_ref[...][None], (B, F, CKK))
        conv = jnp.einsum('bfk,bkq->bfq', wcb, patch_ref[...],
                          preferred_element_type=jnp.float32)        # (B, F, Qc)

        # ---- 2x2 / stride-2 max pool via four statically shifted lane slices ----
        pooled = jnp.maximum(
            jnp.maximum(conv[:, :, 0:Qv], conv[:, :, 1:Qv + 1]),
            jnp.maximum(conv[:, :, Ws:Ws + Qv], conv[:, :, Ws + 1:Ws + 1 + Qv]))
        # bias + relu commute with the (per-filter) max pool
        act = jnp.maximum(pooled + bc_ref[...][None, :, :], 0.0)      # (B, F, Qv)

        # ---- fc1: one matmul; invalid pooled columns hit all-zero weight rows ----
        h = jnp.dot(act.reshape(B, F * Qv), w1_ref[...],
                    preferred_element_type=jnp.float32) + b1_ref[...]
        # dropout: identity (p=0.0 / inference semantics)
        h = jnp.maximum(h, 0.0)

        o_ref[...] = (jnp.dot(h, w2_ref[...], preferred_element_type=jnp.float32)
                      + b2_ref[...])

    return kernel


# ------------------------------- model wrapper -------------------------------- #

class ClassificationCNNPallas:
    def __init__(self, key, input_dim=(3, 16, 16), num_filters=8, kernel_size=5,
                 stride_conv=1, weight_scale=0.001, pool=2, stride_pool=2,
                 hidden_dim=32, num_classes=10, dropout=0.0):
        C, H, W = input_dim
        assert stride_conv == 1, "only stride_conv=1 supported (module default)"
        assert kernel_size % 2 == 1, "odd kernel_size (same-padding conv)"
        assert pool == 2 and stride_pool == 2, "only 2x2/2 max pool supported"
        assert H % 2 == 0 and W % 2 == 0

        K, F = kernel_size, num_filters
        pad = (K - 1) // 2
        Ho, Wo = H // 2, W // 2
        Hp, Wp = H + 2 * pad, W + 2 * pad
        Ws = _round_up(Wp, 8)            # flattened row stride (lane-friendly)
        Qv = H * Ws                      # pooled-output column count (lane axis)
        Qc = Qv + Ws + 1                 # conv columns needed for the 4 pool taps
        Lz = (Hp + 1) * Ws + K           # flattened padded-image length

        self.C, self.H, self.W, self.K, self.pad = C, H, W, K, pad
        self.F, self.Ho, self.Wo = F, Ho, Wo
        self.Hp, self.Wp, self.Ws = Hp, Wp, Ws
        self.Qv, self.Qc, self.Lz = Qv, Qc, Lz
        self.hidden_dim, self.num_classes = hidden_dim, num_classes
        self.dropout = dropout  # inference semantics: identity for any p

        # ---- parameter init (uniform fan-in, mimicking PyTorch defaults) ----
        k = jax.random.split(key, 6)
        fan_conv = C * K * K
        bc = 1.0 / math.sqrt(fan_conv)
        self.conv_w = (jax.random.uniform(k[0], (F, C, K, K), jnp.float32, -bc, bc)
                       * weight_scale)
        self.conv_b = jax.random.uniform(k[1], (F,), jnp.float32, -bc, bc)

        D1 = F * Ho * Wo
        b1 = 1.0 / math.sqrt(D1)
        self.fc1_w = jax.random.uniform(k[2], (D1, hidden_dim), jnp.float32, -b1, b1)
        self.fc1_b = jax.random.uniform(k[3], (hidden_dim,), jnp.float32, -b1, b1)
        b2 = 1.0 / math.sqrt(hidden_dim)
        self.fc2_w = jax.random.uniform(k[4], (hidden_dim, num_classes), jnp.float32, -b2, b2)
        self.fc2_b = jax.random.uniform(k[5], (num_classes,), jnp.float32, -b2, b2)

        # ---- one-time kernel-friendly layouts (no runtime permutes) ----
        CKK = C * K * K
        # conv weight columns ordered (kh, kw, c) to match the patch row ordering
        self.conv_w_mat = self.conv_w.transpose(0, 2, 3, 1).reshape(F, CKK)
        self.conv_b_col = self.conv_b.reshape(F, 1)
        # fold max-pool compaction + PyTorch NCHW flatten into fc1 weight rows:
        # pooled column (f, q=2*ho*Ws+2*wo)  <->  fc1 row f*Ho*Wo + ho*Wo + wo
        f_i = jnp.arange(F)[:, None, None]
        ho_i = jnp.arange(Ho)[None, :, None]
        wo_i = jnp.arange(Wo)[None, None, :]
        rows = (f_i * Qv + 2 * ho_i * Ws + 2 * wo_i).reshape(-1)
        self.fc1_w_fold = jnp.zeros((F * Qv, hidden_dim), jnp.float32).at[rows].set(self.fc1_w)
        self.fc1_b_row = self.fc1_b.reshape(1, hidden_dim)
        self.fc2_b_row = self.fc2_b.reshape(1, num_classes)

    def __call__(self, x):
        N = x.shape[0]
        C, H, W, K, pad = self.C, self.H, self.W, self.K, self.pad
        F, Ws, Qv, Qc, Lz, Hp = self.F, self.Ws, self.Qv, self.Qc, self.Lz, self.Hp
        hidden, nc = self.hidden_dim, self.num_classes
        CKK = C * K * K

        # block of images per grid step (amortizes per-step pipeline overhead,
        # keeps VMEM ~12 MiB so it also fits v7x's 64 MiB)
        B = min(32, _round_up(N, 8))
        N_pad = _round_up(N, B)
        steps = N_pad // B

        # NCHW -> zero-padded, row-strided flat layout (N_pad, C, Lz); no transpose.
        # TODO(synk): move this padding pass into the kernel (zero-init VMEM scratch
        #             + interior DMA) to drop the extra HBM pass for large N.
        xz = jnp.zeros((N_pad, C, Hp, Ws), jnp.float32)
        xz = xz.at[:N, :, pad:pad + H, pad:pad + W].set(x.astype(jnp.float32))
        xz = xz.reshape(N_pad, C, Hp * Ws)
        xz = jnp.pad(xz, ((0, 0), (0, 0), (0, Lz - Hp * Ws)))

        kernel = _make_fused_cnn_kernel(B, C, K, F, Ws, Qc, Qv, hidden, nc)

        grid_spec = pltpu.PrefetchScalarGridSpec(
            num_scalar_prefetch=0,
            grid=(steps,),
            in_specs=[
                pl.BlockSpec((B, C, Lz), lambda n: (n, 0, 0)),
                pl.BlockSpec((F, CKK), lambda n: (0, 0)),
                pl.BlockSpec((F, 1), lambda n: (0, 0)),
                pl.BlockSpec((F * Qv, hidden), lambda n: (0, 0)),
                pl.BlockSpec((1, hidden), lambda n: (0, 0)),
                pl.BlockSpec((hidden, nc), lambda n: (0, 0)),
                pl.BlockSpec((1, nc), lambda n: (0, 0)),
            ],
            out_specs=pl.BlockSpec((B, nc), lambda n: (n, 0)),
            scratch_shapes=[pltpu.VMEM((B, CKK, Qc), jnp.float32)],  # transposed im2col
        )

        out = pl.pallas_call(
            kernel,
            out_shape=jax.ShapeDtypeStruct((N_pad, nc), jnp.float32),
            grid_spec=grid_spec,
            compiler_params=pltpu.CompilerParams(
                dimension_semantics=("parallel",),
                vmem_limit_bytes=40 * 1024 * 1024,
            ),
        )(xz, self.conv_w_mat, self.conv_b_col, self.fc1_w_fold,
          self.fc1_b_row, self.fc2_w, self.fc2_b_row)

        return out[:N]


# ----------------------------------- main ----------------------------------- #

if __name__ == "__main__":
    key = jax.random.PRNGKey(0)
    k_param, k_input = jax.random.split(key)

    model = ClassificationCNNPallas(
        k_param, input_dim=(3, 16, 16), num_filters=8, kernel_size=5,
        weight_scale=0.001, pool=2, stride_pool=2, hidden_dim=32,
        num_classes=10, dropout=0.0,
    )

    x = jax.random.normal(k_input, (2, 3, 16, 16), dtype=jnp.float32)  # NCHW

    fwd = jax.jit(model.__call__)
    out = jax.block_until_ready(fwd(x))
    assert out.shape == (2, 10) and out.dtype == jnp.float32

    # ---- pure-JAX reference (same forward semantics) ----
    ref_conv = lax.conv_general_dilated(
        x, model.conv_w, window_strides=(1, 1),
        padding=((model.pad, model.pad), (model.pad, model.pad)),
        dimension_numbers=("NCHW", "OIHW", "NCHW"),
        precision=lax.Precision.HIGHEST)
    ref_conv = jnp.maximum(ref_conv + model.conv_b[None, :, None, None], 0.0)
    ref_pool = lax.reduce_window(ref_conv, -jnp.inf, lax.max,
                                 (1, 1, 2, 2), (1, 1, 2, 2), "VALID")
    ref_flat = ref_pool.reshape(x.shape[0], -1)                 # NCHW flatten
    ref_h = jnp.maximum(ref_flat @ model.fc1_w + model.fc1_b, 0.0)
    ref_out = ref_h @ model.fc2_w + model.fc2_b

    assert jnp.allclose(out, ref_out, rtol=1e-2, atol=1e-3), (
        "mismatch vs reference: max abs diff = %g"
        % float(jnp.max(jnp.abs(out - ref_out))))

    print("KERNEL_OK")
</pallas_src>

<mosaic_0001>
module attributes {stable_mosaic.version = 11 : i64} {
  func.func @kernel(%arg0: i32, %arg1: memref<8x3x509xf32, #tpu.memory_space<vmem>>, %arg2: memref<8x75xf32, #tpu.memory_space<vmem>>, %arg3: memref<8x1xf32, #tpu.memory_space<vmem>>, %arg4: memref<3072x32xf32, #tpu.memory_space<vmem>>, %arg5: memref<1x32xf32, #tpu.memory_space<vmem>>, %arg6: memref<32x10xf32, #tpu.memory_space<vmem>>, %arg7: memref<1x10xf32, #tpu.memory_space<vmem>>, %arg8: memref<8x10xf32, #tpu.memory_space<vmem>>, %arg9: memref<8x75x409xf32, #tpu.memory_space<vmem>>) attributes {dimension_semantics = [#tpu.dimension_semantics<parallel>], iteration_bounds = array<i64: 1>, scalar_prefetch = 0 : i64, scratch_operands = 1 : i64, tpu.core_type = #tpu.core_type<tc>, window_params = [{transform_indices = @transform_0, window_bounds = array<i64: 8, 3, 509>}, {pipeline_mode = #tpu.pipeline_mode<synchronous>, transform_indices = @transform_1, window_bounds = array<i64: 8, 75>}, {pipeline_mode = #tpu.pipeline_mode<synchronous>, transform_indices = @transform_2, window_bounds = array<i64: 8, 1>}, {pipeline_mode = #tpu.pipeline_mode<synchronous>, transform_indices = @transform_3, window_bounds = array<i64: 3072, 32>}, {pipeline_mode = #tpu.pipeline_mode<synchronous>, transform_indices = @transform_4, window_bounds = array<i64: 1, 32>}, {pipeline_mode = #tpu.pipeline_mode<synchronous>, transform_indices = @transform_5, window_bounds = array<i64: 32, 10>}, {pipeline_mode = #tpu.pipeline_mode<synchronous>, transform_indices = @transform_6, window_bounds = array<i64: 1, 10>}, {transform_indices = @transform_7, window_bounds = array<i64: 8, 10>}]} {
    %c0 = arith.constant 0 : index
    %c0_0 = arith.constant 0 : index
    %c0_1 = arith.constant 0 : index
    %0 = vector.load %arg1[%c0, %c0_0, %c0_1] : memref<8x3x509xf32, #tpu.memory_space<vmem>>, vector<8x3x509xf32>
    %1 = vector.extract_strided_slice %0 {offsets = [0, 0, 0], sizes = [8, 3, 409], strides = [1, 1, 1]} : vector<8x3x509xf32> to vector<8x3x409xf32>
    %c0_2 = arith.constant 0 : index
    %c0_3 = arith.constant 0 : index
    %c0_4 = arith.constant 0 : index
    %2 = vector.load %arg9[%c0_2, %c0_3, %c0_4] : memref<8x75x409xf32, #tpu.memory_space<vmem>>, vector<8x3x409xf32>
    tpu.vector_store %arg9[%c0_2, %c0_3, %c0_4], %1 {strides = array<i32>} : memref<8x75x409xf32, #tpu.memory_space<vmem>>, vector<8x3x409xf32>,
    %3 = vector.extract_strided_slice %0 {offsets = [0, 0, 1], sizes = [8, 3, 409], strides = [1, 1, 1]} : vector<8x3x509xf32> to vector<8x3x409xf32>
    %c0_5 = arith.constant 0 : index
    %c3 = arith.constant 3 : index
    %c0_6 = arith.constant 0 : index
    %4 = vector.load %arg9[%c0_5, %c3, %c0_6] : memref<8x75x409xf32, #tpu.memory_space<vmem>>, vector<8x3x409xf32>
    tpu.vector_store %arg9[%c0_5, %c3, %c0_6], %3 {strides = array<i32>} : memref<8x75x409xf32, #tpu.memory_space<vmem>>, vector<8x3x409xf32>,
    %5 = vector.extract_strided_slice %0 {offsets = [0, 0, 2], sizes = [8, 3, 409], strides = [1, 1, 1]} : vector<8x3x509xf32> to vector<8x3x409xf32>
    %c0_7 = arith.constant 0 : index
    %c6 = arith.constant 6 : index
    %c0_8 = arith.constant 0 : index
    %6 = vector.load %arg9[%c0_7, %c6, %c0_8] : memref<8x75x409xf32, #tpu.memory_space<vmem>>, vector<8x3x409xf32>
    tpu.vector_store %arg9[%c0_7, %c6, %c0_8], %5 {strides = array<i32>} : memref<8x75x409xf32, #tpu.memory_space<vmem>>, vector<8x3x409xf32>,
    %7 = vector.extract_strided_slice %0 {offsets = [0, 0, 3], sizes = [8, 3, 409], strides = [1, 1, 1]} : vector<8x3x509xf32> to vector<8x3x409xf32>
    %c0_9 = arith.constant 0 : index
    %c9 = arith.constant 9 : index
    %c0_10 = arith.constant 0 : index
    %8 = vector.load %arg9[%c0_9, %c9, %c0_10] : memref<8x75x409xf32, #tpu.memory_space<vmem>>, vector<8x3x409xf32>
    tpu.vector_store %arg9[%c0_9, %c9, %c0_10], %7 {strides = array<i32>} : memref<8x75x409xf32, #tpu.memory_space<vmem>>, vector<8x3x409xf32>,
    %9 = vector.extract_strided_slice %0 {offsets = [0, 0, 4], sizes = [8, 3, 409], strides = [1, 1, 1]} : vector<8x3x509xf32> to vector<8x3x409xf32>
    %c0_11 = arith.constant 0 : index
    %c12 = arith.constant 12 : index
    %c0_12 = arith.constant 0 : index
    %10 = vector.load %arg9[%c0_11, %c12, %c0_12] : memref<8x75x409xf32, #tpu.memory_space<vmem>>, vector<8x3x409xf32>
    tpu.vector_store %arg9[%c0_11, %c12, %c0_12], %9 {strides = array<i32>} : memref<8x75x409xf32, #tpu.memory_space<vmem>>, vector<8x3x409xf32>,
    %11 = vector.extract_strided_slice %0 {offsets = [0, 0, 24], sizes = [8, 3, 409], strides = [1, 1, 1]} : vector<8x3x509xf32> to vector<8x3x409xf32>
    %c0_13 = arith.constant 0 : index
    %c15 = arith.constant 15 : index
    %c0_14 = arith.constant 0 : index
    %12 = vector.load %arg9[%c0_13, %c15, %c0_14] : memref<8x75x409xf32, #tpu.memory_space<vmem>>, vector<8x3x409xf32>
    tpu.vector_store %arg9[%c0_13, %c15, %c0_14], %11 {strides = array<i32>} : memref<8x75x409xf32, #tpu.memory_space<vmem>>, vector<8x3x409xf32>,
    %13 = vector.extract_strided_slice %0 {offsets = [0, 0, 25], sizes = [8, 3, 409], strides = [1, 1, 1]} : vector<8x3x509xf32> to vector<8x3x409xf32>
    %c0_15 = arith.constant 0 : index
    %c18 = arith.constant 18 : index
    %c0_16 = arith.constant 0 : index
    %14 = vector.load %arg9[%c0_15, %c18, %c0_16] : memref<8x75x409xf32, #tpu.memory_space<vmem>>, vector<8x3x409xf32>
    tpu.vector_store %arg9[%c0_15, %c18, %c0_16], %13 {strides = array<i32>} : memref<8x75x409xf32, #tpu.memory_space<vmem>>, vector<8x3x409xf32>,
    %15 = vector.extract_strided_slice %0 {offsets = [0, 0, 26], sizes = [8, 3, 409], strides = [1, 1, 1]} : vector<8x3x509xf32> to vector<8x3x409xf32>
    %c0_17 = arith.constant 0 : index
    %c21 = arith.constant 21 : index
    %c0_18 = arith.constant 0 : index
    %16 = vector.load %arg9[%c0_17, %c21, %c0_18] : memref<8x75x409xf32, #tpu.memory_space<vmem>>, vector<8x3x409xf32>
    tpu.vector_store %arg9[%c0_17, %c21, %c0_18], %15 {strides = array<i32>} : memref<8x75x409xf32, #tpu.memory_space<vmem>>, vector<8x3x409xf32>,
    %17 = vector.extract_strided_slice %0 {offsets = [0, 0, 27], sizes = [8, 3, 409], strides = [1, 1, 1]} : vector<8x3x509xf32> to vector<8x3x409xf32>
    %c0_19 = arith.constant 0 : index
    %c24 = arith.constant 24 : index
    %c0_20 = arith.constant 0 : index
    %18 = vector.load %arg9[%c0_19, %c24, %c0_20] : memref<8x75x409xf32, #tpu.memory_space<vmem>>, vector<8x3x409xf32>
    tpu.vector_store %arg9[%c0_19, %c24, %c0_20], %17 {strides = array<i32>} : memref<8x75x409xf32, #tpu.memory_space<vmem>>, vector<8x3x409xf32>,
    %19 = vector.extract_strided_slice %0 {offsets = [0, 0, 28], sizes = [8, 3, 409], strides = [1, 1, 1]} : vector<8x3x509xf32> to vector<8x3x409xf32>
    %c0_21 = arith.constant 0 : index
    %c27 = arith.constant 27 : index
    %c0_22 = arith.constant 0 : index
    %20 = vector.load %arg9[%c0_21, %c27, %c0_22] : memref<8x75x409xf32, #tpu.memory_space<vmem>>, vector<8x3x409xf32>
    tpu.vector_store %arg9[%c0_21, %c27, %c0_22], %19 {strides = array<i32>} : memref<8x75x409xf32, #tpu.memory_space<vmem>>, vector<8x3x409xf32>,
    %21 = vector.extract_strided_slice %0 {offsets = [0, 0, 48], sizes = [8, 3, 409], strides = [1, 1, 1]} : vector<8x3x509xf32> to vector<8x3x409xf32>
    %c0_23 = arith.constant 0 : index
    %c30 = arith.constant 30 : index
    %c0_24 = arith.constant 0 : index
    %22 = vector.load %arg9[%c0_23, %c30, %c0_24] : memref<8x75x409xf32, #tpu.memory_space<vmem>>, vector<8x3x409xf32>
    tpu.vector_store %arg9[%c0_23, %c30, %c0_24], %21 {strides = array<i32>} : memref<8x75x409xf32, #tpu.memory_space<vmem>>, vector<8x3x409xf32>,
    %23 = vector.extract_strided_slice %0 {offsets = [0, 0, 49], sizes = [8, 3, 409], strides = [1, 1, 1]} : vector<8x3x509xf32> to vector<8x3x409xf32>
    %c0_25 = arith.constant 0 : index
    %c33 = arith.constant 33 : index
    %c0_26 = arith.constant 0 : index
    %24 = vector.load %arg9[%c0_25, %c33, %c0_26] : memref<8x75x409xf32, #tpu.memory_space<vmem>>, vector<8x3x409xf32>
    tpu.vector_store %arg9[%c0_25, %c33, %c0_26], %23 {strides = array<i32>} : memref<8x75x409xf32, #tpu.memory_space<vmem>>, vector<8x3x409xf32>,
    %25 = vector.extract_strided_slice %0 {offsets = [0, 0, 50], sizes = [8, 3, 409], strides = [1, 1, 1]} : vector<8x3x509xf32> to vector<8x3x409xf32>
    %c0_27 = arith.constant 0 : index
    %c36 = arith.constant 36 : index
    %c0_28 = arith.constant 0 : index
    %26 = vector.load %arg9[%c0_27, %c36, %c0_28] : memref<8x75x409xf32, #tpu.memory_space<vmem>>, vector<8x3x409xf32>
    tpu.vector_store %arg9[%c0_27, %c36, %c0_28], %25 {strides = array<i32>} : memref<8x75x409xf32, #tpu.memory_space<vmem>>, vector<8x3x409xf32>,
    %27 = vector.extract_strided_slice %0 {offsets = [0, 0, 51], sizes = [8, 3, 409], strides = [1, 1, 1]} : vector<8x3x509xf32> to vector<8x3x409xf32>
    %c0_29 = arith.constant 0 : index
    %c39 = arith.constant 39 : index
    %c0_30 = arith.constant 0 : index
    %28 = vector.load %arg9[%c0_29, %c39, %c0_30] : memref<8x75x409xf32, #tpu.memory_space<vmem>>, vector<8x3x409xf32>
    tpu.vector_store %arg9[%c0_29, %c39, %c0_30], %27 {strides = array<i32>} : memref<8x75x409xf32, #tpu.memory_space<vmem>>, vector<8x3x409xf32>,
    %29 = vector.extract_strided_slice %0 {offsets = [0, 0, 52], sizes = [8, 3, 409], strides = [1, 1, 1]} : vector<8x3x509xf32> to vector<8x3x409xf32>
    %c0_31 = arith.constant 0 : index
    %c42 = arith.constant 42 : index
    %c0_32 = arith.constant 0 : index
    %30 = vector.load %arg9[%c0_31, %c42, %c0_32] : memref<8x75x409xf32, #tpu.memory_space<vmem>>, vector<8x3x409xf32>
    tpu.vector_store %arg9[%c0_31, %c42, %c0_32], %29 {strides = array<i32>} : memref<8x75x409xf32, #tpu.memory_space<vmem>>, vector<8x3x409xf32>,
    %31 = vector.extract_strided_slice %0 {offsets = [0, 0, 72], sizes = [8, 3, 409], strides = [1, 1, 1]} : vector<8x3x509xf32> to vector<8x3x409xf32>
    %c0_33 = arith.constant 0 : index
    %c45 = arith.constant 45 : index
    %c0_34 = arith.constant 0 : index
    %32 = vector.load %arg9[%c0_33, %c45, %c0_34] : memref<8x75x409xf32, #tpu.memory_space<vmem>>, vector<8x3x409xf32>
    tpu.vector_store %arg9[%c0_33, %c45, %c0_34], %31 {strides = array<i32>} : memref<8x75x409xf32, #tpu.memory_space<vmem>>, vector<8x3x409xf32>,
    %33 = vector.extract_strided_slice %0 {offsets = [0, 0, 73], sizes = [8, 3, 409], strides = [1, 1, 1]} : vector<8x3x509xf32> to vector<8x3x409xf32>
    %c0_35 = arith.constant 0 : index
    %c48 = arith.constant 48 : index
    %c0_36 = arith.constant 0 : index
    %34 = vector.load %arg9[%c0_35, %c48, %c0_36] : memref<8x75x409xf32, #tpu.memory_space<vmem>>, vector<8x3x409xf32>
    tpu.vector_store %arg9[%c0_35, %c48, %c0_36], %33 {strides = array<i32>} : memref<8x75x409xf32, #tpu.memory_space<vmem>>, vector<8x3x409xf32>,
    %35 = vector.extract_strided_slice %0 {offsets = [0, 0, 74], sizes = [8, 3, 409], strides = [1, 1, 1]} : vector<8x3x509xf32> to vector<8x3x409xf32>
    %c0_37 = arith.constant 0 : index
    %c51 = arith.constant 51 : index
    %c0_38 = arith.constant 0 : index
    %36 = vector.load %arg9[%c0_37, %c51, %c0_38] : memref<8x75x409xf32, #tpu.memory_space<vmem>>, vector<8x3x409xf32>
    tpu.vector_store %arg9[%c0_37, %c51, %c0_38], %35 {strides = array<i32>} : memref<8x75x409xf32, #tpu.memory_space<vmem>>, vector<8x3x409xf32>,
    %37 = vector.extract_strided_slice %0 {offsets = [0, 0, 75], sizes = [8, 3, 409], strides = [1, 1, 1]} : vector<8x3x509xf32> to vector<8x3x409xf32>
    %c0_39 = arith.constant 0 : index
    %c54 = arith.constant 54 : index
    %c0_40 = arith.constant 0 : index
    %38 = vector.load %arg9[%c0_39, %c54, %c0_40] : memref<8x75x409xf32, #tpu.memory_space<vmem>>, vector<8x3x409xf32>
    tpu.vector_store %arg9[%c0_39, %c54, %c0_40], %37 {strides = array<i32>} : memref<8x75x409xf32, #tpu.memory_space<vmem>>, vector<8x3x409xf32>,
    %39 = vector.extract_strided_slice %0 {offsets = [0, 0, 76], sizes = [8, 3, 409], strides = [1, 1, 1]} : vector<8x3x509xf32> to vector<8x3x409xf32>
    %c0_41 = arith.constant 0 : index
    %c57 = arith.constant 57 : index
    %c0_42 = arith.constant 0 : index
    %40 = vector.load %arg9[%c0_41, %c57, %c0_42] : memref<8x75x409xf32, #tpu.memory_space<vmem>>, vector<8x3x409xf32>
    tpu.vector_store %arg9[%c0_41, %c57, %c0_42], %39 {strides = array<i32>} : memref<8x75x409xf32, #tpu.memory_space<vmem>>, vector<8x3x409xf32>,
    %41 = vector.extract_strided_slice %0 {offsets = [0, 0, 96], sizes = [8, 3, 409], strides = [1, 1, 1]} : vector<8x3x509xf32> to vector<8x3x409xf32>
    %c0_43 = arith.constant 0 : index
    %c60 = arith.constant 60 : index
    %c0_44 = arith.constant 0 : index
    %42 = vector.load %arg9[%c0_43, %c60, %c0_44] : memref<8x75x409xf32, #tpu.memory_space<vmem>>, vector<8x3x409xf32>
    tpu.vector_store %arg9[%c0_43, %c60, %c0_44], %41 {strides = array<i32>} : memref<8x75x409xf32, #tpu.memory_space<vmem>>, vector<8x3x409xf32>,
    %43 = vector.extract_strided_slice %0 {offsets = [0, 0, 97], sizes = [8, 3, 409], strides = [1, 1, 1]} : vector<8x3x509xf32> to vector<8x3x409xf32>
    %c0_45 = arith.constant 0 : index
    %c63 = arith.constant 63 : index
    %c0_46 = arith.constant 0 : index
    %44 = vector.load %arg9[%c0_45, %c63, %c0_46] : memref<8x75x409xf32, #tpu.memory_space<vmem>>, vector<8x3x409xf32>
    tpu.vector_store %arg9[%c0_45, %c63, %c0_46], %43 {strides = array<i32>} : memref<8x75x409xf32, #tpu.memory_space<vmem>>, vector<8x3x409xf32>,
    %45 = vector.extract_strided_slice %0 {offsets = [0, 0, 98], sizes = [8, 3, 409], strides = [1, 1, 1]} : vector<8x3x509xf32> to vector<8x3x409xf32>
    %c0_47 = arith.constant 0 : index
    %c66 = arith.constant 66 : index
    %c0_48 = arith.constant 0 : index
    %46 = vector.load %arg9[%c0_47, %c66, %c0_48] : memref<8x75x409xf32, #tpu.memory_space<vmem>>, vector<8x3x409xf32>
    tpu.vector_store %arg9[%c0_47, %c66, %c0_48], %45 {strides = array<i32>} : memref<8x75x409xf32, #tpu.memory_space<vmem>>, vector<8x3x409xf32>,
    %47 = vector.extract_strided_slice %0 {offsets = [0, 0, 99], sizes = [8, 3, 409], strides = [1, 1, 1]} : vector<8x3x509xf32> to vector<8x3x409xf32>
    %c0_49 = arith.constant 0 : index
    %c69 = arith.constant 69 : index
    %c0_50 = arith.constant 0 : index
    %48 = vector.load %arg9[%c0_49, %c69, %c0_50] : memref<8x75x409xf32, #tpu.memory_space<vmem>>, vector<8x3x409xf32>
    tpu.vector_store %arg9[%c0_49, %c69, %c0_50], %47 {strides = array<i32>} : memref<8x75x409xf32, #tpu.memory_space<vmem>>, vector<8x3x409xf32>,
    %49 = vector.extract_strided_slice %0 {offsets = [0, 0, 100], sizes = [8, 3, 409], strides = [1, 1, 1]} : vector<8x3x509xf32> to vector<8x3x409xf32>
    %c0_51 = arith.constant 0 : index
    %c72 = arith.constant 72 : index
    %c0_52 = arith.constant 0 : index
    %50 = vector.load %arg9[%c0_51, %c72, %c0_52] : memref<8x75x409xf32, #tpu.memory_space<vmem>>, vector<8x3x409xf32>
    tpu.vector_store %arg9[%c0_51, %c72, %c0_52], %49 {strides = array<i32>} : memref<8x75x409xf32, #tpu.memory_space<vmem>>, vector<8x3x409xf32>,
    %c0_53 = arith.constant 0 : index
    %c0_54 = arith.constant 0 : index
    %51 = vector.load %arg2[%c0_53, %c0_54] : memref<8x75xf32, #tpu.memory_space<vmem>>, vector<8x75xf32>
    %52 = vector.shape_cast %51 : vector<8x75xf32> to vector<1x8x75xf32>
    %53 = vector.shape_cast %52 : vector<1x8x75xf32> to vector<1x8x75xf32>
    %54 = vector.broadcast %53 : vector<1x8x75xf32> to vector<8x8x75xf32>
    %c0_55 = arith.constant 0 : index
    %c0_56 = arith.constant 0 : index
    %c0_57 = arith.constant 0 : index
    %55 = vector.load %arg9[%c0_55, %c0_56, %c0_57] : memref<8x75x409xf32, #tpu.memory_space<vmem>>, vector<8x75x409xf32>
    "tpu.trace_start"() <{level = 10 : i32, message = "bfk,bkq->bfq"}> : () -> ()
    %cst = arith.constant dense<0.000000e+00> : vector<8x8x409xf32>
    %56 = tpu.matmul %54, %55, %cst {dimension_numbers = #tpu.dot_dimension_numbers<[2], [1], [1], [2], [0, 0, 0, 1, 1, 2], [0], [0]>} : vector<8x8x75xf32>, vector<8x75x409xf32>, vector<8x8x409xf32> -> vector<8x8x409xf32>
    "tpu.trace_stop"() : () -> ()
    %57 = vector.extract_strided_slice %56 {offsets = [0, 0, 0], sizes = [8, 8, 384], strides = [1, 1, 1]} : vector<8x8x409xf32> to vector<8x8x384xf32>
    %58 = vector.extract_strided_slice %56 {offsets = [0, 0, 1], sizes = [8, 8, 384], strides = [1, 1, 1]} : vector<8x8x409xf32> to vector<8x8x384xf32>
    %59 = arith.maximumf %57, %58 : vector<8x8x384xf32>
    %60 = vector.extract_strided_slice %56 {offsets = [0, 0, 24], sizes = [8, 8, 384], strides = [1, 1, 1]} : vector<8x8x409xf32> to vector<8x8x384xf32>
    %61 = vector.extract_strided_slice %56 {offsets = [0, 0, 25], sizes = [8, 8, 384], strides = [1, 1, 1]} : vector<8x8x409xf32> to vector<8x8x384xf32>
    %62 = arith.maximumf %60, %61 : vector<8x8x384xf32>
    %63 = arith.maximumf %59, %62 : vector<8x8x384xf32>
    %c0_58 = arith.constant 0 : index
    %c0_59 = arith.constant 0 : index
    %64 = vector.load %arg3[%c0_58, %c0_59] : memref<8x1xf32, #tpu.memory_space<vmem>>, vector<8x1xf32>
    %65 = vector.shape_cast %64 : vector<8x1xf32> to vector<1x8x1xf32>
    %66 = vector.broadcast %65 : vector<1x8x1xf32> to vector<8x8x384xf32>
    %67 = arith.addf %63, %66 : vector<8x8x384xf32>
    %cst_60 = arith.constant 0.000000e+00 : f32
    %68 = vector.broadcast %cst_60 : f32 to vector<8x8x384xf32>
    %69 = arith.maximumf %67, %68 : vector<8x8x384xf32>
    %70 = vector.shape_cast %69 : vector<8x8x384xf32> to vector<8x3072xf32>
    %c0_61 = arith.constant 0 : index
    %c0_62 = arith.constant 0 : index
    %71 = vector.load %arg4[%c0_61, %c0_62] : memref<3072x32xf32, #tpu.memory_space<vmem>>, vector<3072x32xf32>
    %cst_63 = arith.constant dense<0.000000e+00> : vector<8x32xf32>
    %72 = tpu.matmul %70, %71, %cst_63 {dimension_numbers = #tpu.dot_dimension_numbers<[1], [0], [0], [1], [0, 0, 1, 1], [], []>} : vector<8x3072xf32>, vector<3072x32xf32>, vector<8x32xf32> -> vector<8x32xf32>
    %c0_64 = arith.constant 0 : index
    %c0_65 = arith.constant 0 : index
    %73 = vector.load %arg5[%c0_64, %c0_65] : memref<1x32xf32, #tpu.memory_space<vmem>>, vector<1x32xf32>
    %74 = vector.broadcast %73 : vector<1x32xf32> to vector<8x32xf32>
    %75 = arith.addf %72, %74 : vector<8x32xf32>
    %cst_66 = arith.constant 0.000000e+00 : f32
    %76 = vector.broadcast %cst_66 : f32 to vector<8x32xf32>
    %77 = arith.maximumf %75, %76 : vector<8x32xf32>
    %c0_67 = arith.constant 0 : index
    %c0_68 = arith.constant 0 : index
    %78 = vector.load %arg6[%c0_67, %c0_68] : memref<32x10xf32, #tpu.memory_space<vmem>>, vector<32x10xf32>
    %cst_69 = arith.constant dense<0.000000e+00> : vector<8x10xf32>
    %79 = tpu.matmul %77, %78, %cst_69 {dimension_numbers = #tpu.dot_dimension_numbers<[1], [0], [0], [1], [0, 0, 1, 1], [], []>} : vector<8x32xf32>, vector<32x10xf32>, vector<8x10xf32> -> vector<8x10xf32>
    %c0_70 = arith.constant 0 : index
    %c0_71 = arith.constant 0 : index
    %80 = vector.load %arg7[%c0_70, %c0_71] : memref<1x10xf32, #tpu.memory_space<vmem>>, vector<1x10xf32>
    %81 = vector.broadcast %80 : vector<1x10xf32> to vector<8x10xf32>
    %82 = arith.addf %79, %81 : vector<8x10xf32>
    %c0_72 = arith.constant 0 : index
    %c0_73 = arith.constant 0 : index
    %83 = vector.load %arg8[%c0_72, %c0_73] : memref<8x10xf32, #tpu.memory_space<vmem>>, vector<8x10xf32>
    tpu.vector_store %arg8[%c0_72, %c0_73], %82 {strides = array<i32>} : memref<8x10xf32, #tpu.memory_space<vmem>>, vector<8x10xf32>,
    return
  }
  func.func @transform_0(%arg0: i32) -> (i32, i32, i32) {
    %c0_i32 = arith.constant 0 : i32
    %c0_i32_0 = arith.constant 0 : i32
    %c0_i32_1 = arith.constant 0 : i32
    return %arg0, %c0_i32, %c0_i32_0 : i32, i32, i32
  }
  func.func @transform_1(%arg0: i32) -> (i32, i32) {
    %c0_i32 = arith.constant 0 : i32
    %c0_i32_0 = arith.constant 0 : i32
    %c0_i32_1 = arith.constant 0 : i32
    return %c0_i32, %c0_i32_0 : i32, i32
  }
  func.func @transform_2(%arg0: i32) -> (i32, i32) {
    %c0_i32 = arith.constant 0 : i32
    %c0_i32_0 = arith.constant 0 : i32
    %c0_i32_1 = arith.constant 0 : i32
    return %c0_i32, %c0_i32_0 : i32, i32
  }
  func.func @transform_3(%arg0: i32) -> (i32, i32) {
    %c0_i32 = arith.constant 0 : i32
    %c0_i32_0 = arith.constant 0 : i32
    %c0_i32_1 = arith.constant 0 : i32
    return %c0_i32, %c0_i32_0 : i32, i32
  }
  func.func @transform_4(%arg0: i32) -> (i32, i32) {
    %c0_i32 = arith.constant 0 : i32
    %c0_i32_0 = arith.constant 0 : i32
    %c0_i32_1 = arith.constant 0 : i32
    return %c0_i32, %c0_i32_0 : i32, i32
  }
  func.func @transform_5(%arg0: i32) -> (i32, i32) {
    %c0_i32 = arith.constant 0 : i32
    %c0_i32_0 = arith.constant 0 : i32
    %c0_i32_1 = arith.constant 0 : i32
    return %c0_i32, %c0_i32_0 : i32, i32
  }
  func.func @transform_6(%arg0: i32) -> (i32, i32) {
    %c0_i32 = arith.constant 0 : i32
    %c0_i32_0 = arith.constant 0 : i32
    %c0_i32_1 = arith.constant 0 : i32
    return %c0_i32, %c0_i32_0 : i32, i32
  }
  func.func @transform_7(%arg0: i32) -> (i32, i32) {
    %c0_i32 = arith.constant 0 : i32
    %c0_i32_0 = arith.constant 0 : i32
    return %arg0, %c0_i32 : i32, i32
  }
}

</mosaic_0001>

<bundles_post_ra>
// kernel: a_call__.1
= control target key start
LH: loop header
LB: loop body
LE: loop exit
PB: predicated region body
PF: predicated region fallthrough
CT: control target
= control target key end

     0   :  { %12 = vsyncpa [#allocation4], 0  ;;  %s12783_s0 = inlined_call_operand.vmem [shape: f32[8,3,509], index: 0, kind: input, shape index: {}]   ;;  %s12784_s1 = inlined_call_operand.hbm [shape: f32[8,75], index: 1, kind: input, shape index: {}]   ;;  %s12785_s2 = inlined_call_operand.hbm [shape: f32[8,1], index: 2, kind: input, shape index: {}]   ;;  %s12786_s3 = inlined_call_operand.hbm [shape: f32[3072,32], index: 3, kind: input, shape index: {}]   ;;  %s12787_s4 = inlined_call_operand.hbm [shape: f32[1,32], index: 4, kind: input, shape index: {}]   ;;  %s12788_s5 = inlined_call_operand.hbm [shape: f32[32,10], index: 5, kind: input, shape index: {}]   ;;  %s12789_s6 = inlined_call_operand.hbm [shape: f32[1,10], index: 6, kind: input, shape index: {}]   ;;  %s12790_s7 = inlined_call_operand.vmem [shape: f32[8,10], index: 7, kind: output, shape index: {}]  }
   0x1   :  { %13 = vsyncpa [#allocation6], 0 }
   0x2   :  { %14 = vsyncpa [#allocation9], 0 }
   0x3   :  { %15 = vsyncpa [#allocation12], 0  ;;  %s8648_s24 = smov [#allocation5]   ;;  %s8649_s26 = smov [#allocation8]  }
   0x4   :  { %s34_s25 = sshll.u32 %s8648_s24, 4  ;;  %s56_s27 = sshll.u32 %s8649_s26, 4  ;;  %s35_s25 = int_to_ptr.vmem [resolvable:$true] %s34_s25  ;;  %s57_s27 = int_to_ptr.vmem [resolvable:$true] %s56_s27 }
   0x5   :  { %s8528_s28 = scalar_lea.vmem %s35_s25, 128  ;;  %p8533_p1 = scmp.lt.s32.totalorder %s35_s25, %s35_s25 }
   0x6   :  { %p8529_p0 = scmp.ne.s32.totalorder %s35_s25, %s8528_s28  ;;  %p8534_p2 = scmp.lt.s32.totalorder %s8528_s28, %s8528_s28 }
   0x8   :  { %p8535_p3 = por %p8534_p2, %p8533_p1 }
   0xa   :  { %p8536_p4 = pnand %p8535_p3, %p8529_p0 }
   0xc   :  { %8539 = shalt.err (!%p8536_p4)
}
   0xd   :  { %37 = dma.hbm_to_vmem [thread:$0]  %s12785_s2, 128, %s35_s25, [#allocation6]  }
   0xe   :  { %s8548_s8 = scalar_lea.vmem %s57_s27, 16  ;;  %s8552_s9 = scalar_lea.vmem %s57_s27, 32 }
   0xf   :  { %p8549_p5 = scmp.ne.s32.totalorder %s57_s27, %s8548_s8  ;;  %p8553_p6 = scmp.lt.s32.totalorder %s57_s27, %s57_s27 }
  0x10   :  { %p8554_p7 = scmp.lt.s32.totalorder %s8552_s9, %s8548_s8 }
  0x12   :  { %p8555_p8 = por %p8554_p7, %p8553_p6 }
  0x14   :  { %p8556_p9 = pnand %p8555_p8, %p8549_p5 }
  0x16   :  { %8559 = shalt.err (!%p8556_p9)
}
  0x17   :  { %59 = dma.hbm_to_vmem [thread:$0]  %s12787_s4, 16, %s57_s27, [#allocation9]  }
  0x18   :  { %s8650_s12 = smov [#allocation3]   ;;  %s8651_s14 = smov [#allocation7]  }
  0x19   :  { %s24_s13 = sshll.u32 %s8650_s12, 4  ;;  %s43_s15 = sshll.u32 %s8651_s14, 4  ;;  %s25_s13 = int_to_ptr.vmem [resolvable:$true] %s24_s13  ;;  %s44_s15 = int_to_ptr.vmem [resolvable:$true] %s43_s15 }
  0x1a   :  { %s8568_s16 = scalar_lea.vmem %s25_s13, 128  ;;  %p8573_p11 = scmp.lt.s32.totalorder %s25_s13, %s25_s13 }
  0x1b   :  { %p8569_p10 = scmp.ne.s32.totalorder %s25_s13, %s8568_s16  ;;  %p8574_p12 = scmp.lt.s32.totalorder %s8568_s16, %s8568_s16 }
  0x1d   :  { %p8575_p13 = por %p8574_p12, %p8573_p11 }
  0x1f   :  { %p8576_p0 = pnand %p8575_p13, %p8569_p10 }
  0x21   :  { %8579 = shalt.err (!%p8576_p0)
}
  0x22   :  { %27 = dma.hbm_to_vmem [thread:$0]  %s12784_s1, 128, %s25_s13, [#allocation4]  }
  0x23   :  { %s8588_s18 = scalar_lea.vmem %s44_s15, 49152  ;;  %p8593_p2 = scmp.lt.s32.totalorder %s44_s15, %s44_s15 }
  0x24   :  { %p8589_p1 = scmp.ne.s32.totalorder %s44_s15, %s8588_s18  ;;  %p8594_p3 = scmp.lt.s32.totalorder %s8588_s18, %s8588_s18 }
  0x26   :  { %p8595_p4 = por %p8594_p3, %p8593_p2 }
  0x28   :  { %p8596_p5 = pnand %p8595_p4, %p8589_p1 }
  0x2a   :  { %8599 = shalt.err (!%p8596_p5)
}
  0x2b   :  { %s8652_s4 = smov 128   ;;  %s8653_s19 = smov 8  }
  0x2c   :  { %49 = dma.hbm_to_vmem [thread:$0]  %s12786_s3, 49152, %s44_s15, [#allocation6], %s8652_s4, %s8652_s4, %s8653_s19  }
  0x2d   :  { %s8654_s22 = smov [#allocation10]   ;;  %s8655_s24 = smov [#allocation11]  }
  0x2e   :  { %s65_s23 = sshll.u32 %s8654_s22, 4  ;;  %s78_s25 = sshll.u32 %s8655_s24, 4  ;;  %s66_s23 = int_to_ptr.vmem [resolvable:$true] %s65_s23  ;;  %s79_s25 = int_to_ptr.vmem [resolvable:$true] %s78_s25 }
  0x2f   :  { %s8608_s1 = scalar_lea.vmem %s66_s23, 512  ;;  %p8613_p7 = scmp.lt.s32.totalorder %s66_s23, %s66_s23 }
  0x30   :  { %p8609_p6 = scmp.ne.s32.totalorder %s66_s23, %s8608_s1  ;;  %p8614_p8 = scmp.lt.s32.totalorder %s8608_s1, %s8608_s1 }
  0x32   :  { %p8615_p9 = por %p8614_p8, %p8613_p7 }
  0x34   :  { %p8616_p10 = pnand %p8615_p9, %p8609_p6 }
  0x36   :  { %8619 = shalt.err (!%p8616_p10)
}
  0x37   :  { %71 = dma.hbm_to_vmem [thread:$0]  %s12788_s5, 512, %s66_s23, [#allocation9], %s8652_s4, %s8652_s4, %s8653_s19  }
  0x38   :  { %s8628_s28 = scalar_lea.vmem %s79_s25, 16  ;;  %s8632_s3 = scalar_lea.vmem %s79_s25, 32 }
  0x39   :  { %p8629_p11 = scmp.ne.s32.totalorder %s79_s25, %s8628_s28  ;;  %p8633_p12 = scmp.lt.s32.totalorder %s79_s25, %s79_s25 }
  0x3a   :  { %p8634_p13 = scmp.lt.s32.totalorder %s8632_s3, %s8628_s28 }
  0x3c   :  { %p8635_p0 = por %p8634_p13, %p8633_p12 }
  0x3e   :  { %p8636_p1 = pnand %p8635_p0, %p8629_p11 }
  0x40   :  { %8639 = shalt.err (!%p8636_p1)
}
  0x41   :  { %81 = dma.hbm_to_vmem [thread:$0]  %s12789_s6, 16, %s79_s25, [#allocation12]  }
  0x42   :  { %8640 = dma.done.wait [#allocation4], 128  }
  0x43   :  { %8641 = vsyncadd [#allocation4], 4294967168 }
  0x44   :  { %8642 = dma.done.wait [#allocation6], 49280  }
  0x45   :  { %8643 = vsyncadd [#allocation6], 4294918016 }
  0x46   :  { %8644 = dma.done.wait [#allocation9], 528  }
  0x47   :  { %8645 = vsyncadd [#allocation9], 4294966768 }
  0x48   :  { %8646 = dma.done.wait [#allocation12], 16  }
  0x49   :  { %8647 = vsyncadd [#allocation12], 4294967280  ;;  %v8746_v0 = vld [vmem:[%s12783_s0 + $0x8] sm:$0x77]  ;;  %v8751_v1 = vld [vmem:[%s12783_s0] sm:$0x77] }
  0x4a   :  { %v8756_v2 = vld [vmem:[%s12783_s0 + $0x10] sm:$0x77]  ;;  %v8759_v3 = vrot.slane %v8746_v0, 5  ;;  %166 = vst [vmem:[#allocation2 + $0x10] sm:$0x7] %v8746_v0  ;;  %v8763_v4 = vrot.slane %v8751_v1, 5  ;;  %v8768_v5 = vcombine.high %v8746_v0, %v8746_v0  ;;  %v8783_v8 = vcombine.high %v8751_v1, %v8751_v1 }
  0x4b   :  { %164 = vst [vmem:[#allocation2] sm:$0x7] %v8751_v1  ;;  %169 = vst [vmem:[#allocation2 + $0x140] sm:$0x7] %v8756_v2  ;;  %v8774_v6 = vld [vmem:[%s12783_s0 + $0x18] sm:$0x77]  ;;  %v8778_v7 = vcombine.high %v8756_v2, %v8756_v2 }
  0x4c   :  { %171 = vst [vmem:[#allocation2 + $0x150] sm:$0x7] %v8774_v6  ;;  %v8788_v9 = vld [vmem:[%s12783_s0 + $0x20] sm:$0x77]  ;;  %v8793_v10 = vld [vmem:[%s12783_s0 + $0x28] sm:$0x77]  ;;  %v8868_v24 = vcombine.high %v8774_v6, %v8774_v6 }
  0x4d   :  { %s8656_s17 = smov 127   ;;  %v8800_v11 = vrot.slane %v8768_v5, 5  ;;  %v8803_v12 = vrot.slane %v8756_v2, 5  ;;  %v8807_v13 = vcombine.high %v8788_v9, %v8788_v9  ;;  %173 = vst [vmem:[#allocation2 + $0x280] sm:$0x7] %v8788_v9  ;;  %v8861_v22 = vrot.slane %v8778_v7, 5 }
  0x4e   :  { %233 = vrot.lane.b32.xlu1 %v8759_v3, %s8656_s17  ;;  %229 = vrot.lane.b32.xlu0 %v8763_v4, %s8656_s17  ;;  %175 = vst [vmem:[#allocation2 + $0x290] sm:$0x7] %v8793_v10  ;;  %v8814_v14 = vld [vmem:[%s12783_s0 + $0x30] sm:$0x77]  ;;  %v8819_v15 = vld [vmem:[%s12783_s0 + $0x38] sm:$0x77]  ;;  %v8935_v36 = vcombine.high %v8793_v10, %v8793_v10 }
  0x4f   :  { %170 = vst [vmem:[#allocation2 + $0x148] sm:$0x7] %v8778_v7  ;;  %165 = vst [vmem:[#allocation2 + $0x8] sm:$0x7] %v8783_v8  ;;  %v8828_v16 = vld [vmem:[%s12783_s0 + $0x40] sm:$0x77]  ;;  %v8833_v17 = vcombine.high %v8814_v14, %v8814_v14  ;;  %v8959_v41 = vcombine.high %v8819_v15, %v8819_v15 }
  0x50   :  { %177 = vst [vmem:[#allocation2 + $0x3c0] sm:$0x7] %v8814_v14  ;;  %179 = vst [vmem:[#allocation2 + $0x3d0] sm:$0x7] %v8819_v15  ;;  %v8839_v18 = vld [vmem:[%s12783_s0 + $0x48] sm:$0x77]  ;;  %v8843_v19 = vcombine.high %v8828_v16, %v8828_v16 }
  0x51   :  { %13216 = vst [vmem:[#allocation17_spill] sm:$0xff] %v8828_v16  ;;  %174 = vst [vmem:[#allocation2 + $0x288] sm:$0x7] %v8807_v13  ;;  %v8849_v20 = vld [vmem:[%s12783_s0 + $0x50] sm:$0x77]  ;;  %v8864_v23 = vrot.slane %v8774_v6, 5  ;;  %v8983_v46 = vcombine.high %v8839_v18, %v8839_v18 }
  0x52   :  { %181 = vst [vmem:[#allocation2 + $0x500] sm:$0x7] %v8828_v16  ;;  %183 = vst [vmem:[#allocation2 + $0x510] sm:$0x7] %v8839_v18  ;;  %v8854_v21 = vld [vmem:[%s12783_s0 + $0x58] sm:$0x77]  ;;  %235 = vrot.lane.b32.xlu1 %v8800_v11, %s8656_s17  ;;  %237 = vrot.lane.b32.xlu0 %v8803_v12, %s8656_s17  ;;  %v8873_v25 = vcombine.high %v8849_v20, %v8849_v20 }
  0x53   :  { %13217 = vst [vmem:[#allocation18_spill] sm:$0xff] %v8849_v20  ;;  %13218 = vst [vmem:[#allocation19_spill] sm:$0xff] %v8854_v21  ;;  %v8880_v26 = vld [vmem:[%s12783_s0 + $0x60] sm:$0x77]  ;;  %v8885_v27 = vld [vmem:[%s12783_s0 + $0x68] sm:$0x77]  ;;  %v9007_v51 = vcombine.high %v8854_v21, %v8854_v21 }
  0x54   :  { %178 = vst [vmem:[#allocation2 + $0x3c8] sm:$0x7] %v8833_v17  ;;  %13219 = vst [vmem:[#allocation20_spill] sm:$0xff] %v8873_v25  ;;  %v8893_v28 = vld [vmem:[%s12783_s0 + $0x70] sm:$0x77]  ;;  %v8898_v29 = vcombine.high %v8880_v26, %v8880_v26  ;;  %v8912_v31 = vrot.slane %v8868_v24, 5  ;;  %v9031_v56 = vcombine.high %v8885_v27, %v8885_v27 }
  0x55   :  { %185 = vst [vmem:[#allocation2 + $0x640] sm:$0x7] %v8849_v20  ;;  %187 = vst [vmem:[#allocation2 + $0x650] sm:$0x7] %v8854_v21  ;;  %v8904_v30 = vld [vmem:[%s12783_s0 + $0x78] sm:$0x77]  ;;  %v8920_v33 = vcombine.high %v8893_v28, %v8893_v28 }
  0x56   :  { %13220 = vst [vmem:[#allocation21_spill] sm:$0xff] %v8880_v26  ;;  %13221 = vst [vmem:[#allocation22_spill] sm:$0xff] %v8885_v27  ;;  %239 = vrot.lane.b32.xlu1 %v8861_v22, %s8656_s17  ;;  %241 = vrot.lane.b32.xlu0 %v8864_v23, %s8656_s17  ;;  %v8915_v32 = vrot.slane %v8783_v8, 5  ;;  %v8928_v34 = vrot.slane %v8807_v13, 5  ;;  %v8931_v35 = vrot.slane %v8788_v9, 5  ;;  %v8942_v37 = vrot.slane %v8935_v36, 5 }
  0x57   :  { %182 = vst [vmem:[#allocation2 + $0x508] sm:$0x7] %v8843_v19  ;;  %189 = vst [vmem:[#allocation2 + $0x780] sm:$0x7] %v8880_v26  ;;  %v8945_v38 = vrot.slane %v8793_v10, 5  ;;  %v8952_v39 = vrot.slane %v8833_v17, 5  ;;  %v9055_v61 = vcombine.high %v8904_v30, %v8904_v30 }
  0x58   :  { %191 = vst [vmem:[#allocation2 + $0x790] sm:$0x7] %v8885_v27  ;;  %13222 = vst [vmem:[#allocation23_spill] sm:$0xff] %v8893_v28  ;;  %v8955_v40 = vrot.slane %v8814_v14, 5  ;;  %v8966_v42 = vrot.slane %v8959_v41, 5  ;;  %v8969_v43 = vrot.slane %v8819_v15, 5 }
  0x59   :  { %186 = vst [vmem:[#allocation2 + $0x648] sm:$0x7] %v8873_v25  ;;  %13223 = vst [vmem:[#allocation24_spill] sm:$0xff] %v8898_v29  ;;  %v8976_v44 = vrot.slane %v8843_v19, 5  ;;  %v8979_v45 = vrot.slane %v8828_v16, 5  ;;  %v8990_v47 = vrot.slane %v8983_v46, 5 }
  0x5a   :  { %193 = vst [vmem:[#allocation2 + $0x8c0] sm:$0x7] %v8893_v28  ;;  %13224 = vst [vmem:[#allocation25_spill] sm:$0xff] %v8904_v30  ;;  %243 = vrot.lane.b32.xlu1 %v8912_v31, %s8656_s17  ;;  %231 = vrot.lane.b32.xlu0 %v8915_v32, %s8656_s17  ;;  %v8993_v48 = vrot.slane %v8839_v18, 5  ;;  %v9000_v49 = vrot.slane %v8873_v25, 5  ;;  %v9003_v50 = vrot.slane %v8849_v20, 5 }
  0x5b   :  { %195 = vst [vmem:[#allocation2 + $0x8d0] sm:$0x7] %v8904_v30  ;;  %190 = vst [vmem:[#allocation2 + $0x788] sm:$0x7] %v8898_v29  ;;  %v9014_v52 = vrot.slane %v9007_v51, 5  ;;  %v9017_v53 = vrot.slane %v8854_v21, 5 }
  0x5c   :  { %13225 = vst [vmem:[#allocation26_spill] sm:$0xff] %v8920_v33  ;;  %194 = vst [vmem:[#allocation2 + $0x8c8] sm:$0x7] %v8920_v33  ;;  %v9024_v54 = vrot.slane %v8898_v29, 5  ;;  %v9027_v55 = vrot.slane %v8880_v26, 5  ;;  %v9038_v57 = vrot.slane %v9031_v56, 5 }
  0x5d   :  { %13226 = vst [vmem:[#allocation27_spill] sm:$0xff] %v8976_v44  ;;  %13227 = vst [vmem:[#allocation28_spill] sm:$0xff] %v8979_v45  ;;  %v9041_v58 = vrot.slane %v8885_v27, 5  ;;  %v9048_v59 = vrot.slane %v8920_v33, 5  ;;  %v9051_v60 = vrot.slane %v8893_v28, 5  ;;  %vm13213_vm0 = vcmask 198656  }
  0x5e   :  { %247 = vrot.lane.b32.xlu1 %v8928_v34, %s8656_s17  ;;  %245 = vrot.lane.b32.xlu0 %v8931_v35, %s8656_s17  ;;  %13228 = vst [vmem:[#allocation29_spill] sm:$0xff] %v8983_v46  ;;  %13229 = vst [vmem:[#allocation30_spill] sm:$0xff] %v8990_v47  ;;  %v9078_v62 = vrot.slane %v9055_v61, 5  ;;  %v9081_v63 = vrot.slane %v8904_v30, 5  ;;  %s8657_s0 = smov 126   ;;  %vm13197_vm1 = vcmask 1039360  }
  0x5f   :  { %13230 = vst [vmem:[#allocation31_spill] sm:$0xff] %v8993_v48  ;;  %13231 = vst [vmem:[#allocation32_spill] sm:$0xff] %v9000_v49  ;;  %vm13204_vm2 = vcmask 201731   ;;  %s8658_s11 = smov 125   ;;  %vm479_vm3 = vcmask 1031168   ;;  %vm539_vm4 = vcmask 203782  }
  0x60   :  { %13232 = vst [vmem:[#allocation33_spill] sm:$0xff] %v9003_v50  ;;  %13233 = vst [vmem:[#allocation34_spill] sm:$0xff] %v9007_v51  ;;  %vm544_vm5 = vcmask 196608   ;;  %s8659_s6 = smov 124   ;;  %vm698_vm6 = vcmask 1022976   ;;  %vm758_vm7 = vcmask 199681  }
  0x61   :  { %13234 = vst [vmem:[#allocation35_spill] sm:$0xff] %v9014_v52  ;;  %13235 = vst [vmem:[#allocation36_spill] sm:$0xff] %v9017_v53  ;;  %s8660_s12 = smov 104   ;;  %vm868_vm8 = vcmask 1014784   ;;  %vm13214_vm9 = vcmask 202756   ;;  %s8661_s13 = smov 103  }
  0x62   :  { %251 = vrot.lane.b32.xlu1 %v8942_v37, %s8656_s17  ;;  %249 = vrot.lane.b32.xlu0 %v8945_v38, %s8656_s17  ;;  %13236 = vst [vmem:[#allocation37_spill] sm:$0xff] %v9024_v54  ;;  %13237 = vst [vmem:[#allocation38_spill] sm:$0xff] %v9027_v55  ;;  %vm13196_vm10 = vcmask 850944   ;;  %vm1114_vm11 = vcmask 203783   ;;  %vm1119_vm12 = vcmask 197632   ;;  %s8662_s14 = smov 102  }
  0x63   :  { %13238 = vst [vmem:[#allocation39_spill] sm:$0xff] %v9031_v56  ;;  %13239 = vst [vmem:[#allocation40_spill] sm:$0xff] %v9038_v57  ;;  %vm1273_vm13 = vcmask 842752   ;;  %vm1333_vm14 = vcmask 200706   ;;  %s8663_s15 = smov 101   ;;  %vm1459_vm15 = vcmask 834560  }
  0x64   :  { %13240 = vst [vmem:[#allocation41_spill] sm:$0xff] %v9041_v58  ;;  %13241 = vst [vmem:[#allocation42_spill] sm:$0xff] %v9048_v59  ;;  %s8664_s16 = smov 100   ;;  %s8665_s2 = smov 28  }
  0x65   :  { %13242 = vst [vmem:[#allocation43_spill] sm:$0xff] %v9051_v60  ;;  %13243 = vst [vmem:[#allocation44_spill] sm:$0xff] %v9055_v61  ;;  %s8666_s18 = smov 31   ;;  %s8667_s4 = smov 30  }
  0x66   :  { %255 = vrot.lane.b32.xlu1 %v8952_v39, %s8656_s17  ;;  %253 = vrot.lane.b32.xlu0 %v8955_v40, %s8656_s17  ;;  %168 = vst.msk [vmem:[#allocation2 + $0x18] sm:$0x7] %vm13213_vm0, %v8768_v5  ;;  %172 = vst.msk [vmem:[#allocation2 + $0x158] sm:$0x7] %vm13213_vm0, %v8868_v24  ;;  %s8668_s19 = smov 29   ;;  %s8669_s20 = smov 53  }
  0x67   :  { %176 = vst.msk [vmem:[#allocation2 + $0x298] sm:$0x7] %vm13213_vm0, %v8935_v36  ;;  %180 = vst.msk [vmem:[#allocation2 + $0x3d8] sm:$0x7] %vm13213_vm0, %v8959_v41  ;;  %s8670_s21 = smov 52   ;;  %s8671_s22 = smov 32  }
  0x68   :  { %184 = vst.msk [vmem:[#allocation2 + $0x518] sm:$0x7] %vm13213_vm0, %v8983_v46  ;;  %188 = vst.msk [vmem:[#allocation2 + $0x658] sm:$0x7] %vm13213_vm0, %v9007_v51  ;;  %s8672_s23 = smov 55   ;;  %s8673_s24 = smov 54  }
  0x69   :  { %192 = vst.msk [vmem:[#allocation2 + $0x798] sm:$0x7] %vm13213_vm0, %v9031_v56  ;;  %196 = vst.msk [vmem:[#allocation2 + $0x8d8] sm:$0x7] %vm13213_vm0, %v9055_v61  ;;  %s8674_s25 = smov 77   ;;  %s8675_s1 = smov 76  }
  0x6a   :  { %259 = vrot.lane.b32.xlu1 %v8966_v42, %s8656_s17  ;;  %257 = vrot.lane.b32.xlu0 %v8969_v43, %s8656_s17  ;;  %13244 = vst [vmem:[#allocation45_spill] sm:$0xff] %v9078_v62  ;;  %13245 = vst [vmem:[#allocation46_spill] sm:$0xff] %v9081_v63  ;;  %s8676_s26 = smov 56   ;;  %s8677_s27 = smov 80  }
  0x6b   :  { %s8678_s28 = smov 79   ;;  %s8679_s3 = smov 78  }
  0x6e   :  { %263 = vrot.lane.b32.xlu1 %v8976_v44, %s8656_s17  ;;  %261 = vrot.lane.b32.xlu0 %v8979_v45, %s8656_s17 }
  0x72   :  { %267 = vrot.lane.b32.xlu1 %v8990_v47, %s8656_s17  ;;  %265 = vrot.lane.b32.xlu0 %v8993_v48, %s8656_s17 }
  0x76   :  { %271 = vrot.lane.b32.xlu1 %v9000_v49, %s8656_s17  ;;  %269 = vrot.lane.b32.xlu0 %v9003_v50, %s8656_s17  ;;  %v9128_v50 = vrot.slane %v8807_v13, 2  ;;  %v9138_v49 = vrot.slane %v8935_v36, 2 }
  0x78   :  { %13254 = vst [vmem:[#allocation55_spill] sm:$0xff] %v9128_v50  ;;  %13256 = vst [vmem:[#allocation57_spill] sm:$0xff] %v9138_v49 }
  0x7a   :  { %275 = vrot.lane.b32.xlu1 %v9014_v52, %s8656_s17  ;;  %273 = vrot.lane.b32.xlu0 %v9017_v53, %s8656_s17  ;;  %v9131_v52 = vrot.slane %v8788_v9, 2  ;;  %v9141_v53 = vrot.slane %v8793_v10, 2 }
  0x7c   :  { %13255 = vst [vmem:[#allocation56_spill] sm:$0xff] %v9131_v52  ;;  %13257 = vst [vmem:[#allocation58_spill] sm:$0xff] %v9141_v53 }
  0x7e   :  { %279 = vrot.lane.b32.xlu1 %v9024_v54, %s8656_s17  ;;  %277 = vrot.lane.b32.xlu0 %v9027_v55, %s8656_s17  ;;  %v9088_v55 = vrot.slane %v8783_v8, 2  ;;  %v9118_v54 = vrot.slane %v8868_v24, 2 }
  0x80   :  { %13246 = vst [vmem:[#allocation47_spill] sm:$0xff] %v9088_v55  ;;  %13252 = vst [vmem:[#allocation53_spill] sm:$0xff] %v9118_v54 }
  0x82   :  { %283 = vrot.lane.b32.xlu1 %v9038_v57, %s8656_s17  ;;  %281 = vrot.lane.b32.xlu0 %v9041_v58, %s8656_s17  ;;  %v9111_v57 = vrot.slane %v8756_v2, 2  ;;  %v9121_v58 = vrot.slane %v8774_v6, 2 }
  0x84   :  { %13251 = vst [vmem:[#allocation52_spill] sm:$0xff] %v9111_v57  ;;  %13253 = vst [vmem:[#allocation54_spill] sm:$0xff] %v9121_v58 }
  0x86   :  { %287 = vrot.lane.b32.xlu1 %v9048_v59, %s8656_s17  ;;  %285 = vrot.lane.b32.xlu0 %v9051_v60, %s8656_s17  ;;  %v9091_v59 = vrot.slane %v8751_v1, 2  ;;  %v9098_v60 = vrot.slane %v8768_v5, 2 }
  0x88   :  { %13247 = vst [vmem:[#allocation48_spill] sm:$0xff] %v9091_v59  ;;  %13248 = vst [vmem:[#allocation49_spill] sm:$0xff] %v9098_v60 }
  0x8a   :  { %291 = vrot.lane.b32.xlu1 %v9078_v62, %s8656_s17  ;;  %289 = vrot.lane.b32.xlu0 %v9081_v63, %s8656_s17  ;;  %v9101_v62 = vrot.slane %v8746_v0, 2  ;;  %v9108_v63 = vrot.slane %v8778_v7, 2 }
  0x8c   :  { %13249 = vst [vmem:[#allocation50_spill] sm:$0xff] %v9101_v62  ;;  %13250 = vst [vmem:[#allocation51_spill] sm:$0xff] %v9108_v63 }
  0x8e   :  { %417 = vrot.lane.b32.xlu1 %v9088_v55, %s8657_s0  ;;  %415 = vrot.lane.b32.xlu0 %v9091_v59, %s8657_s0 }
  0x92   :  { %421 = vrot.lane.b32.xlu1 %v9098_v60, %s8657_s0  ;;  %419 = vrot.lane.b32.xlu0 %v9101_v62, %s8657_s0 }
  0x96   :  { %425 = vrot.lane.b32.xlu1 %v9108_v63, %s8657_s0  ;;  %423 = vrot.lane.b32.xlu0 %v9111_v57, %s8657_s0  ;;  %v9148_v57 = vrot.slane %v8833_v17, 2 }
  0x98   :  { %13258 = vst [vmem:[#allocation59_spill] sm:$0xff] %v9148_v57 }
  0x9a   :  { %429 = vrot.lane.b32.xlu1 %v9118_v54, %s8657_s0  ;;  %427 = vrot.lane.b32.xlu0 %v9121_v58, %s8657_s0 }
  0x9e   :  { %433 = vrot.lane.b32.xlu1 %v9128_v50, %s8657_s0  ;;  %431 = vrot.lane.b32.xlu0 %v9131_v52, %s8657_s0  ;;  %v9151_v50 = vrot.slane %v8814_v14, 2  ;;  %v9158_v52 = vrot.slane %v8959_v41, 2 }
  0xa0   :  { %13259 = vst [vmem:[#allocation60_spill] sm:$0xff] %v9151_v50  ;;  %13260 = vst [vmem:[#allocation61_spill] sm:$0xff] %v9158_v52 }
  0xa2   :  { %437 = vrot.lane.b32.xlu1 %v9138_v49, %s8657_s0  ;;  %435 = vrot.lane.b32.xlu0 %v9141_v53, %s8657_s0  ;;  %v9161_v49 = vrot.slane %v8819_v15, 2  ;;  %v9168_v53 = vrot.slane %v8843_v19, 2 }
  0xa4   :  { %13261 = vst [vmem:[#allocation62_spill] sm:$0xff] %v9161_v49  ;;  %13262 = vst [vmem:[#allocation63_spill] sm:$0xff] %v9168_v53 }
  0xa6   :  { %441 = vrot.lane.b32.xlu1 %v9148_v57, %s8657_s0  ;;  %439 = vrot.lane.b32.xlu0 %v9151_v50, %s8657_s0  ;;  %v9171_v57 = vrot.slane %v8828_v16, 2  ;;  %v9178_v50 = vrot.slane %v8983_v46, 2 }
  0xa8   :  { %13263 = vst [vmem:[#allocation64_spill] sm:$0xff] %v9171_v57  ;;  %13264 = vst [vmem:[#allocation65_spill] sm:$0xff] %v9178_v50 }
  0xaa   :  { %445 = vrot.lane.b32.xlu1 %v9158_v52, %s8657_s0  ;;  %443 = vrot.lane.b32.xlu0 %v9161_v49, %s8657_s0  ;;  %v9181_v52 = vrot.slane %v8839_v18, 2  ;;  %v9188_v49 = vrot.slane %v8873_v25, 2 }
  0xac   :  { %13265 = vst [vmem:[#allocation66_spill] sm:$0xff] %v9181_v52  ;;  %13266 = vst [vmem:[#allocation67_spill] sm:$0xff] %v9188_v49 }
  0xae   :  { %449 = vrot.lane.b32.xlu1 %v9168_v53, %s8657_s0  ;;  %447 = vrot.lane.b32.xlu0 %v9171_v57, %s8657_s0  ;;  %v9191_v53 = vrot.slane %v8849_v20, 2  ;;  %v9198_v57 = vrot.slane %v9007_v51, 2 }
  0xb0   :  { %13267 = vst [vmem:[#allocation68_spill] sm:$0xff] %v9191_v53  ;;  %13268 = vst [vmem:[#allocation69_spill] sm:$0xff] %v9198_v57 }
  0xb2   :  { %453 = vrot.lane.b32.xlu1 %v9178_v50, %s8657_s0  ;;  %451 = vrot.lane.b32.xlu0 %v9181_v52, %s8657_s0  ;;  %v9201_v50 = vrot.slane %v8854_v21, 2  ;;  %v9208_v52 = vrot.slane %v8898_v29, 2 }
  0xb4   :  { %13269 = vst [vmem:[#allocation70_spill] sm:$0xff] %v9201_v50  ;;  %13270 = vst [vmem:[#allocation71_spill] sm:$0xff] %v9208_v52 }
  0xb6   :  { %457 = vrot.lane.b32.xlu1 %v9188_v49, %s8657_s0  ;;  %455 = vrot.lane.b32.xlu0 %v9191_v53, %s8657_s0  ;;  %v9211_v49 = vrot.slane %v8880_v26, 2  ;;  %v9218_v53 = vrot.slane %v9031_v56, 2 }
  0xb8   :  { %13271 = vst [vmem:[#allocation72_spill] sm:$0xff] %v9211_v49  ;;  %13272 = vst [vmem:[#allocation73_spill] sm:$0xff] %v9218_v53 }
  0xba   :  { %461 = vrot.lane.b32.xlu1 %v9198_v57, %s8657_s0  ;;  %459 = vrot.lane.b32.xlu0 %v9201_v50, %s8657_s0  ;;  %v9221_v57 = vrot.slane %v8885_v27, 2 }
  0xbc   :  { %13273 = vst [vmem:[#allocation74_spill] sm:$0xff] %v9221_v57 }
  0xbe   :  { %465 = vrot.lane.b32.xlu1 %v9208_v52, %s8657_s0  ;;  %463 = vrot.lane.b32.xlu0 %v9211_v49, %s8657_s0  ;;  %v9228_v52 = vrot.slane %v8920_v33, 2  ;;  %v9231_v49 = vrot.slane %v8893_v28, 2 }
  0xc0   :  { %v234_v54 = vpop.permute.xlu1 %233  ;;  %v230_v50 = vpop.permute.xlu0 %229  ;;  %13274 = vst [vmem:[#allocation75_spill] sm:$0xff] %v9228_v52  ;;  %13275 = vst [vmem:[#allocation76_spill] sm:$0xff] %v9231_v49 }
  0xc2   :  { %469 = vrot.lane.b32.xlu1 %v9218_v53, %s8657_s0  ;;  %467 = vrot.lane.b32.xlu0 %v9221_v57, %s8657_s0  ;;  %v9240_v53 = vrot.slane %v9055_v61, 2  ;;  %v9243_v57 = vrot.slane %v8904_v30, 2 }
  0xc4   :  { %v236_v63 = vpop.permute.xlu1 %235  ;;  %v238_v58 = vpop.permute.xlu0 %237  ;;  %13276 = vst [vmem:[#allocation77_spill] sm:$0xff] %v9240_v53  ;;  %13277 = vst [vmem:[#allocation78_spill] sm:$0xff] %v9243_v57 }
  0xc5   :  { %v296_v59 = vsel %vm13197_vm1, %v234_v54, %v236_v63  ;;  %354 = vst.msk [vmem:[#allocation2 + $0x18] sm:$0x38] %vm13204_vm2, %v236_v63  ;;  %v9255_v63 = vrot.slane %v8751_v1, 7 }
  0xc6   :  { %352 = vst [vmem:[#allocation2 + $0x10] sm:$0x38] %v296_v59  ;;  %473 = vrot.lane.b32.xlu1 %v9228_v52, %s8657_s0  ;;  %471 = vrot.lane.b32.xlu0 %v9231_v49, %s8657_s0  ;;  %v9252_v59 = vrot.slane %v8783_v8, 7 }
  0xc7   :  { %13279 = vst [vmem:[#allocation80_spill] sm:$0xff] %v9255_v63 }
  0xc8   :  { %v240_v60 = vpop.permute.xlu1 %239  ;;  %v242_v55 = vpop.permute.xlu0 %241  ;;  %13278 = vst [vmem:[#allocation79_spill] sm:$0xff] %v9252_v59 }
  0xc9   :  { %v297_v62 = vsel %vm13197_vm1, %v238_v58, %v240_v60  ;;  %v298_v48 = vsel %vm13197_vm1, %v240_v60, %v242_v55 }
  0xca   :  { %355 = vst [vmem:[#allocation2 + $0x140] sm:$0x38] %v297_v62  ;;  %356 = vst [vmem:[#allocation2 + $0x148] sm:$0x38] %v298_v48  ;;  %477 = vrot.lane.b32.xlu1 %v9240_v53, %s8657_s0  ;;  %475 = vrot.lane.b32.xlu0 %v9243_v57, %s8657_s0  ;;  %v9266_v62 = vrot.slane %v8768_v5, 7  ;;  %v9293_v57 = vrot.slane %v8774_v6, 7 }
  0xcc   :  { %v244_v49 = vpop.permute.xlu1 %243  ;;  %v232_v52 = vpop.permute.xlu0 %231  ;;  %13280 = vst [vmem:[#allocation81_spill] sm:$0xff] %v9266_v62  ;;  %13285 = vst [vmem:[#allocation86_spill] sm:$0xff] %v9293_v57 }
  0xcd   :  { %v299_v58 = vsel %vm13197_vm1, %v242_v55, %v244_v49  ;;  %358 = vst.msk [vmem:[#allocation2 + $0x158] sm:$0x38] %vm13204_vm2, %v244_v49  ;;  %v294_v48 = vsel %vm13197_vm1, %v230_v50, %v232_v52  ;;  %v295_v60 = vsel %vm13197_vm1, %v232_v52, %v234_v54  ;;  %v9269_v55 = vrot.slane %v8746_v0, 7 }
  0xce   :  { %357 = vst [vmem:[#allocation2 + $0x150] sm:$0x38] %v299_v58  ;;  %350 = vst [vmem:[#allocation2] sm:$0x38] %v294_v48  ;;  %636 = vrot.lane.b32.xlu1 %v9252_v59, %s8658_s11  ;;  %634 = vrot.lane.b32.xlu0 %v9255_v63, %s8658_s11  ;;  %v9277_v54 = vrot.slane %v8778_v7, 7  ;;  %v9280_v58 = vrot.slane %v8756_v2, 7 }
  0xcf   :  { %351 = vst [vmem:[#allocation2 + $0x8] sm:$0x38] %v295_v60  ;;  %13281 = vst [vmem:[#allocation82_spill] sm:$0xff] %v9269_v55 }
  0xd0   :  { %v248_v49 = vpop.permute.xlu1 %247  ;;  %v246_v50 = vpop.permute.xlu0 %245  ;;  %13282 = vst [vmem:[#allocation83_spill] sm:$0xff] %v9277_v54  ;;  %13283 = vst [vmem:[#allocation84_spill] sm:$0xff] %v9280_v58 }
  0xd1   :  { %v300_v52 = vsel %vm13197_vm1, %v246_v50, %v248_v49 }
  0xd2   :  { %359 = vst [vmem:[#allocation2 + $0x280] sm:$0x38] %v300_v52  ;;  %640 = vrot.lane.b32.xlu1 %v9266_v62, %s8658_s11  ;;  %638 = vrot.lane.b32.xlu0 %v9269_v55, %s8658_s11  ;;  %v9290_v52 = vrot.slane %v8868_v24, 7  ;;  %v9653_v55 = vrot.slane %v8774_v6, 1 }
  0xd4   :  { %v252_v48 = vpop.permute.xlu1 %251  ;;  %v250_v60 = vpop.permute.xlu0 %249  ;;  %13284 = vst [vmem:[#allocation85_spill] sm:$0xff] %v9290_v52  ;;  %13331 = vst [vmem:[#allocation132_spill] sm:$0xff] %v9653_v55 }
  0xd5   :  { %362 = vst.msk [vmem:[#allocation2 + $0x298] sm:$0x38] %vm13204_vm2, %v252_v48  ;;  %v301_v53 = vsel %vm13197_vm1, %v248_v49, %v250_v60  ;;  %v302_v50 = vsel %vm13197_vm1, %v250_v60, %v252_v48  ;;  %v9304_v48 = vrot.slane %v8788_v9, 7 }
  0xd6   :  { %360 = vst [vmem:[#allocation2 + $0x288] sm:$0x38] %v301_v53  ;;  %361 = vst [vmem:[#allocation2 + $0x290] sm:$0x38] %v302_v50  ;;  %644 = vrot.lane.b32.xlu1 %v9277_v54, %s8658_s11  ;;  %642 = vrot.lane.b32.xlu0 %v9280_v58, %s8658_s11  ;;  %v9301_v53 = vrot.slane %v8807_v13, 7 }
  0xd7   :  { %13287 = vst [vmem:[#allocation88_spill] sm:$0xff] %v9304_v48 }
  0xd8   :  { %v256_v63 = vpop.permute.xlu1 %255  ;;  %v254_v62 = vpop.permute.xlu0 %253  ;;  %13286 = vst [vmem:[#allocation87_spill] sm:$0xff] %v9301_v53 }
  0xd9   :  { %v303_v49 = vsel %vm13197_vm1, %v254_v62, %v256_v63 }
  0xda   :  { %363 = vst [vmem:[#allocation2 + $0x3c0] sm:$0x38] %v303_v49  ;;  %648 = vrot.lane.b32.xlu1 %v9290_v52, %s8658_s11  ;;  %646 = vrot.lane.b32.xlu0 %v9293_v57, %s8658_s11  ;;  %v9314_v49 = vrot.slane %v8935_v36, 7  ;;  %v9317_v52 = vrot.slane %v8793_v10, 7 }
  0xdc   :  { %v260_v60 = vpop.permute.xlu1 %259  ;;  %v258_v50 = vpop.permute.xlu0 %257  ;;  %13288 = vst [vmem:[#allocation89_spill] sm:$0xff] %v9314_v49  ;;  %13289 = vst [vmem:[#allocation90_spill] sm:$0xff] %v9317_v52 }
  0xdd   :  { %366 = vst.msk [vmem:[#allocation2 + $0x3d8] sm:$0x38] %vm13204_vm2, %v260_v60  ;;  %v304_v58 = vsel %vm13197_vm1, %v256_v63, %v258_v50  ;;  %v305_v62 = vsel %vm13197_vm1, %v258_v50, %v260_v60  ;;  %v9328_v60 = vrot.slane %v8814_v14, 7 }
  0xde   :  { %364 = vst [vmem:[#allocation2 + $0x3c8] sm:$0x38] %v304_v58  ;;  %365 = vst [vmem:[#allocation2 + $0x3d0] sm:$0x38] %v305_v62  ;;  %652 = vrot.lane.b32.xlu1 %v9301_v53, %s8658_s11  ;;  %650 = vrot.lane.b32.xlu0 %v9304_v48, %s8658_s11  ;;  %v9325_v58 = vrot.slane %v8833_v17, 7 }
  0xdf   :  { %13291 = vst [vmem:[#allocation92_spill] sm:$0xff] %v9328_v60 }
  0xe0   :  { %v264_v54 = vpop.permute.xlu1 %263  ;;  %v262_v57 = vpop.permute.xlu0 %261  ;;  %13290 = vst [vmem:[#allocation91_spill] sm:$0xff] %v9325_v58 }
  0xe1   :  { %v306_v63 = vsel %vm13197_vm1, %v262_v57, %v264_v54 }
  0xe2   :  { %367 = vst [vmem:[#allocation2 + $0x500] sm:$0x38] %v306_v63  ;;  %656 = vrot.lane.b32.xlu1 %v9314_v49, %s8658_s11  ;;  %654 = vrot.lane.b32.xlu0 %v9317_v52, %s8658_s11  ;;  %v9338_v63 = vrot.slane %v8959_v41, 7  ;;  %v9341_v49 = vrot.slane %v8819_v15, 7 }
  0xe4   :  { %v268_v50 = vpop.permute.xlu1 %267  ;;  %v266_v62 = vpop.permute.xlu0 %265  ;;  %13292 = vst [vmem:[#allocation93_spill] sm:$0xff] %v9338_v63  ;;  %13293 = vst [vmem:[#allocation94_spill] sm:$0xff] %v9341_v49 }
  0xe5   :  { %370 = vst.msk [vmem:[#allocation2 + $0x518] sm:$0x38] %vm13204_vm2, %v268_v50  ;;  %v307_v48 = vsel %vm13197_vm1, %v264_v54, %v266_v62  ;;  %v308_v57 = vsel %vm13197_vm1, %v266_v62, %v268_v50  ;;  %v9352_v50 = vrot.slane %v8828_v16, 7 }
  0xe6   :  { %368 = vst [vmem:[#allocation2 + $0x508] sm:$0x38] %v307_v48  ;;  %369 = vst [vmem:[#allocation2 + $0x510] sm:$0x38] %v308_v57  ;;  %660 = vrot.lane.b32.xlu1 %v9325_v58, %s8658_s11  ;;  %658 = vrot.lane.b32.xlu0 %v9328_v60, %s8658_s11  ;;  %v9349_v48 = vrot.slane %v8843_v19, 7 }
  0xe7   :  { %13295 = vst [vmem:[#allocation96_spill] sm:$0xff] %v9352_v50 }
  0xe8   :  { %v272_v53 = vpop.permute.xlu1 %271  ;;  %v270_v52 = vpop.permute.xlu0 %269  ;;  %13294 = vst [vmem:[#allocation95_spill] sm:$0xff] %v9349_v48 }
  0xe9   :  { %v309_v54 = vsel %vm13197_vm1, %v270_v52, %v272_v53 }
  0xea   :  { %371 = vst [vmem:[#allocation2 + $0x640] sm:$0x38] %v309_v54  ;;  %664 = vrot.lane.b32.xlu1 %v9338_v63, %s8658_s11  ;;  %662 = vrot.lane.b32.xlu0 %v9341_v49, %s8658_s11  ;;  %v9362_v54 = vrot.slane %v8983_v46, 7  ;;  %v9365_v63 = vrot.slane %v8839_v18, 7 }
  0xec   :  { %v276_v62 = vpop.permute.xlu1 %275  ;;  %v274_v57 = vpop.permute.xlu0 %273  ;;  %13296 = vst [vmem:[#allocation97_spill] sm:$0xff] %v9362_v54  ;;  %13297 = vst [vmem:[#allocation98_spill] sm:$0xff] %v9365_v63 }
  0xed   :  { %374 = vst.msk [vmem:[#allocation2 + $0x658] sm:$0x38] %vm13204_vm2, %v276_v62  ;;  %v310_v60 = vsel %vm13197_vm1, %v272_v53, %v274_v57  ;;  %v311_v52 = vsel %vm13197_vm1, %v274_v57, %v276_v62  ;;  %v9376_v62 = vrot.slane %v8849_v20, 7 }
  0xee   :  { %372 = vst [vmem:[#allocation2 + $0x648] sm:$0x38] %v310_v60  ;;  %373 = vst [vmem:[#allocation2 + $0x650] sm:$0x38] %v311_v52  ;;  %668 = vrot.lane.b32.xlu1 %v9349_v48, %s8658_s11  ;;  %666 = vrot.lane.b32.xlu0 %v9352_v50, %s8658_s11  ;;  %v9373_v60 = vrot.slane %v8873_v25, 7 }
  0xef   :  { %13299 = vst [vmem:[#allocation100_spill] sm:$0xff] %v9376_v62 }
  0xf0   :  { %v280_v58 = vpop.permute.xlu1 %279  ;;  %v278_v49 = vpop.permute.xlu0 %277  ;;  %13298 = vst [vmem:[#allocation99_spill] sm:$0xff] %v9373_v60 }
  0xf1   :  { %v312_v53 = vsel %vm13197_vm1, %v278_v49, %v280_v58 }
  0xf2   :  { %375 = vst [vmem:[#allocation2 + $0x780] sm:$0x38] %v312_v53  ;;  %672 = vrot.lane.b32.xlu1 %v9362_v54, %s8658_s11  ;;  %670 = vrot.lane.b32.xlu0 %v9365_v63, %s8658_s11  ;;  %v9386_v53 = vrot.slane %v9007_v51, 7  ;;  %v9389_v54 = vrot.slane %v8854_v21, 7 }
  0xf4   :  { %v284_v57 = vpop.permute.xlu1 %283  ;;  %v282_v52 = vpop.permute.xlu0 %281  ;;  %13300 = vst [vmem:[#allocation101_spill] sm:$0xff] %v9386_v53  ;;  %13301 = vst [vmem:[#allocation102_spill] sm:$0xff] %v9389_v54 }
  0xf5   :  { %378 = vst.msk [vmem:[#allocation2 + $0x798] sm:$0x38] %vm13204_vm2, %v284_v57  ;;  %v313_v50 = vsel %vm13197_vm1, %v280_v58, %v282_v52  ;;  %v314_v49 = vsel %vm13197_vm1, %v282_v52, %v284_v57  ;;  %v9400_v57 = vrot.slane %v8880_v26, 7 }
  0xf6   :  { %376 = vst [vmem:[#allocation2 + $0x788] sm:$0x38] %v313_v50  ;;  %377 = vst [vmem:[#allocation2 + $0x790] sm:$0x38] %v314_v49  ;;  %676 = vrot.lane.b32.xlu1 %v9373_v60, %s8658_s11  ;;  %674 = vrot.lane.b32.xlu0 %v9376_v62, %s8658_s11  ;;  %v9397_v50 = vrot.slane %v8898_v29, 7 }
  0xf7   :  { %13303 = vst [vmem:[#allocation104_spill] sm:$0xff] %v9400_v57 }
  0xf8   :  { %v288_v48 = vpop.permute.xlu1 %287  ;;  %v286_v63 = vpop.permute.xlu0 %285  ;;  %13302 = vst [vmem:[#allocation103_spill] sm:$0xff] %v9397_v50 }
  0xf9   :  { %v315_v58 = vsel %vm13197_vm1, %v286_v63, %v288_v48 }
  0xfa   :  { %379 = vst [vmem:[#allocation2 + $0x8c0] sm:$0x38] %v315_v58  ;;  %680 = vrot.lane.b32.xlu1 %v9386_v53, %s8658_s11  ;;  %678 = vrot.lane.b32.xlu0 %v9389_v54, %s8658_s11  ;;  %v9410_v58 = vrot.slane %v9031_v56, 7  ;;  %v9413_v53 = vrot.slane %v8885_v27, 7 }
  0xfc   :  { %v292_v52 = vpop.permute.xlu1 %291  ;;  %v290_v49 = vpop.permute.xlu0 %289  ;;  %13304 = vst [vmem:[#allocation105_spill] sm:$0xff] %v9410_v58  ;;  %13305 = vst [vmem:[#allocation106_spill] sm:$0xff] %v9413_v53 }
  0xfd   :  { %382 = vst.msk [vmem:[#allocation2 + $0x8d8] sm:$0x38] %vm13204_vm2, %v292_v52  ;;  %v316_v62 = vsel %vm13197_vm1, %v288_v48, %v290_v49  ;;  %v317_v63 = vsel %vm13197_vm1, %v290_v49, %v292_v52  ;;  %v9424_v52 = vrot.slane %v8893_v28, 7  ;;  %vm13200_vm1 = vcmask 236544  }
  0xfe   :  { %380 = vst [vmem:[#allocation2 + $0x8c8] sm:$0x38] %v316_v62  ;;  %381 = vst [vmem:[#allocation2 + $0x8d0] sm:$0x38] %v317_v63  ;;  %684 = vrot.lane.b32.xlu1 %v9397_v50, %s8658_s11  ;;  %682 = vrot.lane.b32.xlu0 %v9400_v57, %s8658_s11  ;;  %v9421_v62 = vrot.slane %v8920_v33, 7  ;;  %v9435_v57 = vrot.slane %v9055_v61, 7 }
  0xff   :  { %13307 = vst [vmem:[#allocation108_spill] sm:$0xff] %v9424_v52 }
 0x100   :  { %v418_v60 = vpop.permute.xlu1 %417  ;;  %v416_v54 = vpop.permute.xlu0 %415  ;;  %13306 = vst [vmem:[#allocation107_spill] sm:$0xff] %v9421_v62  ;;  %13308 = vst [vmem:[#allocation109_spill] sm:$0xff] %v9435_v57 }
 0x101   :  { %v480_v48 = vsel %vm479_vm3, %v416_v54, %v418_v60 }
 0x102   :  { %536 = vst [vmem:[#allocation2 + $0x20] ss:$-28 sps:$4 sm:$0xc1] %v480_v48   ;;  %688 = vrot.lane.b32.xlu1 %v9410_v58, %s8658_s11  ;;  %686 = vrot.lane.b32.xlu0 %v9413_v53, %s8658_s11  ;;  %v9438_v58 = vrot.slane %v8904_v30, 7 }
 0x104   :  { %v422_v49 = vpop.permute.xlu1 %421  ;;  %v420_v63 = vpop.permute.xlu0 %419  ;;  %13309 = vst [vmem:[#allocation110_spill] sm:$0xff] %v9438_v58 }
 0x105   :  { %540 = vst.msk [vmem:[#allocation2 + $0x18] sm:$0xc0] %vm539_vm4, %v422_v49  ;;  %v481_v54 = vsel %vm479_vm3, %v418_v60, %v420_v63  ;;  %v482_v48 = vsel %vm479_vm3, %v420_v63, %v422_v49 }
 0x106   :  { %545 = vst.msk [vmem:[#allocation2 + $0x38] sm:$0x1] %vm544_vm5, %v422_v49  ;;  %537 = vst [vmem:[#allocation2 + $0x28] ss:$-28 sps:$4 sm:$0xc1] %v481_v54   ;;  %692 = vrot.lane.b32.xlu1 %v9421_v62, %s8658_s11  ;;  %690 = vrot.lane.b32.xlu0 %v9424_v52, %s8658_s11  ;;  %v9447_v49 = vcombine.low %v8751_v1, %v8751_v1 }
 0x107   :  { %538 = vst [vmem:[#allocation2 + $0x30] ss:$-28 sps:$4 sm:$0xc1] %v482_v48  }
 0x108   :  { %v426_v50 = vpop.permute.xlu1 %425  ;;  %v424_v53 = vpop.permute.xlu0 %423  ;;  %13310 = vst [vmem:[#allocation111_spill] sm:$0xff] %v9447_v49 }
 0x109   :  { %v483_v60 = vsel %vm479_vm3, %v424_v53, %v426_v50 }
 0x10a   :  { %546 = vst [vmem:[#allocation2 + $0x160] ss:$-28 sps:$4 sm:$0xc1] %v483_v60   ;;  %696 = vrot.lane.b32.xlu1 %v9435_v57, %s8658_s11  ;;  %694 = vrot.lane.b32.xlu0 %v9438_v58, %s8658_s11  ;;  %v9459_v60 = vcombine.low %v8746_v0, %v8746_v0 }
 0x10c   :  { %v430_v63 = vpop.permute.xlu1 %429  ;;  %v428_v54 = vpop.permute.xlu0 %427  ;;  %13311 = vst [vmem:[#allocation112_spill] sm:$0xff] %v9459_v60 }
 0x10d   :  { %549 = vst.msk [vmem:[#allocation2 + $0x158] sm:$0xc0] %vm539_vm4, %v430_v63  ;;  %v484_v48 = vsel %vm479_vm3, %v426_v50, %v428_v54  ;;  %v485_v53 = vsel %vm479_vm3, %v428_v54, %v430_v63  ;;  %v9468_v50 = vcombine.low %v8756_v2, %v8756_v2 }
 0x10e   :  { %553 = vst.msk [vmem:[#allocation2 + $0x178] sm:$0x1] %vm544_vm5, %v430_v63  ;;  %547 = vst [vmem:[#allocation2 + $0x168] ss:$-28 sps:$4 sm:$0xc1] %v484_v48   ;;  %806 = vrot.lane.b32.xlu1 %v8751_v1, %s8659_s6  ;;  %804 = vrot.lane.b32.xlu0 %v9447_v49, %s8659_s6 }
 0x10f   :  { %548 = vst [vmem:[#allocation2 + $0x170] ss:$-28 sps:$4 sm:$0xc1] %v485_v53   ;;  %13312 = vst [vmem:[#allocation113_spill] sm:$0xff] %v9468_v50 }
 0x110   :  { %v434_v52 = vpop.permute.xlu1 %433  ;;  %v432_v57 = vpop.permute.xlu0 %431 }
 0x111   :  { %v486_v62 = vsel %vm479_vm3, %v432_v57, %v434_v52 }
 0x112   :  { %554 = vst [vmem:[#allocation2 + $0x2a0] ss:$-28 sps:$4 sm:$0xc1] %v486_v62   ;;  %810 = vrot.lane.b32.xlu1 %v8746_v0, %s8659_s6  ;;  %808 = vrot.lane.b32.xlu0 %v9459_v60, %s8659_s6  ;;  %v9480_v62 = vcombine.low %v8774_v6, %v8774_v6 }
 0x114   :  { %v438_v63 = vpop.permute.xlu1 %437  ;;  %v436_v54 = vpop.permute.xlu0 %435  ;;  %13313 = vst [vmem:[#allocation114_spill] sm:$0xff] %v9480_v62 }
 0x115   :  { %557 = vst.msk [vmem:[#allocation2 + $0x298] sm:$0xc0] %vm539_vm4, %v438_v63  ;;  %v487_v48 = vsel %vm479_vm3, %v434_v52, %v436_v54  ;;  %v488_v57 = vsel %vm479_vm3, %v436_v54, %v438_v63  ;;  %v9489_v52 = vcombine.low %v8788_v9, %v8788_v9 }
 0x116   :  { %561 = vst.msk [vmem:[#allocation2 + $0x2b8] sm:$0x1] %vm544_vm5, %v438_v63  ;;  %555 = vst [vmem:[#allocation2 + $0x2a8] ss:$-28 sps:$4 sm:$0xc1] %v487_v48   ;;  %814 = vrot.lane.b32.xlu1 %v8756_v2, %s8659_s6  ;;  %812 = vrot.lane.b32.xlu0 %v9468_v50, %s8659_s6 }
 0x117   :  { %556 = vst [vmem:[#allocation2 + $0x2b0] ss:$-28 sps:$4 sm:$0xc1] %v488_v57   ;;  %13314 = vst [vmem:[#allocation115_spill] sm:$0xff] %v9489_v52 }
 0x118   :  { %v442_v53 = vpop.permute.xlu1 %441  ;;  %v440_v58 = vpop.permute.xlu0 %439 }
 0x119   :  { %v489_v49 = vsel %vm479_vm3, %v440_v58, %v442_v53 }
 0x11a   :  { %562 = vst [vmem:[#allocation2 + $0x3e0] ss:$-28 sps:$4 sm:$0xc1] %v489_v49   ;;  %818 = vrot.lane.b32.xlu1 %v8774_v6, %s8659_s6  ;;  %816 = vrot.lane.b32.xlu0 %v9480_v62, %s8659_s6  ;;  %v9501_v49 = vcombine.low %v8793_v10, %v8793_v10 }
 0x11c   :  { %v446_v63 = vpop.permute.xlu1 %445  ;;  %v444_v54 = vpop.permute.xlu0 %443  ;;  %13315 = vst [vmem:[#allocation116_spill] sm:$0xff] %v9501_v49 }
 0x11d   :  { %565 = vst.msk [vmem:[#allocation2 + $0x3d8] sm:$0xc0] %vm539_vm4, %v446_v63  ;;  %v490_v48 = vsel %vm479_vm3, %v442_v53, %v444_v54  ;;  %v491_v58 = vsel %vm479_vm3, %v444_v54, %v446_v63  ;;  %v9510_v53 = vcombine.low %v8814_v14, %v8814_v14 }
 0x11e   :  { %569 = vst.msk [vmem:[#allocation2 + $0x3f8] sm:$0x1] %vm544_vm5, %v446_v63  ;;  %563 = vst [vmem:[#allocation2 + $0x3e8] ss:$-28 sps:$4 sm:$0xc1] %v490_v48   ;;  %822 = vrot.lane.b32.xlu1 %v8788_v9, %s8659_s6  ;;  %820 = vrot.lane.b32.xlu0 %v9489_v52, %s8659_s6 }
 0x11f   :  { %564 = vst [vmem:[#allocation2 + $0x3f0] ss:$-28 sps:$4 sm:$0xc1] %v491_v58   ;;  %13316 = vst [vmem:[#allocation117_spill] sm:$0xff] %v9510_v53 }
 0x120   :  { %v450_v57 = vpop.permute.xlu1 %449  ;;  %v448_v50 = vpop.permute.xlu0 %447 }
 0x121   :  { %v492_v62 = vsel %vm479_vm3, %v448_v50, %v450_v57 }
 0x122   :  { %570 = vst [vmem:[#allocation2 + $0x520] ss:$-28 sps:$4 sm:$0xc1] %v492_v62   ;;  %826 = vrot.lane.b32.xlu1 %v8793_v10, %s8659_s6  ;;  %824 = vrot.lane.b32.xlu0 %v9501_v49, %s8659_s6  ;;  %v9522_v62 = vcombine.low %v8819_v15, %v8819_v15 }
 0x124   :  { %v454_v63 = vpop.permute.xlu1 %453  ;;  %v452_v54 = vpop.permute.xlu0 %451  ;;  %13317 = vst [vmem:[#allocation118_spill] sm:$0xff] %v9522_v62 }
 0x125   :  { %573 = vst.msk [vmem:[#allocation2 + $0x518] sm:$0xc0] %vm539_vm4, %v454_v63  ;;  %v493_v48 = vsel %vm479_vm3, %v450_v57, %v452_v54  ;;  %v494_v50 = vsel %vm479_vm3, %v452_v54, %v454_v63  ;;  %v9531_v57 = vcombine.low %v8828_v16, %v8828_v16 }
 0x126   :  { %577 = vst.msk [vmem:[#allocation2 + $0x538] sm:$0x1] %vm544_vm5, %v454_v63  ;;  %571 = vst [vmem:[#allocation2 + $0x528] ss:$-28 sps:$4 sm:$0xc1] %v493_v48   ;;  %830 = vrot.lane.b32.xlu1 %v8814_v14, %s8659_s6  ;;  %828 = vrot.lane.b32.xlu0 %v9510_v53, %s8659_s6 }
 0x127   :  { %572 = vst [vmem:[#allocation2 + $0x530] ss:$-28 sps:$4 sm:$0xc1] %v494_v50   ;;  %13318 = vst [vmem:[#allocation119_spill] sm:$0xff] %v9531_v57 }
 0x128   :  { %v458_v58 = vpop.permute.xlu1 %457  ;;  %v456_v52 = vpop.permute.xlu0 %455 }
 0x129   :  { %v495_v49 = vsel %vm479_vm3, %v456_v52, %v458_v58 }
 0x12a   :  { %578 = vst [vmem:[#allocation2 + $0x660] ss:$-28 sps:$4 sm:$0xc1] %v495_v49   ;;  %834 = vrot.lane.b32.xlu1 %v8819_v15, %s8659_s6  ;;  %832 = vrot.lane.b32.xlu0 %v9522_v62, %s8659_s6  ;;  %v9543_v49 = vcombine.low %v8839_v18, %v8839_v18 }
 0x12c   :  { %v462_v63 = vpop.permute.xlu1 %461  ;;  %v460_v54 = vpop.permute.xlu0 %459  ;;  %13319 = vst [vmem:[#allocation120_spill] sm:$0xff] %v9543_v49 }
 0x12d   :  { %581 = vst.msk [vmem:[#allocation2 + $0x658] sm:$0xc0] %vm539_vm4, %v462_v63  ;;  %v496_v48 = vsel %vm479_vm3, %v458_v58, %v460_v54  ;;  %v497_v52 = vsel %vm479_vm3, %v460_v54, %v462_v63  ;;  %v9552_v58 = vcombine.low %v8849_v20, %v8849_v20 }
 0x12e   :  { %585 = vst.msk [vmem:[#allocation2 + $0x678] sm:$0x1] %vm544_vm5, %v462_v63  ;;  %579 = vst [vmem:[#allocation2 + $0x668] ss:$-28 sps:$4 sm:$0xc1] %v496_v48   ;;  %838 = vrot.lane.b32.xlu1 %v8828_v16, %s8659_s6  ;;  %836 = vrot.lane.b32.xlu0 %v9531_v57, %s8659_s6 }
 0x12f   :  { %580 = vst [vmem:[#allocation2 + $0x670] ss:$-28 sps:$4 sm:$0xc1] %v497_v52   ;;  %13320 = vst [vmem:[#allocation121_spill] sm:$0xff] %v9552_v58 }
 0x130   :  { %v466_v50 = vpop.permute.xlu1 %465  ;;  %v464_v53 = vpop.permute.xlu0 %463 }
 0x131   :  { %v498_v62 = vsel %vm479_vm3, %v464_v53, %v466_v50 }
 0x132   :  { %586 = vst [vmem:[#allocation2 + $0x7a0] ss:$-28 sps:$4 sm:$0xc1] %v498_v62   ;;  %842 = vrot.lane.b32.xlu1 %v8839_v18, %s8659_s6  ;;  %840 = vrot.lane.b32.xlu0 %v9543_v49, %s8659_s6  ;;  %v9564_v62 = vcombine.low %v8854_v21, %v8854_v21 }
 0x134   :  { %v470_v63 = vpop.permute.xlu1 %469  ;;  %v468_v54 = vpop.permute.xlu0 %467  ;;  %13321 = vst [vmem:[#allocation122_spill] sm:$0xff] %v9564_v62 }
 0x135   :  { %589 = vst.msk [vmem:[#allocation2 + $0x798] sm:$0xc0] %vm539_vm4, %v470_v63  ;;  %v499_v48 = vsel %vm479_vm3, %v466_v50, %v468_v54  ;;  %v500_v53 = vsel %vm479_vm3, %v468_v54, %v470_v63  ;;  %v9573_v50 = vcombine.low %v8880_v26, %v8880_v26 }
 0x136   :  { %593 = vst.msk [vmem:[#allocation2 + $0x7b8] sm:$0x1] %vm544_vm5, %v470_v63  ;;  %587 = vst [vmem:[#allocation2 + $0x7a8] ss:$-28 sps:$4 sm:$0xc1] %v499_v48   ;;  %846 = vrot.lane.b32.xlu1 %v8849_v20, %s8659_s6  ;;  %844 = vrot.lane.b32.xlu0 %v9552_v58, %s8659_s6 }
 0x137   :  { %588 = vst [vmem:[#allocation2 + $0x7b0] ss:$-28 sps:$4 sm:$0xc1] %v500_v53   ;;  %13322 = vst [vmem:[#allocation123_spill] sm:$0xff] %v9573_v50 }
 0x138   :  { %v474_v52 = vpop.permute.xlu1 %473  ;;  %v472_v57 = vpop.permute.xlu0 %471 }
 0x139   :  { %v501_v49 = vsel %vm479_vm3, %v472_v57, %v474_v52 }
 0x13a   :  { %594 = vst [vmem:[#allocation2 + $0x8e0] ss:$-28 sps:$4 sm:$0xc1] %v501_v49   ;;  %850 = vrot.lane.b32.xlu1 %v8854_v21, %s8659_s6  ;;  %848 = vrot.lane.b32.xlu0 %v9564_v62, %s8659_s6  ;;  %v9585_v49 = vcombine.low %v8885_v27, %v8885_v27 }
 0x13c   :  { %v478_v63 = vpop.permute.xlu1 %477  ;;  %v476_v54 = vpop.permute.xlu0 %475  ;;  %13323 = vst [vmem:[#allocation124_spill] sm:$0xff] %v9585_v49 }
 0x13d   :  { %597 = vst.msk [vmem:[#allocation2 + $0x8d8] sm:$0xc0] %vm539_vm4, %v478_v63  ;;  %v502_v48 = vsel %vm479_vm3, %v474_v52, %v476_v54  ;;  %v503_v57 = vsel %vm479_vm3, %v476_v54, %v478_v63  ;;  %v9594_v52 = vcombine.low %v8893_v28, %v8893_v28  ;;  %vm1519_vm3 = vcmask 203781  }
 0x13e   :  { %601 = vst.msk [vmem:[#allocation2 + $0x8f8] sm:$0x1] %vm544_vm5, %v478_v63  ;;  %595 = vst [vmem:[#allocation2 + $0x8e8] ss:$-28 sps:$4 sm:$0xc1] %v502_v48   ;;  %854 = vrot.lane.b32.xlu1 %v8880_v26, %s8659_s6  ;;  %852 = vrot.lane.b32.xlu0 %v9573_v50, %s8659_s6 }
 0x13f   :  { %596 = vst [vmem:[#allocation2 + $0x8f0] ss:$-28 sps:$4 sm:$0xc1] %v503_v57   ;;  %13324 = vst [vmem:[#allocation125_spill] sm:$0xff] %v9594_v52 }
 0x140   :  { %v637_v53 = vpop.permute.xlu1 %636  ;;  %v635_v58 = vpop.permute.xlu0 %634 }
 0x141   :  { %v699_v62 = vsel %vm698_vm6, %v635_v58, %v637_v53 }
 0x142   :  { %755 = vst [vmem:[#allocation2 + $0x20] sm:$0xe] %v699_v62  ;;  %858 = vrot.lane.b32.xlu1 %v8885_v27, %s8659_s6  ;;  %856 = vrot.lane.b32.xlu0 %v9585_v49, %s8659_s6  ;;  %v9605_v62 = vcombine.low %v8904_v30, %v8904_v30 }
 0x144   :  { %v641_v63 = vpop.permute.xlu1 %640  ;;  %v639_v54 = vpop.permute.xlu0 %638  ;;  %13325 = vst [vmem:[#allocation126_spill] sm:$0xff] %v9605_v62 }
 0x145   :  { %759 = vst.msk [vmem:[#allocation2 + $0x38] sm:$0xe] %vm758_vm7, %v641_v63  ;;  %v700_v48 = vsel %vm698_vm6, %v637_v53, %v639_v54  ;;  %v701_v58 = vsel %vm698_vm6, %v639_v54, %v641_v63  ;;  %v9613_v53 = vrot.slane %v8783_v8, 1  ;;  %v9616_v63 = vrot.slane %v8751_v1, 1 }
 0x146   :  { %756 = vst [vmem:[#allocation2 + $0x28] sm:$0xe] %v700_v48  ;;  %757 = vst [vmem:[#allocation2 + $0x30] sm:$0xe] %v701_v58  ;;  %862 = vrot.lane.b32.xlu1 %v8893_v28, %s8659_s6  ;;  %860 = vrot.lane.b32.xlu0 %v9594_v52, %s8659_s6  ;;  %v9629_v52 = vrot.slane %v8746_v0, 1 }
 0x147   :  { %13326 = vst [vmem:[#allocation127_spill] sm:$0xff] %v9616_v63 }
 0x148   :  { %v645_v57 = vpop.permute.xlu1 %644  ;;  %v643_v50 = vpop.permute.xlu0 %642 }
 0x149   :  { %v702_v49 = vsel %vm698_vm6, %v643_v50, %v645_v57 }
 0x14a   :  { %760 = vst [vmem:[#allocation2 + $0x160] sm:$0xe] %v702_v49  ;;  %866 = vrot.lane.b32.xlu1 %v8904_v30, %s8659_s6  ;;  %864 = vrot.lane.b32.xlu0 %v9605_v62, %s8659_s6  ;;  %v9626_v49 = vrot.slane %v8768_v5, 1 }
 0x14c   :  { %v649_v54 = vpop.permute.xlu1 %648  ;;  %v647_v48 = vpop.permute.xlu0 %646  ;;  %13327 = vst [vmem:[#allocation128_spill] sm:$0xff] %v9626_v49 }
 0x14d   :  { %763 = vst.msk [vmem:[#allocation2 + $0x178] sm:$0xe] %vm758_vm7, %v649_v54  ;;  %v703_v58 = vsel %vm698_vm6, %v645_v57, %v647_v48  ;;  %v704_v50 = vsel %vm698_vm6, %v647_v48, %v649_v54  ;;  %v9637_v54 = vrot.slane %v8778_v7, 1  ;;  %v9640_v48 = vrot.slane %v8756_v2, 1 }
 0x14e   :  { %761 = vst [vmem:[#allocation2 + $0x168] sm:$0xe] %v703_v58  ;;  %762 = vst [vmem:[#allocation2 + $0x170] sm:$0xe] %v704_v50  ;;  %992 = vrot.lane.b32.xlu1 %v9613_v53, %s8660_s12  ;;  %990 = vrot.lane.b32.xlu0 %v9616_v63, %s8660_s12 }
 0x14f   :  { %13328 = vst [vmem:[#allocation129_spill] sm:$0xff] %v9637_v54  ;;  %13329 = vst [vmem:[#allocation130_spill] sm:$0xff] %v9640_v48 }
 0x150   :  { %v653_v62 = vpop.permute.xlu1 %652  ;;  %v651_v60 = vpop.permute.xlu0 %650 }
 0x151   :  { %v705_v57 = vsel %vm698_vm6, %v651_v60, %v653_v62 }
 0x152   :  { %764 = vst [vmem:[#allocation2 + $0x2a0] sm:$0xe] %v705_v57  ;;  %996 = vrot.lane.b32.xlu1 %v9626_v49, %s8660_s12  ;;  %994 = vrot.lane.b32.xlu0 %v9629_v52, %s8660_s12  ;;  %v9650_v57 = vrot.slane %v8868_v24, 1 }
 0x154   :  { %v657_v58 = vpop.permute.xlu1 %656  ;;  %v655_v50 = vpop.permute.xlu0 %654  ;;  %13330 = vst [vmem:[#allocation131_spill] sm:$0xff] %v9650_v57 }
 0x155   :  { %767 = vst.msk [vmem:[#allocation2 + $0x2b8] sm:$0xe] %vm758_vm7, %v657_v58  ;;  %v706_v59 = vsel %vm698_vm6, %v653_v62, %v655_v50  ;;  %v707_v60 = vsel %vm698_vm6, %v655_v50, %v657_v58  ;;  %v9664_v58 = vrot.slane %v8788_v9, 1 }
 0x156   :  { %765 = vst [vmem:[#allocation2 + $0x2a8] sm:$0xe] %v706_v59  ;;  %766 = vst [vmem:[#allocation2 + $0x2b0] sm:$0xe] %v707_v60  ;;  %1000 = vrot.lane.b32.xlu1 %v9637_v54, %s8660_s12  ;;  %998 = vrot.lane.b32.xlu0 %v9640_v48, %s8660_s12  ;;  %v9661_v59 = vrot.slane %v8807_v13, 1 }
 0x157   :  { %13333 = vst [vmem:[#allocation134_spill] sm:$0xff] %v9664_v58 }
 0x158   :  { %v661_v63 = vpop.permute.xlu1 %660  ;;  %v659_v49 = vpop.permute.xlu0 %658  ;;  %13332 = vst [vmem:[#allocation133_spill] sm:$0xff] %v9661_v59 }
 0x159   :  { %v708_v62 = vsel %vm698_vm6, %v659_v49, %v661_v63 }
 0x15a   :  { %768 = vst [vmem:[#allocation2 + $0x3e0] sm:$0xe] %v708_v62  ;;  %1004 = vrot.lane.b32.xlu1 %v9650_v57, %s8660_s12  ;;  %1002 = vrot.lane.b32.xlu0 %v9653_v55, %s8660_s12  ;;  %v9674_v62 = vrot.slane %v8935_v36, 1  ;;  %v9677_v57 = vrot.slane %v8793_v10, 1 }
 0x15c   :  { %v665_v50 = vpop.permute.xlu1 %664  ;;  %v663_v60 = vpop.permute.xlu0 %662  ;;  %13334 = vst [vmem:[#allocation135_spill] sm:$0xff] %v9674_v62  ;;  %13335 = vst [vmem:[#allocation136_spill] sm:$0xff] %v9677_v57 }
 0x15d   :  { %771 = vst.msk [vmem:[#allocation2 + $0x3f8] sm:$0xe] %vm758_vm7, %v665_v50  ;;  %v709_v48 = vsel %vm698_vm6, %v661_v63, %v663_v60  ;;  %v710_v49 = vsel %vm698_vm6, %v663_v60, %v665_v50  ;;  %v9688_v50 = vrot.slane %v8814_v14, 1 }
 0x15e   :  { %769 = vst [vmem:[#allocation2 + $0x3e8] sm:$0xe] %v709_v48  ;;  %770 = vst [vmem:[#allocation2 + $0x3f0] sm:$0xe] %v710_v49  ;;  %1008 = vrot.lane.b32.xlu1 %v9661_v59, %s8660_s12  ;;  %1006 = vrot.lane.b32.xlu0 %v9664_v58, %s8660_s12  ;;  %v9685_v48 = vrot.slane %v8833_v17, 1 }
 0x15f   :  { %13337 = vst [vmem:[#allocation138_spill] sm:$0xff] %v9688_v50 }
 0x160   :  { %v669_v54 = vpop.permute.xlu1 %668  ;;  %v667_v55 = vpop.permute.xlu0 %666  ;;  %13336 = vst [vmem:[#allocation137_spill] sm:$0xff] %v9685_v48 }
 0x161   :  { %v711_v63 = vsel %vm698_vm6, %v667_v55, %v669_v54 }
 0x162   :  { %772 = vst [vmem:[#allocation2 + $0x520] sm:$0xe] %v711_v63  ;;  %1012 = vrot.lane.b32.xlu1 %v9674_v62, %s8660_s12  ;;  %1010 = vrot.lane.b32.xlu0 %v9677_v57, %s8660_s12  ;;  %v9698_v63 = vrot.slane %v8959_v41, 1  ;;  %v9701_v62 = vrot.slane %v8819_v15, 1 }
 0x164   :  { %v673_v60 = vpop.permute.xlu1 %672  ;;  %v671_v49 = vpop.permute.xlu0 %670  ;;  %13338 = vst [vmem:[#allocation139_spill] sm:$0xff] %v9698_v63  ;;  %13339 = vst [vmem:[#allocation140_spill] sm:$0xff] %v9701_v62 }
 0x165   :  { %775 = vst.msk [vmem:[#allocation2 + $0x538] sm:$0xe] %vm758_vm7, %v673_v60  ;;  %v712_v58 = vsel %vm698_vm6, %v669_v54, %v671_v49  ;;  %v713_v55 = vsel %vm698_vm6, %v671_v49, %v673_v60  ;;  %v9712_v60 = vrot.slane %v8828_v16, 1 }
 0x166   :  { %773 = vst [vmem:[#allocation2 + $0x528] sm:$0xe] %v712_v58  ;;  %774 = vst [vmem:[#allocation2 + $0x530] sm:$0xe] %v713_v55  ;;  %1016 = vrot.lane.b32.xlu1 %v9685_v48, %s8660_s12  ;;  %1014 = vrot.lane.b32.xlu0 %v9688_v50, %s8660_s12  ;;  %v9709_v58 = vrot.slane %v8843_v19, 1 }
 0x167   :  { %13341 = vst [vmem:[#allocation142_spill] sm:$0xff] %v9712_v60 }
 0x168   :  { %v677_v59 = vpop.permute.xlu1 %676  ;;  %v675_v57 = vpop.permute.xlu0 %674  ;;  %13340 = vst [vmem:[#allocation141_spill] sm:$0xff] %v9709_v58 }
 0x169   :  { %v714_v54 = vsel %vm698_vm6, %v675_v57, %v677_v59 }
 0x16a   :  { %776 = vst [vmem:[#allocation2 + $0x660] sm:$0xe] %v714_v54  ;;  %1020 = vrot.lane.b32.xlu1 %v9698_v63, %s8660_s12  ;;  %1018 = vrot.lane.b32.xlu0 %v9701_v62, %s8660_s12  ;;  %v9722_v54 = vrot.slane %v8983_v46, 1  ;;  %v9725_v63 = vrot.slane %v8839_v18, 1 }
 0x16c   :  { %v681_v49 = vpop.permute.xlu1 %680  ;;  %v679_v55 = vpop.permute.xlu0 %678  ;;  %13342 = vst [vmem:[#allocation143_spill] sm:$0xff] %v9722_v54  ;;  %13343 = vst [vmem:[#allocation144_spill] sm:$0xff] %v9725_v63 }
 0x16d   :  { %779 = vst.msk [vmem:[#allocation2 + $0x678] sm:$0xe] %vm758_vm7, %v681_v49  ;;  %v715_v50 = vsel %vm698_vm6, %v677_v59, %v679_v55  ;;  %v716_v57 = vsel %vm698_vm6, %v679_v55, %v681_v49  ;;  %v9736_v49 = vrot.slane %v8849_v20, 1 }
 0x16e   :  { %777 = vst [vmem:[#allocation2 + $0x668] sm:$0xe] %v715_v50  ;;  %778 = vst [vmem:[#allocation2 + $0x670] sm:$0xe] %v716_v57  ;;  %1024 = vrot.lane.b32.xlu1 %v9709_v58, %s8660_s12  ;;  %1022 = vrot.lane.b32.xlu0 %v9712_v60, %s8660_s12  ;;  %v9733_v50 = vrot.slane %v8873_v25, 1 }
 0x16f   :  { %13345 = vst [vmem:[#allocation146_spill] sm:$0xff] %v9736_v49 }
 0x170   :  { %v685_v48 = vpop.permute.xlu1 %684  ;;  %v683_v62 = vpop.permute.xlu0 %682  ;;  %13344 = vst [vmem:[#allocation145_spill] sm:$0xff] %v9733_v50 }
 0x171   :  { %v717_v59 = vsel %vm698_vm6, %v683_v62, %v685_v48 }
 0x172   :  { %780 = vst [vmem:[#allocation2 + $0x7a0] sm:$0xe] %v717_v59  ;;  %1028 = vrot.lane.b32.xlu1 %v9722_v54, %s8660_s12  ;;  %1026 = vrot.lane.b32.xlu0 %v9725_v63, %s8660_s12  ;;  %v9746_v59 = vrot.slane %v9007_v51, 1  ;;  %v9749_v54 = vrot.slane %v8854_v21, 1 }
 0x174   :  { %v689_v55 = vpop.permute.xlu1 %688  ;;  %v687_v57 = vpop.permute.xlu0 %686  ;;  %13346 = vst [vmem:[#allocation147_spill] sm:$0xff] %v9746_v59  ;;  %13347 = vst [vmem:[#allocation148_spill] sm:$0xff] %v9749_v54 }
 0x175   :  { %783 = vst.msk [vmem:[#allocation2 + $0x7b8] sm:$0xe] %vm758_vm7, %v689_v55  ;;  %v718_v60 = vsel %vm698_vm6, %v685_v48, %v687_v57  ;;  %v719_v62 = vsel %vm698_vm6, %v687_v57, %v689_v55  ;;  %v9760_v55 = vrot.slane %v8880_v26, 1 }
 0x176   :  { %781 = vst [vmem:[#allocation2 + $0x7a8] sm:$0xe] %v718_v60  ;;  %782 = vst [vmem:[#allocation2 + $0x7b0] sm:$0xe] %v719_v62  ;;  %1032 = vrot.lane.b32.xlu1 %v9733_v50, %s8660_s12  ;;  %1030 = vrot.lane.b32.xlu0 %v9736_v49, %s8660_s12  ;;  %v9757_v60 = vrot.slane %v8898_v29, 1 }
 0x177   :  { %13349 = vst [vmem:[#allocation150_spill] sm:$0xff] %v9760_v55 }
 0x178   :  { %v693_v58 = vpop.permute.xlu1 %692  ;;  %v691_v63 = vpop.permute.xlu0 %690  ;;  %13348 = vst [vmem:[#allocation149_spill] sm:$0xff] %v9757_v60 }
 0x179   :  { %v720_v48 = vsel %vm698_vm6, %v691_v63, %v693_v58 }
 0x17a   :  { %784 = vst [vmem:[#allocation2 + $0x8e0] sm:$0xe] %v720_v48  ;;  %1036 = vrot.lane.b32.xlu1 %v9746_v59, %s8660_s12  ;;  %1034 = vrot.lane.b32.xlu0 %v9749_v54, %s8660_s12  ;;  %v9770_v48 = vrot.slane %v9031_v56, 1  ;;  %v9773_v59 = vrot.slane %v8885_v27, 1 }
 0x17c   :  { %v697_v57 = vpop.permute.xlu1 %696  ;;  %v695_v62 = vpop.permute.xlu0 %694  ;;  %13350 = vst [vmem:[#allocation151_spill] sm:$0xff] %v9770_v48  ;;  %13351 = vst [vmem:[#allocation152_spill] sm:$0xff] %v9773_v59 }
 0x17d   :  { %787 = vst.msk [vmem:[#allocation2 + $0x8f8] sm:$0xe] %vm758_vm7, %v697_v57  ;;  %v721_v49 = vsel %vm698_vm6, %v693_v58, %v695_v62  ;;  %v722_v63 = vsel %vm698_vm6, %v695_v62, %v697_v57  ;;  %v9784_v57 = vrot.slane %v8893_v28, 1  ;;  %vm1613_vm6 = vcmask 826368  }
 0x17e   :  { %785 = vst [vmem:[#allocation2 + $0x8e8] sm:$0xe] %v721_v49  ;;  %786 = vst [vmem:[#allocation2 + $0x8f0] sm:$0xe] %v722_v63  ;;  %1040 = vrot.lane.b32.xlu1 %v9757_v60, %s8660_s12  ;;  %1038 = vrot.lane.b32.xlu0 %v9760_v55, %s8660_s12  ;;  %v9781_v49 = vrot.slane %v8920_v33, 1  ;;  %v9794_v55 = vrot.slane %v9055_v61, 1 }
 0x17f   :  { %13353 = vst [vmem:[#allocation154_spill] sm:$0xff] %v9784_v57 }
 0x180   :  { %v807_v50 = vpop.permute.xlu1 %806  ;;  %v805_v54 = vpop.permute.xlu0 %804  ;;  %13352 = vst [vmem:[#allocation153_spill] sm:$0xff] %v9781_v49  ;;  %13354 = vst [vmem:[#allocation155_spill] sm:$0xff] %v9794_v55 }
 0x181   :  { %v869_v58 = vsel %vm868_vm8, %v805_v54, %v807_v50 }
 0x182   :  { %925 = vst [vmem:[#allocation2 + $0x20] sm:$0x70] %v869_v58  ;;  %1044 = vrot.lane.b32.xlu1 %v9770_v48, %s8660_s12  ;;  %1042 = vrot.lane.b32.xlu0 %v9773_v59, %s8660_s12  ;;  %v9797_v48 = vrot.slane %v8904_v30, 1 }
 0x184   :  { %v811_v62 = vpop.permute.xlu1 %810  ;;  %v809_v63 = vpop.permute.xlu0 %808  ;;  %13355 = vst [vmem:[#allocation156_spill] sm:$0xff] %v9797_v48 }
 0x185   :  { %929 = vst.msk [vmem:[#allocation2 + $0x38] sm:$0x70] %vm13214_vm9, %v811_v62  ;;  %v870_v54 = vsel %vm868_vm8, %v807_v50, %v809_v63  ;;  %v871_v58 = vsel %vm868_vm8, %v809_v63, %v811_v62  ;;  %v9805_v62 = vrot.slane %v8783_v8, 6  ;;  %v9808_v63 = vrot.slane %v8751_v1, 6 }
 0x186   :  { %926 = vst [vmem:[#allocation2 + $0x28] sm:$0x70] %v870_v54  ;;  %927 = vst [vmem:[#allocation2 + $0x30] sm:$0x70] %v871_v58  ;;  %1048 = vrot.lane.b32.xlu1 %v9781_v49, %s8660_s12  ;;  %1046 = vrot.lane.b32.xlu0 %v9784_v57, %s8660_s12 }
 0x187   :  { %13356 = vst [vmem:[#allocation157_spill] sm:$0xff] %v9805_v62  ;;  %13357 = vst [vmem:[#allocation158_spill] sm:$0xff] %v9808_v63 }
 0x188   :  { %v815_v60 = vpop.permute.xlu1 %814  ;;  %v813_v59 = vpop.permute.xlu0 %812 }
 0x189   :  { %v872_v50 = vsel %vm868_vm8, %v813_v59, %v815_v60 }
 0x18a   :  { %930 = vst [vmem:[#allocation2 + $0x160] sm:$0x70] %v872_v50  ;;  %1052 = vrot.lane.b32.xlu1 %v9794_v55, %s8660_s12  ;;  %1050 = vrot.lane.b32.xlu0 %v9797_v48, %s8660_s12  ;;  %v9818_v50 = vrot.slane %v8768_v5, 6  ;;  %v9821_v55 = vrot.slane %v8746_v0, 6 }
 0x18c   :  { %v819_v54 = vpop.permute.xlu1 %818  ;;  %v817_v58 = vpop.permute.xlu0 %816  ;;  %13358 = vst [vmem:[#allocation159_spill] sm:$0xff] %v9818_v50  ;;  %13359 = vst [vmem:[#allocation160_spill] sm:$0xff] %v9821_v55 }
 0x18d   :  { %933 = vst.msk [vmem:[#allocation2 + $0x178] sm:$0x70] %vm13214_vm9, %v819_v54  ;;  %v873_v57 = vsel %vm868_vm8, %v815_v60, %v817_v58  ;;  %v874_v59 = vsel %vm868_vm8, %v817_v58, %v819_v54  ;;  %v9832_v54 = vrot.slane %v8756_v2, 6 }
 0x18e   :  { %931 = vst [vmem:[#allocation2 + $0x168] sm:$0x70] %v873_v57  ;;  %932 = vst [vmem:[#allocation2 + $0x170] sm:$0x70] %v874_v59  ;;  %1211 = vrot.lane.b32.xlu1 %v9805_v62, %s8661_s13  ;;  %1209 = vrot.lane.b32.xlu0 %v9808_v63, %s8661_s13  ;;  %v9829_v57 = vrot.slane %v8778_v7, 6 }
 0x18f   :  { %13361 = vst [vmem:[#allocation162_spill] sm:$0xff] %v9832_v54 }
 0x190   :  { %v823_v49 = vpop.permute.xlu1 %822  ;;  %v821_v48 = vpop.permute.xlu0 %820  ;;  %13360 = vst [vmem:[#allocation161_spill] sm:$0xff] %v9829_v57 }
 0x191   :  { %v875_v60 = vsel %vm868_vm8, %v821_v48, %v823_v49 }
 0x192   :  { %934 = vst [vmem:[#allocation2 + $0x2a0] sm:$0x70] %v875_v60  ;;  %1215 = vrot.lane.b32.xlu1 %v9818_v50, %s8661_s13  ;;  %1213 = vrot.lane.b32.xlu0 %v9821_v55, %s8661_s13  ;;  %v9842_v60 = vrot.slane %v8868_v24, 6  ;;  %v9845_v50 = vrot.slane %v8774_v6, 6 }
 0x194   :  { %v827_v58 = vpop.permute.xlu1 %826  ;;  %v825_v59 = vpop.permute.xlu0 %824  ;;  %13362 = vst [vmem:[#allocation163_spill] sm:$0xff] %v9842_v60  ;;  %13363 = vst [vmem:[#allocation164_spill] sm:$0xff] %v9845_v50 }
 0x195   :  { %937 = vst.msk [vmem:[#allocation2 + $0x2b8] sm:$0x70] %vm13214_vm9, %v827_v58  ;;  %v876_v63 = vsel %vm868_vm8, %v823_v49, %v825_v59  ;;  %v877_v48 = vsel %vm868_vm8, %v825_v59, %v827_v58  ;;  %v9856_v58 = vrot.slane %v8788_v9, 6 }
 0x196   :  { %935 = vst [vmem:[#allocation2 + $0x2a8] sm:$0x70] %v876_v63  ;;  %936 = vst [vmem:[#allocation2 + $0x2b0] sm:$0x70] %v877_v48  ;;  %1219 = vrot.lane.b32.xlu1 %v9829_v57, %s8661_s13  ;;  %1217 = vrot.lane.b32.xlu0 %v9832_v54, %s8661_s13  ;;  %v9853_v63 = vrot.slane %v8807_v13, 6 }
 0x197   :  { %13365 = vst [vmem:[#allocation166_spill] sm:$0xff] %v9856_v58 }
 0x198   :  { %v831_v62 = vpop.permute.xlu1 %830  ;;  %v829_v55 = vpop.permute.xlu0 %828  ;;  %13364 = vst [vmem:[#allocation165_spill] sm:$0xff] %v9853_v63 }
 0x199   :  { %v878_v49 = vsel %vm868_vm8, %v829_v55, %v831_v62 }
 0x19a   :  { %938 = vst [vmem:[#allocation2 + $0x3e0] sm:$0x70] %v878_v49  ;;  %1223 = vrot.lane.b32.xlu1 %v9842_v60, %s8661_s13  ;;  %1221 = vrot.lane.b32.xlu0 %v9845_v50, %s8661_s13  ;;  %v9866_v49 = vrot.slane %v8935_v36, 6  ;;  %v9869_v60 = vrot.slane %v8793_v10, 6 }
 0x19c   :  { %v835_v59 = vpop.permute.xlu1 %834  ;;  %v833_v48 = vpop.permute.xlu0 %832  ;;  %13366 = vst [vmem:[#allocation167_spill] sm:$0xff] %v9866_v49  ;;  %13367 = vst [vmem:[#allocation168_spill] sm:$0xff] %v9869_v60 }
 0x19d   :  { %941 = vst.msk [vmem:[#allocation2 + $0x3f8] sm:$0x70] %vm13214_vm9, %v835_v59  ;;  %v879_v54 = vsel %vm868_vm8, %v831_v62, %v833_v48  ;;  %v880_v55 = vsel %vm868_vm8, %v833_v48, %v835_v59  ;;  %v9880_v59 = vrot.slane %v8814_v14, 6 }
 0x19e   :  { %939 = vst [vmem:[#allocation2 + $0x3e8] sm:$0x70] %v879_v54  ;;  %940 = vst [vmem:[#allocation2 + $0x3f0] sm:$0x70] %v880_v55  ;;  %1227 = vrot.lane.b32.xlu1 %v9853_v63, %s8661_s13  ;;  %1225 = vrot.lane.b32.xlu0 %v9856_v58, %s8661_s13  ;;  %v9877_v54 = vrot.slane %v8833_v17, 6 }
 0x19f   :  { %13369 = vst [vmem:[#allocation170_spill] sm:$0xff] %v9880_v59 }
 0x1a0   :  { %v839_v57 = vpop.permute.xlu1 %838  ;;  %v837_v50 = vpop.permute.xlu0 %836  ;;  %13368 = vst [vmem:[#allocation169_spill] sm:$0xff] %v9877_v54 }
 0x1a1   :  { %v881_v62 = vsel %vm868_vm8, %v837_v50, %v839_v57 }
 0x1a2   :  { %942 = vst [vmem:[#allocation2 + $0x520] sm:$0x70] %v881_v62  ;;  %1231 = vrot.lane.b32.xlu1 %v9866_v49, %s8661_s13  ;;  %1229 = vrot.lane.b32.xlu0 %v9869_v60, %s8661_s13  ;;  %v9890_v62 = vrot.slane %v8959_v41, 6  ;;  %v9893_v49 = vrot.slane %v8819_v15, 6 }
 0x1a4   :  { %v843_v48 = vpop.permute.xlu1 %842  ;;  %v841_v55 = vpop.permute.xlu0 %840  ;;  %13370 = vst [vmem:[#allocation171_spill] sm:$0xff] %v9890_v62  ;;  %13371 = vst [vmem:[#allocation172_spill] sm:$0xff] %v9893_v49 }
 0x1a5   :  { %945 = vst.msk [vmem:[#allocation2 + $0x538] sm:$0x70] %vm13214_vm9, %v843_v48  ;;  %v882_v58 = vsel %vm868_vm8, %v839_v57, %v841_v55  ;;  %v883_v50 = vsel %vm868_vm8, %v841_v55, %v843_v48  ;;  %v9904_v48 = vrot.slane %v8828_v16, 6 }
 0x1a6   :  { %943 = vst [vmem:[#allocation2 + $0x528] sm:$0x70] %v882_v58  ;;  %944 = vst [vmem:[#allocation2 + $0x530] sm:$0x70] %v883_v50  ;;  %1235 = vrot.lane.b32.xlu1 %v9877_v54, %s8661_s13  ;;  %1233 = vrot.lane.b32.xlu0 %v9880_v59, %s8661_s13  ;;  %v9901_v58 = vrot.slane %v8843_v19, 6 }
 0x1a7   :  { %13373 = vst [vmem:[#allocation174_spill] sm:$0xff] %v9904_v48 }
 0x1a8   :  { %v847_v63 = vpop.permute.xlu1 %846  ;;  %v845_v60 = vpop.permute.xlu0 %844  ;;  %13372 = vst [vmem:[#allocation173_spill] sm:$0xff] %v9901_v58 }
 0x1a9   :  { %v884_v57 = vsel %vm868_vm8, %v845_v60, %v847_v63 }
 0x1aa   :  { %946 = vst [vmem:[#allocation2 + $0x660] sm:$0x70] %v884_v57  ;;  %1239 = vrot.lane.b32.xlu1 %v9890_v62, %s8661_s13  ;;  %1237 = vrot.lane.b32.xlu0 %v9893_v49, %s8661_s13  ;;  %v9914_v57 = vrot.slane %v8983_v46, 6  ;;  %v9917_v62 = vrot.slane %v8839_v18, 6 }
 0x1ac   :  { %v851_v55 = vpop.permute.xlu1 %850  ;;  %v849_v50 = vpop.permute.xlu0 %848  ;;  %13374 = vst [vmem:[#allocation175_spill] sm:$0xff] %v9914_v57  ;;  %13375 = vst [vmem:[#allocation176_spill] sm:$0xff] %v9917_v62 }
 0x1ad   :  { %949 = vst.msk [vmem:[#allocation2 + $0x678] sm:$0x70] %vm13214_vm9, %v851_v55  ;;  %v885_v59 = vsel %vm868_vm8, %v847_v63, %v849_v50  ;;  %v886_v60 = vsel %vm868_vm8, %v849_v50, %v851_v55  ;;  %v9928_v55 = vrot.slane %v8849_v20, 6 }
 0x1ae   :  { %947 = vst [vmem:[#allocation2 + $0x668] sm:$0x70] %v885_v59  ;;  %948 = vst [vmem:[#allocation2 + $0x670] sm:$0x70] %v886_v60  ;;  %1243 = vrot.lane.b32.xlu1 %v9901_v58, %s8661_s13  ;;  %1241 = vrot.lane.b32.xlu0 %v9904_v48, %s8661_s13  ;;  %v9925_v59 = vrot.slane %v8873_v25, 6 }
 0x1af   :  { %13377 = vst [vmem:[#allocation178_spill] sm:$0xff] %v9928_v55 }
 0x1b0   :  { %v855_v54 = vpop.permute.xlu1 %854  ;;  %v853_v49 = vpop.permute.xlu0 %852  ;;  %13376 = vst [vmem:[#allocation177_spill] sm:$0xff] %v9925_v59 }
 0x1b1   :  { %v887_v63 = vsel %vm868_vm8, %v853_v49, %v855_v54 }
 0x1b2   :  { %950 = vst [vmem:[#allocation2 + $0x7a0] sm:$0x70] %v887_v63  ;;  %1247 = vrot.lane.b32.xlu1 %v9914_v57, %s8661_s13  ;;  %1245 = vrot.lane.b32.xlu0 %v9917_v62, %s8661_s13  ;;  %v9938_v63 = vrot.slane %v9007_v51, 6  ;;  %v9941_v57 = vrot.slane %v8854_v21, 6 }
 0x1b4   :  { %v859_v50 = vpop.permute.xlu1 %858  ;;  %v857_v60 = vpop.permute.xlu0 %856  ;;  %13378 = vst [vmem:[#allocation179_spill] sm:$0xff] %v9938_v63  ;;  %13379 = vst [vmem:[#allocation180_spill] sm:$0xff] %v9941_v57 }
 0x1b5   :  { %953 = vst.msk [vmem:[#allocation2 + $0x7b8] sm:$0x70] %vm13214_vm9, %v859_v50  ;;  %v888_v48 = vsel %vm868_vm8, %v855_v54, %v857_v60  ;;  %v889_v49 = vsel %vm868_vm8, %v857_v60, %v859_v50  ;;  %v9952_v50 = vrot.slane %v8880_v26, 6 }
 0x1b6   :  { %951 = vst [vmem:[#allocation2 + $0x7a8] sm:$0x70] %v888_v48  ;;  %952 = vst [vmem:[#allocation2 + $0x7b0] sm:$0x70] %v889_v49  ;;  %1251 = vrot.lane.b32.xlu1 %v9925_v59, %s8661_s13  ;;  %1249 = vrot.lane.b32.xlu0 %v9928_v55, %s8661_s13  ;;  %v9949_v48 = vrot.slane %v8898_v29, 6 }
 0x1b7   :  { %13381 = vst [vmem:[#allocation182_spill] sm:$0xff] %v9952_v50 }
 0x1b8   :  { %v863_v58 = vpop.permute.xlu1 %862  ;;  %v861_v62 = vpop.permute.xlu0 %860  ;;  %13380 = vst [vmem:[#allocation181_spill] sm:$0xff] %v9949_v48 }
 0x1b9   :  { %v890_v54 = vsel %vm868_vm8, %v861_v62, %v863_v58 }
 0x1ba   :  { %954 = vst [vmem:[#allocation2 + $0x8e0] sm:$0x70] %v890_v54  ;;  %1255 = vrot.lane.b32.xlu1 %v9938_v63, %s8661_s13  ;;  %1253 = vrot.lane.b32.xlu0 %v9941_v57, %s8661_s13  ;;  %v9962_v54 = vrot.slane %v9031_v56, 6  ;;  %v9965_v63 = vrot.slane %v8885_v27, 6 }
 0x1bc   :  { %v867_v60 = vpop.permute.xlu1 %866  ;;  %v865_v49 = vpop.permute.xlu0 %864  ;;  %13382 = vst [vmem:[#allocation183_spill] sm:$0xff] %v9962_v54  ;;  %13383 = vst [vmem:[#allocation184_spill] sm:$0xff] %v9965_v63 }
 0x1bd   :  { %957 = vst.msk [vmem:[#allocation2 + $0x8f8] sm:$0x70] %vm13214_vm9, %v867_v60  ;;  %v891_v55 = vsel %vm868_vm8, %v863_v58, %v865_v49  ;;  %v892_v62 = vsel %vm868_vm8, %v865_v49, %v867_v60  ;;  %v9976_v60 = vrot.slane %v8893_v28, 6  ;;  %vm13198_vm8 = vcmask 818176  }
 0x1be   :  { %955 = vst [vmem:[#allocation2 + $0x8e8] sm:$0x70] %v891_v55  ;;  %956 = vst [vmem:[#allocation2 + $0x8f0] sm:$0x70] %v892_v62  ;;  %1259 = vrot.lane.b32.xlu1 %v9949_v48, %s8661_s13  ;;  %1257 = vrot.lane.b32.xlu0 %v9952_v50, %s8661_s13  ;;  %v9973_v55 = vrot.slane %v8920_v33, 6  ;;  %v9987_v50 = vrot.slane %v9055_v61, 6 }
 0x1bf   :  { %13385 = vst [vmem:[#allocation186_spill] sm:$0xff] %v9976_v60 }
 0x1c0   :  { %v993_v59 = vpop.permute.xlu1 %992  ;;  %v991_v57 = vpop.permute.xlu0 %990  ;;  %13384 = vst [vmem:[#allocation185_spill] sm:$0xff] %v9973_v55  ;;  %13386 = vst [vmem:[#allocation187_spill] sm:$0xff] %v9987_v50 }
 0x1c1   :  { %v1055_v58 = vsel %vm13196_vm10, %v991_v57, %v993_v59 }
 0x1c2   :  { %1111 = vst [vmem:[#allocation2 + $0x40] ss:$-28 sps:$4 sm:$0x83] %v1055_v58   ;;  %1263 = vrot.lane.b32.xlu1 %v9962_v54, %s8661_s13  ;;  %1261 = vrot.lane.b32.xlu0 %v9965_v63, %s8661_s13  ;;  %v9990_v54 = vrot.slane %v8904_v30, 6 }
 0x1c4   :  { %v997_v49 = vpop.permute.xlu1 %996  ;;  %v995_v62 = vpop.permute.xlu0 %994  ;;  %13387 = vst [vmem:[#allocation188_spill] sm:$0xff] %v9990_v54 }
 0x1c5   :  { %1115 = vst.msk [vmem:[#allocation2 + $0x38] sm:$0x80] %vm1114_vm11, %v997_v49  ;;  %v1056_v57 = vsel %vm13196_vm10, %v993_v59, %v995_v62  ;;  %v1057_v58 = vsel %vm13196_vm10, %v995_v62, %v997_v49  ;;  %v10001_v62 = vrot.slane %v8751_v1, 3 }
 0x1c6   :  { %1120 = vst.msk [vmem:[#allocation2 + $0x58] sm:$0x3] %vm1119_vm12, %v997_v49  ;;  %1112 = vst [vmem:[#allocation2 + $0x48] ss:$-28 sps:$4 sm:$0x83] %v1056_v57   ;;  %1267 = vrot.lane.b32.xlu1 %v9973_v55, %s8661_s13  ;;  %1265 = vrot.lane.b32.xlu0 %v9976_v60, %s8661_s13  ;;  %v9998_v49 = vrot.slane %v8783_v8, 3 }
 0x1c7   :  { %1113 = vst [vmem:[#allocation2 + $0x50] ss:$-28 sps:$4 sm:$0x83] %v1057_v58   ;;  %13389 = vst [vmem:[#allocation190_spill] sm:$0xff] %v10001_v62  ;;  %v10012_v60 = vrot.slane %v8768_v5, 3 }
 0x1c8   :  { %v1001_v48 = vpop.permute.xlu1 %1000  ;;  %v999_v63 = vpop.permute.xlu0 %998  ;;  %13388 = vst [vmem:[#allocation189_spill] sm:$0xff] %v9998_v49 }
 0x1c9   :  { %v1058_v59 = vsel %vm13196_vm10, %v999_v63, %v1001_v48  ;;  %13390 = vst [vmem:[#allocation191_spill] sm:$0xff] %v10012_v60 }
 0x1ca   :  { %1121 = vst [vmem:[#allocation2 + $0x180] ss:$-28 sps:$4 sm:$0x83] %v1058_v59   ;;  %1271 = vrot.lane.b32.xlu1 %v9987_v50, %s8661_s13  ;;  %1269 = vrot.lane.b32.xlu0 %v9990_v54, %s8661_s13  ;;  %v10015_v50 = vrot.slane %v8746_v0, 3 }
 0x1cc   :  { %v1005_v57 = vpop.permute.xlu1 %1004  ;;  %v1003_v58 = vpop.permute.xlu0 %1002  ;;  %13391 = vst [vmem:[#allocation192_spill] sm:$0xff] %v10015_v50 }
 0x1cd   :  { %1124 = vst.msk [vmem:[#allocation2 + $0x178] sm:$0x80] %vm1114_vm11, %v1005_v57  ;;  %v1059_v63 = vsel %vm13196_vm10, %v1001_v48, %v1003_v58  ;;  %v1060_v59 = vsel %vm13196_vm10, %v1003_v58, %v1005_v57  ;;  %v10026_v58 = vrot.slane %v8756_v2, 3 }
 0x1ce   :  { %1128 = vst.msk [vmem:[#allocation2 + $0x198] sm:$0x3] %vm1119_vm12, %v1005_v57  ;;  %1122 = vst [vmem:[#allocation2 + $0x188] ss:$-28 sps:$4 sm:$0x83] %v1059_v63   ;;  %1397 = vrot.lane.b32.xlu1 %v9998_v49, %s8662_s14  ;;  %1395 = vrot.lane.b32.xlu0 %v10001_v62, %s8662_s14  ;;  %v10023_v57 = vrot.slane %v8778_v7, 3 }
 0x1cf   :  { %1123 = vst [vmem:[#allocation2 + $0x190] ss:$-28 sps:$4 sm:$0x83] %v1060_v59   ;;  %13393 = vst [vmem:[#allocation194_spill] sm:$0xff] %v10026_v58  ;;  %v10037_v62 = vrot.slane %v8868_v24, 3 }
 0x1d0   :  { %v1009_v55 = vpop.permute.xlu1 %1008  ;;  %v1007_v54 = vpop.permute.xlu0 %1006  ;;  %13392 = vst [vmem:[#allocation193_spill] sm:$0xff] %v10023_v57 }
 0x1d1   :  { %v1061_v48 = vsel %vm13196_vm10, %v1007_v54, %v1009_v55  ;;  %13394 = vst [vmem:[#allocation195_spill] sm:$0xff] %v10037_v62 }
 0x1d2   :  { %1129 = vst [vmem:[#allocation2 + $0x2c0] ss:$-28 sps:$4 sm:$0x83] %v1061_v48   ;;  %1401 = vrot.lane.b32.xlu1 %v10012_v60, %s8662_s14  ;;  %1399 = vrot.lane.b32.xlu0 %v10015_v50, %s8662_s14  ;;  %v10040_v60 = vrot.slane %v8774_v6, 3 }
 0x1d4   :  { %v1013_v63 = vpop.permute.xlu1 %1012  ;;  %v1011_v59 = vpop.permute.xlu0 %1010  ;;  %13395 = vst [vmem:[#allocation196_spill] sm:$0xff] %v10040_v60 }
 0x1d5   :  { %1132 = vst.msk [vmem:[#allocation2 + $0x2b8] sm:$0x80] %vm1114_vm11, %v1013_v63  ;;  %v1062_v54 = vsel %vm13196_vm10, %v1009_v55, %v1011_v59  ;;  %v1063_v48 = vsel %vm13196_vm10, %v1011_v59, %v1013_v63  ;;  %v10051_v59 = vrot.slane %v8788_v9, 3 }
 0x1d6   :  { %1136 = vst.msk [vmem:[#allocation2 + $0x2d8] sm:$0x3] %vm1119_vm12, %v1013_v63  ;;  %1130 = vst [vmem:[#allocation2 + $0x2c8] ss:$-28 sps:$4 sm:$0x83] %v1062_v54   ;;  %1405 = vrot.lane.b32.xlu1 %v10023_v57, %s8662_s14  ;;  %1403 = vrot.lane.b32.xlu0 %v10026_v58, %s8662_s14  ;;  %v10048_v63 = vrot.slane %v8807_v13, 3 }
 0x1d7   :  { %1131 = vst [vmem:[#allocation2 + $0x2d0] ss:$-28 sps:$4 sm:$0x83] %v1063_v48   ;;  %13397 = vst [vmem:[#allocation198_spill] sm:$0xff] %v10051_v59  ;;  %v10062_v58 = vrot.slane %v8935_v36, 3 }
 0x1d8   :  { %v1017_v49 = vpop.permute.xlu1 %1016  ;;  %v1015_v50 = vpop.permute.xlu0 %1014  ;;  %13396 = vst [vmem:[#allocation197_spill] sm:$0xff] %v10048_v63 }
 0x1d9   :  { %v1064_v55 = vsel %vm13196_vm10, %v1015_v50, %v1017_v49  ;;  %13398 = vst [vmem:[#allocation199_spill] sm:$0xff] %v10062_v58 }
 0x1da   :  { %1137 = vst [vmem:[#allocation2 + $0x400] ss:$-28 sps:$4 sm:$0x83] %v1064_v55   ;;  %1409 = vrot.lane.b32.xlu1 %v10037_v62, %s8662_s14  ;;  %1407 = vrot.lane.b32.xlu0 %v10040_v60, %s8662_s14  ;;  %v10065_v62 = vrot.slane %v8793_v10, 3 }
 0x1dc   :  { %v1021_v54 = vpop.permute.xlu1 %1020  ;;  %v1019_v48 = vpop.permute.xlu0 %1018  ;;  %13399 = vst [vmem:[#allocation200_spill] sm:$0xff] %v10065_v62 }
 0x1dd   :  { %1140 = vst.msk [vmem:[#allocation2 + $0x3f8] sm:$0x80] %vm1114_vm11, %v1021_v54  ;;  %v1065_v50 = vsel %vm13196_vm10, %v1017_v49, %v1019_v48  ;;  %v1066_v55 = vsel %vm13196_vm10, %v1019_v48, %v1021_v54  ;;  %v10076_v48 = vrot.slane %v8814_v14, 3 }
 0x1de   :  { %1144 = vst.msk [vmem:[#allocation2 + $0x418] sm:$0x3] %vm1119_vm12, %v1021_v54  ;;  %1138 = vst [vmem:[#allocation2 + $0x408] ss:$-28 sps:$4 sm:$0x83] %v1065_v50   ;;  %1413 = vrot.lane.b32.xlu1 %v10048_v63, %s8662_s14  ;;  %1411 = vrot.lane.b32.xlu0 %v10051_v59, %s8662_s14  ;;  %v10073_v54 = vrot.slane %v8833_v17, 3 }
 0x1df   :  { %1139 = vst [vmem:[#allocation2 + $0x410] ss:$-28 sps:$4 sm:$0x83] %v1066_v55   ;;  %13401 = vst [vmem:[#allocation202_spill] sm:$0xff] %v10076_v48  ;;  %v10087_v59 = vrot.slane %v8959_v41, 3 }
 0x1e0   :  { %v1025_v57 = vpop.permute.xlu1 %1024  ;;  %v1023_v60 = vpop.permute.xlu0 %1022  ;;  %13400 = vst [vmem:[#allocation201_spill] sm:$0xff] %v10073_v54 }
 0x1e1   :  { %v1067_v49 = vsel %vm13196_vm10, %v1023_v60, %v1025_v57  ;;  %13402 = vst [vmem:[#allocation203_spill] sm:$0xff] %v10087_v59 }
 0x1e2   :  { %1145 = vst [vmem:[#allocation2 + $0x540] ss:$-28 sps:$4 sm:$0x83] %v1067_v49   ;;  %1417 = vrot.lane.b32.xlu1 %v10062_v58, %s8662_s14  ;;  %1415 = vrot.lane.b32.xlu0 %v10065_v62, %s8662_s14  ;;  %v10090_v58 = vrot.slane %v8819_v15, 3 }
 0x1e4   :  { %v1029_v50 = vpop.permute.xlu1 %1028  ;;  %v1027_v55 = vpop.permute.xlu0 %1026  ;;  %13403 = vst [vmem:[#allocation204_spill] sm:$0xff] %v10090_v58 }
 0x1e5   :  { %1148 = vst.msk [vmem:[#allocation2 + $0x538] sm:$0x80] %vm1114_vm11, %v1029_v50  ;;  %v1068_v60 = vsel %vm13196_vm10, %v1025_v57, %v1027_v55  ;;  %v1069_v49 = vsel %vm13196_vm10, %v1027_v55, %v1029_v50  ;;  %v10101_v55 = vrot.slane %v8828_v16, 3 }
 0x1e6   :  { %1152 = vst.msk [vmem:[#allocation2 + $0x558] sm:$0x3] %vm1119_vm12, %v1029_v50  ;;  %1146 = vst [vmem:[#allocation2 + $0x548] ss:$-28 sps:$4 sm:$0x83] %v1068_v60   ;;  %1421 = vrot.lane.b32.xlu1 %v10073_v54, %s8662_s14  ;;  %1419 = vrot.lane.b32.xlu0 %v10076_v48, %s8662_s14  ;;  %v10098_v50 = vrot.slane %v8843_v19, 3 }
 0x1e7   :  { %1147 = vst [vmem:[#allocation2 + $0x550] ss:$-28 sps:$4 sm:$0x83] %v1069_v49   ;;  %13405 = vst [vmem:[#allocation206_spill] sm:$0xff] %v10101_v55  ;;  %v10112_v48 = vrot.slane %v8983_v46, 3 }
 0x1e8   :  { %v1033_v63 = vpop.permute.xlu1 %1032  ;;  %v1031_v62 = vpop.permute.xlu0 %1030  ;;  %13404 = vst [vmem:[#allocation205_spill] sm:$0xff] %v10098_v50 }
 0x1e9   :  { %v1070_v57 = vsel %vm13196_vm10, %v1031_v62, %v1033_v63  ;;  %13406 = vst [vmem:[#allocation207_spill] sm:$0xff] %v10112_v48 }
 0x1ea   :  { %1153 = vst [vmem:[#allocation2 + $0x680] ss:$-28 sps:$4 sm:$0x83] %v1070_v57   ;;  %1425 = vrot.lane.b32.xlu1 %v10087_v59, %s8662_s14  ;;  %1423 = vrot.lane.b32.xlu0 %v10090_v58, %s8662_s14  ;;  %v10115_v59 = vrot.slane %v8839_v18, 3 }
 0x1ec   :  { %v1037_v60 = vpop.permute.xlu1 %1036  ;;  %v1035_v49 = vpop.permute.xlu0 %1034  ;;  %13407 = vst [vmem:[#allocation208_spill] sm:$0xff] %v10115_v59 }
 0x1ed   :  { %1156 = vst.msk [vmem:[#allocation2 + $0x678] sm:$0x80] %vm1114_vm11, %v1037_v60  ;;  %v1071_v62 = vsel %vm13196_vm10, %v1033_v63, %v1035_v49  ;;  %v1072_v57 = vsel %vm13196_vm10, %v1035_v49, %v1037_v60  ;;  %v10126_v49 = vrot.slane %v8849_v20, 3 }
 0x1ee   :  { %1160 = vst.msk [vmem:[#allocation2 + $0x698] sm:$0x3] %vm1119_vm12, %v1037_v60  ;;  %1154 = vst [vmem:[#allocation2 + $0x688] ss:$-28 sps:$4 sm:$0x83] %v1071_v62   ;;  %1429 = vrot.lane.b32.xlu1 %v10098_v50, %s8662_s14  ;;  %1427 = vrot.lane.b32.xlu0 %v10101_v55, %s8662_s14  ;;  %v10123_v60 = vrot.slane %v8873_v25, 3 }
 0x1ef   :  { %1155 = vst [vmem:[#allocation2 + $0x690] ss:$-28 sps:$4 sm:$0x83] %v1072_v57   ;;  %13409 = vst [vmem:[#allocation210_spill] sm:$0xff] %v10126_v49  ;;  %v10137_v55 = vrot.slane %v9007_v51, 3 }
 0x1f0   :  { %v1041_v54 = vpop.permute.xlu1 %1040  ;;  %v1039_v58 = vpop.permute.xlu0 %1038  ;;  %13408 = vst [vmem:[#allocation209_spill] sm:$0xff] %v10123_v60 }
 0x1f1   :  { %v1073_v63 = vsel %vm13196_vm10, %v1039_v58, %v1041_v54  ;;  %13410 = vst [vmem:[#allocation211_spill] sm:$0xff] %v10137_v55 }
 0x1f2   :  { %1161 = vst [vmem:[#allocation2 + $0x7c0] ss:$-28 sps:$4 sm:$0x83] %v1073_v63   ;;  %1433 = vrot.lane.b32.xlu1 %v10112_v48, %s8662_s14  ;;  %1431 = vrot.lane.b32.xlu0 %v10115_v59, %s8662_s14  ;;  %v10140_v48 = vrot.slane %v8854_v21, 3 }
 0x1f4   :  { %v1045_v62 = vpop.permute.xlu1 %1044  ;;  %v1043_v57 = vpop.permute.xlu0 %1042  ;;  %13411 = vst [vmem:[#allocation212_spill] sm:$0xff] %v10140_v48 }
 0x1f5   :  { %1164 = vst.msk [vmem:[#allocation2 + $0x7b8] sm:$0x80] %vm1114_vm11, %v1045_v62  ;;  %v1074_v58 = vsel %vm13196_vm10, %v1041_v54, %v1043_v57  ;;  %v1075_v63 = vsel %vm13196_vm10, %v1043_v57, %v1045_v62  ;;  %v10151_v57 = vrot.slane %v8880_v26, 3 }
 0x1f6   :  { %1168 = vst.msk [vmem:[#allocation2 + $0x7d8] sm:$0x3] %vm1119_vm12, %v1045_v62  ;;  %1162 = vst [vmem:[#allocation2 + $0x7c8] ss:$-28 sps:$4 sm:$0x83] %v1074_v58   ;;  %1437 = vrot.lane.b32.xlu1 %v10123_v60, %s8662_s14  ;;  %1435 = vrot.lane.b32.xlu0 %v10126_v49, %s8662_s14  ;;  %v10148_v62 = vrot.slane %v8898_v29, 3 }
 0x1f7   :  { %1163 = vst [vmem:[#allocation2 + $0x7d0] ss:$-28 sps:$4 sm:$0x83] %v1075_v63   ;;  %13413 = vst [vmem:[#allocation214_spill] sm:$0xff] %v10151_v57  ;;  %v10162_v49 = vrot.slane %v9031_v56, 3 }
 0x1f8   :  { %v1049_v50 = vpop.permute.xlu1 %1048  ;;  %v1047_v59 = vpop.permute.xlu0 %1046  ;;  %13412 = vst [vmem:[#allocation213_spill] sm:$0xff] %v10148_v62 }
 0x1f9   :  { %v1076_v54 = vsel %vm13196_vm10, %v1047_v59, %v1049_v50  ;;  %13414 = vst [vmem:[#allocation215_spill] sm:$0xff] %v10162_v49 }
 0x1fa   :  { %1169 = vst [vmem:[#allocation2 + $0x900] ss:$-28 sps:$4 sm:$0x83] %v1076_v54   ;;  %1441 = vrot.lane.b32.xlu1 %v10137_v55, %s8662_s14  ;;  %1439 = vrot.lane.b32.xlu0 %v10140_v48, %s8662_s14  ;;  %v10165_v55 = vrot.slane %v8885_v27, 3 }
 0x1fc   :  { %v1053_v58 = vpop.permute.xlu1 %1052  ;;  %v1051_v63 = vpop.permute.xlu0 %1050  ;;  %13415 = vst [vmem:[#allocation216_spill] sm:$0xff] %v10165_v55 }
 0x1fd   :  { %1172 = vst.msk [vmem:[#allocation2 + $0x8f8] sm:$0x80] %vm1114_vm11, %v1053_v58  ;;  %v1077_v59 = vsel %vm13196_vm10, %v1049_v50, %v1051_v63  ;;  %v1078_v54 = vsel %vm13196_vm10, %v1051_v63, %v1053_v58  ;;  %v10176_v63 = vrot.slane %v8893_v28, 3  ;;  %vm3883_vm10 = vcmask 244736  }
 0x1fe   :  { %1176 = vst.msk [vmem:[#allocation2 + $0x918] sm:$0x3] %vm1119_vm12, %v1053_v58  ;;  %1170 = vst [vmem:[#allocation2 + $0x908] ss:$-28 sps:$4 sm:$0x83] %v1077_v59   ;;  %1445 = vrot.lane.b32.xlu1 %v10148_v62, %s8662_s14  ;;  %1443 = vrot.lane.b32.xlu0 %v10151_v57, %s8662_s14  ;;  %v10173_v58 = vrot.slane %v8920_v33, 3 }
 0x1ff   :  { %1171 = vst [vmem:[#allocation2 + $0x910] ss:$-28 sps:$4 sm:$0x83] %v1078_v54   ;;  %13417 = vst [vmem:[#allocation218_spill] sm:$0xff] %v10176_v63  ;;  %v10186_v57 = vrot.slane %v9055_v61, 3 }
 0x200   :  { %v1212_v60 = vpop.permute.xlu1 %1211  ;;  %v1210_v48 = vpop.permute.xlu0 %1209  ;;  %13416 = vst [vmem:[#allocation217_spill] sm:$0xff] %v10173_v58 }
 0x201   :  { %v1274_v50 = vsel %vm1273_vm13, %v1210_v48, %v1212_v60  ;;  %13418 = vst [vmem:[#allocation219_spill] sm:$0xff] %v10186_v57 }
 0x202   :  { %1330 = vst [vmem:[#allocation2 + $0x40] sm:$0x1c] %v1274_v50  ;;  %1449 = vrot.lane.b32.xlu1 %v10162_v49, %s8662_s14  ;;  %1447 = vrot.lane.b32.xlu0 %v10165_v55, %s8662_s14  ;;  %v10189_v49 = vrot.slane %v8904_v30, 3 }
 0x204   :  { %v1216_v59 = vpop.permute.xlu1 %1215  ;;  %v1214_v54 = vpop.permute.xlu0 %1213  ;;  %13419 = vst [vmem:[#allocation220_spill] sm:$0xff] %v10189_v49 }
 0x205   :  { %1334 = vst.msk [vmem:[#allocation2 + $0x58] sm:$0x1c] %vm1333_vm14, %v1216_v59  ;;  %v1275_v48 = vsel %vm1273_vm13, %v1212_v60, %v1214_v54  ;;  %v1276_v50 = vsel %vm1273_vm13, %v1214_v54, %v1216_v59 }
 0x206   :  { %1331 = vst [vmem:[#allocation2 + $0x48] sm:$0x1c] %v1275_v48  ;;  %1332 = vst [vmem:[#allocation2 + $0x50] sm:$0x1c] %v1276_v50  ;;  %1453 = vrot.lane.b32.xlu1 %v10173_v58, %s8662_s14  ;;  %1451 = vrot.lane.b32.xlu0 %v10176_v63, %s8662_s14 }
 0x208   :  { %v1220_v62 = vpop.permute.xlu1 %1219  ;;  %v1218_v55 = vpop.permute.xlu0 %1217 }
 0x209   :  { %v1277_v60 = vsel %vm1273_vm13, %v1218_v55, %v1220_v62 }
 0x20a   :  { %1335 = vst [vmem:[#allocation2 + $0x180] sm:$0x1c] %v1277_v60  ;;  %1457 = vrot.lane.b32.xlu1 %v10186_v57, %s8662_s14  ;;  %1455 = vrot.lane.b32.xlu0 %v10189_v49, %s8662_s14 }
 0x20c   :  { %v1224_v59 = vpop.permute.xlu1 %1223  ;;  %v1222_v54 = vpop.permute.xlu0 %1221 }
 0x20d   :  { %1338 = vst.msk [vmem:[#allocation2 + $0x198] sm:$0x1c] %vm1333_vm14, %v1224_v59  ;;  %v1278_v48 = vsel %vm1273_vm13, %v1220_v62, %v1222_v54  ;;  %v1279_v50 = vsel %vm1273_vm13, %v1222_v54, %v1224_v59 }
 0x20e   :  { %1336 = vst [vmem:[#allocation2 + $0x188] sm:$0x1c] %v1278_v48  ;;  %1337 = vst [vmem:[#allocation2 + $0x190] sm:$0x1c] %v1279_v50  ;;  %1551 = vrot.lane.b32.xlu1 %v8783_v8, %s8663_s15  ;;  %1549 = vrot.lane.b32.xlu0 %v8751_v1, %s8663_s15 }
 0x210   :  { %v1228_v55 = vpop.permute.xlu1 %1227  ;;  %v1226_v60 = vpop.permute.xlu0 %1225 }
 0x211   :  { %v1280_v63 = vsel %vm1273_vm13, %v1226_v60, %v1228_v55 }
 0x212   :  { %1339 = vst [vmem:[#allocation2 + $0x2c0] sm:$0x1c] %v1280_v63  ;;  %1555 = vrot.lane.b32.xlu1 %v8768_v5, %s8663_s15  ;;  %1553 = vrot.lane.b32.xlu0 %v8746_v0, %s8663_s15 }
 0x214   :  { %v1232_v62 = vpop.permute.xlu1 %1231  ;;  %v1230_v59 = vpop.permute.xlu0 %1229 }
 0x215   :  { %1342 = vst.msk [vmem:[#allocation2 + $0x2d8] sm:$0x1c] %vm1333_vm14, %v1232_v62  ;;  %v1281_v54 = vsel %vm1273_vm13, %v1228_v55, %v1230_v59  ;;  %v1282_v48 = vsel %vm1273_vm13, %v1230_v59, %v1232_v62 }
 0x216   :  { %1340 = vst [vmem:[#allocation2 + $0x2c8] sm:$0x1c] %v1281_v54  ;;  %1341 = vst [vmem:[#allocation2 + $0x2d0] sm:$0x1c] %v1282_v48  ;;  %1559 = vrot.lane.b32.xlu1 %v8778_v7, %s8663_s15  ;;  %1557 = vrot.lane.b32.xlu0 %v8756_v2, %s8663_s15 }
 0x218   :  { %v1236_v63 = vpop.permute.xlu1 %1235  ;;  %v1234_v50 = vpop.permute.xlu0 %1233 }
 0x219   :  { %v1283_v60 = vsel %vm1273_vm13, %v1234_v50, %v1236_v63 }
 0x21a   :  { %1343 = vst [vmem:[#allocation2 + $0x400] sm:$0x1c] %v1283_v60  ;;  %1563 = vrot.lane.b32.xlu1 %v8868_v24, %s8663_s15  ;;  %1561 = vrot.lane.b32.xlu0 %v8774_v6, %s8663_s15 }
 0x21c   :  { %v1240_v55 = vpop.permute.xlu1 %1239  ;;  %v1238_v62 = vpop.permute.xlu0 %1237 }
 0x21d   :  { %1346 = vst.msk [vmem:[#allocation2 + $0x418] sm:$0x1c] %vm1333_vm14, %v1240_v55  ;;  %v1284_v59 = vsel %vm1273_vm13, %v1236_v63, %v1238_v62  ;;  %v1285_v54 = vsel %vm1273_vm13, %v1238_v62, %v1240_v55 }
 0x21e   :  { %1344 = vst [vmem:[#allocation2 + $0x408] sm:$0x1c] %v1284_v59  ;;  %1345 = vst [vmem:[#allocation2 + $0x410] sm:$0x1c] %v1285_v54  ;;  %1567 = vrot.lane.b32.xlu1 %v8807_v13, %s8663_s15  ;;  %1565 = vrot.lane.b32.xlu0 %v8788_v9, %s8663_s15 }
 0x220   :  { %v1244_v48 = vpop.permute.xlu1 %1243  ;;  %v1242_v50 = vpop.permute.xlu0 %1241 }
 0x221   :  { %v1286_v60 = vsel %vm1273_vm13, %v1242_v50, %v1244_v48 }
 0x222   :  { %1347 = vst [vmem:[#allocation2 + $0x540] sm:$0x1c] %v1286_v60  ;;  %1571 = vrot.lane.b32.xlu1 %v8935_v36, %s8663_s15  ;;  %1569 = vrot.lane.b32.xlu0 %v8793_v10, %s8663_s15 }
 0x224   :  { %v1248_v63 = vpop.permute.xlu1 %1247  ;;  %v1246_v55 = vpop.permute.xlu0 %1245 }
 0x225   :  { %1350 = vst.msk [vmem:[#allocation2 + $0x558] sm:$0x1c] %vm1333_vm14, %v1248_v63  ;;  %v1287_v62 = vsel %vm1273_vm13, %v1244_v48, %v1246_v55  ;;  %v1288_v59 = vsel %vm1273_vm13, %v1246_v55, %v1248_v63 }
 0x226   :  { %1348 = vst [vmem:[#allocation2 + $0x548] sm:$0x1c] %v1287_v62  ;;  %1349 = vst [vmem:[#allocation2 + $0x550] sm:$0x1c] %v1288_v59  ;;  %1575 = vrot.lane.b32.xlu1 %v8833_v17, %s8663_s15  ;;  %1573 = vrot.lane.b32.xlu0 %v8814_v14, %s8663_s15 }
 0x228   :  { %v1252_v54 = vpop.permute.xlu1 %1251  ;;  %v1250_v50 = vpop.permute.xlu0 %1249 }
 0x229   :  { %v1289_v60 = vsel %vm1273_vm13, %v1250_v50, %v1252_v54 }
 0x22a   :  { %1351 = vst [vmem:[#allocation2 + $0x680] sm:$0x1c] %v1289_v60  ;;  %1579 = vrot.lane.b32.xlu1 %v8959_v41, %s8663_s15  ;;  %1577 = vrot.lane.b32.xlu0 %v8819_v15, %s8663_s15 }
 0x22c   :  { %v1256_v48 = vpop.permute.xlu1 %1255  ;;  %v1254_v63 = vpop.permute.xlu0 %1253 }
 0x22d   :  { %1354 = vst.msk [vmem:[#allocation2 + $0x698] sm:$0x1c] %vm1333_vm14, %v1256_v48  ;;  %v1290_v55 = vsel %vm1273_vm13, %v1252_v54, %v1254_v63  ;;  %v1291_v62 = vsel %vm1273_vm13, %v1254_v63, %v1256_v48 }
 0x22e   :  { %1352 = vst [vmem:[#allocation2 + $0x688] sm:$0x1c] %v1290_v55  ;;  %1353 = vst [vmem:[#allocation2 + $0x690] sm:$0x1c] %v1291_v62  ;;  %1583 = vrot.lane.b32.xlu1 %v8843_v19, %s8663_s15  ;;  %1581 = vrot.lane.b32.xlu0 %v8828_v16, %s8663_s15 }
 0x230   :  { %v1260_v59 = vpop.permute.xlu1 %1259  ;;  %v1258_v50 = vpop.permute.xlu0 %1257 }
 0x231   :  { %v1292_v60 = vsel %vm1273_vm13, %v1258_v50, %v1260_v59 }
 0x232   :  { %1355 = vst [vmem:[#allocation2 + $0x7c0] sm:$0x1c] %v1292_v60  ;;  %1587 = vrot.lane.b32.xlu1 %v8983_v46, %s8663_s15  ;;  %1585 = vrot.lane.b32.xlu0 %v8839_v18, %s8663_s15 }
 0x234   :  { %v1264_v54 = vpop.permute.xlu1 %1263  ;;  %v1262_v48 = vpop.permute.xlu0 %1261 }
 0x235   :  { %1358 = vst.msk [vmem:[#allocation2 + $0x7d8] sm:$0x1c] %vm1333_vm14, %v1264_v54  ;;  %v1293_v63 = vsel %vm1273_vm13, %v1260_v59, %v1262_v48  ;;  %v1294_v55 = vsel %vm1273_vm13, %v1262_v48, %v1264_v54 }
 0x236   :  { %1356 = vst [vmem:[#allocation2 + $0x7c8] sm:$0x1c] %v1293_v63  ;;  %1357 = vst [vmem:[#allocation2 + $0x7d0] sm:$0x1c] %v1294_v55  ;;  %1591 = vrot.lane.b32.xlu1 %v8873_v25, %s8663_s15  ;;  %1589 = vrot.lane.b32.xlu0 %v8849_v20, %s8663_s15  ;;  %v13433_v25 = vld [vmem:[#allocation82_spill] sm:$0xff] }
 0x238   :  { %v1268_v62 = vpop.permute.xlu1 %1267  ;;  %v1266_v50 = vpop.permute.xlu0 %1265 }
 0x239   :  { %v1295_v60 = vsel %vm1273_vm13, %v1266_v50, %v1268_v62 }
 0x23a   :  { %1359 = vst [vmem:[#allocation2 + $0x900] sm:$0x1c] %v1295_v60  ;;  %1595 = vrot.lane.b32.xlu1 %v9007_v51, %s8663_s15  ;;  %1593 = vrot.lane.b32.xlu0 %v8854_v21, %s8663_s15 }
 0x23c   :  { %v1272_v59 = vpop.permute.xlu1 %1271  ;;  %v1270_v54 = vpop.permute.xlu0 %1269 }
 0x23d   :  { %1362 = vst.msk [vmem:[#allocation2 + $0x918] sm:$0x1c] %vm1333_vm14, %v1272_v59  ;;  %v1296_v48 = vsel %vm1273_vm13, %v1268_v62, %v1270_v54  ;;  %v1297_v63 = vsel %vm1273_vm13, %v1270_v54, %v1272_v59  ;;  %vm13209_vm13 = vcmask 228352  }
 0x23e   :  { %1360 = vst [vmem:[#allocation2 + $0x908] sm:$0x1c] %v1296_v48  ;;  %1361 = vst [vmem:[#allocation2 + $0x910] sm:$0x1c] %v1297_v63  ;;  %1599 = vrot.lane.b32.xlu1 %v8898_v29, %s8663_s15  ;;  %1597 = vrot.lane.b32.xlu0 %v8880_v26, %s8663_s15  ;;  %v13429_v29 = vld [vmem:[#allocation191_spill] sm:$0xff] }
 0x240   :  { %v1398_v55 = vpop.permute.xlu1 %1397  ;;  %v1396_v50 = vpop.permute.xlu0 %1395 }
 0x241   :  { %v1460_v60 = vsel %vm1459_vm15, %v1396_v50, %v1398_v55 }
 0x242   :  { %1516 = vst [vmem:[#allocation2 + $0x40] sm:$0xe0] %v1460_v60  ;;  %1603 = vrot.lane.b32.xlu1 %v9031_v56, %s8663_s15  ;;  %1601 = vrot.lane.b32.xlu0 %v8885_v27, %s8663_s15 }
 0x244   :  { %v1402_v62 = vpop.permute.xlu1 %1401  ;;  %v1400_v59 = vpop.permute.xlu0 %1399 }
 0x245   :  { %1520 = vst.msk [vmem:[#allocation2 + $0x58] sm:$0xe0] %vm1519_vm3, %v1402_v62  ;;  %v1461_v54 = vsel %vm1459_vm15, %v1398_v55, %v1400_v59  ;;  %v1462_v48 = vsel %vm1459_vm15, %v1400_v59, %v1402_v62 }
 0x246   :  { %1517 = vst [vmem:[#allocation2 + $0x48] sm:$0xe0] %v1461_v54  ;;  %1518 = vst [vmem:[#allocation2 + $0x50] sm:$0xe0] %v1462_v48  ;;  %1607 = vrot.lane.b32.xlu1 %v8920_v33, %s8663_s15  ;;  %1605 = vrot.lane.b32.xlu0 %v8893_v28, %s8663_s15  ;;  %v13425_v33 = vld [vmem:[#allocation128_spill] sm:$0xff] }
 0x248   :  { %v1406_v63 = vpop.permute.xlu1 %1405  ;;  %v1404_v50 = vpop.permute.xlu0 %1403 }
 0x249   :  { %v1463_v60 = vsel %vm1459_vm15, %v1404_v50, %v1406_v63 }
 0x24a   :  { %1521 = vst [vmem:[#allocation2 + $0x180] sm:$0xe0] %v1463_v60  ;;  %1611 = vrot.lane.b32.xlu1 %v9055_v61, %s8663_s15  ;;  %1609 = vrot.lane.b32.xlu0 %v8904_v30, %s8663_s15  ;;  %v13427_v30 = vld [vmem:[#allocation159_spill] sm:$0xff] }
 0x24c   :  { %v1410_v55 = vpop.permute.xlu1 %1409  ;;  %v1408_v62 = vpop.permute.xlu0 %1407 }
 0x24d   :  { %1524 = vst.msk [vmem:[#allocation2 + $0x198] sm:$0xe0] %vm1519_vm3, %v1410_v55  ;;  %v1464_v59 = vsel %vm1459_vm15, %v1406_v63, %v1408_v62  ;;  %v1465_v54 = vsel %vm1459_vm15, %v1408_v62, %v1410_v55 }
 0x24e   :  { %1522 = vst [vmem:[#allocation2 + $0x188] sm:$0xe0] %v1464_v59  ;;  %1523 = vst [vmem:[#allocation2 + $0x190] sm:$0xe0] %v1465_v54  ;;  %1704 = vrot.lane.b32.xlu1 %v8915_v32, %s8664_s16  ;;  %1702 = vrot.lane.b32.xlu0 %v8763_v4, %s8664_s16 }
 0x250   :  { %v1414_v48 = vpop.permute.xlu1 %1413  ;;  %v1412_v50 = vpop.permute.xlu0 %1411 }
 0x251   :  { %v1466_v60 = vsel %vm1459_vm15, %v1412_v50, %v1414_v48 }
 0x252   :  { %1525 = vst [vmem:[#allocation2 + $0x2c0] sm:$0xe0] %v1466_v60  ;;  %1708 = vrot.lane.b32.xlu1 %v8800_v11, %s8664_s16  ;;  %1706 = vrot.lane.b32.xlu0 %v8759_v3, %s8664_s16 }
 0x254   :  { %v1418_v63 = vpop.permute.xlu1 %1417  ;;  %v1416_v55 = vpop.permute.xlu0 %1415 }
 0x255   :  { %1528 = vst.msk [vmem:[#allocation2 + $0x2d8] sm:$0xe0] %vm1519_vm3, %v1418_v63  ;;  %v1467_v62 = vsel %vm1459_vm15, %v1414_v48, %v1416_v55  ;;  %v1468_v59 = vsel %vm1459_vm15, %v1416_v55, %v1418_v63 }
 0x256   :  { %1526 = vst [vmem:[#allocation2 + $0x2c8] sm:$0xe0] %v1467_v62  ;;  %1527 = vst [vmem:[#allocation2 + $0x2d0] sm:$0xe0] %v1468_v59  ;;  %1712 = vrot.lane.b32.xlu1 %v8861_v22, %s8664_s16  ;;  %1710 = vrot.lane.b32.xlu0 %v8803_v12, %s8664_s16 }
 0x258   :  { %v1422_v54 = vpop.permute.xlu1 %1421  ;;  %v1420_v50 = vpop.permute.xlu0 %1419 }
 0x259   :  { %v1469_v60 = vsel %vm1459_vm15, %v1420_v50, %v1422_v54 }
 0x25a   :  { %1529 = vst [vmem:[#allocation2 + $0x400] sm:$0xe0] %v1469_v60  ;;  %1716 = vrot.lane.b32.xlu1 %v8912_v31, %s8664_s16  ;;  %1714 = vrot.lane.b32.xlu0 %v8864_v23, %s8664_s16 }
 0x25c   :  { %v1426_v48 = vpop.permute.xlu1 %1425  ;;  %v1424_v63 = vpop.permute.xlu0 %1423 }
 0x25d   :  { %1532 = vst.msk [vmem:[#allocation2 + $0x418] sm:$0xe0] %vm1519_vm3, %v1426_v48  ;;  %v1470_v55 = vsel %vm1459_vm15, %v1422_v54, %v1424_v63  ;;  %v1471_v62 = vsel %vm1459_vm15, %v1424_v63, %v1426_v48 }
 0x25e   :  { %1530 = vst [vmem:[#allocation2 + $0x408] sm:$0xe0] %v1470_v55  ;;  %1531 = vst [vmem:[#allocation2 + $0x410] sm:$0xe0] %v1471_v62  ;;  %1720 = vrot.lane.b32.xlu1 %v8928_v34, %s8664_s16  ;;  %1718 = vrot.lane.b32.xlu0 %v8931_v35, %s8664_s16 }
 0x260   :  { %v1430_v59 = vpop.permute.xlu1 %1429  ;;  %v1428_v50 = vpop.permute.xlu0 %1427 }
 0x261   :  { %v1472_v60 = vsel %vm1459_vm15, %v1428_v50, %v1430_v59 }
 0x262   :  { %1533 = vst [vmem:[#allocation2 + $0x540] sm:$0xe0] %v1472_v60  ;;  %1724 = vrot.lane.b32.xlu1 %v8942_v37, %s8664_s16  ;;  %1722 = vrot.lane.b32.xlu0 %v8945_v38, %s8664_s16 }
 0x264   :  { %v1434_v54 = vpop.permute.xlu1 %1433  ;;  %v1432_v48 = vpop.permute.xlu0 %1431 }
 0x265   :  { %1536 = vst.msk [vmem:[#allocation2 + $0x558] sm:$0xe0] %vm1519_vm3, %v1434_v54  ;;  %v1473_v63 = vsel %vm1459_vm15, %v1430_v59, %v1432_v48  ;;  %v1474_v55 = vsel %vm1459_vm15, %v1432_v48, %v1434_v54 }
 0x266   :  { %1534 = vst [vmem:[#allocation2 + $0x548] sm:$0xe0] %v1473_v63  ;;  %1535 = vst [vmem:[#allocation2 + $0x550] sm:$0xe0] %v1474_v55  ;;  %1728 = vrot.lane.b32.xlu1 %v8952_v39, %s8664_s16  ;;  %1726 = vrot.lane.b32.xlu0 %v8955_v40, %s8664_s16 }
 0x268   :  { %v1438_v62 = vpop.permute.xlu1 %1437  ;;  %v1436_v50 = vpop.permute.xlu0 %1435 }
 0x269   :  { %v1475_v60 = vsel %vm1459_vm15, %v1436_v50, %v1438_v62 }
 0x26a   :  { %1537 = vst [vmem:[#allocation2 + $0x680] sm:$0xe0] %v1475_v60  ;;  %1732 = vrot.lane.b32.xlu1 %v8966_v42, %s8664_s16  ;;  %1730 = vrot.lane.b32.xlu0 %v8969_v43, %s8664_s16 }
 0x26c   :  { %v1442_v59 = vpop.permute.xlu1 %1441  ;;  %v1440_v54 = vpop.permute.xlu0 %1439 }
 0x26d   :  { %1540 = vst.msk [vmem:[#allocation2 + $0x698] sm:$0xe0] %vm1519_vm3, %v1442_v59  ;;  %v1476_v48 = vsel %vm1459_vm15, %v1438_v62, %v1440_v54  ;;  %v1477_v63 = vsel %vm1459_vm15, %v1440_v54, %v1442_v59  ;;  %v13420_v62 = vld [vmem:[#allocation31_spill] sm:$0xff] }
 0x26e   :  { %1538 = vst [vmem:[#allocation2 + $0x688] sm:$0xe0] %v1476_v48  ;;  %1539 = vst [vmem:[#allocation2 + $0x690] sm:$0xe0] %v1477_v63  ;;  %1736 = vrot.lane.b32.xlu1 %v8976_v44, %s8664_s16  ;;  %1734 = vrot.lane.b32.xlu0 %v8979_v45, %s8664_s16  ;;  %v13438_v44 = vld [vmem:[#allocation81_spill] sm:$0xff] }
 0x270   :  { %v1446_v55 = vpop.permute.xlu1 %1445  ;;  %v1444_v50 = vpop.permute.xlu0 %1443 }
 0x271   :  { %v1478_v60 = vsel %vm1459_vm15, %v1444_v50, %v1446_v55 }
 0x272   :  { %1541 = vst [vmem:[#allocation2 + $0x7c0] sm:$0xe0] %v1478_v60  ;;  %1740 = vrot.lane.b32.xlu1 %v8990_v47, %s8664_s16  ;;  %1738 = vrot.lane.b32.xlu0 %v13420_v62, %s8664_s16  ;;  %v13436_v47 = vld [vmem:[#allocation49_spill] sm:$0xff] }
 0x274   :  { %v1450_v59 = vpop.permute.xlu1 %1449  ;;  %v1448_v54 = vpop.permute.xlu0 %1447 }
 0x275   :  { %1544 = vst.msk [vmem:[#allocation2 + $0x7d8] sm:$0xe0] %vm1519_vm3, %v1450_v59  ;;  %v1479_v48 = vsel %vm1459_vm15, %v1446_v55, %v1448_v54  ;;  %v1480_v63 = vsel %vm1459_vm15, %v1448_v54, %v1450_v59 }
 0x276   :  { %1542 = vst [vmem:[#allocation2 + $0x7c8] sm:$0xe0] %v1479_v48  ;;  %1543 = vst [vmem:[#allocation2 + $0x7d0] sm:$0xe0] %v1480_v63  ;;  %4129 = vrot.lane.b32.xlu1 %v8746_v0, %s8665_s2  ;;  %4127 = vrot.lane.b32.xlu0 %v8783_v8, %s8665_s2 }
 0x278   :  { %v1454_v50 = vpop.permute.xlu1 %1453  ;;  %v1452_v60 = vpop.permute.xlu0 %1451 }
 0x279   :  { %v1481_v57 = vsel %vm1459_vm15, %v1452_v60, %v1454_v50 }
 0x27a   :  { %1545 = vst [vmem:[#allocation2 + $0x900] sm:$0xe0] %v1481_v57  ;;  %4131 = vrot.lane.b32.xlu1 %v8768_v5, %s8665_s2  ;;  %4125 = vrot.lane.b32.xlu0 %v8751_v1, %s8665_s2 }
 0x27c   :  { %v1458_v55 = vpop.permute.xlu1 %1457  ;;  %v1456_v59 = vpop.permute.xlu0 %1455 }
 0x27d   :  { %1548 = vst.msk [vmem:[#allocation2 + $0x918] sm:$0xe0] %vm1519_vm3, %v1458_v55  ;;  %v1482_v54 = vsel %vm1459_vm15, %v1454_v50, %v1456_v59  ;;  %v1483_v48 = vsel %vm1459_vm15, %v1456_v59, %v1458_v55  ;;  %v13421_v50 = vld [vmem:[#allocation160_spill] sm:$0xff]  ;;  %v13422_v55 = vld [vmem:[#allocation157_spill] sm:$0xff]  ;;  %vm3698_vm15 = vcmask 252928  }
 0x27e   :  { %1546 = vst [vmem:[#allocation2 + $0x908] sm:$0xe0] %v1482_v54  ;;  %1547 = vst [vmem:[#allocation2 + $0x910] sm:$0xe0] %v1483_v48  ;;  %3638 = vrot.lane.b32.xlu1 %v9629_v52, %s8666_s18  ;;  %3636 = vrot.lane.b32.xlu0 %v9613_v53, %s8666_s18 }
 0x280   :  { %v1552_v57 = vpop.permute.xlu1 %1551  ;;  %v1550_v63 = vpop.permute.xlu0 %1549 }
 0x281   :  { %v1614_v60 = vsel %vm1613_vm6, %v1550_v63, %v1552_v57  ;;  %v13423_v63 = vld [vmem:[#allocation192_spill] sm:$0xff] }
 0x282   :  { %1670 = vst [vmem:[#allocation2 + $0x60] sm:$0x7] %v1614_v60  ;;  %3823 = vrot.lane.b32.xlu1 %v13421_v50, %s8667_s4  ;;  %3821 = vrot.lane.b32.xlu0 %v13422_v55, %s8667_s4  ;;  %v13424_v60 = vld [vmem:[#allocation189_spill] sm:$0xff] }
 0x284   :  { %v1556_v59 = vpop.permute.xlu1 %1555  ;;  %v1554_v54 = vpop.permute.xlu0 %1553 }
 0x285   :  { %1673 = vst.msk [vmem:[#allocation2 + $0x78] sm:$0x7] %vm13213_vm0, %v1556_v59  ;;  %v1615_v48 = vsel %vm1613_vm6, %v1552_v57, %v1554_v54  ;;  %v1616_v58 = vsel %vm1613_vm6, %v1554_v54, %v1556_v59  ;;  %v13426_v57 = vld [vmem:[#allocation127_spill] sm:$0xff] }
 0x286   :  { %1671 = vst [vmem:[#allocation2 + $0x68] sm:$0x7] %v1615_v48  ;;  %1672 = vst [vmem:[#allocation2 + $0x70] sm:$0x7] %v1616_v58  ;;  %3976 = vrot.lane.b32.xlu1 %v13423_v63, %s8668_s19  ;;  %3974 = vrot.lane.b32.xlu0 %v13424_v60, %s8668_s19 }
 0x288   :  { %v1560_v49 = vpop.permute.xlu1 %1559  ;;  %v1558_v28 = vpop.permute.xlu0 %1557 }
 0x289   :  { %v1617_v61 = vsel %vm1613_vm6, %v1558_v28, %v1560_v49  ;;  %v13428_v28 = vld [vmem:[#allocation158_spill] sm:$0xff] }
 0x28a   :  { %1674 = vst [vmem:[#allocation2 + $0x1a0] sm:$0x7] %v1617_v61  ;;  %3640 = vrot.lane.b32.xlu1 %v13425_v33, %s8666_s18  ;;  %3634 = vrot.lane.b32.xlu0 %v13426_v57, %s8666_s18 }
 0x28c   :  { %v1564_v59 = vpop.permute.xlu1 %1563  ;;  %v1562_v58 = vpop.permute.xlu0 %1561 }
 0x28d   :  { %1677 = vst.msk [vmem:[#allocation2 + $0x1b8] sm:$0x7] %vm13213_vm0, %v1564_v59  ;;  %v1618_v54 = vsel %vm1613_vm6, %v1560_v49, %v1562_v58  ;;  %v1619_v48 = vsel %vm1613_vm6, %v1562_v58, %v1564_v59  ;;  %v13430_v49 = vld [vmem:[#allocation190_spill] sm:$0xff] }
 0x28e   :  { %1675 = vst [vmem:[#allocation2 + $0x1a8] sm:$0x7] %v1618_v54  ;;  %1676 = vst [vmem:[#allocation2 + $0x1b0] sm:$0x7] %v1619_v48  ;;  %3825 = vrot.lane.b32.xlu1 %v13427_v30, %s8667_s4  ;;  %3819 = vrot.lane.b32.xlu0 %v13428_v28, %s8667_s4 }
 0x290   :  { %v1568_v61 = vpop.permute.xlu1 %1567  ;;  %v1566_v26 = vpop.permute.xlu0 %1565 }
 0x291   :  { %v1620_v56 = vsel %vm1613_vm6, %v1566_v26, %v1568_v61  ;;  %v13431_v26 = vld [vmem:[#allocation50_spill] sm:$0xff] }
 0x292   :  { %1678 = vst [vmem:[#allocation2 + $0x2e0] sm:$0x7] %v1620_v56  ;;  %3978 = vrot.lane.b32.xlu1 %v13429_v29, %s8668_s19  ;;  %3972 = vrot.lane.b32.xlu0 %v13430_v49, %s8668_s19  ;;  %v13432_v56 = vld [vmem:[#allocation47_spill] sm:$0xff] }
 0x294   :  { %v1572_v59 = vpop.permute.xlu1 %1571  ;;  %v1570_v58 = vpop.permute.xlu0 %1569 }
 0x295   :  { %1681 = vst.msk [vmem:[#allocation2 + $0x2f8] sm:$0x7] %vm13213_vm0, %v1572_v59  ;;  %v1621_v54 = vsel %vm1613_vm6, %v1568_v61, %v1570_v58  ;;  %v1622_v48 = vsel %vm1613_vm6, %v1570_v58, %v1572_v59  ;;  %v13434_v61 = vld [vmem:[#allocation79_spill] sm:$0xff] }
 0x296   :  { %1679 = vst [vmem:[#allocation2 + $0x2e8] sm:$0x7] %v1621_v54  ;;  %1680 = vst [vmem:[#allocation2 + $0x2f0] sm:$0x7] %v1622_v48  ;;  %3147 = vrot.lane.b32.xlu1 %v13431_v26, %s8669_s20  ;;  %3145 = vrot.lane.b32.xlu0 %v13432_v56, %s8669_s20 }
 0x298   :  { %v1576_v27 = vpop.permute.xlu1 %1575  ;;  %v1574_v20 = vpop.permute.xlu0 %1573 }
 0x299   :  { %v1623_v51 = vsel %vm1613_vm6, %v1574_v20, %v1576_v27  ;;  %v13435_v20 = vld [vmem:[#allocation112_spill] sm:$0xff] }
 0x29a   :  { %1682 = vst [vmem:[#allocation2 + $0x420] sm:$0x7] %v1623_v51  ;;  %3332 = vrot.lane.b32.xlu1 %v13433_v25, %s8670_s21  ;;  %3330 = vrot.lane.b32.xlu0 %v13434_v61, %s8670_s21 }
 0x29c   :  { %v1580_v59 = vpop.permute.xlu1 %1579  ;;  %v1578_v58 = vpop.permute.xlu0 %1577 }
 0x29d   :  { %1685 = vst.msk [vmem:[#allocation2 + $0x438] sm:$0x7] %vm13213_vm0, %v1580_v59  ;;  %v1624_v54 = vsel %vm1613_vm6, %v1576_v27, %v1578_v58  ;;  %v1625_v48 = vsel %vm1613_vm6, %v1578_v58, %v1580_v59  ;;  %v13437_v27 = vld [vmem:[#allocation48_spill] sm:$0xff] }
 0x29e   :  { %1683 = vst [vmem:[#allocation2 + $0x428] sm:$0x7] %v1624_v54  ;;  %1684 = vst [vmem:[#allocation2 + $0x430] sm:$0x7] %v1625_v48  ;;  %3485 = vrot.lane.b32.xlu1 %v13435_v20, %s8671_s22  ;;  %3483 = vrot.lane.b32.xlu0 %v8751_v1, %s8671_s22 }
 0x2a0   :  { %v1584_v51 = vpop.permute.xlu1 %1583  ;;  %v1582_v21 = vpop.permute.xlu0 %1581 }
 0x2a1   :  { %v1626_v45 = vsel %vm1613_vm6, %v1582_v21, %v1584_v51  ;;  %v13439_v21 = vld [vmem:[#allocation80_spill] sm:$0xff] }
 0x2a2   :  { %1686 = vst [vmem:[#allocation2 + $0x560] sm:$0x7] %v1626_v45  ;;  %3149 = vrot.lane.b32.xlu1 %v13436_v47, %s8669_s20  ;;  %3143 = vrot.lane.b32.xlu0 %v13437_v27, %s8669_s20 }
 0x2a4   :  { %v1588_v59 = vpop.permute.xlu1 %1587  ;;  %v1586_v58 = vpop.permute.xlu0 %1585 }
 0x2a5   :  { %1689 = vst.msk [vmem:[#allocation2 + $0x578] sm:$0x7] %vm13213_vm0, %v1588_v59  ;;  %v1627_v54 = vsel %vm1613_vm6, %v1584_v51, %v1586_v58  ;;  %v1628_v48 = vsel %vm1613_vm6, %v1586_v58, %v1588_v59  ;;  %v13440_v51 = vld [vmem:[#allocation111_spill] sm:$0xff] }
 0x2a6   :  { %1687 = vst [vmem:[#allocation2 + $0x568] sm:$0x7] %v1627_v54  ;;  %1688 = vst [vmem:[#allocation2 + $0x570] sm:$0x7] %v1628_v48  ;;  %3334 = vrot.lane.b32.xlu1 %v13438_v44, %s8670_s21  ;;  %3328 = vrot.lane.b32.xlu0 %v13439_v21, %s8670_s21 }
 0x2a8   :  { %v1592_v45 = vpop.permute.xlu1 %1591  ;;  %v1590_v62 = vpop.permute.xlu0 %1589 }
 0x2a9   :  { %v1629_v16 = vsel %vm1613_vm6, %v1590_v62, %v1592_v45 }
 0x2aa   :  { %1690 = vst [vmem:[#allocation2 + $0x6a0] sm:$0x7] %v1629_v16  ;;  %3487 = vrot.lane.b32.xlu1 %v8746_v0, %s8671_s22  ;;  %3481 = vrot.lane.b32.xlu0 %v13440_v51, %s8671_s22 }
 0x2ac   :  { %v1596_v59 = vpop.permute.xlu1 %1595  ;;  %v1594_v58 = vpop.permute.xlu0 %1593 }
 0x2ad   :  { %1693 = vst.msk [vmem:[#allocation2 + $0x6b8] sm:$0x7] %vm13213_vm0, %v1596_v59  ;;  %v1630_v54 = vsel %vm1613_vm6, %v1592_v45, %v1594_v58  ;;  %v1631_v48 = vsel %vm1613_vm6, %v1594_v58, %v1596_v59 }
 0x2ae   :  { %1691 = vst [vmem:[#allocation2 + $0x6a8] sm:$0x7] %v1630_v54  ;;  %1692 = vst [vmem:[#allocation2 + $0x6b0] sm:$0x7] %v1631_v48  ;;  %2841 = vrot.lane.b32.xlu1 %v8746_v0, %s8672_s23  ;;  %2839 = vrot.lane.b32.xlu0 %v8783_v8, %s8672_s23 }
 0x2b0   :  { %v1600_v16 = vpop.permute.xlu1 %1599  ;;  %v1598_v62 = vpop.permute.xlu0 %1597 }
 0x2b1   :  { %v1632_v46 = vsel %vm1613_vm6, %v1598_v62, %v1600_v16 }
 0x2b2   :  { %1694 = vst [vmem:[#allocation2 + $0x7e0] sm:$0x7] %v1632_v46  ;;  %2994 = vrot.lane.b32.xlu1 %v8759_v3, %s8673_s24  ;;  %2992 = vrot.lane.b32.xlu0 %v8915_v32, %s8673_s24 }
 0x2b4   :  { %v1604_v45 = vpop.permute.xlu1 %1603  ;;  %v1602_v59 = vpop.permute.xlu0 %1601 }
 0x2b5   :  { %1697 = vst.msk [vmem:[#allocation2 + $0x7f8] sm:$0x7] %vm13213_vm0, %v1604_v45  ;;  %v1633_v58 = vsel %vm1613_vm6, %v1600_v16, %v1602_v59  ;;  %v1634_v8 = vsel %vm1613_vm6, %v1602_v59, %v1604_v45 }
 0x2b6   :  { %1695 = vst [vmem:[#allocation2 + $0x7e8] sm:$0x7] %v1633_v58  ;;  %1696 = vst [vmem:[#allocation2 + $0x7f0] sm:$0x7] %v1634_v8  ;;  %2843 = vrot.lane.b32.xlu1 %v8768_v5, %s8672_s23  ;;  %2837 = vrot.lane.b32.xlu0 %v8751_v1, %s8672_s23 }
 0x2b8   :  { %v1608_v3 = vpop.permute.xlu1 %1607  ;;  %v1606_v46 = vpop.permute.xlu0 %1605 }
 0x2b9   :  { %v1635_v32 = vsel %vm1613_vm6, %v1606_v46, %v1608_v3 }
 0x2ba   :  { %1698 = vst [vmem:[#allocation2 + $0x920] sm:$0x7] %v1635_v32  ;;  %2996 = vrot.lane.b32.xlu1 %v8800_v11, %s8673_s24  ;;  %2990 = vrot.lane.b32.xlu0 %v8763_v4, %s8673_s24 }
 0x2bc   :  { %v1612_v54 = vpop.permute.xlu1 %1611  ;;  %v1610_v48 = vpop.permute.xlu0 %1609 }
 0x2bd   :  { %1701 = vst.msk [vmem:[#allocation2 + $0x938] sm:$0x7] %vm13213_vm0, %v1612_v54  ;;  %v1636_v5 = vsel %vm1613_vm6, %v1608_v3, %v1610_v48  ;;  %v1637_v16 = vsel %vm1613_vm6, %v1610_v48, %v1612_v54  ;;  %vm13199_vm6 = vcmask 1042432  }
 0x2be   :  { %1699 = vst [vmem:[#allocation2 + $0x928] sm:$0x7] %v1636_v5  ;;  %1700 = vst [vmem:[#allocation2 + $0x930] sm:$0x7] %v1637_v16  ;;  %2350 = vrot.lane.b32.xlu1 %v9629_v52, %s8674_s25  ;;  %2348 = vrot.lane.b32.xlu0 %v9613_v53, %s8674_s25 }
 0x2c0   :  { %v1705_v11 = vpop.permute.xlu1 %1704  ;;  %v1703_v4 = vpop.permute.xlu0 %1702 }
 0x2c1   :  { %v1767_v62 = vsel %vm13198_vm8, %v1703_v4, %v1705_v11 }
 0x2c2   :  { %1823 = vst [vmem:[#allocation2 + $0x60] sm:$0x38] %v1767_v62  ;;  %2535 = vrot.lane.b32.xlu1 %v13421_v50, %s8675_s1  ;;  %2533 = vrot.lane.b32.xlu0 %v13422_v55, %s8675_s1 }
 0x2c4   :  { %v1709_v45 = vpop.permute.xlu1 %1708  ;;  %v1707_v59 = vpop.permute.xlu0 %1706 }
 0x2c5   :  { %1826 = vst.msk [vmem:[#allocation2 + $0x78] sm:$0x38] %vm13204_vm2, %v1709_v45  ;;  %v1768_v52 = vsel %vm13198_vm8, %v1705_v11, %v1707_v59  ;;  %v1769_v53 = vsel %vm13198_vm8, %v1707_v59, %v1709_v45 }
 0x2c6   :  { %1824 = vst [vmem:[#allocation2 + $0x68] sm:$0x38] %v1768_v52  ;;  %1825 = vst [vmem:[#allocation2 + $0x70] sm:$0x38] %v1769_v53  ;;  %2688 = vrot.lane.b32.xlu1 %v13423_v63, %s8676_s26  ;;  %2686 = vrot.lane.b32.xlu0 %v13424_v60, %s8676_s26 }
 0x2c8   :  { %v1713_v50 = vpop.permute.xlu1 %1712  ;;  %v1711_v58 = vpop.permute.xlu0 %1710 }
 0x2c9   :  { %v1770_v55 = vsel %vm13198_vm8, %v1711_v58, %v1713_v50  ;;  %v8680_v58 = vmov 0.0  }
 0x2ca   :  { %1827 = vst [vmem:[#allocation2 + $0x1a0] sm:$0x38] %v1770_v55  ;;  %2352 = vrot.lane.b32.xlu1 %v13425_v33, %s8674_s25  ;;  %2346 = vrot.lane.b32.xlu0 %v13426_v57, %s8674_s25 }
 0x2cb   :  { %4680 = vmatprep.mubr.f32.mxu0 %v8680_v58  ;;  %4751 = vmatprep.mubr.f32.mxu1 %v8680_v58 }
 0x2cc   :  { %v1717_v8 = vpop.permute.xlu1 %1716  ;;  %v1715_v3 = vpop.permute.xlu0 %1714 }
 0x2cd   :  { %1830 = vst.msk [vmem:[#allocation2 + $0x1b8] sm:$0x38] %vm13204_vm2, %v1717_v8  ;;  %v1771_v63 = vsel %vm13198_vm8, %v1713_v50, %v1715_v3  ;;  %v1772_v46 = vsel %vm13198_vm8, %v1715_v3, %v1717_v8 }
 0x2ce   :  { %1828 = vst [vmem:[#allocation2 + $0x1a8] sm:$0x38] %v1771_v63  ;;  %1829 = vst [vmem:[#allocation2 + $0x1b0] sm:$0x38] %v1772_v46  ;;  %2537 = vrot.lane.b32.xlu1 %v13427_v30, %s8675_s1  ;;  %2531 = vrot.lane.b32.xlu0 %v13428_v28, %s8675_s1 }
 0x2d0   :  { %v1721_v33 = vpop.permute.xlu1 %1720  ;;  %v1719_v60 = vpop.permute.xlu0 %1718 }
 0x2d1   :  { %v1773_v57 = vsel %vm13198_vm8, %v1719_v60, %v1721_v33  ;;  %v13441_v60 = vld [vmem:[#allocation132_spill] sm:$0xff] }
 0x2d2   :  { %1831 = vst [vmem:[#allocation2 + $0x2e0] sm:$0x38] %v1773_v57  ;;  %2690 = vrot.lane.b32.xlu1 %v13429_v29, %s8676_s26  ;;  %2684 = vrot.lane.b32.xlu0 %v13430_v49, %s8676_s26  ;;  %v13442_v57 = vld [vmem:[#allocation129_spill] sm:$0xff] }
 0x2d4   :  { %v1725_v32 = vpop.permute.xlu1 %1724  ;;  %v1723_v54 = vpop.permute.xlu0 %1722 }
 0x2d5   :  { %1834 = vst.msk [vmem:[#allocation2 + $0x2f8] sm:$0x38] %vm13204_vm2, %v1725_v32  ;;  %v1774_v30 = vsel %vm13198_vm8, %v1721_v33, %v1723_v54  ;;  %v1775_v48 = vsel %vm13198_vm8, %v1723_v54, %v1725_v32 }
 0x2d6   :  { %1832 = vst [vmem:[#allocation2 + $0x2e8] sm:$0x38] %v1774_v30  ;;  %1833 = vst [vmem:[#allocation2 + $0x2f0] sm:$0x38] %v1775_v48  ;;  %1859 = vrot.lane.b32.xlu1 %v13431_v26, %s8677_s27  ;;  %1857 = vrot.lane.b32.xlu0 %v13432_v56, %s8677_s27  ;;  %v13443_v48 = vld [vmem:[#allocation164_spill] sm:$0xff] }
 0x2d8   :  { %v1729_v29 = vpop.permute.xlu1 %1728  ;;  %v1727_v28 = vpop.permute.xlu0 %1726 }
 0x2d9   :  { %v1776_v49 = vsel %vm13198_vm8, %v1727_v28, %v1729_v29 }
 0x2da   :  { %1835 = vst [vmem:[#allocation2 + $0x420] sm:$0x38] %v1776_v49  ;;  %2044 = vrot.lane.b32.xlu1 %v13433_v25, %s8678_s28  ;;  %2042 = vrot.lane.b32.xlu0 %v13434_v61, %s8678_s28 }
 0x2dc   :  { %v1733_v5 = vpop.permute.xlu1 %1732  ;;  %v1731_v16 = vpop.permute.xlu0 %1730 }
 0x2dd   :  { %1838 = vst.msk [vmem:[#allocation2 + $0x438] sm:$0x38] %vm13204_vm2, %v1733_v5  ;;  %v1777_v26 = vsel %vm13198_vm8, %v1729_v29, %v1731_v16  ;;  %v1778_v56 = vsel %vm13198_vm8, %v1731_v16, %v1733_v5  ;;  %v13444_v29 = vld [vmem:[#allocation161_spill] sm:$0xff] }
 0x2de   :  { %1836 = vst [vmem:[#allocation2 + $0x428] sm:$0x38] %v1777_v26  ;;  %1837 = vst [vmem:[#allocation2 + $0x430] sm:$0x38] %v1778_v56  ;;  %2197 = vrot.lane.b32.xlu1 %v13435_v20, %s8679_s3  ;;  %2195 = vrot.lane.b32.xlu0 %v8751_v1, %s8679_s3  ;;  %v13445_v26 = vld [vmem:[#allocation196_spill] sm:$0xff]  ;;  %v13446_v56 = vld [vmem:[#allocation193_spill] sm:$0xff] }
 0x2e0   :  { %v1737_v25 = vpop.permute.xlu1 %1736  ;;  %v1735_v11 = vpop.permute.xlu0 %1734 }
 0x2e1   :  { %v1779_v61 = vsel %vm13198_vm8, %v1735_v11, %v1737_v25 }
 0x2e2   :  { %1839 = vst [vmem:[#allocation2 + $0x560] sm:$0x38] %v1779_v61  ;;  %1861 = vrot.lane.b32.xlu1 %v13436_v47, %s8677_s27  ;;  %1855 = vrot.lane.b32.xlu0 %v13437_v27, %s8677_s27 }
 0x2e4   :  { %v1741_v4 = vpop.permute.xlu1 %1740  ;;  %v1739_v62 = vpop.permute.xlu0 %1738 }
 0x2e5   :  { %1842 = vst.msk [vmem:[#allocation2 + $0x578] sm:$0x38] %vm13204_vm2, %v1741_v4  ;;  %v1780_v20 = vsel %vm13198_vm8, %v1737_v25, %v1739_v62  ;;  %v1781_v45 = vsel %vm13198_vm8, %v1739_v62, %v1741_v4  ;;  %vm13202_vm8 = vcmask 433152  }
 0x2e6   :  { %1840 = vst [vmem:[#allocation2 + $0x568] sm:$0x38] %v1780_v20  ;;  %1841 = vst [vmem:[#allocation2 + $0x570] sm:$0x38] %v1781_v45  ;;  %2046 = vrot.lane.b32.xlu1 %v13438_v44, %s8678_s28  ;;  %2040 = vrot.lane.b32.xlu0 %v13439_v21, %s8678_s28  ;;  %v13447_v20 = vld [vmem:[#allocation131_spill] sm:$0xff]  ;;  %v13448_v45 = vld [vmem:[#allocation130_spill] sm:$0xff] }
 0x2e8   :  { %v4130_v1 = vpop.permute.xlu1 %4129  ;;  %v4128_v47 = vpop.permute.xlu0 %4127 }
 0x2e9   :  { %v4191_v27 = vsel %vm13209_vm13, %v4128_v47, %v4130_v1 }
 0x2ea   :  { %4247 = vst [vmem:[#allocation2 + $0x128] sm:$0x7] %v4191_v27  ;;  %2199 = vrot.lane.b32.xlu1 %v8746_v0, %s8679_s3  ;;  %2193 = vrot.lane.b32.xlu0 %v13440_v51, %s8679_s3 }
 0x2ec   :  { %v4132_v59 = vpop.permute.xlu1 %4131  ;;  %v4126_v52 = vpop.permute.xlu0 %4125 }
 0x2ed   :  { %v4192_v53 = vsel %vm13209_vm13, %v4130_v1, %v4132_v59  ;;  %4249 = vst.msk [vmem:[#allocation2 + $0x138] sm:$0x7] %vm13213_vm0, %v4132_v59  ;;  %v4190_v44 = vsel %vm13209_vm13, %v4126_v52, %v4128_v47  ;;  %v13449_v52 = vld [vmem:[#allocation163_spill] sm:$0xff] }
 0x2ee   :  { %4248 = vst [vmem:[#allocation2 + $0x130] sm:$0x7] %v4192_v53  ;;  %4246 = vst [vmem:[#allocation2 + $0x120] sm:$0x7] %v4190_v44  ;;  %4137 = vrot.lane.b32.xlu1 %v8774_v6, %s8665_s2  ;;  %4135 = vrot.lane.b32.xlu0 %v8778_v7, %s8665_s2  ;;  %v13450_v53 = vld [vmem:[#allocation162_spill] sm:$0xff] }
 0x2f0   :  { %v3639_v0 = vpop.permute.xlu1 %3638  ;;  %v3637_v21 = vpop.permute.xlu0 %3636 }
 0x2f1   :  { %v3700_v51 = vsel %vm3698_vm15, %v3637_v21, %v3639_v0  ;;  %v4316_v50 = vld [vmem:[#allocation2 + $0x128] sm:$0x7] }
 0x2f2   :  { %3756 = vst [vmem:[#allocation2 + $0x108] ss:$-28 sps:$4 sm:$0x83] %v3700_v51   ;;  %4139 = vrot.lane.b32.xlu1 %v8868_v24, %s8665_s2  ;;  %4133 = vrot.lane.b32.xlu0 %v8756_v2, %s8665_s2  ;;  %v13451_v51 = vld [vmem:[#allocation195_spill] sm:$0xff] }
 0x2f3   :  { %7976 = vmatprep.subr.msk.mxu0 %vm13199_vm6, %v4316_v50  ;;  %v13452_v50 = vld [vmem:[#allocation194_spill] sm:$0xff] }
 0x2f4   :  { %v3824_v55 = vpop.permute.xlu1 %3823  ;;  %v3822_v8 = vpop.permute.xlu0 %3821  ;;  %v4318_v3 = vld [vmem:[#allocation2 + $0x138] sm:$0x7] }
 0x2f5   :  { %v3885_v63 = vsel %vm3883_vm10, %v3822_v8, %v3824_v55  ;;  %7979 = vmatprep.subr.msk.mxu1 %vm13199_vm6, %v4318_v3  ;;  %v4317_v46 = vld [vmem:[#allocation2 + $0x130] sm:$0x7]  ;;  %v4315_v33 = vld [vmem:[#allocation2 + $0x120] sm:$0x7] }
 0x2f6   :  { %3941 = vst [vmem:[#allocation2 + $0x108] sm:$0x1c] %v3885_v63  ;;  %3646 = vrot.lane.b32.xlu1 %v13441_v60, %s8666_s18  ;;  %7980 = vmatpush1.msk.msra.mxu1 %vm13199_vm6, %v4317_v46 }
 0x2f7   :  { %3644 = vrot.lane.b32.xlu0 %v13442_v57, %s8666_s18  ;;  %7977 = vmatpush1.msk.msra.mxu0 %vm13199_vm6, %v4315_v33  ;;  %vm13201_vm6 = vcmask 424960  }
 0x2f8   :  { %v3977_v32 = vpop.permute.xlu1 %3976  ;;  %v3975_v54 = vpop.permute.xlu0 %3974 }
 0x2f9   :  { %v4038_v30 = vsel %vm13200_vm1, %v3975_v54, %v3977_v32 }
 0x2fa   :  { %4094 = vst [vmem:[#allocation2 + $0x108] sm:$0xe0] %v4038_v30  ;;  %3831 = vrot.lane.b32.xlu1 %v13443_v48, %s8667_s4 }
 0x2fb   :  { %3829 = vrot.lane.b32.xlu0 %v13444_v29, %s8667_s4 }
 0x2fc   :  { %v3641_v28 = vpop.permute.xlu1 %3640  ;;  %v3635_v49 = vpop.permute.xlu0 %3634 }
 0x2fd   :  { %v3701_v5 = vsel %vm3698_vm15, %v3639_v0, %v3641_v28  ;;  %3758 = vst.msk [vmem:[#allocation2 + $0xf8] sm:$0x80] %vm1114_vm11, %v3641_v28  ;;  %v3699_v16 = vsel %vm3698_vm15, %v3635_v49, %v3637_v21 }
 0x2fe   :  { %3762 = vst.msk [vmem:[#allocation2 + $0x118] sm:$0x3] %vm1119_vm12, %v3641_v28  ;;  %3757 = vst [vmem:[#allocation2 + $0x110] ss:$-28 sps:$4 sm:$0x83] %v3701_v5   ;;  %3984 = vrot.lane.b32.xlu1 %v13445_v26, %s8668_s19  ;;  %v13455_v5 = vld [vmem:[#allocation86_spill] sm:$0xff] }
 0x2ff   :  { %3755 = vst [vmem:[#allocation2 + $0x100] ss:$-28 sps:$4 sm:$0x83] %v3699_v16   ;;  %3982 = vrot.lane.b32.xlu0 %v13446_v56, %s8668_s19  ;;  %v13456_v16 = vld [vmem:[#allocation83_spill] sm:$0xff] }
 0x300   :  { %v3826_v25 = vpop.permute.xlu1 %3825  ;;  %v3820_v11 = vpop.permute.xlu0 %3819 }
 0x301   :  { %v3886_v61 = vsel %vm3883_vm10, %v3824_v55, %v3826_v25  ;;  %3943 = vst.msk [vmem:[#allocation2 + $0x118] sm:$0x1c] %vm1333_vm14, %v3826_v25  ;;  %v3884_v4 = vsel %vm3883_vm10, %v3820_v11, %v3822_v8  ;;  %v4312_v62 = vld [vmem:[#allocation2 + $0x108] sm:$0xff] }
 0x302   :  { %3942 = vst [vmem:[#allocation2 + $0x110] sm:$0x1c] %v3886_v61  ;;  %3940 = vst [vmem:[#allocation2 + $0x100] sm:$0x1c] %v3884_v4  ;;  %3648 = vrot.lane.b32.xlu1 %v13447_v20, %s8666_s18  ;;  %4630 = vmatprep.subr.mxu0 %v4312_v62  ;;  %v13457_v62 = vld [vmem:[#allocation114_spill] sm:$0xff] }
 0x303   :  { %3642 = vrot.lane.b32.xlu0 %v13448_v45, %s8666_s18 }
 0x304   :  { %v3979_v1 = vpop.permute.xlu1 %3978  ;;  %v3973_v47 = vpop.permute.xlu0 %3972 }
 0x305   :  { %v4039_v27 = vsel %vm13200_vm1, %v3977_v32, %v3979_v1  ;;  %4096 = vst.msk [vmem:[#allocation2 + $0x118] sm:$0xe0] %vm1519_vm3, %v3979_v1  ;;  %v4037_v59 = vsel %vm13200_vm1, %v3973_v47, %v3975_v54  ;;  %v13453_v32 = vld [vmem:[#allocation54_spill] sm:$0xff]  ;;  %vm13215_vm1 = vcmask 261120   ;;  %v13454_v54 = vld [vmem:[#allocation51_spill] sm:$0xff] }
 0x306   :  { %4095 = vst [vmem:[#allocation2 + $0x110] sm:$0xe0] %v4039_v27  ;;  %4093 = vst [vmem:[#allocation2 + $0x100] sm:$0xe0] %v4037_v59  ;;  %3833 = vrot.lane.b32.xlu1 %v13449_v52, %s8667_s4 }
 0x307   :  { %3827 = vrot.lane.b32.xlu0 %v13450_v53, %s8667_s4 }
 0x308   :  { %v3148_v44 = vpop.permute.xlu1 %3147  ;;  %v3146_v0 = vpop.permute.xlu0 %3145 }
 0x309   :  { %v3209_v21 = vsel %vm13202_vm8, %v3146_v0, %v3148_v44 }
 0x30a   :  { %3265 = vst [vmem:[#allocation2 + $0xe8] ss:$-28 sps:$4 sm:$0xc1] %v3209_v21   ;;  %3986 = vrot.lane.b32.xlu1 %v13451_v51, %s8668_s19  ;;  %v13459_v21 = vld [vmem:[#allocation52_spill] sm:$0xff] }
 0x30b   :  { %3980 = vrot.lane.b32.xlu0 %v13452_v50, %s8668_s19 }
 0x30c   :  { %v3333_v55 = vpop.permute.xlu1 %3332  ;;  %v3331_v8 = vpop.permute.xlu0 %3330  ;;  %v4314_v3 = vld [vmem:[#allocation2 + $0x118] sm:$0xff] }
 0x30d   :  { %v3394_v63 = vsel %vm13201_vm6, %v3331_v8, %v3333_v55  ;;  %4701 = vmatprep.subr.mxu1 %v4314_v3  ;;  %v4313_v46 = vld [vmem:[#allocation2 + $0x110] sm:$0xff]  ;;  %v4311_v33 = vld [vmem:[#allocation2 + $0x100] sm:$0xff] }
 0x30e   :  { %3450 = vst [vmem:[#allocation2 + $0xe8] sm:$0xe] %v3394_v63  ;;  %3155 = vrot.lane.b32.xlu1 %v13453_v32, %s8669_s20  ;;  %4702 = vmatpush1.msra.mxu1 %v4313_v46 }
 0x30f   :  { %3153 = vrot.lane.b32.xlu0 %v13454_v54, %s8669_s20  ;;  %4631 = vmatpush1.msra.mxu0 %v4311_v33  ;;  %v13461_v33 = vld [vmem:[#allocation84_spill] sm:$0xff] }
 0x310   :  { %v3486_v30 = vpop.permute.xlu1 %3485  ;;  %v3484_v28 = vpop.permute.xlu0 %3483 }
 0x311   :  { %v3547_v49 = vsel %vm13215_vm1, %v3484_v28, %v3486_v30 }
 0x312   :  { %3603 = vst [vmem:[#allocation2 + $0xe8] sm:$0x70] %v3547_v49  ;;  %3340 = vrot.lane.b32.xlu1 %v13455_v5, %s8670_s21 }
 0x313   :  { %3338 = vrot.lane.b32.xlu0 %v13456_v16, %s8670_s21 }
 0x314   :  { %v3150_v25 = vpop.permute.xlu1 %3149  ;;  %v3144_v11 = vpop.permute.xlu0 %3143 }
 0x315   :  { %v3210_v61 = vsel %vm13202_vm8, %v3148_v44, %v3150_v25  ;;  %3267 = vst.msk [vmem:[#allocation2 + $0xd8] sm:$0xc0] %vm539_vm4, %v3150_v25  ;;  %v3208_v4 = vsel %vm13202_vm8, %v3144_v11, %v3146_v0  ;;  %v13458_v0 = vld [vmem:[#allocation53_spill] sm:$0xff]  ;;  %vm13205_vm8 = vcmask 441344  }
 0x316   :  { %3271 = vst.msk [vmem:[#allocation2 + $0xf8] sm:$0x1] %vm544_vm5, %v3150_v25  ;;  %3266 = vst [vmem:[#allocation2 + $0xf0] ss:$-28 sps:$4 sm:$0xc1] %v3210_v61   ;;  %3493 = vrot.lane.b32.xlu1 %v13457_v62, %s8671_s22 }
 0x317   :  { %3264 = vst [vmem:[#allocation2 + $0xe0] ss:$-28 sps:$4 sm:$0xc1] %v3208_v4   ;;  %3491 = vrot.lane.b32.xlu0 %v8756_v2, %s8671_s22 }
 0x318   :  { %v3335_v1 = vpop.permute.xlu1 %3334  ;;  %v3329_v47 = vpop.permute.xlu0 %3328 }
 0x319   :  { %v3395_v27 = vsel %vm13201_vm6, %v3333_v55, %v3335_v1  ;;  %3452 = vst.msk [vmem:[#allocation2 + $0xf8] sm:$0xe] %vm758_vm7, %v3335_v1  ;;  %v3393_v59 = vsel %vm13201_vm6, %v3329_v47, %v3331_v8  ;;  %v4308_v44 = vld [vmem:[#allocation2 + $0xe8] sm:$0xff]  ;;  %v13460_v8 = vld [vmem:[#allocation85_spill] sm:$0xff]  ;;  %vm13203_vm6 = vcmask 449536  }
 0x31a   :  { %3451 = vst [vmem:[#allocation2 + $0xf0] sm:$0xe] %v3395_v27  ;;  %3449 = vst [vmem:[#allocation2 + $0xe0] sm:$0xe] %v3393_v59  ;;  %3157 = vrot.lane.b32.xlu1 %v13458_v0, %s8669_s20  ;;  %4632 = vmatprep.subr.mxu0 %v4308_v44 }
 0x31b   :  { %3151 = vrot.lane.b32.xlu0 %v13459_v21, %s8669_s20 }
 0x31c   :  { %v3488_v3 = vpop.permute.xlu1 %3487  ;;  %v3482_v63 = vpop.permute.xlu0 %3481 }
 0x31d   :  { %v3548_v46 = vsel %vm13215_vm1, %v3486_v30, %v3488_v3  ;;  %3605 = vst.msk [vmem:[#allocation2 + $0xf8] sm:$0x70] %vm13214_vm9, %v3488_v3  ;;  %v3546_v55 = vsel %vm13215_vm1, %v3482_v63, %v3484_v28  ;;  %v13462_v30 = vld [vmem:[#allocation113_spill] sm:$0xff] }
 0x31e   :  { %3604 = vst [vmem:[#allocation2 + $0xf0] sm:$0x70] %v3548_v46  ;;  %3602 = vst [vmem:[#allocation2 + $0xe0] sm:$0x70] %v3546_v55  ;;  %3342 = vrot.lane.b32.xlu1 %v13460_v8, %s8670_s21 }
 0x31f   :  { %3336 = vrot.lane.b32.xlu0 %v13461_v33, %s8670_s21 }
 0x320   :  { %v2842_v49 = vpop.permute.xlu1 %2841  ;;  %v2840_v25 = vpop.permute.xlu0 %2839 }
 0x321   :  { %v2903_v11 = vsel %vm13203_vm6, %v2840_v25, %v2842_v49 }
 0x322   :  { %2959 = vst [vmem:[#allocation2 + $0xc8] sm:$0x7] %v2903_v11  ;;  %3495 = vrot.lane.b32.xlu1 %v8774_v6, %s8671_s22 }
 0x323   :  { %3489 = vrot.lane.b32.xlu0 %v13462_v30, %s8671_s22 }
 0x324   :  { %v2995_v28 = vpop.permute.xlu1 %2994  ;;  %v2993_v61 = vpop.permute.xlu0 %2992  ;;  %v4310_v4 = vld [vmem:[#allocation2 + $0xf8] sm:$0xff] }
 0x325   :  { %v3056_v1 = vsel %vm13205_vm8, %v2993_v61, %v2995_v28  ;;  %4703 = vmatprep.subr.mxu1 %v4310_v4  ;;  %v4309_v47 = vld [vmem:[#allocation2 + $0xf0] sm:$0xff]  ;;  %v4307_v27 = vld [vmem:[#allocation2 + $0xe0] sm:$0xff] }
 0x326   :  { %3112 = vst [vmem:[#allocation2 + $0xc8] sm:$0x38] %v3056_v1  ;;  %2849 = vrot.lane.b32.xlu1 %v8774_v6, %s8672_s23  ;;  %4704 = vmatpush1.msra.mxu1 %v4309_v47 }
 0x327   :  { %2847 = vrot.lane.b32.xlu0 %v8778_v7, %s8672_s23  ;;  %4633 = vmatpush1.msra.mxu0 %v4307_v27 }
 0x328   :  { %v2844_v59 = vpop.permute.xlu1 %2843  ;;  %v2838_v44 = vpop.permute.xlu0 %2837 }
 0x329   :  { %v2904_v3 = vsel %vm13203_vm6, %v2842_v49, %v2844_v59  ;;  %2961 = vst.msk [vmem:[#allocation2 + $0xd8] sm:$0x7] %vm13213_vm0, %v2844_v59  ;;  %v2902_v63 = vsel %vm13203_vm6, %v2838_v44, %v2840_v25  ;;  %vm13207_vm6 = vcmask 629760  }
 0x32a   :  { %2960 = vst [vmem:[#allocation2 + $0xd0] sm:$0x7] %v2904_v3  ;;  %2958 = vst [vmem:[#allocation2 + $0xc0] sm:$0x7] %v2902_v63  ;;  %3002 = vrot.lane.b32.xlu1 %v8864_v23, %s8673_s24 }
 0x32b   :  { %3000 = vrot.lane.b32.xlu0 %v8861_v22, %s8673_s24 }
 0x32c   :  { %v2997_v46 = vpop.permute.xlu1 %2996  ;;  %v2991_v55 = vpop.permute.xlu0 %2990 }
 0x32d   :  { %v3057_v7 = vsel %vm13205_vm8, %v2995_v28, %v2997_v46  ;;  %3114 = vst.msk [vmem:[#allocation2 + $0xd8] sm:$0x38] %vm13204_vm2, %v2997_v46  ;;  %v3055_v49 = vsel %vm13205_vm8, %v2991_v55, %v2993_v61  ;;  %v4304_v11 = vld [vmem:[#allocation2 + $0xc8] sm:$0xff]  ;;  %vm13206_vm2 = vcmask 621568   ;;  %vm13208_vm8 = vcmask 457728  }
 0x32e   :  { %3113 = vst [vmem:[#allocation2 + $0xd0] sm:$0x38] %v3057_v7  ;;  %3111 = vst [vmem:[#allocation2 + $0xc0] sm:$0x38] %v3055_v49  ;;  %2851 = vrot.lane.b32.xlu1 %v8868_v24, %s8672_s23  ;;  %4634 = vmatprep.subr.mxu0 %v4304_v11 }
 0x32f   :  { %2845 = vrot.lane.b32.xlu0 %v8756_v2, %s8672_s23 }
 0x330   :  { %v2351_v22 = vpop.permute.xlu1 %2350  ;;  %v2349_v23 = vpop.permute.xlu0 %2348 }
 0x331   :  { %v2412_v25 = vsel %vm13207_vm6, %v2349_v23, %v2351_v22 }
 0x332   :  { %2468 = vst [vmem:[#allocation2 + $0xa8] ss:$-28 sps:$4 sm:$0x83] %v2412_v25   ;;  %3004 = vrot.lane.b32.xlu1 %v8912_v31, %s8673_s24 }
 0x333   :  { %2998 = vrot.lane.b32.xlu0 %v8803_v12, %s8673_s24 }
 0x334   :  { %v2536_v28 = vpop.permute.xlu1 %2535  ;;  %v2534_v61 = vpop.permute.xlu0 %2533  ;;  %v4306_v24 = vld [vmem:[#allocation2 + $0xd8] sm:$0xff] }
 0x335   :  { %v2597_v4 = vsel %vm13206_vm2, %v2534_v61, %v2536_v28  ;;  %4705 = vmatprep.subr.mxu1 %v4306_v24  ;;  %v4305_v1 = vld [vmem:[#allocation2 + $0xd0] sm:$0xff]  ;;  %v4303_v47 = vld [vmem:[#allocation2 + $0xc0] sm:$0xff] }
 0x336   :  { %2653 = vst [vmem:[#allocation2 + $0xa8] sm:$0x1c] %v2597_v4  ;;  %2358 = vrot.lane.b32.xlu1 %v13441_v60, %s8674_s25  ;;  %4706 = vmatpush1.msra.mxu1 %v4305_v1 }
 0x337   :  { %2356 = vrot.lane.b32.xlu0 %v13442_v57, %s8674_s25  ;;  %4635 = vmatpush1.msra.mxu0 %v4303_v47 }
 0x338   :  { %v2689_v31 = vpop.permute.xlu1 %2688  ;;  %v2687_v12 = vpop.permute.xlu0 %2686 }
 0x339   :  { %v2750_v27 = vsel %vm13208_vm8, %v2687_v12, %v2689_v31 }
 0x33a   :  { %2806 = vst [vmem:[#allocation2 + $0xa8] sm:$0xe0] %v2750_v27  ;;  %2543 = vrot.lane.b32.xlu1 %v13443_v48, %s8675_s1 }
 0x33b   :  { %2541 = vrot.lane.b32.xlu0 %v13444_v29, %s8675_s1 }
 0x33c   :  { %v2353_v59 = vpop.permute.xlu1 %2352  ;;  %v2347_v44 = vpop.permute.xlu0 %2346 }
 0x33d   :  { %v2413_v60 = vsel %vm13207_vm6, %v2351_v22, %v2353_v59  ;;  %2470 = vst.msk [vmem:[#allocation2 + $0x98] sm:$0x80] %vm1114_vm11, %v2353_v59  ;;  %v2411_v57 = vsel %vm13207_vm6, %v2347_v44, %v2349_v23  ;;  %vm13211_vm6 = vcmask 646144  }
 0x33e   :  { %2474 = vst.msk [vmem:[#allocation2 + $0xb8] sm:$0x3] %vm1119_vm12, %v2353_v59  ;;  %2469 = vst [vmem:[#allocation2 + $0xb0] ss:$-28 sps:$4 sm:$0x83] %v2413_v60   ;;  %2696 = vrot.lane.b32.xlu1 %v13445_v26, %s8676_s26 }
 0x33f   :  { %2467 = vst [vmem:[#allocation2 + $0xa0] ss:$-28 sps:$4 sm:$0x83] %v2411_v57   ;;  %2694 = vrot.lane.b32.xlu0 %v13446_v56, %s8676_s26 }
 0x340   :  { %v2538_v48 = vpop.permute.xlu1 %2537  ;;  %v2532_v29 = vpop.permute.xlu0 %2531 }
 0x341   :  { %v2598_v3 = vsel %vm13206_vm2, %v2536_v28, %v2538_v48  ;;  %2655 = vst.msk [vmem:[#allocation2 + $0xb8] sm:$0x1c] %vm1333_vm14, %v2538_v48  ;;  %v2596_v63 = vsel %vm13206_vm2, %v2532_v29, %v2534_v61  ;;  %v4300_v46 = vld [vmem:[#allocation2 + $0xa8] sm:$0xff]  ;;  %vm13212_vm2 = vcmask 654336  }
 0x342   :  { %2654 = vst [vmem:[#allocation2 + $0xb0] sm:$0x1c] %v2598_v3  ;;  %2652 = vst [vmem:[#allocation2 + $0xa0] sm:$0x1c] %v2596_v63  ;;  %2360 = vrot.lane.b32.xlu1 %v13447_v20, %s8674_s25  ;;  %4636 = vmatprep.subr.mxu0 %v4300_v46 }
 0x343   :  { %2354 = vrot.lane.b32.xlu0 %v13448_v45, %s8674_s25 }
 0x344   :  { %v2691_v26 = vpop.permute.xlu1 %2690  ;;  %v2685_v56 = vpop.permute.xlu0 %2684 }
 0x345   :  { %v2751_v55 = vsel %vm13208_vm8, %v2689_v31, %v2691_v26  ;;  %2808 = vst.msk [vmem:[#allocation2 + $0xb8] sm:$0xe0] %vm1519_vm3, %v2691_v26  ;;  %v2749_v7 = vsel %vm13208_vm8, %v2685_v56, %v2687_v12  ;;  %vm13210_vm8 = vcmask 637952   ;;  %v4288_v26 = vld [vmem:[#allocation2 + $0x48] sm:$0xff]  ;;  %v4290_v56 = vld [vmem:[#allocation2 + $0x58] sm:$0xff] }
 0x346   :  { %2807 = vst [vmem:[#allocation2 + $0xb0] sm:$0xe0] %v2751_v55  ;;  %2805 = vst [vmem:[#allocation2 + $0xa0] sm:$0xe0] %v2749_v7  ;;  %2545 = vrot.lane.b32.xlu1 %v13449_v52, %s8675_s1  ;;  %v4289_v7 = vld [vmem:[#allocation2 + $0x50] sm:$0xff] }
 0x347   :  { %2539 = vrot.lane.b32.xlu0 %v13450_v53, %s8675_s1 }
 0x348   :  { %v1860_v20 = vpop.permute.xlu1 %1859  ;;  %v1858_v49 = vpop.permute.xlu0 %1857 }
 0x349   :  { %v1921_v45 = vsel %vm13212_vm2, %v1858_v49, %v1860_v20 }
 0x34a   :  { %1977 = vst [vmem:[#allocation2 + $0x88] ss:$-28 sps:$4 sm:$0xc1] %v1921_v45   ;;  %2698 = vrot.lane.b32.xlu1 %v13451_v51, %s8676_s26  ;;  %v4286_v45 = vld [vmem:[#allocation2 + $0x38] sm:$0xff] }
 0x34b   :  { %2692 = vrot.lane.b32.xlu0 %v13452_v50, %s8676_s26 }
 0x34c   :  { %v2045_v11 = vpop.permute.xlu1 %2044  ;;  %v2043_v22 = vpop.permute.xlu0 %2042  ;;  %v4302_v23 = vld [vmem:[#allocation2 + $0xb8] sm:$0xff] }
 0x34d   :  { %v2106_v52 = vsel %vm13211_vm6, %v2043_v22, %v2045_v11  ;;  %4707 = vmatprep.subr.mxu1 %v4302_v23  ;;  %v4301_v25 = vld [vmem:[#allocation2 + $0xb0] sm:$0xff]  ;;  %v4299_v53 = vld [vmem:[#allocation2 + $0xa0] sm:$0xff] }
 0x34e   :  { %2162 = vst [vmem:[#allocation2 + $0x88] sm:$0xe] %v2106_v52  ;;  %1867 = vrot.lane.b32.xlu1 %v13453_v32, %s8677_s27  ;;  %4708 = vmatpush1.msra.mxu1 %v4301_v25  ;;  %v4285_v23 = vld [vmem:[#allocation2 + $0x30] sm:$0xff] }
 0x34f   :  { %1865 = vrot.lane.b32.xlu0 %v13454_v54, %s8677_s27  ;;  %4637 = vmatpush1.msra.mxu0 %v4299_v53  ;;  %v4280_v53 = vld [vmem:[#allocation2 + $0x8] sm:$0xff] }
 0x350   :  { %v2198_v51 = vpop.permute.xlu1 %2197  ;;  %v2196_v50 = vpop.permute.xlu0 %2195 }
 0x351   :  { %v2259_v28 = vsel %vm13210_vm8, %v2196_v50, %v2198_v51 }
 0x352   :  { %2315 = vst [vmem:[#allocation2 + $0x88] sm:$0x70] %v2259_v28  ;;  %2052 = vrot.lane.b32.xlu1 %v13455_v5, %s8678_s28 }
 0x353   :  { %2050 = vrot.lane.b32.xlu0 %v13456_v16, %s8678_s28 }
 0x354   :  { %v1862_v61 = vpop.permute.xlu1 %1861  ;;  %v1856_v24 = vpop.permute.xlu0 %1855 }
 0x355   :  { %v1922_v32 = vsel %vm13212_vm2, %v1860_v20, %v1862_v61  ;;  %1979 = vst.msk [vmem:[#allocation2 + $0x78] sm:$0xc0] %vm539_vm4, %v1862_v61  ;;  %v1920_v54 = vsel %vm13212_vm2, %v1856_v24, %v1858_v49  ;;  %v4287_v20 = vld [vmem:[#allocation2 + $0x40] sm:$0xff]  ;;  %v4284_v49 = vld [vmem:[#allocation2 + $0x28] sm:$0xff]  ;;  %vm13467_vm2 = vcmask 236544  }
 0x356   :  { %1983 = vst.msk [vmem:[#allocation2 + $0x98] sm:$0x1] %vm544_vm5, %v1862_v61  ;;  %1978 = vst [vmem:[#allocation2 + $0x90] ss:$-28 sps:$4 sm:$0xc1] %v1922_v32   ;;  %2205 = vrot.lane.b32.xlu1 %v13457_v62, %s8679_s3  ;;  %v13463_v61 = vld [vmem:[#allocation136_spill] sm:$0xff] }
 0x357   :  { %1976 = vst [vmem:[#allocation2 + $0x80] ss:$-28 sps:$4 sm:$0xc1] %v1920_v54   ;;  %2203 = vrot.lane.b32.xlu0 %v8756_v2, %s8679_s3  ;;  %v4279_v24 = vld [vmem:[#allocation2] sm:$0xff] }
 0x358   :  { %v2047_v5 = vpop.permute.xlu1 %2046  ;;  %v2041_v16 = vpop.permute.xlu0 %2040  ;;  %v10737_v54 = vld [vmem:[#allocation3] sm:$0xff] }
 0x359   :  { %v2107_v4 = vsel %vm13211_vm6, %v2045_v11, %v2047_v5  ;;  %2164 = vst.msk [vmem:[#allocation2 + $0x98] sm:$0xe] %vm758_vm7, %v2047_v5  ;;  %v2105_v1 = vsel %vm13211_vm6, %v2041_v16, %v2043_v22  ;;  %v4296_v47 = vld [vmem:[#allocation2 + $0x88] sm:$0xff]  ;;  %v4283_v22 = vld [vmem:[#allocation2 + $0x20] sm:$0xff]  ;;  %v13464_v5 = vld [vmem:[#allocation133_spill] sm:$0xff] }
 0x35a   :  { %2163 = vst [vmem:[#allocation2 + $0x90] sm:$0xe] %v2107_v4  ;;  %2161 = vst [vmem:[#allocation2 + $0x80] sm:$0xe] %v2105_v1  ;;  %1869 = vrot.lane.b32.xlu1 %v13458_v0, %s8677_s27  ;;  %4638 = vmatprep.subr.mxu0 %v4296_v47 }
 0x35b   :  { %1863 = vrot.lane.b32.xlu0 %v13459_v21, %s8677_s27 }
 0x35c   :  { %v2200_v62 = vpop.permute.xlu1 %2199  ;;  %v2194_v2 = vpop.permute.xlu0 %2193 }
 0x35d   :  { %v2260_v31 = vsel %vm13210_vm8, %v2198_v51, %v2200_v62  ;;  %2317 = vst.msk [vmem:[#allocation2 + $0x98] sm:$0x70] %vm13214_vm9, %v2200_v62  ;;  %v2258_v12 = vsel %vm13210_vm8, %v2194_v2, %v2196_v50  ;;  %v4293_v63 = vld [vmem:[#allocation2 + $0x70] sm:$0xff]  ;;  %v4282_v51 = vld [vmem:[#allocation2 + $0x18] sm:$0xff]  ;;  %vm13465_vm8 = vcmask 1042432  }
 0x35e   :  { %2316 = vst [vmem:[#allocation2 + $0x90] sm:$0x70] %v2260_v31  ;;  %2314 = vst [vmem:[#allocation2 + $0x80] sm:$0x70] %v2258_v12  ;;  %2054 = vrot.lane.b32.xlu1 %v13460_v8, %s8678_s28  ;;  %v4291_v3 = vld [vmem:[#allocation2 + $0x60] sm:$0xff]  ;;  %v4281_v50 = vld [vmem:[#allocation2 + $0x10] sm:$0xff] }
 0x35f   :  { %2048 = vrot.lane.b32.xlu0 %v13461_v33, %s8678_s28  ;;  %vm13466_vm6 = vmmov %vm13465_vm8  ;;  %v13470_v31 = vld [vmem:[#allocation168_spill] sm:$0xff]  ;;  %v13471_v12 = vld [vmem:[#allocation165_spill] sm:$0xff] }
 0x360   :  { %v4138_v0 = vpop.permute.xlu1 %4137  ;;  %v4136_v27 = vpop.permute.xlu0 %4135 }
 0x361   :  { %v4194_v21 = vsel %vm13209_vm13, %v4136_v27, %v4138_v0 }
 0x362   :  { %4251 = vst [vmem:[#allocation2 + $0x268] sm:$0x7] %v4194_v21  ;;  %2207 = vrot.lane.b32.xlu1 %v8774_v6, %s8679_s3  ;;  %v4292_v6 = vld [vmem:[#allocation2 + $0x68] sm:$0xff] }
 0x363   :  { %2201 = vrot.lane.b32.xlu0 %v13462_v30, %s8679_s3  ;;  %v4294_v30 = vld [vmem:[#allocation2 + $0x78] sm:$0xff] }
 0x364   :  { %v4140_v59 = vpop.permute.xlu1 %4139  ;;  %v4134_v44 = vpop.permute.xlu0 %4133  ;;  %v4298_v60 = vld [vmem:[#allocation2 + $0x98] sm:$0xff] }
 0x365   :  { %v4195_v57 = vsel %vm13209_vm13, %v4138_v0, %v4140_v59  ;;  %4253 = vst.msk [vmem:[#allocation2 + $0x278] sm:$0x7] %vm13213_vm0, %v4140_v59  ;;  %v4193_v8 = vsel %vm13209_vm13, %v4134_v44, %v4136_v27  ;;  %4709 = vmatprep.subr.mxu1 %v4298_v60  ;;  %v4297_v33 = vld [vmem:[#allocation2 + $0x90] sm:$0xff]  ;;  %v4295_v48 = vld [vmem:[#allocation2 + $0x80] sm:$0xff]  ;;  %vm4599_vm13 = vcmask 613376   ;;  %vm13468_vm0 = vmmov %vm13466_vm6 }
 0x366   :  { %4252 = vst [vmem:[#allocation2 + $0x270] sm:$0x7] %v4195_v57  ;;  %4250 = vst [vmem:[#allocation2 + $0x260] sm:$0x7] %v4193_v8  ;;  %4145 = vrot.lane.b32.xlu1 %v8793_v10, %s8665_s2  ;;  %4710 = vmatpush1.msra.mxu1 %v4297_v33  ;;  %v13472_v44 = vld [vmem:[#allocation200_spill] sm:$0xff]  ;;  %v13473_v60 = vld [vmem:[#allocation197_spill] sm:$0xff] }
 0x367   :  { %4143 = vrot.lane.b32.xlu0 %v8807_v13, %s8665_s2  ;;  %4639 = vmatpush1.msra.mxu0 %v4295_v48  ;;  %vm13469_vm9 = vmmov %vm13468_vm0 }
 0x368   :  { %4640 = vmatprep.subr.mxu0 %v4292_v6  ;;  %4711 = vmatprep.subr.mxu1 %v4294_v30  ;;  %v3647_v29 = vpop.permute.xlu1 %3646  ;;  %v13474_v30 = vld [vmem:[#allocation135_spill] sm:$0xff] }
 0x369   :  { %4641 = vmatpush1.msra.mxu0 %v4291_v3  ;;  %4712 = vmatpush1.msra.mxu1 %v4293_v63  ;;  %v3645_v46 = vpop.permute.xlu0 %3644  ;;  %v4356_v16 = vld [vmem:[#allocation2 + $0x268] sm:$0x7] }
 0x36a   :  { %v3703_v55 = vsel %vm3698_vm15, %v3645_v46, %v3647_v29  ;;  %4642 = vmatprep.subr.mxu0 %v4288_v26  ;;  %4713 = vmatprep.subr.mxu1 %v4290_v56  ;;  %v13478_v56 = vld [vmem:[#allocation167_spill] sm:$0xff] }
 0x36b   :  { %3764 = vst [vmem:[#allocation2 + $0x248] ss:$-28 sps:$4 sm:$0x83] %v3703_v55   ;;  %4147 = vrot.lane.b32.xlu1 %v8935_v36, %s8665_s2  ;;  %4714 = vmatpush1.msra.mxu1 %v4289_v7  ;;  %v13479_v55 = vld [vmem:[#allocation166_spill] sm:$0xff] }
 0x36c   :  { %4141 = vrot.lane.b32.xlu0 %v8788_v9, %s8665_s2  ;;  %4643 = vmatpush1.msra.mxu0 %v4287_v20  ;;  %v3832_v11 = vpop.permute.xlu1 %3831  ;;  %v4358_v28 = vld [vmem:[#allocation2 + $0x278] sm:$0x7] }
 0x36d   :  { %4644 = vmatprep.subr.mxu0 %v4284_v49  ;;  %4715 = vmatprep.subr.mxu1 %v4286_v45  ;;  %v3830_v52 = vpop.permute.xlu0 %3829  ;;  %v4357_v47 = vld [vmem:[#allocation2 + $0x270] sm:$0x7]  ;;  %v4355_v62 = vld [vmem:[#allocation2 + $0x260] sm:$0x7] }
 0x36e   :  { %4645 = vmatpush1.msra.mxu0 %v4283_v22  ;;  %4716 = vmatpush1.msra.mxu1 %v4285_v23  ;;  %v3888_v25 = vsel %vm3883_vm10, %v3830_v52, %v3832_v11  ;;  %v13482_v22 = vld [vmem:[#allocation198_spill] sm:$0xff] }
 0x36f   :  { %3945 = vst [vmem:[#allocation2 + $0x248] sm:$0x1c] %v3888_v25  ;;  %4646 = vmatprep.subr.mxu0 %v4280_v53  ;;  %4717 = vmatprep.subr.mxu1 %v4282_v51 }
 0x370   :  { %3654 = vrot.lane.b32.xlu1 %v13463_v61, %s8666_s18  ;;  %4718 = vmatpush1.msra.mxu1 %v4281_v50  ;;  %v3985_v32 = vpop.permute.xlu1 %3984  ;;  %v13484_v50 = vld [vmem:[#allocation58_spill] sm:$0xff] }
 0x371   :  { %3652 = vrot.lane.b32.xlu0 %v13464_v5, %s8666_s18  ;;  %4647 = vmatpush1.msra.mxu0 %v4279_v24  ;;  %v3983_v4 = vpop.permute.xlu0 %3982 }
 0x372   :  { %7982 = vmatprep.subr.msk.mxu0 %vm13465_vm8, %v4356_v16  ;;  %7985 = vmatprep.subr.msk.mxu1 %vm13466_vm6, %v4358_v28  ;;  %v4041_v1 = vsel %vm13467_vm2, %v3983_v4, %v3985_v32  ;;  %vm13483_vm8 = vcmask 424960   ;;  %v13485_v28 = vld [vmem:[#allocation55_spill] sm:$0xff] }
 0x373   :  { %7981 = vmatmul.mubr.msk.f32.vlgmr.msra.gmra.mxu1 %vm4599_vm13, %v10737_v54  ;;  %4098 = vst [vmem:[#allocation2 + $0x248] sm:$0xe0] %v4041_v1  ;;  %7978 = vmatmul.mubr.msk.f32.vlgmr.msra.gmra.mxu0 %vm4599_vm13, %v10737_v54  ;;  %v13487_v1 = vld [vmem:[#allocation87_spill] sm:$0xff] }
 0x374   :  { %7986 = vmatpush1.msk.msra.mxu1 %vm13468_vm0, %v4357_v47  ;;  %7983 = vmatpush1.msk.msra.mxu0 %vm13469_vm9, %v4355_v62  ;;  %v3649_v2 = vpop.permute.xlu1 %3648  ;;  %vm13476_vm0 = vmmov %vm13467_vm2  ;;  %vm13480_vm9 = vcmask 433152  }
 0x375   :  { %3839 = vrot.lane.b32.xlu1 %v13470_v31, %s8667_s4  ;;  %3837 = vrot.lane.b32.xlu0 %v13471_v12, %s8667_s4  ;;  %v3704_v0 = vsel %vm3698_vm15, %v3647_v29, %v3649_v2  ;;  %3766 = vst.msk [vmem:[#allocation2 + $0x238] sm:$0x80] %vm1114_vm11, %v3649_v2  ;;  %v3643_v27 = vpop.permute.xlu0 %3642  ;;  %v13475_v29 = vld [vmem:[#allocation134_spill] sm:$0xff]  ;;  %vm13477_vm2 = vmmov %vm13476_vm0 }
 0x376   :  { %3770 = vst.msk [vmem:[#allocation2 + $0x258] sm:$0x3] %vm1119_vm12, %v3649_v2  ;;  %3765 = vst [vmem:[#allocation2 + $0x250] ss:$-28 sps:$4 sm:$0x83] %v3704_v0   ;;  %v3702_v21 = vsel %vm3698_vm15, %v3643_v27, %v3645_v46  ;;  %4834 = vmatprep.mubr.f32.mxu0 %v8680_v58  ;;  %4905 = vmatprep.mubr.f32.mxu1 %v8680_v58  ;;  %v13490_v27 = vld [vmem:[#allocation116_spill] sm:$0xff] }
 0x377   :  { %3763 = vst [vmem:[#allocation2 + $0x240] ss:$-28 sps:$4 sm:$0x83] %v3702_v21   ;;  %vm13488_vm6 = vmmov %vm13480_vm9 }
 0x378   :  { %v3834_v59 = vpop.permute.xlu1 %3833 }
 0x379   :  { %3992 = vrot.lane.b32.xlu1 %v13472_v44, %s8668_s19  ;;  %3990 = vrot.lane.b32.xlu0 %v13473_v60, %s8668_s19  ;;  %v3889_v57 = vsel %vm3883_vm10, %v3832_v11, %v3834_v59  ;;  %3947 = vst.msk [vmem:[#allocation2 + $0x258] sm:$0x1c] %vm1333_vm14, %v3834_v59  ;;  %v3828_v8 = vpop.permute.xlu0 %3827  ;;  %v13481_v11 = vld [vmem:[#allocation199_spill] sm:$0xff] }
 0x37a   :  { %3946 = vst [vmem:[#allocation2 + $0x250] sm:$0x1c] %v3889_v57  ;;  %v3887_v33 = vsel %vm3883_vm10, %v3828_v8, %v3830_v52  ;;  %v4352_v48 = vld [vmem:[#allocation2 + $0x248] sm:$0xff] }
 0x37b   :  { %3944 = vst [vmem:[#allocation2 + $0x240] sm:$0x1c] %v3887_v33  ;;  %4784 = vmatprep.subr.mxu0 %v4352_v48  ;;  %v13493_v48 = vld [vmem:[#allocation57_spill] sm:$0xff] }
 0x37c   :  { %v3987_v6 = vpop.permute.xlu1 %3986 }
 0x37d   :  { %3656 = vrot.lane.b32.xlu1 %v13474_v30, %s8666_s18  ;;  %3650 = vrot.lane.b32.xlu0 %v13475_v29, %s8666_s18  ;;  %v4042_v3 = vsel %vm13476_vm0, %v3985_v32, %v3987_v6  ;;  %4100 = vst.msk [vmem:[#allocation2 + $0x258] sm:$0xe0] %vm1519_vm3, %v3987_v6  ;;  %v3981_v63 = vpop.permute.xlu0 %3980  ;;  %vm13489_vm0 = vmmov %vm13488_vm6  ;;  %v13494_v6 = vld [vmem:[#allocation56_spill] sm:$0xff] }
 0x37e   :  { %4099 = vst [vmem:[#allocation2 + $0x250] sm:$0xe0] %v4042_v3  ;;  %v4040_v46 = vsel %vm13477_vm2, %v3981_v63, %v3983_v4  ;;  %v13486_v4 = vld [vmem:[#allocation90_spill] sm:$0xff]  ;;  %vm13491_vm2 = vmmov %vm13483_vm8 }
 0x37f   :  { %4097 = vst [vmem:[#allocation2 + $0x240] sm:$0xe0] %v4040_v46 }
 0x380   :  { %v3156_v26 = vpop.permute.xlu1 %3155 }
 0x381   :  { %3841 = vrot.lane.b32.xlu1 %v13478_v56, %s8667_s4  ;;  %3835 = vrot.lane.b32.xlu0 %v13479_v55, %s8667_s4  ;;  %v3154_v7 = vpop.permute.xlu0 %3153 }
 0x382   :  { %v3212_v20 = vsel %vm13480_vm9, %v3154_v7, %v3156_v26  ;;  %vm13492_vm9 = vmmov %vm13491_vm2 }
 0x383   :  { %3273 = vst [vmem:[#allocation2 + $0x228] ss:$-28 sps:$4 sm:$0xc1] %v3212_v20   ;;  %v13497_v20 = vld [vmem:[#allocation88_spill] sm:$0xff] }
 0x384   :  { %v3341_v49 = vpop.permute.xlu1 %3340  ;;  %v4354_v45 = vld [vmem:[#allocation2 + $0x258] sm:$0xff] }
 0x385   :  { %3994 = vrot.lane.b32.xlu1 %v13481_v11, %s8668_s19  ;;  %3988 = vrot.lane.b32.xlu0 %v13482_v22, %s8668_s19  ;;  %v3339_v23 = vpop.permute.xlu0 %3338  ;;  %v4353_v52 = vld [vmem:[#allocation2 + $0x250] sm:$0xff] }
 0x386   :  { %v3397_v25 = vsel %vm13483_vm8, %v3339_v23, %v3341_v49  ;;  %4855 = vmatprep.subr.mxu1 %v4354_v45  ;;  %v4351_v53 = vld [vmem:[#allocation2 + $0x240] sm:$0xff]  ;;  %vm13495_vm8 = vcmask 202756  }
 0x387   :  { %3454 = vst [vmem:[#allocation2 + $0x228] sm:$0xe] %v3397_v25  ;;  %4856 = vmatpush1.msra.mxu1 %v4353_v52  ;;  %4785 = vmatpush1.msra.mxu0 %v4351_v53  ;;  %v13499_v25 = vld [vmem:[#allocation115_spill] sm:$0xff] }
 0x388   :  { %v3494_v51 = vpop.permute.xlu1 %3493 }
 0x389   :  { %3163 = vrot.lane.b32.xlu1 %v13484_v50, %s8669_s20  ;;  %3161 = vrot.lane.b32.xlu0 %v13485_v28, %s8669_s20  ;;  %v3492_v24 = vpop.permute.xlu0 %3491 }
 0x38a   :  { %v3550_v32 = vsel %vm13215_vm1, %v3492_v24, %v3494_v51 }
 0x38b   :  { %3607 = vst [vmem:[#allocation2 + $0x228] sm:$0x70] %v3550_v32 }
 0x38c   :  { %v3158_v16 = vpop.permute.xlu1 %3157 }
 0x38d   :  { %3348 = vrot.lane.b32.xlu1 %v13486_v4, %s8670_s21  ;;  %3346 = vrot.lane.b32.xlu0 %v13487_v1, %s8670_s21  ;;  %v3213_v47 = vsel %vm13488_vm6, %v3156_v26, %v3158_v16  ;;  %3275 = vst.msk [vmem:[#allocation2 + $0x218] sm:$0xc0] %vm539_vm4, %v3158_v16  ;;  %v3152_v62 = vpop.permute.xlu0 %3151  ;;  %vm13498_vm6 = vcmask 449536  }
 0x38e   :  { %3279 = vst.msk [vmem:[#allocation2 + $0x238] sm:$0x1] %vm544_vm5, %v3158_v16  ;;  %3274 = vst [vmem:[#allocation2 + $0x230] ss:$-28 sps:$4 sm:$0xc1] %v3213_v47   ;;  %v3211_v2 = vsel %vm13489_vm0, %v3152_v62, %v3154_v7  ;;  %v13496_v7 = vld [vmem:[#allocation89_spill] sm:$0xff] }
 0x38f   :  { %3272 = vst [vmem:[#allocation2 + $0x220] ss:$-28 sps:$4 sm:$0xc1] %v3211_v2   ;;  %vm13500_vm0 = vcmask 441344  }
 0x390   :  { %v3343_v0 = vpop.permute.xlu1 %3342 }
 0x391   :  { %3501 = vrot.lane.b32.xlu1 %v13490_v27, %s8671_s22  ;;  %3499 = vrot.lane.b32.xlu0 %v8788_v9, %s8671_s22  ;;  %v3398_v21 = vsel %vm13491_vm2, %v3341_v49, %v3343_v0  ;;  %3456 = vst.msk [vmem:[#allocation2 + $0x238] sm:$0xe] %vm758_vm7, %v3343_v0  ;;  %v3337_v59 = vpop.permute.xlu0 %3336  ;;  %vm13501_vm2 = vmmov %vm13498_vm6 }
 0x392   :  { %3455 = vst [vmem:[#allocation2 + $0x230] sm:$0xe] %v3398_v21  ;;  %v3396_v57 = vsel %vm13492_vm9, %v3337_v59, %v3339_v23  ;;  %v4348_v8 = vld [vmem:[#allocation2 + $0x228] sm:$0xff]  ;;  %vm13502_vm9 = vcmask 198656  }
 0x393   :  { %3453 = vst [vmem:[#allocation2 + $0x220] sm:$0xe] %v3396_v57  ;;  %4786 = vmatprep.subr.mxu0 %v4348_v8 }
 0x394   :  { %v3496_v33 = vpop.permute.xlu1 %3495 }
 0x395   :  { %3165 = vrot.lane.b32.xlu1 %v13493_v48, %s8669_s20  ;;  %3159 = vrot.lane.b32.xlu0 %v13494_v6, %s8669_s20  ;;  %v3551_v3 = vsel %vm13215_vm1, %v3494_v51, %v3496_v33  ;;  %3609 = vst.msk [vmem:[#allocation2 + $0x238] sm:$0x70] %vm13495_vm8, %v3496_v33  ;;  %v3490_v63 = vpop.permute.xlu0 %3489  ;;  %vm13503_vm8 = vmmov %vm13501_vm2 }
 0x396   :  { %3608 = vst [vmem:[#allocation2 + $0x230] sm:$0x70] %v3551_v3  ;;  %v3549_v46 = vsel %vm13215_vm1, %v3490_v63, %v3492_v24 }
 0x397   :  { %3606 = vst [vmem:[#allocation2 + $0x220] sm:$0x70] %v3549_v46 }
 0x398   :  { %v2850_v26 = vpop.permute.xlu1 %2849 }
 0x399   :  { %3350 = vrot.lane.b32.xlu1 %v13496_v7, %s8670_s21  ;;  %3344 = vrot.lane.b32.xlu0 %v13497_v20, %s8670_s21  ;;  %v2848_v49 = vpop.permute.xlu0 %2847 }
 0x39a   :  { %v2906_v45 = vsel %vm13498_vm6, %v2848_v49, %v2850_v26  ;;  %vm13504_vm6 = vmmov %vm13500_vm0 }
 0x39b   :  { %2963 = vst [vmem:[#allocation2 + $0x208] sm:$0x7] %v2906_v45 }
 0x39c   :  { %v3003_v23 = vpop.permute.xlu1 %3002  ;;  %v4350_v52 = vld [vmem:[#allocation2 + $0x238] sm:$0xff] }
 0x39d   :  { %3503 = vrot.lane.b32.xlu1 %v8793_v10, %s8671_s22  ;;  %3497 = vrot.lane.b32.xlu0 %v13499_v25, %s8671_s22  ;;  %v3001_v53 = vpop.permute.xlu0 %3000  ;;  %v4349_v51 = vld [vmem:[#allocation2 + $0x230] sm:$0xff] }
 0x39e   :  { %v3059_v24 = vsel %vm13500_vm0, %v3001_v53, %v3003_v23  ;;  %4857 = vmatprep.subr.mxu1 %v4350_v52  ;;  %v4347_v32 = vld [vmem:[#allocation2 + $0x220] sm:$0xff]  ;;  %vm13505_vm0 = vcmask 201731  }
 0x39f   :  { %3116 = vst [vmem:[#allocation2 + $0x208] sm:$0x38] %v3059_v24  ;;  %4858 = vmatpush1.msra.mxu1 %v4349_v51  ;;  %4787 = vmatpush1.msra.mxu0 %v4347_v32 }
 0x3a0   :  { %v2852_v16 = vpop.permute.xlu1 %2851 }
 0x3a1   :  { %2857 = vrot.lane.b32.xlu1 %v8793_v10, %s8672_s23  ;;  %2855 = vrot.lane.b32.xlu0 %v8807_v13, %s8672_s23  ;;  %v2907_v47 = vsel %vm13501_vm2, %v2850_v26, %v2852_v16  ;;  %2965 = vst.msk [vmem:[#allocation2 + $0x218] sm:$0x7] %vm13502_vm9, %v2852_v16  ;;  %v2846_v62 = vpop.permute.xlu0 %2845  ;;  %vm13506_vm2 = vmmov %vm13504_vm6  ;;  %vm13507_vm9 = vcmask 629760  }
 0x3a2   :  { %2964 = vst [vmem:[#allocation2 + $0x210] sm:$0x7] %v2907_v47  ;;  %v2905_v2 = vsel %vm13503_vm8, %v2846_v62, %v2848_v49  ;;  %vm13508_vm8 = vcmask 621568  }
 0x3a3   :  { %2962 = vst [vmem:[#allocation2 + $0x200] sm:$0x7] %v2905_v2 }
 0x3a4   :  { %v3005_v0 = vpop.permute.xlu1 %3004 }
 0x3a5   :  { %3010 = vrot.lane.b32.xlu1 %v8945_v38, %s8673_s24  ;;  %3008 = vrot.lane.b32.xlu0 %v8928_v34, %s8673_s24  ;;  %v3060_v21 = vsel %vm13504_vm6, %v3003_v23, %v3005_v0  ;;  %3118 = vst.msk [vmem:[#allocation2 + $0x218] sm:$0x38] %vm13505_vm0, %v3005_v0  ;;  %v2999_v13 = vpop.permute.xlu0 %2998  ;;  %vm13509_vm6 = vcmask 457728   ;;  %vm13510_vm0 = vmmov %vm13507_vm9 }
 0x3a6   :  { %3117 = vst [vmem:[#allocation2 + $0x210] sm:$0x38] %v3060_v21  ;;  %v3058_v59 = vsel %vm13506_vm2, %v2999_v13, %v3001_v53  ;;  %v4344_v57 = vld [vmem:[#allocation2 + $0x208] sm:$0xff]  ;;  %vm13511_vm2 = vmmov %vm13510_vm0 }
 0x3a7   :  { %3115 = vst [vmem:[#allocation2 + $0x200] sm:$0x38] %v3058_v59  ;;  %4788 = vmatprep.subr.mxu0 %v4344_v57 }
 0x3a8   :  { %v2359_v8 = vpop.permute.xlu1 %2358 }
 0x3a9   :  { %2859 = vrot.lane.b32.xlu1 %v8935_v36, %s8672_s23  ;;  %2853 = vrot.lane.b32.xlu0 %v8788_v9, %s8672_s23  ;;  %v2357_v38 = vpop.permute.xlu0 %2356 }
 0x3aa   :  { %v2415_v34 = vsel %vm13507_vm9, %v2357_v38, %v2359_v8  ;;  %vm13512_vm9 = vmmov %vm13508_vm8 }
 0x3ab   :  { %2476 = vst [vmem:[#allocation2 + $0x1e8] ss:$-28 sps:$4 sm:$0x83] %v2415_v34  }
 0x3ac   :  { %v2544_v33 = vpop.permute.xlu1 %2543  ;;  %v4346_v3 = vld [vmem:[#allocation2 + $0x218] sm:$0xff] }
 0x3ad   :  { %3012 = vrot.lane.b32.xlu1 %v8942_v37, %s8673_s24  ;;  %3006 = vrot.lane.b32.xlu0 %v8931_v35, %s8673_s24  ;;  %v2542_v63 = vpop.permute.xlu0 %2541  ;;  %v4345_v46 = vld [vmem:[#allocation2 + $0x210] sm:$0xff] }
 0x3ae   :  { %v2600_v26 = vsel %vm13508_vm8, %v2542_v63, %v2544_v33  ;;  %4859 = vmatprep.subr.mxu1 %v4346_v3  ;;  %v4343_v36 = vld [vmem:[#allocation2 + $0x200] sm:$0xff] }
 0x3af   :  { %2657 = vst [vmem:[#allocation2 + $0x1e8] sm:$0x1c] %v2600_v26  ;;  %4860 = vmatpush1.msra.mxu1 %v4345_v46  ;;  %4789 = vmatpush1.msra.mxu0 %v4343_v36 }
 0x3b0   :  { %v2697_v49 = vpop.permute.xlu1 %2696 }
 0x3b1   :  { %2366 = vrot.lane.b32.xlu1 %v13463_v61, %s8674_s25  ;;  %2364 = vrot.lane.b32.xlu0 %v13464_v5, %s8674_s25  ;;  %v2695_v37 = vpop.permute.xlu0 %2694 }
 0x3b2   :  { %v2753_v45 = vsel %vm13509_vm6, %v2695_v37, %v2697_v49 }
 0x3b3   :  { %2810 = vst [vmem:[#allocation2 + $0x1e8] sm:$0xe0] %v2753_v45 }
 0x3b4   :  { %v2361_v35 = vpop.permute.xlu1 %2360 }
 0x3b5   :  { %2551 = vrot.lane.b32.xlu1 %v13470_v31, %s8675_s1  ;;  %2549 = vrot.lane.b32.xlu0 %v13471_v12, %s8675_s1  ;;  %v2416_v23 = vsel %vm13510_vm0, %v2359_v8, %v2361_v35  ;;  %2478 = vst.msk [vmem:[#allocation2 + $0x1d8] sm:$0x80] %vm1114_vm11, %v2361_v35  ;;  %v2355_v61 = vpop.permute.xlu0 %2354  ;;  %vm13513_vm0 = vmmov %vm13509_vm6 }
 0x3b6   :  { %2482 = vst.msk [vmem:[#allocation2 + $0x1f8] sm:$0x3] %vm1119_vm12, %v2361_v35  ;;  %2477 = vst [vmem:[#allocation2 + $0x1f0] ss:$-28 sps:$4 sm:$0x83] %v2416_v23   ;;  %v2414_v5 = vsel %vm13511_vm2, %v2355_v61, %v2357_v38  ;;  %vm13514_vm2 = vcmask 654336  }
 0x3b7   :  { %2475 = vst [vmem:[#allocation2 + $0x1e0] ss:$-28 sps:$4 sm:$0x83] %v2414_v5   ;;  %v4328_v23 = vld [vmem:[#allocation2 + $0x188] sm:$0xff]  ;;  %v4330_v61 = vld [vmem:[#allocation2 + $0x198] sm:$0xff] }
 0x3b8   :  { %v2546_v52 = vpop.permute.xlu1 %2545 }
 0x3b9   :  { %2704 = vrot.lane.b32.xlu1 %v13472_v44, %s8676_s26  ;;  %2702 = vrot.lane.b32.xlu0 %v13473_v60, %s8676_s26  ;;  %v2601_v31 = vsel %vm13512_vm9, %v2544_v33, %v2546_v52  ;;  %2659 = vst.msk [vmem:[#allocation2 + $0x1f8] sm:$0x1c] %vm1333_vm14, %v2546_v52  ;;  %v2540_v12 = vpop.permute.xlu0 %2539  ;;  %vm13515_vm9 = vcmask 646144   ;;  %v4329_v52 = vld [vmem:[#allocation2 + $0x190] sm:$0xff] }
 0x3ba   :  { %2658 = vst [vmem:[#allocation2 + $0x1f0] sm:$0x1c] %v2601_v31  ;;  %v2599_v53 = vsel %vm13508_vm8, %v2540_v12, %v2542_v63  ;;  %v4340_v51 = vld [vmem:[#allocation2 + $0x1e8] sm:$0xff]  ;;  %vm13516_vm8 = vcmask 637952   ;;  %v4327_v31 = vld [vmem:[#allocation2 + $0x180] sm:$0xff] }
 0x3bb   :  { %2656 = vst [vmem:[#allocation2 + $0x1e0] sm:$0x1c] %v2599_v53  ;;  %4790 = vmatprep.subr.mxu0 %v4340_v51  ;;  %v4324_v53 = vld [vmem:[#allocation2 + $0x168] sm:$0xff]  ;;  %v4326_v51 = vld [vmem:[#allocation2 + $0x178] sm:$0xff] }
 0x3bc   :  { %v2699_v24 = vpop.permute.xlu1 %2698 }
 0x3bd   :  { %2368 = vrot.lane.b32.xlu1 %v13474_v30, %s8674_s25  ;;  %2362 = vrot.lane.b32.xlu0 %v13475_v29, %s8674_s25  ;;  %v2754_v44 = vsel %vm13509_vm6, %v2697_v49, %v2699_v24  ;;  %2812 = vst.msk [vmem:[#allocation2 + $0x1f8] sm:$0xe0] %vm1519_vm3, %v2699_v24  ;;  %v2693_v60 = vpop.permute.xlu0 %2692  ;;  %vm13517_vm6 = vmmov %vm13514_vm2  ;;  %v4325_v24 = vld [vmem:[#allocation2 + $0x170] sm:$0xff] }
 0x3be   :  { %2811 = vst [vmem:[#allocation2 + $0x1f0] sm:$0xe0] %v2754_v44  ;;  %v2752_v32 = vsel %vm13513_vm0, %v2693_v60, %v2695_v37  ;;  %vm13518_vm0 = vmmov %vm13514_vm2  ;;  %v4323_v44 = vld [vmem:[#allocation2 + $0x160] sm:$0xff] }
 0x3bf   :  { %2809 = vst [vmem:[#allocation2 + $0x1e0] sm:$0xe0] %v2752_v32 }
 0x3c0   :  { %v1868_v16 = vpop.permute.xlu1 %1867 }
 0x3c1   :  { %2553 = vrot.lane.b32.xlu1 %v13478_v56, %s8675_s1  ;;  %2547 = vrot.lane.b32.xlu0 %v13479_v55, %s8675_s1  ;;  %v1866_v30 = vpop.permute.xlu0 %1865 }
 0x3c2   :  { %v1924_v47 = vsel %vm13514_vm2, %v1866_v30, %v1868_v16  ;;  %vm13519_vm2 = vmmov %vm13515_vm9 }
 0x3c3   :  { %1985 = vst [vmem:[#allocation2 + $0x1c8] ss:$-28 sps:$4 sm:$0xc1] %v1924_v47  }
 0x3c4   :  { %v2053_v29 = vpop.permute.xlu1 %2052  ;;  %v4342_v62 = vld [vmem:[#allocation2 + $0x1f8] sm:$0xff] }
 0x3c5   :  { %2706 = vrot.lane.b32.xlu1 %v13481_v11, %s8676_s26  ;;  %2700 = vrot.lane.b32.xlu0 %v13482_v22, %s8676_s26  ;;  %v2051_v2 = vpop.permute.xlu0 %2050  ;;  %v4341_v0 = vld [vmem:[#allocation2 + $0x1f0] sm:$0xff] }
 0x3c6   :  { %v2109_v21 = vsel %vm13515_vm9, %v2051_v2, %v2053_v29  ;;  %4861 = vmatprep.subr.mxu1 %v4342_v62  ;;  %v4339_v56 = vld [vmem:[#allocation2 + $0x1e0] sm:$0xff]  ;;  %vm13520_vm9 = vmmov %vm13519_vm2 }
 0x3c7   :  { %2166 = vst [vmem:[#allocation2 + $0x1c8] sm:$0xe] %v2109_v21  ;;  %4862 = vmatpush1.msra.mxu1 %v4341_v0  ;;  %4791 = vmatpush1.msra.mxu0 %v4339_v56  ;;  %v4319_v0 = vld [vmem:[#allocation2 + $0x140] sm:$0xff]  ;;  %v13528_v21 = vld [vmem:[#allocation137_spill] sm:$0xff] }
 0x3c8   :  { %v2206_v55 = vpop.permute.xlu1 %2205 }
 0x3c9   :  { %1875 = vrot.lane.b32.xlu1 %v13484_v50, %s8677_s27  ;;  %1873 = vrot.lane.b32.xlu0 %v13485_v28, %s8677_s27  ;;  %v2204_v11 = vpop.permute.xlu0 %2203 }
 0x3ca   :  { %v2262_v13 = vsel %vm13516_vm8, %v2204_v11, %v2206_v55  ;;  %v4332_v37 = vld [vmem:[#allocation2 + $0x1a8] sm:$0xff] }
 0x3cb   :  { %2319 = vst [vmem:[#allocation2 + $0x1c8] sm:$0x70] %v2262_v13 }
 0x3cc   :  { %v1870_v22 = vpop.permute.xlu1 %1869 }
 0x3cd   :  { %2060 = vrot.lane.b32.xlu1 %v13486_v4, %s8678_s28  ;;  %2058 = vrot.lane.b32.xlu0 %v13487_v1, %s8678_s28  ;;  %v1925_v59 = vsel %vm13517_vm6, %v1868_v16, %v1870_v22  ;;  %1987 = vst.msk [vmem:[#allocation2 + $0x1b8] sm:$0xc0] %vm539_vm4, %v1870_v22  ;;  %v1864_v50 = vpop.permute.xlu0 %1863  ;;  %vm13521_vm6 = vcmask 202756   ;;  %v4320_v16 = vld [vmem:[#allocation2 + $0x148] sm:$0xff] }
 0x3ce   :  { %1991 = vst.msk [vmem:[#allocation2 + $0x1d8] sm:$0x1] %vm544_vm5, %v1870_v22  ;;  %1986 = vst [vmem:[#allocation2 + $0x1d0] ss:$-28 sps:$4 sm:$0xc1] %v1925_v59   ;;  %v1923_v28 = vsel %vm13518_vm0, %v1864_v50, %v1866_v30  ;;  %v4322_v30 = vld [vmem:[#allocation2 + $0x158] sm:$0xff] }
 0x3cf   :  { %1984 = vst [vmem:[#allocation2 + $0x1c0] ss:$-28 sps:$4 sm:$0xc1] %v1923_v28   ;;  %vm13522_vm0 = vmmov %vm13516_vm8  ;;  %v13534_v50 = vld [vmem:[#allocation172_spill] sm:$0xff]  ;;  %v13535_v28 = vld [vmem:[#allocation169_spill] sm:$0xff] }
 0x3d0   :  { %v2055_v57 = vpop.permute.xlu1 %2054 }
 0x3d1   :  { %2213 = vrot.lane.b32.xlu1 %v13490_v27, %s8679_s3  ;;  %2211 = vrot.lane.b32.xlu0 %v8788_v9, %s8679_s3  ;;  %v2110_v4 = vsel %vm13519_vm2, %v2053_v29, %v2055_v57  ;;  %2168 = vst.msk [vmem:[#allocation2 + $0x1d8] sm:$0xe] %vm758_vm7, %v2055_v57  ;;  %v2049_v1 = vpop.permute.xlu0 %2048  ;;  %vm13523_vm2 = vcmask 228352   ;;  %v4321_v29 = vld [vmem:[#allocation2 + $0x150] sm:$0xff] }
 0x3d2   :  { %2167 = vst [vmem:[#allocation2 + $0x1d0] sm:$0xe] %v2110_v4  ;;  %v2108_v8 = vsel %vm13520_vm9, %v2049_v1, %v2051_v2  ;;  %v4336_v38 = vld [vmem:[#allocation2 + $0x1c8] sm:$0xff]  ;;  %vm13524_vm9 = vmmov %vm13523_vm2 }
 0x3d3   :  { %2165 = vst [vmem:[#allocation2 + $0x1c0] sm:$0xe] %v2108_v8  ;;  %4792 = vmatprep.subr.mxu0 %v4336_v38  ;;  %v13527_v2 = vld [vmem:[#allocation140_spill] sm:$0xff]  ;;  %v13537_v38 = vld [vmem:[#allocation201_spill] sm:$0xff] }
 0x3d4   :  { %v2208_v34 = vpop.permute.xlu1 %2207  ;;  %v4334_v45 = vld [vmem:[#allocation2 + $0x1b8] sm:$0xff]  ;;  %v13536_v8 = vld [vmem:[#allocation204_spill] sm:$0xff] }
 0x3d5   :  { %1877 = vrot.lane.b32.xlu1 %v13493_v48, %s8677_s27  ;;  %1871 = vrot.lane.b32.xlu0 %v13494_v6, %s8677_s27  ;;  %v2263_v9 = vsel %vm13516_vm8, %v2206_v55, %v2208_v34  ;;  %2321 = vst.msk [vmem:[#allocation2 + $0x1d8] sm:$0x70] %vm13521_vm6, %v2208_v34  ;;  %v2202_v27 = vpop.permute.xlu0 %2201  ;;  %vm13525_vm8 = vcmask 198656   ;;  %vm13526_vm6 = vmmov %vm13523_vm2 }
 0x3d6   :  { %2320 = vst [vmem:[#allocation2 + $0x1d0] sm:$0x70] %v2263_v9  ;;  %v2261_v33 = vsel %vm13522_vm0, %v2202_v27, %v2204_v11  ;;  %vm13529_vm0 = vcmask 1042432  }
 0x3d7   :  { %2318 = vst [vmem:[#allocation2 + $0x1c0] sm:$0x70] %v2261_v33 }
 0x3d8   :  { %v4146_v3 = vpop.permute.xlu1 %4145 }
 0x3d9   :  { %2062 = vrot.lane.b32.xlu1 %v13496_v7, %s8678_s28  ;;  %2056 = vrot.lane.b32.xlu0 %v13497_v20, %s8678_s28  ;;  %v4144_v48 = vpop.permute.xlu0 %4143 }
 0x3da   :  { %v4197_v63 = vsel %vm13523_vm2, %v4144_v48, %v4146_v3  ;;  %vm13530_vm2 = vmmov %vm13529_vm0 }
 0x3db   :  { %4255 = vst [vmem:[#allocation2 + $0x3a8] sm:$0x7] %v4197_v63  ;;  %v13539_v63 = vld [vmem:[#allocation138_spill] sm:$0xff] }
 0x3dc   :  { %v4338_v6 = vld [vmem:[#allocation2 + $0x1d8] sm:$0xff] }
 0x3dd   :  { %2215 = vrot.lane.b32.xlu1 %v8793_v10, %s8679_s3  ;;  %2209 = vrot.lane.b32.xlu0 %v13499_v25, %s8679_s3  ;;  %v4148_v46 = vpop.permute.xlu1 %4147  ;;  %v4337_v26 = vld [vmem:[#allocation2 + $0x1d0] sm:$0xff]  ;;  %v4331_v25 = vld [vmem:[#allocation2 + $0x1a0] sm:$0xff] }
 0x3de   :  { %v4198_v36 = vsel %vm13524_vm9, %v4146_v3, %v4148_v46  ;;  %4257 = vst.msk [vmem:[#allocation2 + $0x3b8] sm:$0x7] %vm13525_vm8, %v4148_v46  ;;  %v4142_v7 = vpop.permute.xlu0 %4141  ;;  %4863 = vmatprep.subr.mxu1 %v4338_v6  ;;  %v4335_v20 = vld [vmem:[#allocation2 + $0x1c0] sm:$0xff]  ;;  %v4333_v10 = vld [vmem:[#allocation2 + $0x1b0] sm:$0xff]  ;;  %vm13531_vm9 = vcmask 236544   ;;  %vm13532_vm8 = vmmov %vm13529_vm0 }
 0x3df   :  { %4256 = vst [vmem:[#allocation2 + $0x3b0] sm:$0x7] %v4198_v36  ;;  %v4196_v49 = vsel %vm13526_vm6, %v4142_v7, %v4144_v48  ;;  %4864 = vmatpush1.msra.mxu1 %v4337_v26  ;;  %4793 = vmatpush1.msra.mxu0 %v4335_v20  ;;  %vm13533_vm6 = vmmov %vm13529_vm0  ;;  %v13538_v48 = vld [vmem:[#allocation139_spill] sm:$0xff]  ;;  %v13543_v20 = vld [vmem:[#allocation170_spill] sm:$0xff] }
 0x3e0   :  { %4254 = vst [vmem:[#allocation2 + $0x3a0] sm:$0x7] %v4196_v49  ;;  %4794 = vmatprep.subr.mxu0 %v4332_v37  ;;  %4865 = vmatprep.subr.mxu1 %v4334_v45  ;;  %v13542_v7 = vld [vmem:[#allocation171_spill] sm:$0xff] }
 0x3e1   :  { %4153 = vrot.lane.b32.xlu1 %v8819_v15, %s8665_s2  ;;  %4151 = vrot.lane.b32.xlu0 %v8833_v17, %s8665_s2 }
 0x3e2   :  { %v3655_v35 = vpop.permute.xlu1 %3654  ;;  %4866 = vmatpush1.msra.mxu1 %v4333_v10  ;;  %4795 = vmatpush1.msra.mxu0 %v4331_v25  ;;  %v4396_v56 = vld [vmem:[#allocation2 + $0x3a8] sm:$0x7]  ;;  %v13546_v25 = vld [vmem:[#allocation202_spill] sm:$0xff] }
 0x3e3   :  { %v3653_v5 = vpop.permute.xlu0 %3652  ;;  %4796 = vmatprep.subr.mxu0 %v4328_v23  ;;  %4867 = vmatprep.subr.mxu1 %v4330_v61  ;;  %v13545_v10 = vld [vmem:[#allocation203_spill] sm:$0xff] }
 0x3e4   :  { %v3706_v12 = vsel %vm3698_vm15, %v3653_v5, %v3655_v35  ;;  %4868 = vmatpush1.msra.mxu1 %v4329_v52  ;;  %4797 = vmatpush1.msra.mxu0 %v4327_v31 }
 0x3e5   :  { %3772 = vst [vmem:[#allocation2 + $0x388] ss:$-28 sps:$4 sm:$0x83] %v3706_v12   ;;  %4155 = vrot.lane.b32.xlu1 %v8959_v41, %s8665_s2  ;;  %4149 = vrot.lane.b32.xlu0 %v8814_v14, %s8665_s2  ;;  %v4398_v62 = vld [vmem:[#allocation2 + $0x3b8] sm:$0x7]  ;;  %v13548_v12 = vld [vmem:[#allocation62_spill] sm:$0xff] }
 0x3e6   :  { %4798 = vmatprep.subr.mxu0 %v4324_v53  ;;  %4869 = vmatprep.subr.mxu1 %v4326_v51  ;;  %v4397_v13 = vld [vmem:[#allocation2 + $0x3b0] sm:$0x7]  ;;  %v13549_v53 = vld [vmem:[#allocation59_spill] sm:$0xff] }
 0x3e7   :  { %v3840_v60 = vpop.permute.xlu1 %3839  ;;  %4870 = vmatpush1.msra.mxu1 %v4325_v24  ;;  %v3838_v32 = vpop.permute.xlu0 %3837  ;;  %4799 = vmatpush1.msra.mxu0 %v4323_v44  ;;  %v4395_v59 = vld [vmem:[#allocation2 + $0x3a0] sm:$0x7] }
 0x3e8   :  { %v3891_v47 = vsel %vm3883_vm10, %v3838_v32, %v3840_v60  ;;  %4800 = vmatprep.subr.mxu0 %v4320_v16  ;;  %4871 = vmatprep.subr.mxu1 %v4322_v30 }
 0x3e9   :  { %3949 = vst [vmem:[#allocation2 + $0x388] sm:$0x1c] %v3891_v47  ;;  %3662 = vrot.lane.b32.xlu1 %v13527_v2, %s8666_s18  ;;  %4872 = vmatpush1.msra.mxu1 %v4321_v29 }
 0x3ea   :  { %3660 = vrot.lane.b32.xlu0 %v13528_v21, %s8666_s18  ;;  %4801 = vmatpush1.msra.mxu0 %v4319_v0 }
 0x3eb   :  { %7988 = vmatprep.subr.msk.mxu0 %vm13529_vm0, %v4396_v56  ;;  %7991 = vmatprep.subr.msk.mxu1 %vm13530_vm2, %v4398_v62  ;;  %v3993_v55 = vpop.permute.xlu1 %3992  ;;  %v3991_v11 = vpop.permute.xlu0 %3990  ;;  %vm13540_vm0 = vmmov %vm13531_vm9  ;;  %v13554_v62 = vld [vmem:[#allocation118_spill] sm:$0xff] }
 0x3ec   :  { %7987 = vmatmul.mubr.msk.f32.vlgmr.msra.gmra.mxu1 %vm4599_vm13, %v10737_v54  ;;  %v4044_v22 = vsel %vm13531_vm9, %v3991_v11, %v3993_v55  ;;  %7984 = vmatmul.mubr.msk.f32.vlgmr.msra.gmra.mxu0 %vm4599_vm13, %v10737_v54  ;;  %vm13541_vm2 = vmmov %vm13540_vm0  ;;  %vm13544_vm9 = vcmask 433152  }
 0x3ed   :  { %7992 = vmatpush1.msk.msra.mxu1 %vm13532_vm8, %v4397_v13  ;;  %4102 = vst [vmem:[#allocation2 + $0x388] sm:$0xe0] %v4044_v22  ;;  %7989 = vmatpush1.msk.msra.mxu0 %vm13533_vm6, %v4395_v59  ;;  %vm13547_vm8 = vcmask 424960   ;;  %vm13552_vm6 = vmmov %vm13544_vm9  ;;  %v13557_v22 = vld [vmem:[#allocation61_spill] sm:$0xff]  ;;  %v13558_v59 = vld [vmem:[#allocation60_spill] sm:$0xff] }
 0x3ee   :  { %3847 = vrot.lane.b32.xlu1 %v13534_v50, %s8667_s4  ;;  %3845 = vrot.lane.b32.xlu0 %v13535_v28, %s8667_s4 }
 0x3ef   :  { %v3657_v57 = vpop.permute.xlu1 %3656  ;;  %v3651_v4 = vpop.permute.xlu0 %3650  ;;  %4988 = vmatprep.mubr.f32.mxu0 %v8680_v58  ;;  %5059 = vmatprep.mubr.f32.mxu1 %v8680_v58 }
 0x3f0   :  { %v3707_v54 = vsel %vm3698_vm15, %v3655_v35, %v3657_v57  ;;  %3774 = vst.msk [vmem:[#allocation2 + $0x378] sm:$0x80] %vm1114_vm11, %v3657_v57  ;;  %v3705_v1 = vsel %vm3698_vm15, %v3651_v4, %v3653_v5 }
 0x3f1   :  { %3778 = vst.msk [vmem:[#allocation2 + $0x398] sm:$0x3] %vm1119_vm12, %v3657_v57  ;;  %3773 = vst [vmem:[#allocation2 + $0x390] ss:$-28 sps:$4 sm:$0x83] %v3707_v54  }
 0x3f2   :  { %3771 = vst [vmem:[#allocation2 + $0x380] ss:$-28 sps:$4 sm:$0x83] %v3705_v1   ;;  %4000 = vrot.lane.b32.xlu1 %v13536_v8, %s8668_s19  ;;  %3998 = vrot.lane.b32.xlu0 %v13537_v38, %s8668_s19 }
 0x3f3   :  { %v3842_v34 = vpop.permute.xlu1 %3841  ;;  %v3836_v9 = vpop.permute.xlu0 %3835 }
 0x3f4   :  { %v3892_v27 = vsel %vm3883_vm10, %v3840_v60, %v3842_v34  ;;  %3951 = vst.msk [vmem:[#allocation2 + $0x398] sm:$0x1c] %vm1333_vm14, %v3842_v34  ;;  %v3890_v33 = vsel %vm3883_vm10, %v3836_v9, %v3838_v32  ;;  %v4392_v3 = vld [vmem:[#allocation2 + $0x388] sm:$0xff]  ;;  %v13550_v60 = vld [vmem:[#allocation94_spill] sm:$0xff]  ;;  %v13560_v34 = vld [vmem:[#allocation93_spill] sm:$0xff] }
 0x3f5   :  { %3950 = vst [vmem:[#allocation2 + $0x390] sm:$0x1c] %v3892_v27  ;;  %3948 = vst [vmem:[#allocation2 + $0x380] sm:$0x1c] %v3890_v33  ;;  %4938 = vmatprep.subr.mxu0 %v4392_v3  ;;  %v13551_v32 = vld [vmem:[#allocation91_spill] sm:$0xff]  ;;  %v13561_v9 = vld [vmem:[#allocation92_spill] sm:$0xff] }
 0x3f6   :  { %3664 = vrot.lane.b32.xlu1 %v13538_v48, %s8666_s18  ;;  %3658 = vrot.lane.b32.xlu0 %v13539_v63, %s8666_s18 }
 0x3f7   :  { %v3995_v6 = vpop.permute.xlu1 %3994  ;;  %v3989_v46 = vpop.permute.xlu0 %3988 }
 0x3f8   :  { %v4045_v26 = vsel %vm13540_vm0, %v3993_v55, %v3995_v6  ;;  %4104 = vst.msk [vmem:[#allocation2 + $0x398] sm:$0xe0] %vm1519_vm3, %v3995_v6  ;;  %v4043_v36 = vsel %vm13541_vm2, %v3989_v46, %v3991_v11  ;;  %vm13553_vm0 = vmmov %vm13552_vm6  ;;  %v13563_v6 = vld [vmem:[#allocation117_spill] sm:$0xff] }
 0x3f9   :  { %4103 = vst [vmem:[#allocation2 + $0x390] sm:$0xe0] %v4045_v26  ;;  %4101 = vst [vmem:[#allocation2 + $0x380] sm:$0xe0] %v4043_v36 }
 0x3fa   :  { %3849 = vrot.lane.b32.xlu1 %v13542_v7, %s8667_s4  ;;  %3843 = vrot.lane.b32.xlu0 %v13543_v20, %s8667_s4  ;;  %vm13555_vm2 = vmmov %vm13547_vm8 }
 0x3fb   :  { %v3164_v49 = vpop.permute.xlu1 %3163  ;;  %v3162_v37 = vpop.permute.xlu0 %3161 }
 0x3fc   :  { %v3215_v45 = vsel %vm13544_vm9, %v3162_v37, %v3164_v49  ;;  %vm13556_vm9 = vmmov %vm13555_vm2 }
 0x3fd   :  { %3281 = vst [vmem:[#allocation2 + $0x368] ss:$-28 sps:$4 sm:$0xc1] %v3215_v45  }
 0x3fe   :  { %4002 = vrot.lane.b32.xlu1 %v13545_v10, %s8668_s19  ;;  %3996 = vrot.lane.b32.xlu0 %v13546_v25, %s8668_s19 }
 0x3ff   :  { %v3349_v35 = vpop.permute.xlu1 %3348  ;;  %v3347_v23 = vpop.permute.xlu0 %3346  ;;  %v4394_v61 = vld [vmem:[#allocation2 + $0x398] sm:$0xff] }
 0x400   :  { %v3400_v5 = vsel %vm13547_vm8, %v3347_v23, %v3349_v35  ;;  %5009 = vmatprep.subr.mxu1 %v4394_v61  ;;  %v4393_v52 = vld [vmem:[#allocation2 + $0x390] sm:$0xff]  ;;  %v4391_v31 = vld [vmem:[#allocation2 + $0x380] sm:$0xff]  ;;  %vm13559_vm8 = vcmask 202756  }
 0x401   :  { %3458 = vst [vmem:[#allocation2 + $0x368] sm:$0xe] %v3400_v5  ;;  %5010 = vmatpush1.msra.mxu1 %v4393_v52  ;;  %4939 = vmatpush1.msra.mxu0 %v4391_v31 }
 0x402   :  { %3171 = vrot.lane.b32.xlu1 %v13548_v12, %s8669_s20  ;;  %3169 = vrot.lane.b32.xlu0 %v13549_v53, %s8669_s20 }
 0x403   :  { %v3502_v51 = vpop.permute.xlu1 %3501  ;;  %v3500_v24 = vpop.permute.xlu0 %3499 }
 0x404   :  { %v3553_v44 = vsel %vm13215_vm1, %v3500_v24, %v3502_v51 }
 0x405   :  { %3611 = vst [vmem:[#allocation2 + $0x368] sm:$0x70] %v3553_v44 }
 0x406   :  { %3356 = vrot.lane.b32.xlu1 %v13550_v60, %s8670_s21  ;;  %3354 = vrot.lane.b32.xlu0 %v13551_v32, %s8670_s21 }
 0x407   :  { %v3166_v16 = vpop.permute.xlu1 %3165  ;;  %v3160_v30 = vpop.permute.xlu0 %3159 }
 0x408   :  { %v3216_v47 = vsel %vm13552_vm6, %v3164_v49, %v3166_v16  ;;  %3283 = vst.msk [vmem:[#allocation2 + $0x358] sm:$0xc0] %vm539_vm4, %v3166_v16  ;;  %v3214_v29 = vsel %vm13553_vm0, %v3160_v30, %v3162_v37  ;;  %vm13562_vm6 = vcmask 449536   ;;  %vm13564_vm0 = vcmask 441344  }
 0x409   :  { %3287 = vst.msk [vmem:[#allocation2 + $0x378] sm:$0x1] %vm544_vm5, %v3166_v16  ;;  %3282 = vst [vmem:[#allocation2 + $0x370] ss:$-28 sps:$4 sm:$0xc1] %v3216_v47  }
 0x40a   :  { %3280 = vst [vmem:[#allocation2 + $0x360] ss:$-28 sps:$4 sm:$0xc1] %v3214_v29   ;;  %3509 = vrot.lane.b32.xlu1 %v13554_v62, %s8671_s22  ;;  %3507 = vrot.lane.b32.xlu0 %v8814_v14, %s8671_s22 }
 0x40b   :  { %v3351_v0 = vpop.permute.xlu1 %3350  ;;  %v3345_v56 = vpop.permute.xlu0 %3344 }
 0x40c   :  { %v3401_v55 = vsel %vm13555_vm2, %v3349_v35, %v3351_v0  ;;  %3460 = vst.msk [vmem:[#allocation2 + $0x378] sm:$0xe] %vm758_vm7, %v3351_v0  ;;  %v3399_v11 = vsel %vm13556_vm9, %v3345_v56, %v3347_v23  ;;  %v4388_v13 = vld [vmem:[#allocation2 + $0x368] sm:$0xff]  ;;  %vm13565_vm2 = vmmov %vm13562_vm6  ;;  %vm13566_vm9 = vcmask 198656  }
 0x40d   :  { %3459 = vst [vmem:[#allocation2 + $0x370] sm:$0xe] %v3401_v55  ;;  %3457 = vst [vmem:[#allocation2 + $0x360] sm:$0xe] %v3399_v11  ;;  %4940 = vmatprep.subr.mxu0 %v4388_v13 }
 0x40e   :  { %3173 = vrot.lane.b32.xlu1 %v13557_v22, %s8669_s20  ;;  %3167 = vrot.lane.b32.xlu0 %v13558_v59, %s8669_s20 }
 0x40f   :  { %v3504_v57 = vpop.permute.xlu1 %3503  ;;  %v3498_v4 = vpop.permute.xlu0 %3497 }
 0x410   :  { %v3554_v54 = vsel %vm13215_vm1, %v3502_v51, %v3504_v57  ;;  %3613 = vst.msk [vmem:[#allocation2 + $0x378] sm:$0x70] %vm13559_vm8, %v3504_v57  ;;  %v3552_v1 = vsel %vm13215_vm1, %v3498_v4, %v3500_v24  ;;  %vm13567_vm8 = vmmov %vm13565_vm2 }
 0x411   :  { %3612 = vst [vmem:[#allocation2 + $0x370] sm:$0x70] %v3554_v54  ;;  %3610 = vst [vmem:[#allocation2 + $0x360] sm:$0x70] %v3552_v1 }
 0x412   :  { %3358 = vrot.lane.b32.xlu1 %v13560_v34, %s8670_s21  ;;  %3352 = vrot.lane.b32.xlu0 %v13561_v9, %s8670_s21 }
 0x413   :  { %v2858_v27 = vpop.permute.xlu1 %2857  ;;  %v2856_v33 = vpop.permute.xlu0 %2855 }
 0x414   :  { %v2909_v3 = vsel %vm13562_vm6, %v2856_v33, %v2858_v27  ;;  %vm13568_vm6 = vmmov %vm13564_vm0 }
 0x415   :  { %2967 = vst [vmem:[#allocation2 + $0x348] sm:$0x7] %v2909_v3  ;;  %vm13570_vm1 = vmmov %vm13568_vm6 }
 0x416   :  { %3511 = vrot.lane.b32.xlu1 %v8819_v15, %s8671_s22  ;;  %3505 = vrot.lane.b32.xlu0 %v13563_v6, %s8671_s22 }
 0x417   :  { %v3011_v46 = vpop.permute.xlu1 %3010  ;;  %v3009_v26 = vpop.permute.xlu0 %3008  ;;  %v4390_v36 = vld [vmem:[#allocation2 + $0x378] sm:$0xff] }
 0x418   :  { %v3062_v49 = vsel %vm13564_vm0, %v3009_v26, %v3011_v46  ;;  %5011 = vmatprep.subr.mxu1 %v4390_v36  ;;  %v4389_v37 = vld [vmem:[#allocation2 + $0x370] sm:$0xff]  ;;  %v4387_v45 = vld [vmem:[#allocation2 + $0x360] sm:$0xff]  ;;  %vm13569_vm0 = vcmask 201731  }
 0x419   :  { %3120 = vst [vmem:[#allocation2 + $0x348] sm:$0x38] %v3062_v49  ;;  %5012 = vmatpush1.msra.mxu1 %v4389_v37  ;;  %4941 = vmatpush1.msra.mxu0 %v4387_v45 }
 0x41a   :  { %2865 = vrot.lane.b32.xlu1 %v8819_v15, %s8672_s23  ;;  %2863 = vrot.lane.b32.xlu0 %v8833_v17, %s8672_s23 }
 0x41b   :  { %v2860_v35 = vpop.permute.xlu1 %2859  ;;  %v2854_v23 = vpop.permute.xlu0 %2853 }
 0x41c   :  { %v2910_v61 = vsel %vm13565_vm2, %v2858_v27, %v2860_v35  ;;  %2969 = vst.msk [vmem:[#allocation2 + $0x358] sm:$0x7] %vm13566_vm9, %v2860_v35  ;;  %v2908_v5 = vsel %vm13567_vm8, %v2854_v23, %v2856_v33  ;;  %vm13571_vm2 = vcmask 629760   ;;  %vm13573_vm9 = vcmask 457728  }
 0x41d   :  { %2968 = vst [vmem:[#allocation2 + $0x350] sm:$0x7] %v2910_v61  ;;  %2966 = vst [vmem:[#allocation2 + $0x340] sm:$0x7] %v2908_v5 }
 0x41e   :  { %3018 = vrot.lane.b32.xlu1 %v8969_v43, %s8673_s24  ;;  %3016 = vrot.lane.b32.xlu0 %v8952_v39, %s8673_s24  ;;  %vm13574_vm8 = vmmov %vm13571_vm2 }
 0x41f   :  { %v3013_v52 = vpop.permute.xlu1 %3012  ;;  %v3007_v31 = vpop.permute.xlu0 %3006 }
 0x420   :  { %v3063_v17 = vsel %vm13568_vm6, %v3011_v46, %v3013_v52  ;;  %3122 = vst.msk [vmem:[#allocation2 + $0x358] sm:$0x38] %vm13569_vm0, %v3013_v52  ;;  %v3061_v51 = vsel %vm13570_vm1, %v3007_v31, %v3009_v26  ;;  %v4384_v24 = vld [vmem:[#allocation2 + $0x348] sm:$0xff]  ;;  %vm13572_vm1 = vcmask 621568   ;;  %vm13575_vm6 = vmmov %vm13571_vm2 }
 0x421   :  { %3121 = vst [vmem:[#allocation2 + $0x350] sm:$0x38] %v3063_v17  ;;  %3119 = vst [vmem:[#allocation2 + $0x340] sm:$0x38] %v3061_v51  ;;  %4942 = vmatprep.subr.mxu0 %v4384_v24 }
 0x422   :  { %2867 = vrot.lane.b32.xlu1 %v8959_v41, %s8672_s23  ;;  %2861 = vrot.lane.b32.xlu0 %v8814_v14, %s8672_s23  ;;  %vm13576_vm0 = vmmov %vm13572_vm1 }
 0x423   :  { %v2367_v43 = vpop.permute.xlu1 %2366  ;;  %v2365_v39 = vpop.permute.xlu0 %2364 }
 0x424   :  { %v2418_v44 = vsel %vm13571_vm2, %v2365_v39, %v2367_v43  ;;  %vm13577_vm2 = vmmov %vm13576_vm0 }
 0x425   :  { %2484 = vst [vmem:[#allocation2 + $0x328] ss:$-28 sps:$4 sm:$0x83] %v2418_v44  }
 0x426   :  { %3020 = vrot.lane.b32.xlu1 %v8966_v42, %s8673_s24  ;;  %3014 = vrot.lane.b32.xlu0 %v8955_v40, %s8673_s24 }
 0x427   :  { %v2552_v16 = vpop.permute.xlu1 %2551  ;;  %v2550_v30 = vpop.permute.xlu0 %2549  ;;  %v4386_v47 = vld [vmem:[#allocation2 + $0x358] sm:$0xff] }
 0x428   :  { %v2603_v29 = vsel %vm13572_vm1, %v2550_v30, %v2552_v16  ;;  %5013 = vmatprep.subr.mxu1 %v4386_v47  ;;  %v4385_v41 = vld [vmem:[#allocation2 + $0x350] sm:$0xff]  ;;  %v4383_v0 = vld [vmem:[#allocation2 + $0x340] sm:$0xff]  ;;  %vm13578_vm1 = vmmov %vm13573_vm9 }
 0x429   :  { %2661 = vst [vmem:[#allocation2 + $0x328] sm:$0x1c] %v2603_v29  ;;  %5014 = vmatpush1.msra.mxu1 %v4385_v41  ;;  %4943 = vmatpush1.msra.mxu0 %v4383_v0  ;;  %v4368_v47 = vld [vmem:[#allocation2 + $0x2c8] sm:$0xff]  ;;  %v4370_v29 = vld [vmem:[#allocation2 + $0x2d8] sm:$0xff]  ;;  %v4369_v0 = vld [vmem:[#allocation2 + $0x2d0] sm:$0xff] }
 0x42a   :  { %2374 = vrot.lane.b32.xlu1 %v13527_v2, %s8674_s25  ;;  %2372 = vrot.lane.b32.xlu0 %v13528_v21, %s8674_s25 }
 0x42b   :  { %v2705_v42 = vpop.permute.xlu1 %2704  ;;  %v2703_v56 = vpop.permute.xlu0 %2702 }
 0x42c   :  { %v2756_v40 = vsel %vm13573_vm9, %v2703_v56, %v2705_v42  ;;  %vm13579_vm9 = vmmov %vm13578_vm1 }
 0x42d   :  { %2814 = vst [vmem:[#allocation2 + $0x328] sm:$0xe0] %v2756_v40  ;;  %v13595_v40 = vld [vmem:[#allocation17_spill] sm:$0xff] }
 0x42e   :  { %2559 = vrot.lane.b32.xlu1 %v13534_v50, %s8675_s1  ;;  %2557 = vrot.lane.b32.xlu0 %v13535_v28, %s8675_s1 }
 0x42f   :  { %v2369_v55 = vpop.permute.xlu1 %2368  ;;  %v2363_v11 = vpop.permute.xlu0 %2362 }
 0x430   :  { %v2419_v13 = vsel %vm13574_vm8, %v2367_v43, %v2369_v55  ;;  %2486 = vst.msk [vmem:[#allocation2 + $0x318] sm:$0x80] %vm1114_vm11, %v2369_v55  ;;  %v2417_v2 = vsel %vm13575_vm6, %v2363_v11, %v2365_v39  ;;  %vm13580_vm8 = vcmask 654336   ;;  %vm13581_vm6 = vcmask 646144   ;;  %v4366_v11 = vld [vmem:[#allocation2 + $0x2b8] sm:$0xff] }
 0x431   :  { %2490 = vst.msk [vmem:[#allocation2 + $0x338] sm:$0x3] %vm1119_vm12, %v2369_v55  ;;  %2485 = vst [vmem:[#allocation2 + $0x330] ss:$-28 sps:$4 sm:$0x83] %v2419_v13   ;;  %v4364_v55 = vld [vmem:[#allocation2 + $0x2a8] sm:$0xff] }
 0x432   :  { %2483 = vst [vmem:[#allocation2 + $0x320] ss:$-28 sps:$4 sm:$0x83] %v2417_v2   ;;  %2712 = vrot.lane.b32.xlu1 %v13536_v8, %s8676_s26  ;;  %2710 = vrot.lane.b32.xlu0 %v13537_v38, %s8676_s26  ;;  %v4365_v2 = vld [vmem:[#allocation2 + $0x2b0] sm:$0xff] }
 0x433   :  { %v2554_v21 = vpop.permute.xlu1 %2553  ;;  %v2548_v50 = vpop.permute.xlu0 %2547 }
 0x434   :  { %v2604_v28 = vsel %vm13576_vm0, %v2552_v16, %v2554_v21  ;;  %2663 = vst.msk [vmem:[#allocation2 + $0x338] sm:$0x1c] %vm1333_vm14, %v2554_v21  ;;  %v2602_v57 = vsel %vm13577_vm2, %v2548_v50, %v2550_v30  ;;  %v4380_v4 = vld [vmem:[#allocation2 + $0x328] sm:$0xff]  ;;  %vm13582_vm0 = vcmask 637952   ;;  %vm13583_vm2 = vmmov %vm13580_vm8  ;;  %v4363_v50 = vld [vmem:[#allocation2 + $0x2a0] sm:$0xff] }
 0x435   :  { %2662 = vst [vmem:[#allocation2 + $0x330] sm:$0x1c] %v2604_v28  ;;  %2660 = vst [vmem:[#allocation2 + $0x320] sm:$0x1c] %v2602_v57  ;;  %4944 = vmatprep.subr.mxu0 %v4380_v4  ;;  %v4360_v57 = vld [vmem:[#allocation2 + $0x288] sm:$0xff]  ;;  %v4362_v4 = vld [vmem:[#allocation2 + $0x298] sm:$0xff] }
 0x436   :  { %2376 = vrot.lane.b32.xlu1 %v13538_v48, %s8674_s25  ;;  %2370 = vrot.lane.b32.xlu0 %v13539_v63, %s8674_s25 }
 0x437   :  { %v2707_v8 = vpop.permute.xlu1 %2706  ;;  %v2701_v38 = vpop.permute.xlu0 %2700 }
 0x438   :  { %v2757_v54 = vsel %vm13578_vm1, %v2705_v42, %v2707_v8  ;;  %2816 = vst.msk [vmem:[#allocation2 + $0x338] sm:$0xe0] %vm1519_vm3, %v2707_v8  ;;  %v2755_v1 = vsel %vm13579_vm9, %v2701_v38, %v2703_v56  ;;  %vm13584_vm1 = vmmov %vm13583_vm2  ;;  %v13594_v42 = vld [vmem:[#allocation29_spill] sm:$0xff]  ;;  %v4367_v56 = vld [vmem:[#allocation2 + $0x2c0] sm:$0xff] }
 0x439   :  { %2815 = vst [vmem:[#allocation2 + $0x330] sm:$0xe0] %v2757_v54  ;;  %2813 = vst [vmem:[#allocation2 + $0x320] sm:$0xe0] %v2755_v1  ;;  %v4361_v8 = vld [vmem:[#allocation2 + $0x290] sm:$0xff]  ;;  %v4359_v1 = vld [vmem:[#allocation2 + $0x280] sm:$0xff] }
 0x43a   :  { %2561 = vrot.lane.b32.xlu1 %v13542_v7, %s8675_s1  ;;  %2555 = vrot.lane.b32.xlu0 %v13543_v20, %s8675_s1  ;;  %vm13585_vm9 = vmmov %vm13581_vm6  ;;  %v13596_v54 = vld [vmem:[#allocation144_spill] sm:$0xff] }
 0x43b   :  { %v1876_v48 = vpop.permute.xlu1 %1875  ;;  %v1874_v27 = vpop.permute.xlu0 %1873 }
 0x43c   :  { %v1927_v63 = vsel %vm13580_vm8, %v1874_v27, %v1876_v48  ;;  %vm13586_vm8 = vmmov %vm13581_vm6 }
 0x43d   :  { %1993 = vst [vmem:[#allocation2 + $0x308] ss:$-28 sps:$4 sm:$0xc1] %v1927_v63  }
 0x43e   :  { %2714 = vrot.lane.b32.xlu1 %v13545_v10, %s8676_s26  ;;  %2708 = vrot.lane.b32.xlu0 %v13546_v25, %s8676_s26 }
 0x43f   :  { %v2061_v33 = vpop.permute.xlu1 %2060  ;;  %v2059_v3 = vpop.permute.xlu0 %2058  ;;  %v4382_v46 = vld [vmem:[#allocation2 + $0x338] sm:$0xff] }
 0x440   :  { %v2112_v26 = vsel %vm13581_vm6, %v2059_v3, %v2061_v33  ;;  %5015 = vmatprep.subr.mxu1 %v4382_v46  ;;  %v4381_v7 = vld [vmem:[#allocation2 + $0x330] sm:$0xff]  ;;  %v4379_v36 = vld [vmem:[#allocation2 + $0x320] sm:$0xff]  ;;  %vm13587_vm6 = vmmov %vm13582_vm0 }
 0x441   :  { %2170 = vst [vmem:[#allocation2 + $0x308] sm:$0xe] %v2112_v26  ;;  %5016 = vmatpush1.msra.mxu1 %v4381_v7  ;;  %4945 = vmatpush1.msra.mxu0 %v4379_v36  ;;  %v11132_v46 = vld [vmem:[#allocation3] sm:$0xff]  ;;  %v13603_v36 = vld [vmem:[#allocation176_spill] sm:$0xff] }
 0x442   :  { %1883 = vrot.lane.b32.xlu1 %v13548_v12, %s8677_s27  ;;  %1881 = vrot.lane.b32.xlu0 %v13549_v53, %s8677_s27 }
 0x443   :  { %v2214_v20 = vpop.permute.xlu1 %2213  ;;  %v2212_v10 = vpop.permute.xlu0 %2211 }
 0x444   :  { %v2265_v25 = vsel %vm13582_vm0, %v2212_v10, %v2214_v20  ;;  %vm13588_vm0 = vcmask 202756  }
 0x445   :  { %2323 = vst [vmem:[#allocation2 + $0x308] sm:$0x70] %v2265_v25 }
 0x446   :  { %2068 = vrot.lane.b32.xlu1 %v13550_v60, %s8678_s28  ;;  %2066 = vrot.lane.b32.xlu0 %v13551_v32, %s8678_s28 }
 0x447   :  { %v1878_v49 = vpop.permute.xlu1 %1877  ;;  %v1872_v37 = vpop.permute.xlu0 %1871 }
 0x448   :  { %v1928_v45 = vsel %vm13583_vm2, %v1876_v48, %v1878_v49  ;;  %1995 = vst.msk [vmem:[#allocation2 + $0x2f8] sm:$0xc0] %vm539_vm4, %v1878_v49  ;;  %v1926_v12 = vsel %vm13584_vm1, %v1872_v37, %v1874_v27  ;;  %vm13589_vm2 = vmmov %vm13587_vm6  ;;  %vm13590_vm1 = vcmask 228352   ;;  %v13597_v48 = vld [vmem:[#allocation141_spill] sm:$0xff] }
 0x449   :  { %1999 = vst.msk [vmem:[#allocation2 + $0x318] sm:$0x1] %vm544_vm5, %v1878_v49  ;;  %1994 = vst [vmem:[#allocation2 + $0x310] ss:$-28 sps:$4 sm:$0xc1] %v1928_v45   ;;  %v13605_v45 = vld [vmem:[#allocation208_spill] sm:$0xff] }
 0x44a   :  { %1992 = vst [vmem:[#allocation2 + $0x300] ss:$-28 sps:$4 sm:$0xc1] %v1926_v12   ;;  %2221 = vrot.lane.b32.xlu1 %v13554_v62, %s8679_s3  ;;  %2219 = vrot.lane.b32.xlu0 %v8814_v14, %s8679_s3  ;;  %v13606_v12 = vld [vmem:[#allocation205_spill] sm:$0xff] }
 0x44b   :  { %v2063_v53 = vpop.permute.xlu1 %2062  ;;  %v2057_v60 = vpop.permute.xlu0 %2056 }
 0x44c   :  { %v2113_v32 = vsel %vm13585_vm9, %v2061_v33, %v2063_v53  ;;  %2172 = vst.msk [vmem:[#allocation2 + $0x318] sm:$0xe] %vm758_vm7, %v2063_v53  ;;  %v2111_v35 = vsel %vm13586_vm8, %v2057_v60, %v2059_v3  ;;  %v4376_v23 = vld [vmem:[#allocation2 + $0x308] sm:$0xff]  ;;  %vm13591_vm9 = vmmov %vm13590_vm1  ;;  %vm13592_vm8 = vcmask 198656  }
 0x44d   :  { %2171 = vst [vmem:[#allocation2 + $0x310] sm:$0xe] %v2113_v32  ;;  %2169 = vst [vmem:[#allocation2 + $0x300] sm:$0xe] %v2111_v35  ;;  %4946 = vmatprep.subr.mxu0 %v4376_v23 }
 0x44e   :  { %1885 = vrot.lane.b32.xlu1 %v13557_v22, %s8677_s27  ;;  %1879 = vrot.lane.b32.xlu0 %v13558_v59, %s8677_s27 }
 0x44f   :  { %v2216_v62 = vpop.permute.xlu1 %2215  ;;  %v2210_v14 = vpop.permute.xlu0 %2209 }
 0x450   :  { %v2266_v61 = vsel %vm13587_vm6, %v2214_v20, %v2216_v62  ;;  %2325 = vst.msk [vmem:[#allocation2 + $0x318] sm:$0x70] %vm13588_vm0, %v2216_v62  ;;  %v2264_v5 = vsel %vm13589_vm2, %v2210_v14, %v2212_v10  ;;  %vm13593_vm6 = vmmov %vm13590_vm1  ;;  %v4373_v44 = vld [vmem:[#allocation2 + $0x2f0] sm:$0xff]  ;;  %vm13598_vm0 = vcmask 1042432   ;;  %v13607_v62 = vld [vmem:[#allocation143_spill] sm:$0xff] }
 0x451   :  { %2324 = vst [vmem:[#allocation2 + $0x310] sm:$0x70] %v2266_v61  ;;  %2322 = vst [vmem:[#allocation2 + $0x300] sm:$0x70] %v2264_v5  ;;  %v4371_v16 = vld [vmem:[#allocation2 + $0x2e0] sm:$0xff]  ;;  %v13604_v20 = vld [vmem:[#allocation173_spill] sm:$0xff] }
 0x452   :  { %2070 = vrot.lane.b32.xlu1 %v13560_v34, %s8678_s28  ;;  %2064 = vrot.lane.b32.xlu0 %v13561_v9, %s8678_s28  ;;  %vm13599_vm2 = vmmov %vm13598_vm0  ;;  %v13608_v14 = vld [vmem:[#allocation142_spill] sm:$0xff] }
 0x453   :  { %v4154_v22 = vpop.permute.xlu1 %4153  ;;  %v4152_v52 = vpop.permute.xlu0 %4151 }
 0x454   :  { %v4200_v59 = vsel %vm13590_vm1, %v4152_v52, %v4154_v22  ;;  %vm13600_vm1 = vcmask 236544  }
 0x455   :  { %4259 = vst [vmem:[#allocation2 + $0x4e8] sm:$0x7] %v4200_v59  ;;  %v13611_v59 = vld [vmem:[#allocation175_spill] sm:$0xff] }
 0x456   :  { %2223 = vrot.lane.b32.xlu1 %v8819_v15, %s8679_s3  ;;  %2217 = vrot.lane.b32.xlu0 %v13563_v6, %s8679_s3  ;;  %v4372_v15 = vld [vmem:[#allocation2 + $0x2e8] sm:$0xff]  ;;  %v4374_v6 = vld [vmem:[#allocation2 + $0x2f8] sm:$0xff] }
 0x457   :  { %v4156_v31 = vpop.permute.xlu1 %4155  ;;  %v4150_v17 = vpop.permute.xlu0 %4149  ;;  %v4378_v51 = vld [vmem:[#allocation2 + $0x318] sm:$0xff] }
 0x458   :  { %v4201_v24 = vsel %vm13591_vm9, %v4154_v22, %v4156_v31  ;;  %4261 = vst.msk [vmem:[#allocation2 + $0x4f8] sm:$0x7] %vm13592_vm8, %v4156_v31  ;;  %v4199_v34 = vsel %vm13593_vm6, %v4150_v17, %v4152_v52  ;;  %5017 = vmatprep.subr.mxu1 %v4378_v51  ;;  %v4377_v9 = vld [vmem:[#allocation2 + $0x310] sm:$0xff]  ;;  %v4375_v43 = vld [vmem:[#allocation2 + $0x300] sm:$0xff]  ;;  %vm13601_vm9 = vmmov %vm13598_vm0 }
 0x459   :  { %4260 = vst [vmem:[#allocation2 + $0x4f0] sm:$0x7] %v4201_v24  ;;  %4258 = vst [vmem:[#allocation2 + $0x4e0] sm:$0x7] %v4199_v34  ;;  %5018 = vmatpush1.msra.mxu1 %v4377_v9  ;;  %4947 = vmatpush1.msra.mxu0 %v4375_v43  ;;  %v13612_v31 = vld [vmem:[#allocation174_spill] sm:$0xff]  ;;  %v13614_v34 = vld [vmem:[#allocation207_spill] sm:$0xff] }
 0x45a   :  { %4161 = vrot.lane.b32.xlu1 %v8839_v18, %s8665_s2  ;;  %4159 = vrot.lane.b32.xlu0 %v8843_v19, %s8665_s2  ;;  %vm13602_vm8 = vmmov %vm13598_vm0  ;;  %v13615_v9 = vld [vmem:[#allocation206_spill] sm:$0xff] }
 0x45b   :  { %4948 = vmatprep.subr.mxu0 %v4372_v15  ;;  %5019 = vmatprep.subr.mxu1 %v4374_v6  ;;  %v3663_v39 = vpop.permute.xlu1 %3662  ;;  %vm13609_vm6 = vmmov %vm13600_vm1 }
 0x45c   :  { %5020 = vmatpush1.msra.mxu1 %v4373_v44  ;;  %v3661_v30 = vpop.permute.xlu0 %3660  ;;  %4949 = vmatpush1.msra.mxu0 %v4371_v16  ;;  %v4436_v27 = vld [vmem:[#allocation2 + $0x4e8] sm:$0x7] }
 0x45d   :  { %v3709_v41 = vsel %vm3698_vm15, %v3661_v30, %v3663_v39  ;;  %4950 = vmatprep.subr.mxu0 %v4368_v47  ;;  %5021 = vmatprep.subr.mxu1 %v4370_v29  ;;  %v13618_v47 = vld [vmem:[#allocation63_spill] sm:$0xff] }
 0x45e   :  { %3780 = vst [vmem:[#allocation2 + $0x4c8] ss:$-28 sps:$4 sm:$0x83] %v3709_v41   ;;  %4163 = vrot.lane.b32.xlu1 %v13594_v42, %s8665_s2  ;;  %5022 = vmatpush1.msra.mxu1 %v4369_v0 }
 0x45f   :  { %4157 = vrot.lane.b32.xlu0 %v13595_v40, %s8665_s2  ;;  %4951 = vmatpush1.msra.mxu0 %v4367_v56  ;;  %v4438_v38 = vld [vmem:[#allocation2 + $0x4f8] sm:$0x7]  ;;  %v13620_v56 = vld [vmem:[#allocation98_spill] sm:$0xff] }
 0x460   :  { %4952 = vmatprep.subr.mxu0 %v4364_v55  ;;  %5023 = vmatprep.subr.mxu1 %v4366_v11  ;;  %v3848_v13 = vpop.permute.xlu1 %3847  ;;  %v3846_v21 = vpop.permute.xlu0 %3845  ;;  %v4437_v26 = vld [vmem:[#allocation2 + $0x4f0] sm:$0x7]  ;;  %v4435_v7 = vld [vmem:[#allocation2 + $0x4e0] sm:$0x7]  ;;  %v13621_v55 = vld [vmem:[#allocation95_spill] sm:$0xff] }
 0x461   :  { %5024 = vmatpush1.msra.mxu1 %v4365_v2  ;;  %v3894_v28 = vsel %vm3883_vm10, %v3846_v21, %v3848_v13  ;;  %4953 = vmatpush1.msra.mxu0 %v4363_v50  ;;  %v13624_v50 = vld [vmem:[#allocation120_spill] sm:$0xff] }
 0x462   :  { %3953 = vst [vmem:[#allocation2 + $0x4c8] sm:$0x1c] %v3894_v28  ;;  %4954 = vmatprep.subr.mxu0 %v4360_v57  ;;  %5025 = vmatprep.subr.mxu1 %v4362_v4 }
 0x463   :  { %3670 = vrot.lane.b32.xlu1 %v13596_v54, %s8666_s18  ;;  %5026 = vmatpush1.msra.mxu1 %v4361_v8 }
 0x464   :  { %3668 = vrot.lane.b32.xlu0 %v13597_v48, %s8666_s18  ;;  %4955 = vmatpush1.msra.mxu0 %v4359_v1  ;;  %v4001_v63 = vpop.permute.xlu1 %4000  ;;  %v3999_v33 = vpop.permute.xlu0 %3998  ;;  %v13627_v1 = vld [vmem:[#allocation65_spill] sm:$0xff] }
 0x465   :  { %7994 = vmatprep.subr.msk.mxu0 %vm13598_vm0, %v4436_v27  ;;  %7997 = vmatprep.subr.msk.mxu1 %vm13599_vm2, %v4438_v38  ;;  %v4047_v3 = vsel %vm13600_vm1, %v3999_v33, %v4001_v63  ;;  %vm13610_vm0 = vmmov %vm13600_vm1  ;;  %vm13613_vm2 = vcmask 433152   ;;  %vm13616_vm1 = vcmask 424960   ;;  %v13628_v27 = vld [vmem:[#allocation64_spill] sm:$0xff] }
 0x466   :  { %7993 = vmatmul.mubr.msk.f32.vlgmr.msra.gmra.mxu1 %vm4599_vm13, %v11132_v46  ;;  %4106 = vst [vmem:[#allocation2 + $0x4c8] sm:$0xe0] %v4047_v3  ;;  %7990 = vmatmul.mubr.msk.f32.vlgmr.msra.gmra.mxu0 %vm4599_vm13, %v11132_v46 }
 0x467   :  { %7998 = vmatpush1.msk.msra.mxu1 %vm13601_vm9, %v4437_v26  ;;  %7995 = vmatpush1.msk.msra.mxu0 %vm13602_vm8, %v4435_v7  ;;  %vm13619_vm9 = vcmask 261120   ;;  %vm13622_vm8 = vmmov %vm13613_vm2  ;;  %v13632_v7 = vld [vmem:[#allocation97_spill] sm:$0xff] }
 0x468   :  { %3855 = vrot.lane.b32.xlu1 %v13603_v36, %s8667_s4  ;;  %3853 = vrot.lane.b32.xlu0 %v13604_v20, %s8667_s4  ;;  %v3665_v10 = vpop.permute.xlu1 %3664  ;;  %v3659_v25 = vpop.permute.xlu0 %3658 }
 0x469   :  { %v3710_v49 = vsel %vm3698_vm15, %v3663_v39, %v3665_v10  ;;  %3782 = vst.msk [vmem:[#allocation2 + $0x4b8] sm:$0x80] %vm1114_vm11, %v3665_v10  ;;  %v3708_v37 = vsel %vm3698_vm15, %v3659_v25, %v3661_v30  ;;  %5142 = vmatprep.mubr.f32.mxu0 %v8680_v58  ;;  %5213 = vmatprep.mubr.f32.mxu1 %v8680_v58  ;;  %v13617_v30 = vld [vmem:[#allocation66_spill] sm:$0xff] }
 0x46a   :  { %3786 = vst.msk [vmem:[#allocation2 + $0x4d8] sm:$0x3] %vm1119_vm12, %v3665_v10  ;;  %3781 = vst [vmem:[#allocation2 + $0x4d0] ss:$-28 sps:$4 sm:$0x83] %v3710_v49   ;;  %v13633_v10 = vld [vmem:[#allocation96_spill] sm:$0xff] }
 0x46b   :  { %3779 = vst [vmem:[#allocation2 + $0x4c0] ss:$-28 sps:$4 sm:$0x83] %v3708_v37  }
 0x46c   :  { %4008 = vrot.lane.b32.xlu1 %v13605_v45, %s8668_s19  ;;  %4006 = vrot.lane.b32.xlu0 %v13606_v12, %s8668_s19  ;;  %v3850_v53 = vpop.permute.xlu1 %3849  ;;  %v3844_v60 = vpop.permute.xlu0 %3843 }
 0x46d   :  { %v3895_v32 = vsel %vm3883_vm10, %v3848_v13, %v3850_v53  ;;  %3955 = vst.msk [vmem:[#allocation2 + $0x4d8] sm:$0x1c] %vm1333_vm14, %v3850_v53  ;;  %v3893_v35 = vsel %vm3883_vm10, %v3844_v60, %v3846_v21  ;;  %v4432_v23 = vld [vmem:[#allocation2 + $0x4c8] sm:$0xff] }
 0x46e   :  { %3954 = vst [vmem:[#allocation2 + $0x4d0] sm:$0x1c] %v3895_v32  ;;  %3952 = vst [vmem:[#allocation2 + $0x4c0] sm:$0x1c] %v3893_v35  ;;  %5092 = vmatprep.subr.mxu0 %v4432_v23  ;;  %v13635_v53 = vld [vmem:[#allocation119_spill] sm:$0xff] }
 0x470   :  { %3672 = vrot.lane.b32.xlu1 %v13607_v62, %s8666_s18  ;;  %3666 = vrot.lane.b32.xlu0 %v13608_v14, %s8666_s18  ;;  %v4003_v61 = vpop.permute.xlu1 %4002  ;;  %v3997_v5 = vpop.permute.xlu0 %3996 }
 0x471   :  { %v4048_v22 = vsel %vm13609_vm6, %v4001_v63, %v4003_v61  ;;  %4108 = vst.msk [vmem:[#allocation2 + $0x4d8] sm:$0xe0] %vm1519_vm3, %v4003_v61  ;;  %v4046_v52 = vsel %vm13610_vm0, %v3997_v5, %v3999_v33  ;;  %vm13623_vm6 = vmmov %vm13613_vm2 }
 0x472   :  { %4107 = vst [vmem:[#allocation2 + $0x4d0] sm:$0xe0] %v4048_v22  ;;  %4105 = vst [vmem:[#allocation2 + $0x4c0] sm:$0xe0] %v4046_v52 }
 0x473   :  { %vm13625_vm0 = vmmov %vm13616_vm1 }
 0x474   :  { %3857 = vrot.lane.b32.xlu1 %v13611_v59, %s8667_s4  ;;  %3851 = vrot.lane.b32.xlu0 %v13612_v31, %s8667_s4  ;;  %v3172_v17 = vpop.permute.xlu1 %3171  ;;  %v3170_v51 = vpop.permute.xlu0 %3169 }
 0x475   :  { %v3218_v24 = vsel %vm13613_vm2, %v3170_v51, %v3172_v17  ;;  %vm13626_vm2 = vmmov %vm13625_vm0 }
 0x476   :  { %3289 = vst [vmem:[#allocation2 + $0x4a8] ss:$-28 sps:$4 sm:$0xc1] %v3218_v24   ;;  %v13640_v24 = vld [vmem:[#allocation31_spill] sm:$0xff] }
 0x478   :  { %4010 = vrot.lane.b32.xlu1 %v13614_v34, %s8668_s19  ;;  %4004 = vrot.lane.b32.xlu0 %v13615_v9, %s8668_s19  ;;  %v3357_v43 = vpop.permute.xlu1 %3356  ;;  %v3355_v15 = vpop.permute.xlu0 %3354  ;;  %v4434_v6 = vld [vmem:[#allocation2 + $0x4d8] sm:$0xff] }
 0x479   :  { %v3403_v39 = vsel %vm13616_vm1, %v3355_v15, %v3357_v43  ;;  %5163 = vmatprep.subr.mxu1 %v4434_v6  ;;  %v4433_v44 = vld [vmem:[#allocation2 + $0x4d0] sm:$0xff]  ;;  %v4431_v16 = vld [vmem:[#allocation2 + $0x4c0] sm:$0xff]  ;;  %vm13629_vm1 = vmmov %vm13619_vm9 }
 0x47a   :  { %3462 = vst [vmem:[#allocation2 + $0x4a8] sm:$0xe] %v3403_v39  ;;  %5164 = vmatpush1.msra.mxu1 %v4433_v44  ;;  %5093 = vmatpush1.msra.mxu0 %v4431_v16 }
 0x47c   :  { %3179 = vrot.lane.b32.xlu1 %v13617_v30, %s8669_s20  ;;  %3177 = vrot.lane.b32.xlu0 %v13618_v47, %s8669_s20  ;;  %v3510_v29 = vpop.permute.xlu1 %3509  ;;  %v3508_v41 = vpop.permute.xlu0 %3507 }
 0x47d   :  { %v3556_v0 = vsel %vm13619_vm9, %v3508_v41, %v3510_v29  ;;  %vm13630_vm9 = vcmask 202756  }
 0x47e   :  { %3615 = vst [vmem:[#allocation2 + $0x4a8] sm:$0x70] %v3556_v0  ;;  %v13645_v0 = vld [vmem:[#allocation30_spill] sm:$0xff] }
 0x480   :  { %3364 = vrot.lane.b32.xlu1 %v13620_v56, %s8670_s21  ;;  %3362 = vrot.lane.b32.xlu0 %v13621_v55, %s8670_s21  ;;  %v3174_v11 = vpop.permute.xlu1 %3173  ;;  %v3168_v13 = vpop.permute.xlu0 %3167 }
 0x481   :  { %v3219_v2 = vsel %vm13622_vm8, %v3172_v17, %v3174_v11  ;;  %3291 = vst.msk [vmem:[#allocation2 + $0x498] sm:$0xc0] %vm539_vm4, %v3174_v11  ;;  %v3217_v21 = vsel %vm13623_vm6, %v3168_v13, %v3170_v51  ;;  %vm13631_vm8 = vmmov %vm13629_vm1  ;;  %vm13634_vm6 = vcmask 449536  }
 0x482   :  { %3295 = vst.msk [vmem:[#allocation2 + $0x4b8] sm:$0x1] %vm544_vm5, %v3174_v11  ;;  %3290 = vst [vmem:[#allocation2 + $0x4b0] ss:$-28 sps:$4 sm:$0xc1] %v3219_v2   ;;  %v13646_v11 = vld [vmem:[#allocation28_spill] sm:$0xff] }
 0x483   :  { %3288 = vst [vmem:[#allocation2 + $0x4a0] ss:$-28 sps:$4 sm:$0xc1] %v3217_v21  }
 0x484   :  { %3517 = vrot.lane.b32.xlu1 %v13624_v50, %s8671_s22  ;;  %3515 = vrot.lane.b32.xlu0 %v13595_v40, %s8671_s22  ;;  %v3359_v28 = vpop.permute.xlu1 %3358  ;;  %v3353_v57 = vpop.permute.xlu0 %3352 }
 0x485   :  { %v3404_v4 = vsel %vm13625_vm0, %v3357_v43, %v3359_v28  ;;  %3464 = vst.msk [vmem:[#allocation2 + $0x4b8] sm:$0xe] %vm758_vm7, %v3359_v28  ;;  %v3402_v8 = vsel %vm13626_vm2, %v3353_v57, %v3355_v15  ;;  %v4428_v38 = vld [vmem:[#allocation2 + $0x4a8] sm:$0xff]  ;;  %vm13636_vm0 = vcmask 441344   ;;  %vm13637_vm2 = vmmov %vm13634_vm6 }
 0x486   :  { %3463 = vst [vmem:[#allocation2 + $0x4b0] sm:$0xe] %v3404_v4  ;;  %3461 = vst [vmem:[#allocation2 + $0x4a0] sm:$0xe] %v3402_v8  ;;  %5094 = vmatprep.subr.mxu0 %v4428_v38  ;;  %v13641_v43 = vld [vmem:[#allocation27_spill] sm:$0xff] }
 0x488   :  { %3181 = vrot.lane.b32.xlu1 %v13627_v1, %s8669_s20  ;;  %3175 = vrot.lane.b32.xlu0 %v13628_v27, %s8669_s20  ;;  %v3512_v63 = vpop.permute.xlu1 %3511  ;;  %v3506_v33 = vpop.permute.xlu0 %3505 }
 0x489   :  { %v3557_v3 = vsel %vm13629_vm1, %v3510_v29, %v3512_v63  ;;  %3617 = vst.msk [vmem:[#allocation2 + $0x4b8] sm:$0x70] %vm13630_vm9, %v3512_v63  ;;  %v3555_v26 = vsel %vm13631_vm8, %v3506_v33, %v3508_v41  ;;  %vm13638_vm1 = vcmask 198656   ;;  %vm13639_vm9 = vmmov %vm13637_vm2 }
 0x48a   :  { %3616 = vst [vmem:[#allocation2 + $0x4b0] sm:$0x70] %v3557_v3  ;;  %3614 = vst [vmem:[#allocation2 + $0x4a0] sm:$0x70] %v3555_v26 }
 0x48b   :  { %vm13642_vm8 = vmmov %vm13636_vm0 }
 0x48c   :  { %3366 = vrot.lane.b32.xlu1 %v13632_v7, %s8670_s21  ;;  %3360 = vrot.lane.b32.xlu0 %v13633_v10, %s8670_s21  ;;  %v2866_v25 = vpop.permute.xlu1 %2865  ;;  %v2864_v49 = vpop.permute.xlu0 %2863 }
 0x48d   :  { %v2912_v37 = vsel %vm13634_vm6, %v2864_v49, %v2866_v25  ;;  %vm13643_vm6 = vcmask 201731  }
 0x48e   :  { %2971 = vst [vmem:[#allocation2 + $0x488] sm:$0x7] %v2912_v37 }
 0x490   :  { %3519 = vrot.lane.b32.xlu1 %v8839_v18, %s8671_s22  ;;  %3513 = vrot.lane.b32.xlu0 %v13635_v53, %s8671_s22  ;;  %v3019_v60 = vpop.permute.xlu1 %3018  ;;  %v3017_v32 = vpop.permute.xlu0 %3016  ;;  %v4430_v35 = vld [vmem:[#allocation2 + $0x4b8] sm:$0xff] }
 0x491   :  { %v3065_v23 = vsel %vm13636_vm0, %v3017_v32, %v3019_v60  ;;  %5165 = vmatprep.subr.mxu1 %v4430_v35  ;;  %v4429_v61 = vld [vmem:[#allocation2 + $0x4b0] sm:$0xff]  ;;  %v4427_v5 = vld [vmem:[#allocation2 + $0x4a0] sm:$0xff] }
 0x492   :  { %3124 = vst [vmem:[#allocation2 + $0x488] sm:$0x38] %v3065_v23  ;;  %5166 = vmatpush1.msra.mxu1 %v4429_v61  ;;  %5095 = vmatpush1.msra.mxu0 %v4427_v5 }
 0x494   :  { %2873 = vrot.lane.b32.xlu1 %v8839_v18, %s8672_s23  ;;  %2871 = vrot.lane.b32.xlu0 %v8843_v19, %s8672_s23  ;;  %v2868_v22 = vpop.permute.xlu1 %2867  ;;  %v2862_v52 = vpop.permute.xlu0 %2861 }
 0x495   :  { %v2913_v17 = vsel %vm13637_vm2, %v2866_v25, %v2868_v22  ;;  %2973 = vst.msk [vmem:[#allocation2 + $0x498] sm:$0x7] %vm13638_vm1, %v2868_v22  ;;  %v2911_v51 = vsel %vm13639_vm9, %v2862_v52, %v2864_v49  ;;  %vm13644_vm2 = vcmask 629760   ;;  %vm13647_vm1 = vcmask 621568  }
 0x496   :  { %2972 = vst [vmem:[#allocation2 + $0x490] sm:$0x7] %v2913_v17  ;;  %2970 = vst [vmem:[#allocation2 + $0x480] sm:$0x7] %v2911_v51  ;;  %vm13648_vm9 = vcmask 457728  }
 0x498   :  { %3026 = vrot.lane.b32.xlu1 %v13640_v24, %s8673_s24  ;;  %3024 = vrot.lane.b32.xlu0 %v13641_v43, %s8673_s24  ;;  %v3021_v15 = vpop.permute.xlu1 %3020  ;;  %v3015_v6 = vpop.permute.xlu0 %3014 }
 0x499   :  { %v3066_v19 = vsel %vm13642_vm8, %v3019_v60, %v3021_v15  ;;  %3126 = vst.msk [vmem:[#allocation2 + $0x498] sm:$0x38] %vm13643_vm6, %v3021_v15  ;;  %v3064_v39 = vsel %vm13636_vm0, %v3015_v6, %v3017_v32  ;;  %v4424_v44 = vld [vmem:[#allocation2 + $0x488] sm:$0xff]  ;;  %vm13649_vm8 = vmmov %vm13644_vm2 }
 0x49a   :  { %3125 = vst [vmem:[#allocation2 + $0x490] sm:$0x38] %v3066_v19  ;;  %3123 = vst [vmem:[#allocation2 + $0x480] sm:$0x38] %v3064_v39  ;;  %5096 = vmatprep.subr.mxu0 %v4424_v44 }
 0x49b   :  { %vm13650_vm6 = vmmov %vm13644_vm2 }
 0x49c   :  { %2875 = vrot.lane.b32.xlu1 %v13594_v42, %s8672_s23  ;;  %2869 = vrot.lane.b32.xlu0 %v13595_v40, %s8672_s23  ;;  %v2375_v16 = vpop.permute.xlu1 %2374  ;;  %v2373_v29 = vpop.permute.xlu0 %2372  ;;  %vm13651_vm0 = vmmov %vm13647_vm1 }
 0x49d   :  { %v2421_v41 = vsel %vm13644_vm2, %v2373_v29, %v2375_v16  ;;  %vm13652_vm2 = vmmov %vm13651_vm0 }
 0x49e   :  { %2492 = vst [vmem:[#allocation2 + $0x468] ss:$-28 sps:$4 sm:$0x83] %v2421_v41  }
 0x4a0   :  { %3028 = vrot.lane.b32.xlu1 %v13645_v0, %s8673_s24  ;;  %3022 = vrot.lane.b32.xlu0 %v13646_v11, %s8673_s24  ;;  %v2560_v13 = vpop.permute.xlu1 %2559  ;;  %v2558_v2 = vpop.permute.xlu0 %2557  ;;  %v4426_v21 = vld [vmem:[#allocation2 + $0x498] sm:$0xff]  ;;  %v13670_v0 = vld [vmem:[#allocation20_spill] sm:$0xff] }
 0x4a1   :  { %v2606_v28 = vsel %vm13647_vm1, %v2558_v2, %v2560_v13  ;;  %5167 = vmatprep.subr.mxu1 %v4426_v21  ;;  %v4425_v42 = vld [vmem:[#allocation2 + $0x490] sm:$0xff]  ;;  %v4423_v57 = vld [vmem:[#allocation2 + $0x480] sm:$0xff]  ;;  %vm13653_vm1 = vmmov %vm13648_vm9 }
 0x4a2   :  { %2665 = vst [vmem:[#allocation2 + $0x468] sm:$0x1c] %v2606_v28  ;;  %5168 = vmatpush1.msra.mxu1 %v4425_v42  ;;  %5097 = vmatpush1.msra.mxu0 %v4423_v57  ;;  %v4408_v21 = vld [vmem:[#allocation2 + $0x408] sm:$0xff]  ;;  %v4410_v28 = vld [vmem:[#allocation2 + $0x418] sm:$0xff]  ;;  %v4409_v57 = vld [vmem:[#allocation2 + $0x410] sm:$0xff] }
 0x4a4   :  { %2382 = vrot.lane.b32.xlu1 %v13596_v54, %s8674_s25  ;;  %2380 = vrot.lane.b32.xlu0 %v13597_v48, %s8674_s25  ;;  %v2713_v4 = vpop.permute.xlu1 %2712  ;;  %v2711_v8 = vpop.permute.xlu0 %2710 }
 0x4a5   :  { %v2759_v38 = vsel %vm13648_vm9, %v2711_v8, %v2713_v4  ;;  %vm13654_vm9 = vmmov %vm13653_vm1 }
 0x4a6   :  { %2818 = vst [vmem:[#allocation2 + $0x468] sm:$0xe0] %v2759_v38  ;;  %v13671_v38 = vld [vmem:[#allocation34_spill] sm:$0xff] }
 0x4a8   :  { %2567 = vrot.lane.b32.xlu1 %v13603_v36, %s8675_s1  ;;  %2565 = vrot.lane.b32.xlu0 %v13604_v20, %s8675_s1  ;;  %v2377_v63 = vpop.permute.xlu1 %2376  ;;  %v2371_v33 = vpop.permute.xlu0 %2370 }
 0x4a9   :  { %v2422_v3 = vsel %vm13649_vm8, %v2375_v16, %v2377_v63  ;;  %2494 = vst.msk [vmem:[#allocation2 + $0x458] sm:$0x80] %vm1114_vm11, %v2377_v63  ;;  %v2420_v54 = vsel %vm13650_vm6, %v2371_v33, %v2373_v29  ;;  %vm13655_vm8 = vcmask 654336   ;;  %vm13656_vm6 = vcmask 646144   ;;  %v4404_v33 = vld [vmem:[#allocation2 + $0x3e8] sm:$0xff] }
 0x4aa   :  { %2498 = vst.msk [vmem:[#allocation2 + $0x478] sm:$0x3] %vm1119_vm12, %v2377_v63  ;;  %2493 = vst [vmem:[#allocation2 + $0x470] ss:$-28 sps:$4 sm:$0x83] %v2422_v3   ;;  %v13672_v63 = vld [vmem:[#allocation18_spill] sm:$0xff] }
 0x4ab   :  { %2491 = vst [vmem:[#allocation2 + $0x460] ss:$-28 sps:$4 sm:$0x83] %v2420_v54   ;;  %v4406_v3 = vld [vmem:[#allocation2 + $0x3f8] sm:$0xff]  ;;  %v4405_v54 = vld [vmem:[#allocation2 + $0x3f0] sm:$0xff] }
 0x4ac   :  { %2720 = vrot.lane.b32.xlu1 %v13605_v45, %s8676_s26  ;;  %2718 = vrot.lane.b32.xlu0 %v13606_v12, %s8676_s26  ;;  %v2562_v48 = vpop.permute.xlu1 %2561  ;;  %v2556_v36 = vpop.permute.xlu0 %2555 }
 0x4ad   :  { %v2607_v20 = vsel %vm13651_vm0, %v2560_v13, %v2562_v48  ;;  %2667 = vst.msk [vmem:[#allocation2 + $0x478] sm:$0x1c] %vm1333_vm14, %v2562_v48  ;;  %v2605_v26 = vsel %vm13652_vm2, %v2556_v36, %v2558_v2  ;;  %v4420_v25 = vld [vmem:[#allocation2 + $0x468] sm:$0xff]  ;;  %vm13657_vm0 = vcmask 637952   ;;  %vm13658_vm2 = vmmov %vm13655_vm8  ;;  %v4403_v48 = vld [vmem:[#allocation2 + $0x3e0] sm:$0xff] }
 0x4ae   :  { %2666 = vst [vmem:[#allocation2 + $0x470] sm:$0x1c] %v2607_v20  ;;  %2664 = vst [vmem:[#allocation2 + $0x460] sm:$0x1c] %v2605_v26  ;;  %5098 = vmatprep.subr.mxu0 %v4420_v25  ;;  %v4400_v26 = vld [vmem:[#allocation2 + $0x3c8] sm:$0xff]  ;;  %v4402_v25 = vld [vmem:[#allocation2 + $0x3d8] sm:$0xff] }
 0x4b0   :  { %2384 = vrot.lane.b32.xlu1 %v13607_v62, %s8674_s25  ;;  %2378 = vrot.lane.b32.xlu0 %v13608_v14, %s8674_s25  ;;  %v2715_v45 = vpop.permute.xlu1 %2714  ;;  %v2709_v12 = vpop.permute.xlu0 %2708 }
 0x4b1   :  { %v2760_v49 = vsel %vm13653_vm1, %v2713_v4, %v2715_v45  ;;  %2820 = vst.msk [vmem:[#allocation2 + $0x478] sm:$0xe0] %vm1519_vm3, %v2715_v45  ;;  %v2758_v37 = vsel %vm13654_vm9, %v2709_v12, %v2711_v8  ;;  %vm13659_vm1 = vmmov %vm13658_vm2  ;;  %v4407_v4 = vld [vmem:[#allocation2 + $0x400] sm:$0xff]  ;;  %v4401_v12 = vld [vmem:[#allocation2 + $0x3d0] sm:$0xff] }
 0x4b2   :  { %2819 = vst [vmem:[#allocation2 + $0x470] sm:$0xe0] %v2760_v49  ;;  %2817 = vst [vmem:[#allocation2 + $0x460] sm:$0xe0] %v2758_v37  ;;  %v13673_v37 = vld [vmem:[#allocation148_spill] sm:$0xff] }
 0x4b3   :  { %vm13660_vm9 = vmmov %vm13656_vm6 }
 0x4b4   :  { %2569 = vrot.lane.b32.xlu1 %v13611_v59, %s8675_s1  ;;  %2563 = vrot.lane.b32.xlu0 %v13612_v31, %s8675_s1  ;;  %v1884_v62 = vpop.permute.xlu1 %1883  ;;  %v1882_v60 = vpop.permute.xlu0 %1881 }
 0x4b5   :  { %v1930_v14 = vsel %vm13655_vm8, %v1882_v60, %v1884_v62  ;;  %vm13661_vm8 = vmmov %vm13656_vm6 }
 0x4b6   :  { %2001 = vst [vmem:[#allocation2 + $0x448] ss:$-28 sps:$4 sm:$0xc1] %v1930_v14  }
 0x4b8   :  { %2722 = vrot.lane.b32.xlu1 %v13614_v34, %s8676_s26  ;;  %2716 = vrot.lane.b32.xlu0 %v13615_v9, %s8676_s26  ;;  %v2069_v32 = vpop.permute.xlu1 %2068  ;;  %v2067_v35 = vpop.permute.xlu0 %2066  ;;  %v4422_v23 = vld [vmem:[#allocation2 + $0x478] sm:$0xff] }
 0x4b9   :  { %v2115_v61 = vsel %vm13656_vm6, %v2067_v35, %v2069_v32  ;;  %5169 = vmatprep.subr.mxu1 %v4422_v23  ;;  %v4421_v59 = vld [vmem:[#allocation2 + $0x470] sm:$0xff]  ;;  %v4419_v5 = vld [vmem:[#allocation2 + $0x460] sm:$0xff]  ;;  %vm13662_vm6 = vmmov %vm13657_vm0 }
 0x4ba   :  { %2174 = vst [vmem:[#allocation2 + $0x448] sm:$0xe] %v2115_v61  ;;  %5170 = vmatpush1.msra.mxu1 %v4421_v59  ;;  %5099 = vmatpush1.msra.mxu0 %v4419_v5  ;;  %v13680_v5 = vld [vmem:[#allocation180_spill] sm:$0xff] }
 0x4bc   :  { %1891 = vrot.lane.b32.xlu1 %v13617_v30, %s8677_s27  ;;  %1889 = vrot.lane.b32.xlu0 %v13618_v47, %s8677_s27  ;;  %v2222_v31 = vpop.permute.xlu1 %2221  ;;  %v2220_v34 = vpop.permute.xlu0 %2219 }
 0x4bd   :  { %v2268_v9 = vsel %vm13657_vm0, %v2220_v34, %v2222_v31  ;;  %vm13663_vm0 = vcmask 202756   ;;  %v4412_v41 = vld [vmem:[#allocation2 + $0x428] sm:$0xff] }
 0x4be   :  { %2327 = vst [vmem:[#allocation2 + $0x448] sm:$0x70] %v2268_v9 }
 0x4c0   :  { %2076 = vrot.lane.b32.xlu1 %v13620_v56, %s8678_s28  ;;  %2074 = vrot.lane.b32.xlu0 %v13621_v55, %s8678_s28  ;;  %v1886_v22 = vpop.permute.xlu1 %1885  ;;  %v1880_v52 = vpop.permute.xlu0 %1879 }
 0x4c1   :  { %v1931_v17 = vsel %vm13658_vm2, %v1884_v62, %v1886_v22  ;;  %2003 = vst.msk [vmem:[#allocation2 + $0x438] sm:$0xc0] %vm539_vm4, %v1886_v22  ;;  %v1929_v30 = vsel %vm13659_vm1, %v1880_v52, %v1882_v60  ;;  %vm13664_vm2 = vmmov %vm13662_vm6  ;;  %vm13665_vm1 = vcmask 228352   ;;  %v4399_v62 = vld [vmem:[#allocation2 + $0x3c0] sm:$0xff]  ;;  %v13674_v60 = vld [vmem:[#allocation145_spill] sm:$0xff] }
 0x4c2   :  { %2007 = vst.msk [vmem:[#allocation2 + $0x458] sm:$0x1] %vm544_vm5, %v1886_v22  ;;  %2002 = vst [vmem:[#allocation2 + $0x450] ss:$-28 sps:$4 sm:$0xc1] %v1931_v17   ;;  %v13682_v52 = vld [vmem:[#allocation212_spill] sm:$0xff] }
 0x4c3   :  { %2000 = vst [vmem:[#allocation2 + $0x440] ss:$-28 sps:$4 sm:$0xc1] %v1929_v30   ;;  %v13683_v17 = vld [vmem:[#allocation209_spill] sm:$0xff] }
 0x4c4   :  { %2229 = vrot.lane.b32.xlu1 %v13624_v50, %s8679_s3  ;;  %2227 = vrot.lane.b32.xlu0 %v13595_v40, %s8679_s3  ;;  %v2071_v47 = vpop.permute.xlu1 %2070  ;;  %v2065_v56 = vpop.permute.xlu0 %2064 }
 0x4c5   :  { %v2116_v55 = vsel %vm13660_vm9, %v2069_v32, %v2071_v47  ;;  %2176 = vst.msk [vmem:[#allocation2 + $0x458] sm:$0xe] %vm758_vm7, %v2071_v47  ;;  %v2114_v51 = vsel %vm13661_vm8, %v2065_v56, %v2067_v35  ;;  %v4416_v24 = vld [vmem:[#allocation2 + $0x448] sm:$0xff]  ;;  %vm13666_vm9 = vmmov %vm13665_vm1  ;;  %vm13667_vm8 = vcmask 198656  }
 0x4c6   :  { %2175 = vst [vmem:[#allocation2 + $0x450] sm:$0xe] %v2116_v55  ;;  %2173 = vst [vmem:[#allocation2 + $0x440] sm:$0xe] %v2114_v51  ;;  %5100 = vmatprep.subr.mxu0 %v4416_v24  ;;  %v13684_v24 = vld [vmem:[#allocation147_spill] sm:$0xff] }
 0x4c8   :  { %1893 = vrot.lane.b32.xlu1 %v13627_v1, %s8677_s27  ;;  %1887 = vrot.lane.b32.xlu0 %v13628_v27, %s8677_s27  ;;  %v2224_v50 = vpop.permute.xlu1 %2223  ;;  %v2218_v40 = vpop.permute.xlu0 %2217 }
 0x4c9   :  { %v2269_v43 = vsel %vm13662_vm6, %v2222_v31, %v2224_v50  ;;  %2329 = vst.msk [vmem:[#allocation2 + $0x458] sm:$0x70] %vm13663_vm0, %v2224_v50  ;;  %v2267_v15 = vsel %vm13664_vm2, %v2218_v40, %v2220_v34  ;;  %vm13668_vm6 = vmmov %vm13665_vm1  ;;  %v4413_v11 = vld [vmem:[#allocation2 + $0x430] sm:$0xff]  ;;  %vm13675_vm0 = vcmask 1042432   ;;  %v13685_v50 = vld [vmem:[#allocation146_spill] sm:$0xff] }
 0x4ca   :  { %2328 = vst [vmem:[#allocation2 + $0x450] sm:$0x70] %v2269_v43  ;;  %2326 = vst [vmem:[#allocation2 + $0x440] sm:$0x70] %v2267_v15  ;;  %v4411_v13 = vld [vmem:[#allocation2 + $0x420] sm:$0xff]  ;;  %v13681_v31 = vld [vmem:[#allocation177_spill] sm:$0xff] }
 0x4cb   :  { %vm13676_vm2 = vmmov %vm13675_vm0 }
 0x4cc   :  { %2078 = vrot.lane.b32.xlu1 %v13632_v7, %s8678_s28  ;;  %2072 = vrot.lane.b32.xlu0 %v13633_v10, %s8678_s28  ;;  %v4162_v1 = vpop.permute.xlu1 %4161  ;;  %v4160_v6 = vpop.permute.xlu0 %4159 }
 0x4cd   :  { %v4203_v27 = vsel %vm13665_vm1, %v4160_v6, %v4162_v1  ;;  %vm13677_vm1 = vcmask 236544  }
 0x4ce   :  { %4263 = vst [vmem:[#allocation2 + $0x628] sm:$0x7] %v4203_v27  ;;  %v13689_v27 = vld [vmem:[#allocation178_spill] sm:$0xff] }
 0x4d0   :  { %2231 = vrot.lane.b32.xlu1 %v8839_v18, %s8679_s3  ;;  %2225 = vrot.lane.b32.xlu0 %v13635_v53, %s8679_s3  ;;  %v4164_v19 = vpop.permute.xlu1 %4163  ;;  %v4418_v39 = vld [vmem:[#allocation2 + $0x458] sm:$0xff]  ;;  %v13669_v53 = vld [vmem:[#allocation19_spill] sm:$0xff] }
 0x4d1   :  { %v4204_v44 = vsel %vm13666_vm9, %v4162_v1, %v4164_v19  ;;  %4265 = vst.msk [vmem:[#allocation2 + $0x638] sm:$0x7] %vm13667_vm8, %v4164_v19  ;;  %v4158_v7 = vpop.permute.xlu0 %4157  ;;  %5171 = vmatprep.subr.mxu1 %v4418_v39  ;;  %v4417_v10 = vld [vmem:[#allocation2 + $0x450] sm:$0xff]  ;;  %v4415_v16 = vld [vmem:[#allocation2 + $0x440] sm:$0xff]  ;;  %v4414_v18 = vld [vmem:[#allocation2 + $0x438] sm:$0xff] }
 0x4d2   :  { %4264 = vst [vmem:[#allocation2 + $0x630] sm:$0x7] %v4204_v44  ;;  %v4202_v29 = vsel %vm13668_vm6, %v4158_v7, %v4160_v6  ;;  %5172 = vmatpush1.msra.mxu1 %v4417_v10  ;;  %5101 = vmatpush1.msra.mxu0 %v4415_v16  ;;  %vm13678_vm9 = vmmov %vm13675_vm0  ;;  %v13688_v6 = vld [vmem:[#allocation179_spill] sm:$0xff]  ;;  %v13692_v10 = vld [vmem:[#allocation210_spill] sm:$0xff] }
 0x4d3   :  { %4262 = vst [vmem:[#allocation2 + $0x620] sm:$0x7] %v4202_v29  ;;  %5102 = vmatprep.subr.mxu0 %v4412_v41  ;;  %5173 = vmatprep.subr.mxu1 %v4414_v18  ;;  %vm13679_vm8 = vmmov %vm13675_vm0  ;;  %v13691_v7 = vld [vmem:[#allocation211_spill] sm:$0xff] }
 0x4d4   :  { %4169 = vrot.lane.b32.xlu1 %v13669_v53, %s8665_s2  ;;  %4167 = vrot.lane.b32.xlu0 %v13670_v0, %s8665_s2  ;;  %vm13686_vm6 = vmmov %vm13677_vm1 }
 0x4d5   :  { %v3671_v2 = vpop.permute.xlu1 %3670  ;;  %5174 = vmatpush1.msra.mxu1 %v4413_v11  ;;  %5103 = vmatpush1.msra.mxu0 %v4411_v13  ;;  %v4476_v14 = vld [vmem:[#allocation2 + $0x628] sm:$0x7] }
 0x4d6   :  { %v3669_v42 = vpop.permute.xlu0 %3668  ;;  %5104 = vmatprep.subr.mxu0 %v4408_v21  ;;  %5175 = vmatprep.subr.mxu1 %v4410_v28  ;;  %v13695_v21 = vld [vmem:[#allocation67_spill] sm:$0xff] }
 0x4d7   :  { %v3712_v8 = vsel %vm3698_vm15, %v3669_v42, %v3671_v2  ;;  %5176 = vmatpush1.msra.mxu1 %v4409_v57  ;;  %5105 = vmatpush1.msra.mxu0 %v4407_v4  ;;  %v13697_v4 = vld [vmem:[#allocation102_spill] sm:$0xff] }
 0x4d8   :  { %3788 = vst [vmem:[#allocation2 + $0x608] ss:$-28 sps:$4 sm:$0x83] %v3712_v8   ;;  %4171 = vrot.lane.b32.xlu1 %v13671_v38, %s8665_s2  ;;  %4165 = vrot.lane.b32.xlu0 %v13672_v63, %s8665_s2  ;;  %v4478_v49 = vld [vmem:[#allocation2 + $0x638] sm:$0x7]  ;;  %v13698_v8 = vld [vmem:[#allocation99_spill] sm:$0xff] }
 0x4d9   :  { %5106 = vmatprep.subr.mxu0 %v4404_v33  ;;  %5177 = vmatprep.subr.mxu1 %v4406_v3  ;;  %v4477_v23 = vld [vmem:[#allocation2 + $0x630] sm:$0x7] }
 0x4da   :  { %v3856_v36 = vpop.permute.xlu1 %3855  ;;  %5178 = vmatpush1.msra.mxu1 %v4405_v54  ;;  %v3854_v20 = vpop.permute.xlu0 %3853  ;;  %5107 = vmatpush1.msra.mxu0 %v4403_v48  ;;  %v4475_v59 = vld [vmem:[#allocation2 + $0x620] sm:$0x7] }
 0x4db   :  { %v3897_v45 = vsel %vm3883_vm10, %v3854_v20, %v3856_v36  ;;  %5108 = vmatprep.subr.mxu0 %v4400_v26  ;;  %5179 = vmatprep.subr.mxu1 %v4402_v25 }
 0x4dc   :  { %3957 = vst [vmem:[#allocation2 + $0x608] sm:$0x1c] %v3897_v45  ;;  %3678 = vrot.lane.b32.xlu1 %v13673_v37, %s8666_s18  ;;  %5180 = vmatpush1.msra.mxu1 %v4401_v12 }
 0x4dd   :  { %3676 = vrot.lane.b32.xlu0 %v13674_v60, %s8666_s18  ;;  %5109 = vmatpush1.msra.mxu0 %v4399_v62  ;;  %v13705_v62 = vld [vmem:[#allocation68_spill] sm:$0xff] }
 0x4de   :  { %8000 = vmatprep.subr.msk.mxu0 %vm13675_vm0, %v4476_v14  ;;  %8003 = vmatprep.subr.msk.mxu1 %vm13676_vm2, %v4478_v49  ;;  %v4009_v32 = vpop.permute.xlu1 %4008  ;;  %v4007_v35 = vpop.permute.xlu0 %4006  ;;  %vm13687_vm0 = vmmov %vm13677_vm1  ;;  %vm13690_vm2 = vcmask 433152   ;;  %v13704_v49 = vld [vmem:[#allocation69_spill] sm:$0xff] }
 0x4df   :  { %7999 = vmatmul.mubr.msk.f32.vlgmr.msra.gmra.mxu1 %vm4599_vm13, %v11132_v46  ;;  %v4050_v61 = vsel %vm13677_vm1, %v4007_v35, %v4009_v32  ;;  %7996 = vmatmul.mubr.msk.f32.vlgmr.msra.gmra.mxu0 %vm4599_vm13, %v11132_v46  ;;  %vm13693_vm1 = vcmask 424960  }
 0x4e0   :  { %8004 = vmatpush1.msk.msra.mxu1 %vm13678_vm9, %v4477_v23  ;;  %4110 = vst [vmem:[#allocation2 + $0x608] sm:$0xe0] %v4050_v61  ;;  %8001 = vmatpush1.msk.msra.mxu0 %vm13679_vm8, %v4475_v59  ;;  %vm13696_vm9 = vcmask 261120   ;;  %vm13699_vm8 = vmmov %vm13690_vm2  ;;  %v13709_v61 = vld [vmem:[#allocation101_spill] sm:$0xff]  ;;  %v13710_v59 = vld [vmem:[#allocation100_spill] sm:$0xff] }
 0x4e1   :  { %3863 = vrot.lane.b32.xlu1 %v13680_v5, %s8667_s4  ;;  %3861 = vrot.lane.b32.xlu0 %v13681_v31, %s8667_s4 }
 0x4e2   :  { %v3673_v34 = vpop.permute.xlu1 %3672  ;;  %v3667_v9 = vpop.permute.xlu0 %3666  ;;  %5296 = vmatprep.mubr.f32.mxu0 %v8680_v58  ;;  %5367 = vmatprep.mubr.f32.mxu1 %v8680_v58 }
 0x4e3   :  { %v3713_v46 = vsel %vm3698_vm15, %v3671_v2, %v3673_v34  ;;  %3790 = vst.msk [vmem:[#allocation2 + $0x5f8] sm:$0x80] %vm1114_vm11, %v3673_v34  ;;  %v3711_v22 = vsel %vm3698_vm15, %v3667_v9, %v3669_v42  ;;  %v13694_v2 = vld [vmem:[#allocation70_spill] sm:$0xff] }
 0x4e4   :  { %3794 = vst.msk [vmem:[#allocation2 + $0x618] sm:$0x3] %vm1119_vm12, %v3673_v34  ;;  %3789 = vst [vmem:[#allocation2 + $0x610] ss:$-28 sps:$4 sm:$0x83] %v3713_v46  }
 0x4e5   :  { %3787 = vst [vmem:[#allocation2 + $0x600] ss:$-28 sps:$4 sm:$0x83] %v3711_v22   ;;  %4016 = vrot.lane.b32.xlu1 %v13682_v52, %s8668_s19  ;;  %4014 = vrot.lane.b32.xlu0 %v13683_v17, %s8668_s19  ;;  %v13712_v22 = vld [vmem:[#allocation121_spill] sm:$0xff] }
 0x4e6   :  { %v3858_v30 = vpop.permute.xlu1 %3857  ;;  %v3852_v47 = vpop.permute.xlu0 %3851 }
 0x4e7   :  { %v3898_v56 = vsel %vm3883_vm10, %v3856_v36, %v3858_v30  ;;  %3959 = vst.msk [vmem:[#allocation2 + $0x618] sm:$0x1c] %vm1333_vm14, %v3858_v30  ;;  %v3896_v55 = vsel %vm3883_vm10, %v3852_v47, %v3854_v20  ;;  %v4472_v51 = vld [vmem:[#allocation2 + $0x608] sm:$0xff]  ;;  %v13701_v36 = vld [vmem:[#allocation122_spill] sm:$0xff] }
 0x4e8   :  { %3958 = vst [vmem:[#allocation2 + $0x610] sm:$0x1c] %v3898_v56  ;;  %3956 = vst [vmem:[#allocation2 + $0x600] sm:$0x1c] %v3896_v55  ;;  %5246 = vmatprep.subr.mxu0 %v4472_v51 }
 0x4e9   :  { %3680 = vrot.lane.b32.xlu1 %v13684_v24, %s8666_s18  ;;  %3674 = vrot.lane.b32.xlu0 %v13685_v50, %s8666_s18 }
 0x4ea   :  { %v4011_v40 = vpop.permute.xlu1 %4010  ;;  %v4005_v43 = vpop.permute.xlu0 %4004 }
 0x4eb   :  { %v4051_v15 = vsel %vm13686_vm6, %v4009_v32, %v4011_v40  ;;  %4112 = vst.msk [vmem:[#allocation2 + $0x618] sm:$0xe0] %vm1519_vm3, %v4011_v40  ;;  %v4049_v1 = vsel %vm13687_vm0, %v4005_v43, %v4007_v35  ;;  %vm13700_vm6 = vmmov %vm13690_vm2 }
 0x4ec   :  { %4111 = vst [vmem:[#allocation2 + $0x610] sm:$0xe0] %v4051_v15  ;;  %4109 = vst [vmem:[#allocation2 + $0x600] sm:$0xe0] %v4049_v1 }
 0x4ed   :  { %3865 = vrot.lane.b32.xlu1 %v13688_v6, %s8667_s4  ;;  %3859 = vrot.lane.b32.xlu0 %v13689_v27, %s8667_s4  ;;  %vm13702_vm0 = vmmov %vm13693_vm1 }
 0x4ee   :  { %v3180_v19 = vpop.permute.xlu1 %3179  ;;  %v3178_v39 = vpop.permute.xlu0 %3177 }
 0x4ef   :  { %v3221_v44 = vsel %vm13690_vm2, %v3178_v39, %v3180_v19  ;;  %vm13703_vm2 = vmmov %vm13702_vm0 }
 0x4f0   :  { %3297 = vst [vmem:[#allocation2 + $0x5e8] ss:$-28 sps:$4 sm:$0xc1] %v3221_v44   ;;  %v13718_v44 = vld [vmem:[#allocation32_spill] sm:$0xff] }
 0x4f1   :  { %4018 = vrot.lane.b32.xlu1 %v13691_v7, %s8668_s19  ;;  %4012 = vrot.lane.b32.xlu0 %v13692_v10, %s8668_s19 }
 0x4f2   :  { %v3365_v16 = vpop.permute.xlu1 %3364  ;;  %v3363_v29 = vpop.permute.xlu0 %3362  ;;  %v4474_v41 = vld [vmem:[#allocation2 + $0x618] sm:$0xff] }
 0x4f3   :  { %v3406_v18 = vsel %vm13693_vm1, %v3363_v29, %v3365_v16  ;;  %5317 = vmatprep.subr.mxu1 %v4474_v41  ;;  %v4473_v11 = vld [vmem:[#allocation2 + $0x610] sm:$0xff]  ;;  %v4471_v13 = vld [vmem:[#allocation2 + $0x600] sm:$0xff]  ;;  %vm13706_vm1 = vmmov %vm13696_vm9 }
 0x4f4   :  { %3466 = vst [vmem:[#allocation2 + $0x5e8] sm:$0xe] %v3406_v18  ;;  %5318 = vmatpush1.msra.mxu1 %v4473_v11  ;;  %5247 = vmatpush1.msra.mxu0 %v4471_v13 }
 0x4f5   :  { %3187 = vrot.lane.b32.xlu1 %v13694_v2, %s8669_s20  ;;  %3185 = vrot.lane.b32.xlu0 %v13695_v21, %s8669_s20 }
 0x4f6   :  { %v3518_v28 = vpop.permute.xlu1 %3517  ;;  %v3516_v42 = vpop.permute.xlu0 %3515 }
 0x4f7   :  { %v3559_v57 = vsel %vm13696_vm9, %v3516_v42, %v3518_v28  ;;  %vm13707_vm9 = vcmask 202756  }
 0x4f8   :  { %3619 = vst [vmem:[#allocation2 + $0x5e8] sm:$0x70] %v3559_v57  ;;  %v13723_v57 = vld [vmem:[#allocation33_spill] sm:$0xff] }
 0x4f9   :  { %3372 = vrot.lane.b32.xlu1 %v13697_v4, %s8670_s21  ;;  %3370 = vrot.lane.b32.xlu0 %v13698_v8, %s8670_s21 }
 0x4fa   :  { %v3182_v33 = vpop.permute.xlu1 %3181  ;;  %v3176_v3 = vpop.permute.xlu0 %3175 }
 0x4fb   :  { %v3222_v54 = vsel %vm13699_vm8, %v3180_v19, %v3182_v33  ;;  %3299 = vst.msk [vmem:[#allocation2 + $0x5d8] sm:$0xc0] %vm539_vm4, %v3182_v33  ;;  %v3220_v48 = vsel %vm13700_vm6, %v3176_v3, %v3178_v39  ;;  %vm13708_vm8 = vmmov %vm13706_vm1  ;;  %vm13711_vm6 = vcmask 449536   ;;  %v13717_v39 = vld [vmem:[#allocation36_spill] sm:$0xff] }
 0x4fc   :  { %3303 = vst.msk [vmem:[#allocation2 + $0x5f8] sm:$0x1] %vm544_vm5, %v3182_v33  ;;  %3298 = vst [vmem:[#allocation2 + $0x5f0] ss:$-28 sps:$4 sm:$0xc1] %v3222_v54  }
 0x4fd   :  { %3296 = vst [vmem:[#allocation2 + $0x5e0] ss:$-28 sps:$4 sm:$0xc1] %v3220_v48   ;;  %3525 = vrot.lane.b32.xlu1 %v13701_v36, %s8671_s22  ;;  %3523 = vrot.lane.b32.xlu0 %v13672_v63, %s8671_s22 }
 0x4fe   :  { %v3367_v20 = vpop.permute.xlu1 %3366  ;;  %v3361_v26 = vpop.permute.xlu0 %3360 }
 0x4ff   :  { %v3407_v25 = vsel %vm13702_vm0, %v3365_v16, %v3367_v20  ;;  %3468 = vst.msk [vmem:[#allocation2 + $0x5f8] sm:$0xe] %vm758_vm7, %v3367_v20  ;;  %v3405_v45 = vsel %vm13703_vm2, %v3361_v26, %v3363_v29  ;;  %v4468_v12 = vld [vmem:[#allocation2 + $0x5e8] sm:$0xff]  ;;  %vm13713_vm0 = vcmask 441344   ;;  %vm13714_vm2 = vmmov %vm13711_vm6 }
 0x500   :  { %3467 = vst [vmem:[#allocation2 + $0x5f0] sm:$0xe] %v3407_v25  ;;  %3465 = vst [vmem:[#allocation2 + $0x5e0] sm:$0xe] %v3405_v45  ;;  %5248 = vmatprep.subr.mxu0 %v4468_v12 }
 0x501   :  { %3189 = vrot.lane.b32.xlu1 %v13704_v49, %s8669_s20  ;;  %3183 = vrot.lane.b32.xlu0 %v13705_v62, %s8669_s20 }
 0x502   :  { %v3520_v14 = vpop.permute.xlu1 %3519  ;;  %v3514_v32 = vpop.permute.xlu0 %3513 }
 0x503   :  { %v3560_v35 = vsel %vm13706_vm1, %v3518_v28, %v3520_v14  ;;  %3621 = vst.msk [vmem:[#allocation2 + $0x5f8] sm:$0x70] %vm13707_vm9, %v3520_v14  ;;  %v3558_v23 = vsel %vm13708_vm8, %v3514_v32, %v3516_v42  ;;  %vm13715_vm1 = vcmask 198656   ;;  %vm13716_vm9 = vmmov %vm13714_vm2  ;;  %v13722_v42 = vld [vmem:[#allocation35_spill] sm:$0xff] }
 0x504   :  { %3620 = vst [vmem:[#allocation2 + $0x5f0] sm:$0x70] %v3560_v35  ;;  %3618 = vst [vmem:[#allocation2 + $0x5e0] sm:$0x70] %v3558_v23 }
 0x505   :  { %3374 = vrot.lane.b32.xlu1 %v13709_v61, %s8670_s21  ;;  %3368 = vrot.lane.b32.xlu0 %v13710_v59, %s8670_s21  ;;  %vm13719_vm8 = vmmov %vm13713_vm0 }
 0x506   :  { %v2874_v34 = vpop.permute.xlu1 %2873  ;;  %v2872_v9 = vpop.permute.xlu0 %2871 }
 0x507   :  { %v2915_v46 = vsel %vm13711_vm6, %v2872_v9, %v2874_v34  ;;  %vm13720_vm6 = vcmask 201731  }
 0x508   :  { %2975 = vst [vmem:[#allocation2 + $0x5c8] sm:$0x7] %v2915_v46 }
 0x509   :  { %3527 = vrot.lane.b32.xlu1 %v13669_v53, %s8671_s22  ;;  %3521 = vrot.lane.b32.xlu0 %v13712_v22, %s8671_s22 }
 0x50a   :  { %v3027_v30 = vpop.permute.xlu1 %3026  ;;  %v3025_v47 = vpop.permute.xlu0 %3024  ;;  %v4470_v56 = vld [vmem:[#allocation2 + $0x5f8] sm:$0xff] }
 0x50b   :  { %v3068_v55 = vsel %vm13713_vm0, %v3025_v47, %v3027_v30  ;;  %5319 = vmatprep.subr.mxu1 %v4470_v56  ;;  %v4469_v51 = vld [vmem:[#allocation2 + $0x5f0] sm:$0xff]  ;;  %v4467_v40 = vld [vmem:[#allocation2 + $0x5e0] sm:$0xff] }
 0x50c   :  { %3128 = vst [vmem:[#allocation2 + $0x5c8] sm:$0x38] %v3068_v55  ;;  %5320 = vmatpush1.msra.mxu1 %v4469_v51  ;;  %5249 = vmatpush1.msra.mxu0 %v4467_v40 }
 0x50d   :  { %2881 = vrot.lane.b32.xlu1 %v13669_v53, %s8672_s23  ;;  %2879 = vrot.lane.b32.xlu0 %v13670_v0, %s8672_s23 }
 0x50e   :  { %v2876_v43 = vpop.permute.xlu1 %2875  ;;  %v2870_v15 = vpop.permute.xlu0 %2869 }
 0x50f   :  { %v2916_v1 = vsel %vm13714_vm2, %v2874_v34, %v2876_v43  ;;  %2977 = vst.msk [vmem:[#allocation2 + $0x5d8] sm:$0x7] %vm13715_vm1, %v2876_v43  ;;  %v2914_v19 = vsel %vm13716_vm9, %v2870_v15, %v2872_v9  ;;  %vm13721_vm2 = vcmask 629760   ;;  %vm13724_vm1 = vcmask 621568  }
 0x510   :  { %2976 = vst [vmem:[#allocation2 + $0x5d0] sm:$0x7] %v2916_v1  ;;  %2974 = vst [vmem:[#allocation2 + $0x5c0] sm:$0x7] %v2914_v19  ;;  %vm13725_vm9 = vcmask 457728  }
 0x511   :  { %3034 = vrot.lane.b32.xlu1 %v13717_v39, %s8673_s24  ;;  %3032 = vrot.lane.b32.xlu0 %v13718_v44, %s8673_s24 }
 0x512   :  { %v3029_v16 = vpop.permute.xlu1 %3028  ;;  %v3023_v29 = vpop.permute.xlu0 %3022 }
 0x513   :  { %v3069_v0 = vsel %vm13719_vm8, %v3027_v30, %v3029_v16  ;;  %3130 = vst.msk [vmem:[#allocation2 + $0x5d8] sm:$0x38] %vm13720_vm6, %v3029_v16  ;;  %v3067_v41 = vsel %vm13713_vm0, %v3023_v29, %v3025_v47  ;;  %v4464_v18 = vld [vmem:[#allocation2 + $0x5c8] sm:$0xff]  ;;  %vm13726_vm8 = vmmov %vm13721_vm2 }
 0x514   :  { %3129 = vst [vmem:[#allocation2 + $0x5d0] sm:$0x38] %v3069_v0  ;;  %3127 = vst [vmem:[#allocation2 + $0x5c0] sm:$0x38] %v3067_v41  ;;  %5250 = vmatprep.subr.mxu0 %v4464_v18 }
 0x515   :  { %2883 = vrot.lane.b32.xlu1 %v13671_v38, %s8672_s23  ;;  %2877 = vrot.lane.b32.xlu0 %v13672_v63, %s8672_s23  ;;  %vm13727_vm6 = vmmov %vm13721_vm2 }
 0x516   :  { %v2383_v11 = vpop.permute.xlu1 %2382  ;;  %v2381_v13 = vpop.permute.xlu0 %2380  ;;  %vm13728_vm0 = vmmov %vm13724_vm1 }
 0x517   :  { %v2424_v28 = vsel %vm13721_vm2, %v2381_v13, %v2383_v11  ;;  %vm13729_vm2 = vmmov %vm13728_vm0 }
 0x518   :  { %2500 = vst [vmem:[#allocation2 + $0x5a8] ss:$-28 sps:$4 sm:$0x83] %v2424_v28  }
 0x519   :  { %3036 = vrot.lane.b32.xlu1 %v13722_v42, %s8673_s24  ;;  %3030 = vrot.lane.b32.xlu0 %v13723_v57, %s8673_s24 }
 0x51a   :  { %v2568_v33 = vpop.permute.xlu1 %2567  ;;  %v2566_v3 = vpop.permute.xlu0 %2565  ;;  %v4466_v54 = vld [vmem:[#allocation2 + $0x5d8] sm:$0xff] }
 0x51b   :  { %v2609_v48 = vsel %vm13724_vm1, %v2566_v3, %v2568_v33  ;;  %5321 = vmatprep.subr.mxu1 %v4466_v54  ;;  %v4465_v38 = vld [vmem:[#allocation2 + $0x5d0] sm:$0xff]  ;;  %v4463_v20 = vld [vmem:[#allocation2 + $0x5c0] sm:$0xff]  ;;  %vm13730_vm1 = vmmov %vm13725_vm9 }
 0x51c   :  { %2669 = vst [vmem:[#allocation2 + $0x5a8] sm:$0x1c] %v2609_v48  ;;  %5322 = vmatpush1.msra.mxu1 %v4465_v38  ;;  %5251 = vmatpush1.msra.mxu0 %v4463_v20  ;;  %v4448_v38 = vld [vmem:[#allocation2 + $0x548] sm:$0xff]  ;;  %v4450_v20 = vld [vmem:[#allocation2 + $0x558] sm:$0xff] }
 0x51d   :  { %2390 = vrot.lane.b32.xlu1 %v13673_v37, %s8674_s25  ;;  %2388 = vrot.lane.b32.xlu0 %v13674_v60, %s8674_s25 }
 0x51e   :  { %v2721_v26 = vpop.permute.xlu1 %2720  ;;  %v2719_v25 = vpop.permute.xlu0 %2718 }
 0x51f   :  { %v2762_v45 = vsel %vm13725_vm9, %v2719_v25, %v2721_v26  ;;  %vm13731_vm9 = vmmov %vm13730_vm1 }
 0x520   :  { %2822 = vst [vmem:[#allocation2 + $0x5a8] sm:$0xe0] %v2762_v45  ;;  %v4446_v45 = vld [vmem:[#allocation2 + $0x538] sm:$0xff] }
 0x521   :  { %2575 = vrot.lane.b32.xlu1 %v13680_v5, %s8675_s1  ;;  %2573 = vrot.lane.b32.xlu0 %v13681_v31, %s8675_s1 }
 0x522   :  { %v2385_v12 = vpop.permute.xlu1 %2384  ;;  %v2379_v14 = vpop.permute.xlu0 %2378 }
 0x523   :  { %v2425_v32 = vsel %vm13726_vm8, %v2383_v11, %v2385_v12  ;;  %2502 = vst.msk [vmem:[#allocation2 + $0x598] sm:$0x80] %vm1114_vm11, %v2385_v12  ;;  %v2423_v37 = vsel %vm13727_vm6, %v2379_v14, %v2381_v13  ;;  %vm13732_vm8 = vcmask 654336   ;;  %vm13733_vm6 = vcmask 646144   ;;  %v4445_v14 = vld [vmem:[#allocation2 + $0x530] sm:$0xff] }
 0x524   :  { %2506 = vst.msk [vmem:[#allocation2 + $0x5b8] sm:$0x3] %vm1119_vm12, %v2385_v12  ;;  %2501 = vst [vmem:[#allocation2 + $0x5b0] ss:$-28 sps:$4 sm:$0x83] %v2425_v32  }
 0x525   :  { %2499 = vst [vmem:[#allocation2 + $0x5a0] ss:$-28 sps:$4 sm:$0x83] %v2423_v37   ;;  %2728 = vrot.lane.b32.xlu1 %v13682_v52, %s8676_s26  ;;  %2726 = vrot.lane.b32.xlu0 %v13683_v17, %s8676_s26  ;;  %v4443_v37 = vld [vmem:[#allocation2 + $0x520] sm:$0xff] }
 0x526   :  { %v2570_v60 = vpop.permute.xlu1 %2569  ;;  %v2564_v5 = vpop.permute.xlu0 %2563 }
 0x527   :  { %v2610_v31 = vsel %vm13728_vm0, %v2568_v33, %v2570_v60  ;;  %2671 = vst.msk [vmem:[#allocation2 + $0x5b8] sm:$0x1c] %vm1333_vm14, %v2570_v60  ;;  %v2608_v35 = vsel %vm13729_vm2, %v2564_v5, %v2566_v3  ;;  %v4460_v23 = vld [vmem:[#allocation2 + $0x5a8] sm:$0xff]  ;;  %vm13734_vm0 = vcmask 637952   ;;  %vm13735_vm2 = vmmov %vm13732_vm8 }
 0x528   :  { %2670 = vst [vmem:[#allocation2 + $0x5b0] sm:$0x1c] %v2610_v31  ;;  %2668 = vst [vmem:[#allocation2 + $0x5a0] sm:$0x1c] %v2608_v35  ;;  %5252 = vmatprep.subr.mxu0 %v4460_v23  ;;  %v4440_v5 = vld [vmem:[#allocation2 + $0x508] sm:$0xff]  ;;  %v4441_v31 = vld [vmem:[#allocation2 + $0x510] sm:$0xff] }
 0x529   :  { %2392 = vrot.lane.b32.xlu1 %v13684_v24, %s8674_s25  ;;  %2386 = vrot.lane.b32.xlu0 %v13685_v50, %s8674_s25  ;;  %v13746_v35 = vld [vmem:[#allocation22_spill] sm:$0xff] }
 0x52a   :  { %v2723_v52 = vpop.permute.xlu1 %2722  ;;  %v2717_v17 = vpop.permute.xlu0 %2716  ;;  %v4439_v23 = vld [vmem:[#allocation2 + $0x500] sm:$0xff] }
 0x52b   :  { %v2763_v34 = vsel %vm13730_vm1, %v2721_v26, %v2723_v52  ;;  %2824 = vst.msk [vmem:[#allocation2 + $0x5b8] sm:$0xe0] %vm1519_vm3, %v2723_v52  ;;  %v2761_v9 = vsel %vm13731_vm9, %v2717_v17, %v2719_v25  ;;  %vm13736_vm1 = vmmov %vm13735_vm2  ;;  %v4444_v25 = vld [vmem:[#allocation2 + $0x528] sm:$0xff] }
 0x52c   :  { %2823 = vst [vmem:[#allocation2 + $0x5b0] sm:$0xe0] %v2763_v34  ;;  %2821 = vst [vmem:[#allocation2 + $0x5a0] sm:$0xe0] %v2761_v9  ;;  %v13747_v52 = vld [vmem:[#allocation24_spill] sm:$0xff] }
 0x52d   :  { %2577 = vrot.lane.b32.xlu1 %v13688_v6, %s8675_s1  ;;  %2571 = vrot.lane.b32.xlu0 %v13689_v27, %s8675_s1  ;;  %vm13737_vm9 = vmmov %vm13733_vm6 }
 0x52e   :  { %v1892_v24 = vpop.permute.xlu1 %1891  ;;  %v1890_v46 = vpop.permute.xlu0 %1889 }
 0x52f   :  { %v1933_v50 = vsel %vm13732_vm8, %v1890_v46, %v1892_v24  ;;  %vm13738_vm8 = vmmov %vm13733_vm6 }
 0x530   :  { %2009 = vst [vmem:[#allocation2 + $0x588] ss:$-28 sps:$4 sm:$0xc1] %v1933_v50  }
 0x531   :  { %2730 = vrot.lane.b32.xlu1 %v13691_v7, %s8676_s26  ;;  %2724 = vrot.lane.b32.xlu0 %v13692_v10, %s8676_s26 }
 0x532   :  { %v2077_v30 = vpop.permute.xlu1 %2076  ;;  %v2075_v47 = vpop.permute.xlu0 %2074  ;;  %v4462_v56 = vld [vmem:[#allocation2 + $0x5b8] sm:$0xff] }
 0x533   :  { %v2118_v55 = vsel %vm13733_vm6, %v2075_v47, %v2077_v30  ;;  %5323 = vmatprep.subr.mxu1 %v4462_v56  ;;  %v4461_v6 = vld [vmem:[#allocation2 + $0x5b0] sm:$0xff]  ;;  %v4459_v51 = vld [vmem:[#allocation2 + $0x5a0] sm:$0xff]  ;;  %vm13739_vm6 = vmmov %vm13734_vm0 }
 0x534   :  { %2178 = vst [vmem:[#allocation2 + $0x588] sm:$0xe] %v2118_v55  ;;  %5324 = vmatpush1.msra.mxu1 %v4461_v6  ;;  %5253 = vmatpush1.msra.mxu0 %v4459_v51  ;;  %v13754_v56 = vld [vmem:[#allocation21_spill] sm:$0xff] }
 0x535   :  { %1899 = vrot.lane.b32.xlu1 %v13694_v2, %s8677_s27  ;;  %1897 = vrot.lane.b32.xlu0 %v13695_v21, %s8677_s27 }
 0x536   :  { %v2230_v27 = vpop.permute.xlu1 %2229  ;;  %v2228_v7 = vpop.permute.xlu0 %2227 }
 0x537   :  { %v2271_v10 = vsel %vm13734_vm0, %v2228_v7, %v2230_v27  ;;  %vm13740_vm0 = vcmask 202756  }
 0x538   :  { %2331 = vst [vmem:[#allocation2 + $0x588] sm:$0x70] %v2271_v10  ;;  %v13756_v10 = vld [vmem:[#allocation149_spill] sm:$0xff] }
 0x539   :  { %2084 = vrot.lane.b32.xlu1 %v13697_v4, %s8678_s28  ;;  %2082 = vrot.lane.b32.xlu0 %v13698_v8, %s8678_s28 }
 0x53a   :  { %v1894_v40 = vpop.permute.xlu1 %1893  ;;  %v1888_v43 = vpop.permute.xlu0 %1887 }
 0x53b   :  { %v1934_v15 = vsel %vm13735_vm2, %v1892_v24, %v1894_v40  ;;  %2011 = vst.msk [vmem:[#allocation2 + $0x578] sm:$0xc0] %vm539_vm4, %v1894_v40  ;;  %v1932_v2 = vsel %vm13736_vm1, %v1888_v43, %v1890_v46  ;;  %vm13741_vm2 = vmmov %vm13739_vm6  ;;  %vm13742_vm1 = vcmask 228352   ;;  %v11522_v46 = vld [vmem:[#allocation3] sm:$0xff] }
 0x53c   :  { %2015 = vst.msk [vmem:[#allocation2 + $0x598] sm:$0x1] %vm544_vm5, %v1894_v40  ;;  %2010 = vst [vmem:[#allocation2 + $0x590] ss:$-28 sps:$4 sm:$0xc1] %v1934_v15  }
 0x53d   :  { %2008 = vst [vmem:[#allocation2 + $0x580] ss:$-28 sps:$4 sm:$0xc1] %v1932_v2   ;;  %2237 = vrot.lane.b32.xlu1 %v13701_v36, %s8679_s3  ;;  %2235 = vrot.lane.b32.xlu0 %v13672_v63, %s8679_s3 }
 0x53e   :  { %v2079_v21 = vpop.permute.xlu1 %2078  ;;  %v2073_v4 = vpop.permute.xlu0 %2072 }
 0x53f   :  { %v2119_v8 = vsel %vm13737_vm9, %v2077_v30, %v2079_v21  ;;  %2180 = vst.msk [vmem:[#allocation2 + $0x598] sm:$0xe] %vm758_vm7, %v2079_v21  ;;  %v2117_v1 = vsel %vm13738_vm8, %v2073_v4, %v2075_v47  ;;  %v4456_v19 = vld [vmem:[#allocation2 + $0x588] sm:$0xff]  ;;  %vm13743_vm9 = vmmov %vm13742_vm1  ;;  %vm13744_vm8 = vcmask 198656  }
 0x540   :  { %2179 = vst [vmem:[#allocation2 + $0x590] sm:$0xe] %v2119_v8  ;;  %2177 = vst [vmem:[#allocation2 + $0x580] sm:$0xe] %v2117_v1  ;;  %5254 = vmatprep.subr.mxu0 %v4456_v19  ;;  %v13753_v47 = vld [vmem:[#allocation39_spill] sm:$0xff]  ;;  %v13757_v4 = vld [vmem:[#allocation184_spill] sm:$0xff] }
 0x541   :  { %1901 = vrot.lane.b32.xlu1 %v13704_v49, %s8677_s27  ;;  %1895 = vrot.lane.b32.xlu0 %v13705_v62, %s8677_s27  ;;  %v13758_v8 = vld [vmem:[#allocation181_spill] sm:$0xff] }
 0x542   :  { %v2232_v36 = vpop.permute.xlu1 %2231  ;;  %v2226_v63 = vpop.permute.xlu0 %2225 }
 0x543   :  { %v2272_v16 = vsel %vm13739_vm6, %v2230_v27, %v2232_v36  ;;  %2333 = vst.msk [vmem:[#allocation2 + $0x598] sm:$0x70] %vm13740_vm0, %v2232_v36  ;;  %v2270_v29 = vsel %vm13741_vm2, %v2226_v63, %v2228_v7  ;;  %vm13745_vm6 = vmmov %vm13742_vm1  ;;  %v4453_v3 = vld [vmem:[#allocation2 + $0x570] sm:$0xff]  ;;  %vm13748_vm0 = vcmask 1042432  }
 0x544   :  { %2332 = vst [vmem:[#allocation2 + $0x590] sm:$0x70] %v2272_v16  ;;  %2330 = vst [vmem:[#allocation2 + $0x580] sm:$0x70] %v2270_v29  ;;  %v4451_v54 = vld [vmem:[#allocation2 + $0x560] sm:$0xff]  ;;  %v13755_v7 = vld [vmem:[#allocation152_spill] sm:$0xff] }
 0x545   :  { %2086 = vrot.lane.b32.xlu1 %v13709_v61, %s8678_s28  ;;  %2080 = vrot.lane.b32.xlu0 %v13710_v59, %s8678_s28  ;;  %vm13749_vm2 = vmmov %vm13748_vm0  ;;  %v13761_v16 = vld [vmem:[#allocation216_spill] sm:$0xff]  ;;  %v13762_v29 = vld [vmem:[#allocation213_spill] sm:$0xff] }
 0x546   :  { %v4170_v49 = vpop.permute.xlu1 %4169  ;;  %v4168_v0 = vpop.permute.xlu0 %4167 }
 0x547   :  { %v4206_v62 = vsel %vm13742_vm1, %v4168_v0, %v4170_v49  ;;  %vm13750_vm1 = vcmask 236544  }
 0x548   :  { %4267 = vst [vmem:[#allocation2 + $0x768] sm:$0x7] %v4206_v62 }
 0x549   :  { %2239 = vrot.lane.b32.xlu1 %v13669_v53, %s8679_s3  ;;  %2233 = vrot.lane.b32.xlu0 %v13712_v22, %s8679_s3  ;;  %v4452_v53 = vld [vmem:[#allocation2 + $0x568] sm:$0xff]  ;;  %v4454_v22 = vld [vmem:[#allocation2 + $0x578] sm:$0xff] }
 0x54a   :  { %v4172_v41 = vpop.permute.xlu1 %4171  ;;  %v4166_v18 = vpop.permute.xlu0 %4165  ;;  %v4458_v11 = vld [vmem:[#allocation2 + $0x598] sm:$0xff] }
 0x54b   :  { %v4207_v13 = vsel %vm13743_vm9, %v4170_v49, %v4172_v41  ;;  %4269 = vst.msk [vmem:[#allocation2 + $0x778] sm:$0x7] %vm13744_vm8, %v4172_v41  ;;  %v4205_v61 = vsel %vm13745_vm6, %v4166_v18, %v4168_v0  ;;  %5325 = vmatprep.subr.mxu1 %v4458_v11  ;;  %v4457_v59 = vld [vmem:[#allocation2 + $0x590] sm:$0xff]  ;;  %v4455_v28 = vld [vmem:[#allocation2 + $0x580] sm:$0xff]  ;;  %vm13751_vm9 = vmmov %vm13748_vm0 }
 0x54c   :  { %4268 = vst [vmem:[#allocation2 + $0x770] sm:$0x7] %v4207_v13  ;;  %4266 = vst [vmem:[#allocation2 + $0x760] sm:$0x7] %v4205_v61  ;;  %5326 = vmatpush1.msra.mxu1 %v4457_v59  ;;  %5255 = vmatpush1.msra.mxu0 %v4455_v28  ;;  %v13764_v41 = vld [vmem:[#allocation151_spill] sm:$0xff]  ;;  %v13765_v18 = vld [vmem:[#allocation150_spill] sm:$0xff] }
 0x54d   :  { %1746 = vrot.lane.b32.xlu1 %v13717_v39, %s8664_s16  ;;  %1744 = vrot.lane.b32.xlu0 %v13718_v44, %s8664_s16  ;;  %v4449_v39 = vld [vmem:[#allocation2 + $0x550] sm:$0xff]  ;;  %v4447_v44 = vld [vmem:[#allocation2 + $0x540] sm:$0xff]  ;;  %vm13752_vm8 = vmmov %vm13748_vm0 }
 0x54e   :  { %5256 = vmatprep.subr.mxu0 %v4452_v53  ;;  %5327 = vmatprep.subr.mxu1 %v4454_v22  ;;  %v3679_v33 = vpop.permute.xlu1 %3678  ;;  %vm13759_vm6 = vmmov %vm13750_vm1  ;;  %v13767_v22 = vld [vmem:[#allocation183_spill] sm:$0xff] }
 0x54f   :  { %5328 = vmatpush1.msra.mxu1 %v4453_v3  ;;  %v3677_v48 = vpop.permute.xlu0 %3676  ;;  %5257 = vmatpush1.msra.mxu0 %v4451_v54  ;;  %v4516_v17 = vld [vmem:[#allocation2 + $0x768] sm:$0x7] }
 0x550   :  { %v3715_v26 = vsel %vm3698_vm15, %v3677_v48, %v3679_v33  ;;  %5258 = vmatprep.subr.mxu0 %v4448_v38  ;;  %5329 = vmatprep.subr.mxu1 %v4450_v20  ;;  %v13770_v38 = vld [vmem:[#allocation215_spill] sm:$0xff]  ;;  %v13771_v20 = vld [vmem:[#allocation214_spill] sm:$0xff] }
 0x551   :  { %3796 = vst [vmem:[#allocation2 + $0x748] ss:$-28 sps:$4 sm:$0x83] %v3715_v26   ;;  %1748 = vrot.lane.b32.xlu1 %v13722_v42, %s8664_s16  ;;  %5330 = vmatpush1.msra.mxu1 %v4449_v39  ;;  %v4442_v42 = vld [vmem:[#allocation2 + $0x518] sm:$0xff] }
 0x552   :  { %1742 = vrot.lane.b32.xlu0 %v13723_v57, %s8664_s16  ;;  %5259 = vmatpush1.msra.mxu0 %v4447_v44  ;;  %v4518_v57 = vld [vmem:[#allocation2 + $0x778] sm:$0x7] }
 0x553   :  { %5260 = vmatprep.subr.mxu0 %v4444_v25  ;;  %5331 = vmatprep.subr.mxu1 %v4446_v45  ;;  %v3864_v12 = vpop.permute.xlu1 %3863  ;;  %v3862_v32 = vpop.permute.xlu0 %3861  ;;  %v4517_v50 = vld [vmem:[#allocation2 + $0x770] sm:$0x7]  ;;  %v4515_v30 = vld [vmem:[#allocation2 + $0x760] sm:$0x7] }
 0x554   :  { %5332 = vmatpush1.msra.mxu1 %v4445_v14  ;;  %v3900_v60 = vsel %vm3883_vm10, %v3862_v32, %v3864_v12  ;;  %5261 = vmatpush1.msra.mxu0 %v4443_v37  ;;  %v13774_v45 = vld [vmem:[#allocation74_spill] sm:$0xff] }
 0x555   :  { %3961 = vst [vmem:[#allocation2 + $0x748] sm:$0x1c] %v3900_v60  ;;  %5262 = vmatprep.subr.mxu0 %v4440_v5  ;;  %5333 = vmatprep.subr.mxu1 %v4442_v42  ;;  %v13778_v42 = vld [vmem:[#allocation106_spill] sm:$0xff] }
 0x556   :  { %4177 = vrot.lane.b32.xlu1 %v13746_v35, %s8665_s2  ;;  %5334 = vmatpush1.msra.mxu1 %v4441_v31  ;;  %v13779_v31 = vld [vmem:[#allocation103_spill] sm:$0xff] }
 0x557   :  { %4175 = vrot.lane.b32.xlu0 %v13747_v52, %s8665_s2  ;;  %5263 = vmatpush1.msra.mxu0 %v4439_v23  ;;  %v4017_v34 = vpop.permute.xlu1 %4016  ;;  %v4015_v9 = vpop.permute.xlu0 %4014 }
 0x558   :  { %8006 = vmatprep.subr.msk.mxu0 %vm13748_vm0, %v4516_v17  ;;  %8009 = vmatprep.subr.msk.mxu1 %vm13749_vm2, %v4518_v57  ;;  %v4053_v24 = vsel %vm13750_vm1, %v4015_v9, %v4017_v34  ;;  %vm13760_vm0 = vmmov %vm13750_vm1  ;;  %vm13763_vm2 = vcmask 433152   ;;  %vm13766_vm1 = vcmask 424960  }
 0x559   :  { %8005 = vmatmul.mubr.msk.f32.vlgmr.msra.gmra.mxu1 %vm4599_vm13, %v11522_v46  ;;  %4114 = vst [vmem:[#allocation2 + $0x748] sm:$0xe0] %v4053_v24  ;;  %8002 = vmatmul.mubr.msk.f32.vlgmr.msra.gmra.mxu0 %vm4599_vm13, %v11522_v46 }
 0x55a   :  { %8010 = vmatpush1.msk.msra.mxu1 %vm13751_vm9, %v4517_v50  ;;  %8007 = vmatpush1.msk.msra.mxu0 %vm13752_vm8, %v4515_v30  ;;  %vm13769_vm9 = vcmask 261120   ;;  %vm13772_vm8 = vmmov %vm13763_vm2 }
 0x55b   :  { %4179 = vrot.lane.b32.xlu1 %v13753_v47, %s8665_s2  ;;  %4173 = vrot.lane.b32.xlu0 %v13754_v56, %s8665_s2  ;;  %v3681_v55 = vpop.permute.xlu1 %3680  ;;  %v3675_v6 = vpop.permute.xlu0 %3674 }
 0x55c   :  { %v3716_v51 = vsel %vm3698_vm15, %v3679_v33, %v3681_v55  ;;  %3798 = vst.msk [vmem:[#allocation2 + $0x738] sm:$0x80] %vm1114_vm11, %v3681_v55  ;;  %v3714_v27 = vsel %vm3698_vm15, %v3675_v6, %v3677_v48  ;;  %5450 = vmatprep.mubr.f32.mxu0 %v8680_v58  ;;  %5521 = vmatprep.mubr.f32.mxu1 %v8680_v58  ;;  %v13768_v33 = vld [vmem:[#allocation182_spill] sm:$0xff]  ;;  %v13786_v6 = vld [vmem:[#allocation72_spill] sm:$0xff] }
 0x55d   :  { %3802 = vst.msk [vmem:[#allocation2 + $0x758] sm:$0x3] %vm1119_vm12, %v3681_v55  ;;  %3797 = vst [vmem:[#allocation2 + $0x750] ss:$-28 sps:$4 sm:$0x83] %v3716_v51   ;;  %v13785_v55 = vld [vmem:[#allocation73_spill] sm:$0xff] }
 0x55e   :  { %3795 = vst [vmem:[#allocation2 + $0x740] ss:$-28 sps:$4 sm:$0x83] %v3714_v27  }
 0x55f   :  { %3686 = vrot.lane.b32.xlu1 %v13755_v7, %s8666_s18  ;;  %3684 = vrot.lane.b32.xlu0 %v13756_v10, %s8666_s18  ;;  %v3866_v40 = vpop.permute.xlu1 %3865  ;;  %v3860_v43 = vpop.permute.xlu0 %3859 }
 0x560   :  { %v3901_v15 = vsel %vm3883_vm10, %v3864_v12, %v3866_v40  ;;  %3963 = vst.msk [vmem:[#allocation2 + $0x758] sm:$0x1c] %vm1333_vm14, %v3866_v40  ;;  %v3899_v2 = vsel %vm3883_vm10, %v3860_v43, %v3862_v32  ;;  %v4512_v21 = vld [vmem:[#allocation2 + $0x748] sm:$0xff] }
 0x561   :  { %3962 = vst [vmem:[#allocation2 + $0x750] sm:$0x1c] %v3901_v15  ;;  %3960 = vst [vmem:[#allocation2 + $0x740] sm:$0x1c] %v3899_v2  ;;  %5400 = vmatprep.subr.mxu0 %v4512_v21  ;;  %v13775_v12 = vld [vmem:[#allocation71_spill] sm:$0xff]  ;;  %v13788_v21 = vld [vmem:[#allocation105_spill] sm:$0xff] }
 0x563   :  { %3871 = vrot.lane.b32.xlu1 %v13757_v4, %s8667_s4  ;;  %3869 = vrot.lane.b32.xlu0 %v13758_v8, %s8667_s4  ;;  %v4019_v1 = vpop.permute.xlu1 %4018  ;;  %v4013_v19 = vpop.permute.xlu0 %4012 }
 0x564   :  { %v4054_v36 = vsel %vm13759_vm6, %v4017_v34, %v4019_v1  ;;  %4116 = vst.msk [vmem:[#allocation2 + $0x758] sm:$0xe0] %vm1519_vm3, %v4019_v1  ;;  %v4052_v63 = vsel %vm13760_vm0, %v4013_v19, %v4015_v9  ;;  %vm13773_vm6 = vmmov %vm13763_vm2  ;;  %v13783_v9 = vld [vmem:[#allocation124_spill] sm:$0xff] }
 0x565   :  { %4115 = vst [vmem:[#allocation2 + $0x750] sm:$0xe0] %v4054_v36  ;;  %4113 = vst [vmem:[#allocation2 + $0x740] sm:$0xe0] %v4052_v63  ;;  %v13789_v1 = vld [vmem:[#allocation104_spill] sm:$0xff] }
 0x566   :  { %vm13776_vm0 = vmmov %vm13766_vm1 }
 0x567   :  { %4024 = vrot.lane.b32.xlu1 %v13761_v16, %s8668_s19  ;;  %4022 = vrot.lane.b32.xlu0 %v13762_v29, %s8668_s19  ;;  %v3188_v49 = vpop.permute.xlu1 %3187  ;;  %v3186_v0 = vpop.permute.xlu0 %3185 }
 0x568   :  { %v3224_v62 = vsel %vm13763_vm2, %v3186_v0, %v3188_v49  ;;  %vm13777_vm2 = vmmov %vm13776_vm0 }
 0x569   :  { %3305 = vst [vmem:[#allocation2 + $0x728] ss:$-28 sps:$4 sm:$0xc1] %v3224_v62  }
 0x56b   :  { %3688 = vrot.lane.b32.xlu1 %v13764_v41, %s8666_s18  ;;  %3682 = vrot.lane.b32.xlu0 %v13765_v18, %s8666_s18  ;;  %v3373_v11 = vpop.permute.xlu1 %3372  ;;  %v3371_v13 = vpop.permute.xlu0 %3370  ;;  %v4514_v61 = vld [vmem:[#allocation2 + $0x758] sm:$0xff] }
 0x56c   :  { %v3409_v59 = vsel %vm13766_vm1, %v3371_v13, %v3373_v11  ;;  %5471 = vmatprep.subr.mxu1 %v4514_v61  ;;  %v4513_v28 = vld [vmem:[#allocation2 + $0x750] sm:$0xff]  ;;  %v4511_v53 = vld [vmem:[#allocation2 + $0x740] sm:$0xff]  ;;  %vm13780_vm1 = vmmov %vm13769_vm9 }
 0x56d   :  { %3470 = vst [vmem:[#allocation2 + $0x728] sm:$0xe] %v3409_v59  ;;  %5472 = vmatpush1.msra.mxu1 %v4513_v28  ;;  %5401 = vmatpush1.msra.mxu0 %v4511_v53 }
 0x56f   :  { %3873 = vrot.lane.b32.xlu1 %v13767_v22, %s8667_s4  ;;  %3867 = vrot.lane.b32.xlu0 %v13768_v33, %s8667_s4  ;;  %v3526_v3 = vpop.permute.xlu1 %3525  ;;  %v3524_v54 = vpop.permute.xlu0 %3523 }
 0x570   :  { %v3562_v48 = vsel %vm13769_vm9, %v3524_v54, %v3526_v3  ;;  %vm13781_vm9 = vcmask 202756  }
 0x571   :  { %3623 = vst [vmem:[#allocation2 + $0x728] sm:$0x70] %v3562_v48  ;;  %v13798_v48 = vld [vmem:[#allocation37_spill] sm:$0xff] }
 0x573   :  { %4026 = vrot.lane.b32.xlu1 %v13770_v38, %s8668_s19  ;;  %4020 = vrot.lane.b32.xlu0 %v13771_v20, %s8668_s19  ;;  %v3190_v26 = vpop.permute.xlu1 %3189  ;;  %v3184_v39 = vpop.permute.xlu0 %3183 }
 0x574   :  { %v3225_v44 = vsel %vm13772_vm8, %v3188_v49, %v3190_v26  ;;  %3307 = vst.msk [vmem:[#allocation2 + $0x718] sm:$0xc0] %vm539_vm4, %v3190_v26  ;;  %v3223_v25 = vsel %vm13773_vm6, %v3184_v39, %v3186_v0  ;;  %vm13782_vm8 = vmmov %vm13780_vm1  ;;  %vm13784_vm6 = vcmask 449536   ;;  %v13793_v0 = vld [vmem:[#allocation123_spill] sm:$0xff] }
 0x575   :  { %3311 = vst.msk [vmem:[#allocation2 + $0x738] sm:$0x1] %vm544_vm5, %v3190_v26  ;;  %3306 = vst [vmem:[#allocation2 + $0x730] ss:$-28 sps:$4 sm:$0xc1] %v3225_v44  }
 0x576   :  { %3304 = vst [vmem:[#allocation2 + $0x720] ss:$-28 sps:$4 sm:$0xc1] %v3223_v25  }
 0x577   :  { %3195 = vrot.lane.b32.xlu1 %v13774_v45, %s8669_s20  ;;  %3193 = vrot.lane.b32.xlu0 %v13775_v12, %s8669_s20  ;;  %v3375_v14 = vpop.permute.xlu1 %3374  ;;  %v3369_v32 = vpop.permute.xlu0 %3368 }
 0x578   :  { %v3410_v37 = vsel %vm13776_vm0, %v3373_v11, %v3375_v14  ;;  %3472 = vst.msk [vmem:[#allocation2 + $0x738] sm:$0xe] %vm758_vm7, %v3375_v14  ;;  %v3408_v60 = vsel %vm13777_vm2, %v3369_v32, %v3371_v13  ;;  %v4508_v5 = vld [vmem:[#allocation2 + $0x728] sm:$0xff]  ;;  %vm13787_vm0 = vcmask 441344   ;;  %vm13790_vm2 = vmmov %vm13784_vm6 }
 0x579   :  { %3471 = vst [vmem:[#allocation2 + $0x730] sm:$0xe] %v3410_v37  ;;  %3469 = vst [vmem:[#allocation2 + $0x720] sm:$0xe] %v3408_v60  ;;  %5402 = vmatprep.subr.mxu0 %v4508_v5  ;;  %v13801_v5 = vld [vmem:[#allocation40_spill] sm:$0xff] }
 0x57b   :  { %3380 = vrot.lane.b32.xlu1 %v13778_v42, %s8670_s21  ;;  %3378 = vrot.lane.b32.xlu0 %v13779_v31, %s8670_s21  ;;  %v3528_v57 = vpop.permute.xlu1 %3527  ;;  %v3522_v23 = vpop.permute.xlu0 %3521 }
 0x57c   :  { %v3563_v17 = vsel %vm13780_vm1, %v3526_v3, %v3528_v57  ;;  %3625 = vst.msk [vmem:[#allocation2 + $0x738] sm:$0x70] %vm13781_vm9, %v3528_v57  ;;  %v3561_v34 = vsel %vm13782_vm8, %v3522_v23, %v3524_v54  ;;  %vm13791_vm1 = vcmask 198656   ;;  %vm13792_vm9 = vmmov %vm13790_vm2  ;;  %v13797_v54 = vld [vmem:[#allocation41_spill] sm:$0xff]  ;;  %v13802_v57 = vld [vmem:[#allocation38_spill] sm:$0xff] }
 0x57d   :  { %3624 = vst [vmem:[#allocation2 + $0x730] sm:$0x70] %v3563_v17  ;;  %3622 = vst [vmem:[#allocation2 + $0x720] sm:$0x70] %v3561_v34 }
 0x57e   :  { %vm13794_vm8 = vmmov %vm13787_vm0 }
 0x57f   :  { %3533 = vrot.lane.b32.xlu1 %v13783_v9, %s8671_s22  ;;  %3531 = vrot.lane.b32.xlu0 %v13754_v56, %s8671_s22  ;;  %v2882_v24 = vpop.permute.xlu1 %2881  ;;  %v2880_v50 = vpop.permute.xlu0 %2879 }
 0x580   :  { %v2918_v30 = vsel %vm13784_vm6, %v2880_v50, %v2882_v24  ;;  %vm13795_vm6 = vcmask 201731  }
 0x581   :  { %2979 = vst [vmem:[#allocation2 + $0x708] sm:$0x7] %v2918_v30 }
 0x583   :  { %3197 = vrot.lane.b32.xlu1 %v13785_v55, %s8669_s20  ;;  %3191 = vrot.lane.b32.xlu0 %v13786_v6, %s8669_s20  ;;  %v3035_v51 = vpop.permute.xlu1 %3034  ;;  %v3033_v27 = vpop.permute.xlu0 %3032  ;;  %v4510_v40 = vld [vmem:[#allocation2 + $0x738] sm:$0xff] }
 0x584   :  { %v3071_v43 = vsel %vm13787_vm0, %v3033_v27, %v3035_v51  ;;  %5473 = vmatprep.subr.mxu1 %v4510_v40  ;;  %v4509_v15 = vld [vmem:[#allocation2 + $0x730] sm:$0xff]  ;;  %v4507_v2 = vld [vmem:[#allocation2 + $0x720] sm:$0xff] }
 0x585   :  { %3132 = vst [vmem:[#allocation2 + $0x708] sm:$0x38] %v3071_v43  ;;  %5474 = vmatpush1.msra.mxu1 %v4509_v15  ;;  %5403 = vmatpush1.msra.mxu0 %v4507_v2 }
 0x587   :  { %3382 = vrot.lane.b32.xlu1 %v13788_v21, %s8670_s21  ;;  %3376 = vrot.lane.b32.xlu0 %v13789_v1, %s8670_s21  ;;  %v2884_v19 = vpop.permute.xlu1 %2883  ;;  %v2878_v36 = vpop.permute.xlu0 %2877 }
 0x588   :  { %v2919_v63 = vsel %vm13790_vm2, %v2882_v24, %v2884_v19  ;;  %2981 = vst.msk [vmem:[#allocation2 + $0x718] sm:$0x7] %vm13791_vm1, %v2884_v19  ;;  %v2917_v49 = vsel %vm13792_vm9, %v2878_v36, %v2880_v50  ;;  %vm13796_vm2 = vcmask 629760   ;;  %vm13799_vm1 = vcmask 621568  }
 0x589   :  { %2980 = vst [vmem:[#allocation2 + $0x710] sm:$0x7] %v2919_v63  ;;  %2978 = vst [vmem:[#allocation2 + $0x700] sm:$0x7] %v2917_v49  ;;  %vm13800_vm9 = vcmask 457728  }
 0x58b   :  { %3535 = vrot.lane.b32.xlu1 %v13746_v35, %s8671_s22  ;;  %3529 = vrot.lane.b32.xlu0 %v13793_v0, %s8671_s22  ;;  %v3037_v62 = vpop.permute.xlu1 %3036  ;;  %v3031_v11 = vpop.permute.xlu0 %3030 }
 0x58c   :  { %v3072_v13 = vsel %vm13794_vm8, %v3035_v51, %v3037_v62  ;;  %3134 = vst.msk [vmem:[#allocation2 + $0x718] sm:$0x38] %vm13795_vm6, %v3037_v62  ;;  %v3070_v61 = vsel %vm13787_vm0, %v3031_v11, %v3033_v27  ;;  %v4504_v59 = vld [vmem:[#allocation2 + $0x708] sm:$0xff]  ;;  %vm13803_vm8 = vmmov %vm13796_vm2 }
 0x58d   :  { %3133 = vst [vmem:[#allocation2 + $0x710] sm:$0x38] %v3072_v13  ;;  %3131 = vst [vmem:[#allocation2 + $0x700] sm:$0x38] %v3070_v61  ;;  %5404 = vmatprep.subr.mxu0 %v4504_v59 }
 0x58e   :  { %vm13804_vm6 = vmmov %vm13796_vm2 }
 0x58f   :  { %2889 = vrot.lane.b32.xlu1 %v13746_v35, %s8672_s23  ;;  %2887 = vrot.lane.b32.xlu0 %v13747_v52, %s8672_s23  ;;  %v2391_v28 = vpop.permute.xlu1 %2390  ;;  %v2389_v53 = vpop.permute.xlu0 %2388  ;;  %vm13805_vm0 = vmmov %vm13799_vm1 }
 0x590   :  { %v2427_v3 = vsel %vm13796_vm2, %v2389_v53, %v2391_v28  ;;  %vm13806_vm2 = vmmov %vm13805_vm0 }
 0x591   :  { %2508 = vst [vmem:[#allocation2 + $0x6e8] ss:$-28 sps:$4 sm:$0x83] %v2427_v3  }
 0x593   :  { %3042 = vrot.lane.b32.xlu1 %v13797_v54, %s8673_s24  ;;  %3040 = vrot.lane.b32.xlu0 %v13798_v48, %s8673_s24  ;;  %v2576_v26 = vpop.permute.xlu1 %2575  ;;  %v2574_v39 = vpop.permute.xlu0 %2573  ;;  %v4506_v44 = vld [vmem:[#allocation2 + $0x718] sm:$0xff] }
 0x594   :  { %v2612_v25 = vsel %vm13799_vm1, %v2574_v39, %v2576_v26  ;;  %5475 = vmatprep.subr.mxu1 %v4506_v44  ;;  %v4505_v14 = vld [vmem:[#allocation2 + $0x710] sm:$0xff]  ;;  %v4503_v32 = vld [vmem:[#allocation2 + $0x700] sm:$0xff]  ;;  %vm13807_vm1 = vmmov %vm13800_vm9 }
 0x595   :  { %2673 = vst [vmem:[#allocation2 + $0x6e8] sm:$0x1c] %v2612_v25  ;;  %5476 = vmatpush1.msra.mxu1 %v4505_v14  ;;  %5405 = vmatpush1.msra.mxu0 %v4503_v32 }
 0x597   :  { %2891 = vrot.lane.b32.xlu1 %v13753_v47, %s8672_s23  ;;  %2885 = vrot.lane.b32.xlu0 %v13754_v56, %s8672_s23  ;;  %v2729_v52 = vpop.permute.xlu1 %2728  ;;  %v2727_v37 = vpop.permute.xlu0 %2726 }
 0x598   :  { %v2765_v60 = vsel %vm13800_vm9, %v2727_v37, %v2729_v52  ;;  %vm13808_vm9 = vmmov %vm13807_vm1 }
 0x599   :  { %2826 = vst [vmem:[#allocation2 + $0x6e8] sm:$0xe0] %v2765_v60 }
 0x59b   :  { %3044 = vrot.lane.b32.xlu1 %v13801_v5, %s8673_s24  ;;  %3038 = vrot.lane.b32.xlu0 %v13802_v57, %s8673_s24  ;;  %v2393_v23 = vpop.permute.xlu1 %2392  ;;  %v2387_v17 = vpop.permute.xlu0 %2386 }
 0x59c   :  { %v2428_v34 = vsel %vm13803_vm8, %v2391_v28, %v2393_v23  ;;  %2510 = vst.msk [vmem:[#allocation2 + $0x6d8] sm:$0x80] %vm1114_vm11, %v2393_v23  ;;  %v2426_v47 = vsel %vm13804_vm6, %v2387_v17, %v2389_v53  ;;  %vm13809_vm8 = vcmask 654336   ;;  %vm13810_vm6 = vcmask 646144   ;;  %v4490_v17 = vld [vmem:[#allocation2 + $0x698] sm:$0xff] }
 0x59d   :  { %2514 = vst.msk [vmem:[#allocation2 + $0x6f8] sm:$0x3] %vm1119_vm12, %v2393_v23  ;;  %2509 = vst [vmem:[#allocation2 + $0x6f0] ss:$-28 sps:$4 sm:$0x83] %v2428_v34  }
 0x59e   :  { %2507 = vst [vmem:[#allocation2 + $0x6e0] ss:$-28 sps:$4 sm:$0x83] %v2426_v47  }
 0x59f   :  { %2398 = vrot.lane.b32.xlu1 %v13755_v7, %s8674_s25  ;;  %2396 = vrot.lane.b32.xlu0 %v13756_v10, %s8674_s25  ;;  %v2578_v24 = vpop.permute.xlu1 %2577  ;;  %v2572_v50 = vpop.permute.xlu0 %2571 }
 0x5a0   :  { %v2613_v30 = vsel %vm13805_vm0, %v2576_v26, %v2578_v24  ;;  %2675 = vst.msk [vmem:[#allocation2 + $0x6f8] sm:$0x1c] %vm1333_vm14, %v2578_v24  ;;  %v2611_v51 = vsel %vm13806_vm2, %v2572_v50, %v2574_v39  ;;  %v4500_v27 = vld [vmem:[#allocation2 + $0x6e8] sm:$0xff]  ;;  %vm13811_vm0 = vcmask 637952   ;;  %vm13812_vm2 = vmmov %vm13809_vm8  ;;  %v4487_v24 = vld [vmem:[#allocation2 + $0x680] sm:$0xff] }
 0x5a1   :  { %2674 = vst [vmem:[#allocation2 + $0x6f0] sm:$0x1c] %v2613_v30  ;;  %2672 = vst [vmem:[#allocation2 + $0x6e0] sm:$0x1c] %v2611_v51  ;;  %5406 = vmatprep.subr.mxu0 %v4500_v27  ;;  %v4486_v50 = vld [vmem:[#allocation2 + $0x678] sm:$0xff]  ;;  %v4484_v27 = vld [vmem:[#allocation2 + $0x668] sm:$0xff] }
 0x5a3   :  { %2583 = vrot.lane.b32.xlu1 %v13757_v4, %s8675_s1  ;;  %2581 = vrot.lane.b32.xlu0 %v13758_v8, %s8675_s1  ;;  %v2731_v7 = vpop.permute.xlu1 %2730  ;;  %v2725_v10 = vpop.permute.xlu0 %2724 }
 0x5a4   :  { %v2766_v40 = vsel %vm13807_vm1, %v2729_v52, %v2731_v7  ;;  %2828 = vst.msk [vmem:[#allocation2 + $0x6f8] sm:$0xe0] %vm1519_vm3, %v2731_v7  ;;  %v2764_v43 = vsel %vm13808_vm9, %v2725_v10, %v2727_v37  ;;  %vm13813_vm1 = vmmov %vm13812_vm2  ;;  %v4485_v7 = vld [vmem:[#allocation2 + $0x670] sm:$0xff] }
 0x5a5   :  { %2827 = vst [vmem:[#allocation2 + $0x6f0] sm:$0xe0] %v2766_v40  ;;  %2825 = vst [vmem:[#allocation2 + $0x6e0] sm:$0xe0] %v2764_v43  ;;  %v4480_v40 = vld [vmem:[#allocation2 + $0x648] sm:$0xff]  ;;  %v4481_v43 = vld [vmem:[#allocation2 + $0x650] sm:$0xff] }
 0x5a6   :  { %vm13814_vm9 = vmmov %vm13810_vm6 }
 0x5a7   :  { %2736 = vrot.lane.b32.xlu1 %v13761_v16, %s8676_s26  ;;  %2734 = vrot.lane.b32.xlu0 %v13762_v29, %s8676_s26  ;;  %v1900_v4 = vpop.permute.xlu1 %1899  ;;  %v1898_v15 = vpop.permute.xlu0 %1897 }
 0x5a8   :  { %v1936_v8 = vsel %vm13809_vm8, %v1898_v15, %v1900_v4  ;;  %vm13815_vm8 = vmmov %vm13810_vm6 }
 0x5a9   :  { %2017 = vst [vmem:[#allocation2 + $0x6c8] ss:$-28 sps:$4 sm:$0xc1] %v1936_v8   ;;  %v4479_v8 = vld [vmem:[#allocation2 + $0x640] sm:$0xff] }
 0x5ab   :  { %2400 = vrot.lane.b32.xlu1 %v13764_v41, %s8674_s25  ;;  %2394 = vrot.lane.b32.xlu0 %v13765_v18, %s8674_s25  ;;  %v2085_v2 = vpop.permute.xlu1 %2084  ;;  %v2083_v19 = vpop.permute.xlu0 %2082  ;;  %v4502_v36 = vld [vmem:[#allocation2 + $0x6f8] sm:$0xff] }
 0x5ac   :  { %v2121_v63 = vsel %vm13810_vm6, %v2083_v19, %v2085_v2  ;;  %5477 = vmatprep.subr.mxu1 %v4502_v36  ;;  %v4501_v16 = vld [vmem:[#allocation2 + $0x6f0] sm:$0xff]  ;;  %v4499_v49 = vld [vmem:[#allocation2 + $0x6e0] sm:$0xff]  ;;  %vm13816_vm6 = vmmov %vm13811_vm0 }
 0x5ad   :  { %2182 = vst [vmem:[#allocation2 + $0x6c8] sm:$0xe] %v2121_v63  ;;  %5478 = vmatpush1.msra.mxu1 %v4501_v16  ;;  %5407 = vmatpush1.msra.mxu0 %v4499_v49  ;;  %v13830_v16 = vld [vmem:[#allocation26_spill] sm:$0xff] }
 0x5af   :  { %2585 = vrot.lane.b32.xlu1 %v13767_v22, %s8675_s1  ;;  %2579 = vrot.lane.b32.xlu0 %v13768_v33, %s8675_s1  ;;  %v2238_v29 = vpop.permute.xlu1 %2237  ;;  %v2236_v41 = vpop.permute.xlu0 %2235 }
 0x5b0   :  { %v2274_v18 = vsel %vm13811_vm0, %v2236_v41, %v2238_v29  ;;  %vm13817_vm0 = vcmask 202756  }
 0x5b1   :  { %2335 = vst [vmem:[#allocation2 + $0x6c8] sm:$0x70] %v2274_v18  ;;  %v13834_v18 = vld [vmem:[#allocation44_spill] sm:$0xff] }
 0x5b3   :  { %2738 = vrot.lane.b32.xlu1 %v13770_v38, %s8676_s26  ;;  %2732 = vrot.lane.b32.xlu0 %v13771_v20, %s8676_s26  ;;  %v1902_v62 = vpop.permute.xlu1 %1901  ;;  %v1896_v11 = vpop.permute.xlu0 %1895 }
 0x5b4   :  { %v1937_v13 = vsel %vm13812_vm2, %v1900_v4, %v1902_v62  ;;  %2019 = vst.msk [vmem:[#allocation2 + $0x6b8] sm:$0xc0] %vm539_vm4, %v1902_v62  ;;  %v1935_v22 = vsel %vm13813_vm1, %v1896_v11, %v1898_v15  ;;  %vm13818_vm2 = vmmov %vm13816_vm6  ;;  %vm13819_vm1 = vcmask 818176  }
 0x5b5   :  { %2023 = vst.msk [vmem:[#allocation2 + $0x6d8] sm:$0x1] %vm544_vm5, %v1902_v62  ;;  %2018 = vst [vmem:[#allocation2 + $0x6d0] ss:$-28 sps:$4 sm:$0xc1] %v1937_v13   ;;  %v13835_v62 = vld [vmem:[#allocation23_spill] sm:$0xff] }
 0x5b6   :  { %2016 = vst [vmem:[#allocation2 + $0x6c0] ss:$-28 sps:$4 sm:$0xc1] %v1935_v22  }
 0x5b7   :  { %1907 = vrot.lane.b32.xlu1 %v13774_v45, %s8677_s27  ;;  %1905 = vrot.lane.b32.xlu0 %v13775_v12, %s8677_s27  ;;  %v2087_v33 = vpop.permute.xlu1 %2086  ;;  %v2081_v38 = vpop.permute.xlu0 %2080 }
 0x5b8   :  { %v2122_v20 = vsel %vm13814_vm9, %v2085_v2, %v2087_v33  ;;  %2184 = vst.msk [vmem:[#allocation2 + $0x6d8] sm:$0xe] %vm758_vm7, %v2087_v33  ;;  %v2120_v61 = vsel %vm13815_vm8, %v2081_v38, %v2083_v19  ;;  %v4496_v59 = vld [vmem:[#allocation2 + $0x6c8] sm:$0xff]  ;;  %vm13820_vm9 = vmmov %vm13819_vm1  ;;  %vm13821_vm8 = vcmask 201731   ;;  %v13837_v38 = vld [vmem:[#allocation153_spill] sm:$0xff] }
 0x5b9   :  { %2183 = vst [vmem:[#allocation2 + $0x6d0] sm:$0xe] %v2122_v20  ;;  %2181 = vst [vmem:[#allocation2 + $0x6c0] sm:$0xe] %v2120_v61  ;;  %5408 = vmatprep.subr.mxu0 %v4496_v59  ;;  %v13836_v33 = vld [vmem:[#allocation156_spill] sm:$0xff] }
 0x5bb   :  { %2092 = vrot.lane.b32.xlu1 %v13778_v42, %s8678_s28  ;;  %2090 = vrot.lane.b32.xlu0 %v13779_v31, %s8678_s28  ;;  %v2240_v45 = vpop.permute.xlu1 %2239  ;;  %v2234_v12 = vpop.permute.xlu0 %2233 }
 0x5bc   :  { %v2275_v28 = vsel %vm13816_vm6, %v2238_v29, %v2240_v45  ;;  %2337 = vst.msk [vmem:[#allocation2 + $0x6d8] sm:$0x70] %vm13817_vm0, %v2240_v45  ;;  %v2273_v53 = vsel %vm13818_vm2, %v2234_v12, %v2236_v41  ;;  %vm13822_vm6 = vmmov %vm13819_vm1  ;;  %vm13823_vm0 = vcmask 228352  }
 0x5bd   :  { %2336 = vst [vmem:[#allocation2 + $0x6d0] sm:$0x70] %v2275_v28  ;;  %2334 = vst [vmem:[#allocation2 + $0x6c0] sm:$0x70] %v2273_v53  ;;  %v13838_v28 = vld [vmem:[#allocation188_spill] sm:$0xff]  ;;  %v13839_v53 = vld [vmem:[#allocation185_spill] sm:$0xff] }
 0x5be   :  { %vm13824_vm2 = vmmov %vm13823_vm0 }
 0x5bf   :  { %2245 = vrot.lane.b32.xlu1 %v13783_v9, %s8679_s3  ;;  %2243 = vrot.lane.b32.xlu0 %v13754_v56, %s8679_s3  ;;  %v1747_v42 = vpop.permute.xlu1 %1746  ;;  %v1745_v3 = vpop.permute.xlu0 %1744 }
 0x5c0   :  { %v1783_v31 = vsel %vm13819_vm1, %v1745_v3, %v1747_v42  ;;  %vm13825_vm1 = vcmask 198656  }
 0x5c1   :  { %1844 = vst [vmem:[#allocation2 + $0x6a8] sm:$0x38] %v1783_v31 }
 0x5c3   :  { %1909 = vrot.lane.b32.xlu1 %v13785_v55, %s8677_s27  ;;  %1903 = vrot.lane.b32.xlu0 %v13786_v6, %s8677_s27  ;;  %v1749_v26 = vpop.permute.xlu1 %1748  ;;  %v4498_v39 = vld [vmem:[#allocation2 + $0x6d8] sm:$0xff] }
 0x5c4   :  { %v1784_v44 = vsel %vm13820_vm9, %v1747_v42, %v1749_v26  ;;  %1846 = vst.msk [vmem:[#allocation2 + $0x6b8] sm:$0x38] %vm13821_vm8, %v1749_v26  ;;  %v1743_v9 = vpop.permute.xlu0 %1742  ;;  %5479 = vmatprep.subr.mxu1 %v4498_v39  ;;  %v4497_v56 = vld [vmem:[#allocation2 + $0x6d0] sm:$0xff]  ;;  %v4495_v25 = vld [vmem:[#allocation2 + $0x6c0] sm:$0xff]  ;;  %vm13826_vm9 = vmmov %vm13823_vm0  ;;  %vm13827_vm8 = vcmask 1042432  }
 0x5c5   :  { %1845 = vst [vmem:[#allocation2 + $0x6b0] sm:$0x38] %v1784_v44  ;;  %v1782_v14 = vsel %vm13822_vm6, %v1743_v9, %v1745_v3  ;;  %5480 = vmatpush1.msra.mxu1 %v4497_v56  ;;  %5409 = vmatpush1.msra.mxu0 %v4495_v25  ;;  %vm13828_vm6 = vmmov %vm13827_vm8  ;;  %v13842_v39 = vld [vmem:[#allocation220_spill] sm:$0xff]  ;;  %v13843_v44 = vld [vmem:[#allocation217_spill] sm:$0xff] }
 0x5c6   :  { %1843 = vst [vmem:[#allocation2 + $0x6a0] sm:$0x38] %v1782_v14  ;;  %v13845_v14 = vld [vmem:[#allocation155_spill] sm:$0xff] }
 0x5c7   :  { %2094 = vrot.lane.b32.xlu1 %v13788_v21, %s8678_s28  ;;  %2088 = vrot.lane.b32.xlu0 %v13789_v1, %s8678_s28 }
 0x5c8   :  { %v4178_v55 = vpop.permute.xlu1 %4177  ;;  %v4492_v6 = vld [vmem:[#allocation2 + $0x6a8] sm:$0xff] }
 0x5c9   :  { %v4176_v32 = vpop.permute.xlu0 %4175  ;;  %5410 = vmatprep.subr.mxu0 %v4492_v6 }
 0x5ca   :  { %v4209_v52 = vsel %vm13823_vm0, %v4176_v32, %v4178_v55  ;;  %vm13831_vm0 = vmmov %vm13828_vm6 }
 0x5cb   :  { %4271 = vst [vmem:[#allocation2 + $0x8a8] sm:$0x7] %v4209_v52  ;;  %2247 = vrot.lane.b32.xlu1 %v13746_v35, %s8679_s3  ;;  %2241 = vrot.lane.b32.xlu0 %v13793_v0, %s8679_s3  ;;  %v4494_v37 = vld [vmem:[#allocation2 + $0x6b8] sm:$0xff]  ;;  %v4488_v35 = vld [vmem:[#allocation2 + $0x688] sm:$0xff]  ;;  %v4489_v0 = vld [vmem:[#allocation2 + $0x690] sm:$0xff] }
 0x5cc   :  { %5481 = vmatprep.subr.mxu1 %v4494_v37  ;;  %v4493_v60 = vld [vmem:[#allocation2 + $0x6b0] sm:$0xff] }
 0x5cd   :  { %v4180_v21 = vpop.permute.xlu1 %4179  ;;  %v4174_v23 = vpop.permute.xlu0 %4173  ;;  %5482 = vmatpush1.msra.mxu1 %v4493_v60  ;;  %v4491_v1 = vld [vmem:[#allocation2 + $0x6a0] sm:$0xff] }
 0x5ce   :  { %v4210_v34 = vsel %vm13824_vm2, %v4178_v55, %v4180_v21  ;;  %4273 = vst.msk [vmem:[#allocation2 + $0x8b8] sm:$0x7] %vm13825_vm1, %v4180_v21  ;;  %v4208_v47 = vsel %vm13826_vm9, %v4174_v23, %v4176_v32  ;;  %5411 = vmatpush1.msra.mxu0 %v4491_v1  ;;  %5483 = vmatprep.subr.mxu1 %v4490_v17  ;;  %vm13832_vm2 = vmmov %vm13831_vm0  ;;  %vm13833_vm1 = vcmask 236544   ;;  %v13846_v55 = vld [vmem:[#allocation154_spill] sm:$0xff]  ;;  %v13848_v23 = vld [vmem:[#allocation187_spill] sm:$0xff] }
 0x5cf   :  { %4272 = vst [vmem:[#allocation2 + $0x8b0] sm:$0x7] %v4210_v34  ;;  %4270 = vst [vmem:[#allocation2 + $0x8a0] sm:$0x7] %v4208_v47  ;;  %1754 = vrot.lane.b32.xlu1 %v13797_v54, %s8664_s16  ;;  %1752 = vrot.lane.b32.xlu0 %v13798_v48, %s8664_s16  ;;  %v4483_v54 = vld [vmem:[#allocation2 + $0x660] sm:$0xff]  ;;  %v4482_v48 = vld [vmem:[#allocation2 + $0x658] sm:$0xff] }
 0x5d0   :  { %5412 = vmatprep.subr.mxu0 %v4488_v35  ;;  %5484 = vmatpush1.msra.mxu1 %v4489_v0  ;;  %vm13840_vm9 = vmmov %vm13833_vm1  ;;  %v13849_v1 = vld [vmem:[#allocation186_spill] sm:$0xff]  ;;  %v13851_v35 = vld [vmem:[#allocation219_spill] sm:$0xff] }
 0x5d1   :  { %v3687_v30 = vpop.permute.xlu1 %3686  ;;  %v3685_v51 = vpop.permute.xlu0 %3684  ;;  %5413 = vmatpush1.msra.mxu0 %v4487_v24  ;;  %5485 = vmatprep.subr.mxu1 %v4486_v50  ;;  %v13852_v0 = vld [vmem:[#allocation218_spill] sm:$0xff] }
 0x5d2   :  { %v3718_v10 = vsel %vm3698_vm15, %v3685_v51, %v3687_v30  ;;  %5414 = vmatprep.subr.mxu0 %v4484_v27  ;;  %5486 = vmatpush1.msra.mxu1 %v4485_v7  ;;  %v4556_v36 = vld [vmem:[#allocation2 + $0x8a8] sm:$0x7]  ;;  %v13855_v27 = vld [vmem:[#allocation78_spill] sm:$0xff] }
 0x5d3   :  { %3804 = vst [vmem:[#allocation2 + $0x888] ss:$-28 sps:$4 sm:$0x83] %v3718_v10   ;;  %1756 = vrot.lane.b32.xlu1 %v13801_v5, %s8664_s16  ;;  %1750 = vrot.lane.b32.xlu0 %v13802_v57, %s8664_s16  ;;  %v13829_v57 = vld [vmem:[#allocation25_spill] sm:$0xff]  ;;  %v13856_v7 = vld [vmem:[#allocation75_spill] sm:$0xff] }
 0x5d4   :  { %5415 = vmatpush1.msra.mxu0 %v4483_v54  ;;  %5487 = vmatprep.subr.mxu1 %v4482_v48 }
 0x5d5   :  { %5416 = vmatprep.subr.mxu0 %v4480_v40  ;;  %v3872_v4 = vpop.permute.xlu1 %3871  ;;  %5488 = vmatpush1.msra.mxu1 %v4481_v43  ;;  %v3870_v15 = vpop.permute.xlu0 %3869  ;;  %v4558_v2 = vld [vmem:[#allocation2 + $0x8b8] sm:$0x7] }
 0x5d6   :  { %v3903_v19 = vsel %vm3883_vm10, %v3870_v15, %v3872_v4  ;;  %5417 = vmatpush1.msra.mxu0 %v4479_v8  ;;  %8015 = vmatprep.subr.msk.mxu1 %vm13827_vm8, %v4558_v2  ;;  %v4557_v5 = vld [vmem:[#allocation2 + $0x8b0] sm:$0x7]  ;;  %v4555_v63 = vld [vmem:[#allocation2 + $0x8a0] sm:$0x7]  ;;  %vm13841_vm8 = vmmov %vm13833_vm1 }
 0x5d7   :  { %3965 = vst [vmem:[#allocation2 + $0x888] sm:$0x1c] %v3903_v19  ;;  %8012 = vmatprep.subr.msk.mxu0 %vm13828_vm6, %v4556_v36  ;;  %4185 = vrot.lane.b32.xlu1 %v13829_v57, %s8665_s2  ;;  %vm13844_vm6 = vcmask 433152  }
 0x5d8   :  { %8011 = vmatmul.mubr.msk.f32.vlgmr.msra.gmra.mxu1 %vm4599_vm13, %v11522_v46  ;;  %4183 = vrot.lane.b32.xlu0 %v13830_v16, %s8665_s2 }
 0x5d9   :  { %8016 = vmatpush1.msk.msra.mxu1 %vm13831_vm0, %v4557_v5  ;;  %8008 = vmatmul.mubr.msk.f32.vlgmr.msra.gmra.mxu0 %vm4599_vm13, %v11522_v46  ;;  %v4025_v49 = vpop.permute.xlu1 %4024  ;;  %v4023_v29 = vpop.permute.xlu0 %4022  ;;  %vm13847_vm0 = vcmask 424960   ;;  %v13864_v5 = vld [vmem:[#allocation126_spill] sm:$0xff] }
 0x5da   :  { %8013 = vmatpush1.msk.msra.mxu0 %vm13832_vm2, %v4555_v63  ;;  %v4056_v41 = vsel %vm13833_vm1, %v4023_v29, %v4025_v49  ;;  %5604 = vmatprep.mubr.f32.mxu0 %v8680_v58  ;;  %vm13850_vm2 = vcmask 261120   ;;  %vm13853_vm1 = vmmov %vm13844_vm6 }
 0x5db   :  { %4118 = vst [vmem:[#allocation2 + $0x888] sm:$0xe0] %v4056_v41  ;;  %4187 = vrot.lane.b32.xlu1 %v13834_v18, %s8665_s2  ;;  %5675 = vmatprep.mubr.f32.mxu1 %v8680_v58  ;;  %v13866_v41 = vld [vmem:[#allocation77_spill] sm:$0xff] }
 0x5dc   :  { %4181 = vrot.lane.b32.xlu0 %v13835_v62, %s8665_s2 }
 0x5dd   :  { %v3689_v11 = vpop.permute.xlu1 %3688  ;;  %v3683_v13 = vpop.permute.xlu0 %3682 }
 0x5de   :  { %v3719_v46 = vsel %vm3698_vm15, %v3687_v30, %v3689_v11  ;;  %3806 = vst.msk [vmem:[#allocation2 + $0x878] sm:$0x80] %vm1114_vm11, %v3689_v11  ;;  %v3717_v22 = vsel %vm3698_vm15, %v3683_v13, %v3685_v51 }
 0x5df   :  { %3810 = vst.msk [vmem:[#allocation2 + $0x898] sm:$0x3] %vm1119_vm12, %v3689_v11  ;;  %3805 = vst [vmem:[#allocation2 + $0x890] ss:$-28 sps:$4 sm:$0x83] %v3719_v46   ;;  %3694 = vrot.lane.b32.xlu1 %v13836_v33, %s8666_s18  ;;  %v13867_v11 = vld [vmem:[#allocation76_spill] sm:$0xff] }
 0x5e0   :  { %3803 = vst [vmem:[#allocation2 + $0x880] ss:$-28 sps:$4 sm:$0x83] %v3717_v22   ;;  %3692 = vrot.lane.b32.xlu0 %v13837_v38, %s8666_s18 }
 0x5e1   :  { %v3874_v20 = vpop.permute.xlu1 %3873  ;;  %v3868_v61 = vpop.permute.xlu0 %3867 }
 0x5e2   :  { %v3904_v59 = vsel %vm3883_vm10, %v3872_v4, %v3874_v20  ;;  %3967 = vst.msk [vmem:[#allocation2 + $0x898] sm:$0x1c] %vm1333_vm14, %v3874_v20  ;;  %v3902_v45 = vsel %vm3883_vm10, %v3868_v61, %v3870_v15  ;;  %v4552_v12 = vld [vmem:[#allocation2 + $0x888] sm:$0xff]  ;;  %v13859_v4 = vld [vmem:[#allocation110_spill] sm:$0xff] }
 0x5e3   :  { %3966 = vst [vmem:[#allocation2 + $0x890] sm:$0x1c] %v3904_v59  ;;  %3964 = vst [vmem:[#allocation2 + $0x880] sm:$0x1c] %v3902_v45  ;;  %3879 = vrot.lane.b32.xlu1 %v13838_v28, %s8667_s4  ;;  %5554 = vmatprep.subr.mxu0 %v4552_v12  ;;  %v13860_v15 = vld [vmem:[#allocation107_spill] sm:$0xff]  ;;  %v13869_v45 = vld [vmem:[#allocation109_spill] sm:$0xff] }
 0x5e4   :  { %3877 = vrot.lane.b32.xlu0 %v13839_v53, %s8667_s4  ;;  %v13870_v12 = vld [vmem:[#allocation108_spill] sm:$0xff] }
 0x5e5   :  { %v4027_v42 = vpop.permute.xlu1 %4026  ;;  %v4021_v3 = vpop.permute.xlu0 %4020 }
 0x5e6   :  { %v4057_v31 = vsel %vm13840_vm9, %v4025_v49, %v4027_v42  ;;  %4120 = vst.msk [vmem:[#allocation2 + $0x898] sm:$0xe0] %vm1519_vm3, %v4027_v42  ;;  %v4055_v26 = vsel %vm13841_vm8, %v4021_v3, %v4023_v29  ;;  %vm13854_vm9 = vmmov %vm13853_vm1 }
 0x5e7   :  { %4119 = vst [vmem:[#allocation2 + $0x890] sm:$0xe0] %v4057_v31  ;;  %4117 = vst [vmem:[#allocation2 + $0x880] sm:$0xe0] %v4055_v26  ;;  %4032 = vrot.lane.b32.xlu1 %v13842_v39, %s8668_s19 }
 0x5e8   :  { %4030 = vrot.lane.b32.xlu0 %v13843_v44, %s8668_s19  ;;  %vm13857_vm8 = vmmov %vm13847_vm0 }
 0x5e9   :  { %v3196_v9 = vpop.permute.xlu1 %3195  ;;  %v3194_v56 = vpop.permute.xlu0 %3193 }
 0x5ea   :  { %v3227_v25 = vsel %vm13844_vm6, %v3194_v56, %v3196_v9  ;;  %vm13858_vm6 = vmmov %vm13847_vm0 }
 0x5eb   :  { %3313 = vst [vmem:[#allocation2 + $0x868] ss:$-28 sps:$4 sm:$0xc1] %v3227_v25   ;;  %3696 = vrot.lane.b32.xlu1 %v13845_v14, %s8666_s18 }
 0x5ec   :  { %3690 = vrot.lane.b32.xlu0 %v13846_v55, %s8666_s18 }
 0x5ed   :  { %v3381_v6 = vpop.permute.xlu1 %3380  ;;  %v3379_v32 = vpop.permute.xlu0 %3378  ;;  %v4554_v52 = vld [vmem:[#allocation2 + $0x898] sm:$0xff] }
 0x5ee   :  { %v3412_v37 = vsel %vm13847_vm0, %v3379_v32, %v3381_v6  ;;  %5625 = vmatprep.subr.mxu1 %v4554_v52  ;;  %v4553_v60 = vld [vmem:[#allocation2 + $0x890] sm:$0xff]  ;;  %v4551_v21 = vld [vmem:[#allocation2 + $0x880] sm:$0xff]  ;;  %vm13861_vm0 = vmmov %vm13850_vm2 }
 0x5ef   :  { %3474 = vst [vmem:[#allocation2 + $0x868] sm:$0xe] %v3412_v37  ;;  %3881 = vrot.lane.b32.xlu1 %v13848_v23, %s8667_s4  ;;  %5626 = vmatpush1.msra.mxu1 %v4553_v60 }
 0x5f0   :  { %3875 = vrot.lane.b32.xlu0 %v13849_v1, %s8667_s4  ;;  %5555 = vmatpush1.msra.mxu0 %v4551_v21 }
 0x5f1   :  { %v3534_v17 = vpop.permute.xlu1 %3533  ;;  %v3532_v34 = vpop.permute.xlu0 %3531 }
 0x5f2   :  { %v3565_v47 = vsel %vm13850_vm2, %v3532_v34, %v3534_v17  ;;  %vm13862_vm2 = vcmask 202756  }
 0x5f3   :  { %3627 = vst [vmem:[#allocation2 + $0x868] sm:$0x70] %v3565_v47  ;;  %4034 = vrot.lane.b32.xlu1 %v13851_v35, %s8668_s19 }
 0x5f4   :  { %4028 = vrot.lane.b32.xlu0 %v13852_v0, %s8668_s19 }
 0x5f5   :  { %v3198_v24 = vpop.permute.xlu1 %3197  ;;  %v3192_v50 = vpop.permute.xlu0 %3191 }
 0x5f6   :  { %v3228_v30 = vsel %vm13853_vm1, %v3196_v9, %v3198_v24  ;;  %3315 = vst.msk [vmem:[#allocation2 + $0x858] sm:$0xc0] %vm539_vm4, %v3198_v24  ;;  %v3226_v51 = vsel %vm13854_vm9, %v3192_v50, %v3194_v56  ;;  %vm13863_vm1 = vmmov %vm13861_vm0  ;;  %vm13865_vm9 = vcmask 449536   ;;  %v13874_v9 = vld [vmem:[#allocation125_spill] sm:$0xff] }
 0x5f7   :  { %3319 = vst.msk [vmem:[#allocation2 + $0x878] sm:$0x1] %vm544_vm5, %v3198_v24  ;;  %3314 = vst [vmem:[#allocation2 + $0x870] ss:$-28 sps:$4 sm:$0xc1] %v3228_v30   ;;  %3203 = vrot.lane.b32.xlu1 %v13855_v27, %s8669_s20 }
 0x5f8   :  { %3312 = vst [vmem:[#allocation2 + $0x860] ss:$-28 sps:$4 sm:$0xc1] %v3226_v51   ;;  %3201 = vrot.lane.b32.xlu0 %v13856_v7, %s8669_s20 }
 0x5f9   :  { %v3383_v10 = vpop.permute.xlu1 %3382  ;;  %v3377_v54 = vpop.permute.xlu0 %3376 }
 0x5fa   :  { %v3413_v48 = vsel %vm13857_vm8, %v3381_v6, %v3383_v10  ;;  %3476 = vst.msk [vmem:[#allocation2 + $0x878] sm:$0xe] %vm758_vm7, %v3383_v10  ;;  %v3411_v40 = vsel %vm13858_vm6, %v3377_v54, %v3379_v32  ;;  %v4548_v43 = vld [vmem:[#allocation2 + $0x868] sm:$0xff]  ;;  %vm13868_vm8 = vcmask 441344   ;;  %vm13871_vm6 = vmmov %vm13865_vm9 }
 0x5fb   :  { %3475 = vst [vmem:[#allocation2 + $0x870] sm:$0xe] %v3413_v48  ;;  %3473 = vst [vmem:[#allocation2 + $0x860] sm:$0xe] %v3411_v40  ;;  %3388 = vrot.lane.b32.xlu1 %v13859_v4, %s8670_s21  ;;  %5556 = vmatprep.subr.mxu0 %v4548_v43  ;;  %v13883_v40 = vld [vmem:[#allocation45_spill] sm:$0xff]  ;;  %v13884_v43 = vld [vmem:[#allocation43_spill] sm:$0xff] }
 0x5fc   :  { %3386 = vrot.lane.b32.xlu0 %v13860_v15, %s8670_s21 }
 0x5fd   :  { %v3536_v8 = vpop.permute.xlu1 %3535  ;;  %v3530_v2 = vpop.permute.xlu0 %3529 }
 0x5fe   :  { %v3566_v19 = vsel %vm13861_vm0, %v3534_v17, %v3536_v8  ;;  %3629 = vst.msk [vmem:[#allocation2 + $0x878] sm:$0x70] %vm13862_vm2, %v3536_v8  ;;  %v3564_v36 = vsel %vm13863_vm1, %v3530_v2, %v3532_v34  ;;  %vm13872_vm0 = vcmask 198656   ;;  %vm13873_vm2 = vmmov %vm13871_vm6  ;;  %v13879_v17 = vld [vmem:[#allocation46_spill] sm:$0xff] }
 0x5ff   :  { %3628 = vst [vmem:[#allocation2 + $0x870] sm:$0x70] %v3566_v19  ;;  %3626 = vst [vmem:[#allocation2 + $0x860] sm:$0x70] %v3564_v36  ;;  %3541 = vrot.lane.b32.xlu1 %v13864_v5, %s8671_s22  ;;  %v13880_v34 = vld [vmem:[#allocation42_spill] sm:$0xff] }
 0x600   :  { %3539 = vrot.lane.b32.xlu0 %v13835_v62, %s8671_s22  ;;  %vm13875_vm1 = vmmov %vm13868_vm8 }
 0x601   :  { %v2890_v63 = vpop.permute.xlu1 %2889  ;;  %v2888_v49 = vpop.permute.xlu0 %2887 }
 0x602   :  { %v2921_v29 = vsel %vm13865_vm9, %v2888_v49, %v2890_v63  ;;  %vm13876_vm9 = vcmask 201731  }
 0x603   :  { %2983 = vst [vmem:[#allocation2 + $0x848] sm:$0x7] %v2921_v29  ;;  %3205 = vrot.lane.b32.xlu1 %v13866_v41, %s8669_s20 }
 0x604   :  { %3199 = vrot.lane.b32.xlu0 %v13867_v11, %s8669_s20 }
 0x605   :  { %v3043_v13 = vpop.permute.xlu1 %3042  ;;  %v3041_v46 = vpop.permute.xlu0 %3040  ;;  %v4550_v22 = vld [vmem:[#allocation2 + $0x878] sm:$0xff] }
 0x606   :  { %v3074_v20 = vsel %vm13868_vm8, %v3041_v46, %v3043_v13  ;;  %5627 = vmatprep.subr.mxu1 %v4550_v22  ;;  %v4549_v61 = vld [vmem:[#allocation2 + $0x870] sm:$0xff]  ;;  %v4547_v59 = vld [vmem:[#allocation2 + $0x860] sm:$0xff]  ;;  %vm13877_vm8 = vmmov %vm13875_vm1 }
 0x607   :  { %3136 = vst [vmem:[#allocation2 + $0x848] sm:$0x38] %v3074_v20  ;;  %3390 = vrot.lane.b32.xlu1 %v13869_v45, %s8670_s21  ;;  %5628 = vmatpush1.msra.mxu1 %v4549_v61 }
 0x608   :  { %3384 = vrot.lane.b32.xlu0 %v13870_v12, %s8670_s21  ;;  %5557 = vmatpush1.msra.mxu0 %v4547_v59 }
 0x609   :  { %v2892_v42 = vpop.permute.xlu1 %2891  ;;  %v2886_v3 = vpop.permute.xlu0 %2885 }
 0x60a   :  { %v2922_v31 = vsel %vm13871_vm6, %v2890_v63, %v2892_v42  ;;  %2985 = vst.msk [vmem:[#allocation2 + $0x858] sm:$0x7] %vm13872_vm0, %v2892_v42  ;;  %v2920_v26 = vsel %vm13873_vm2, %v2886_v3, %v2888_v49  ;;  %vm13878_vm6 = vcmask 629760   ;;  %vm13881_vm0 = vcmask 621568  }
 0x60b   :  { %2984 = vst [vmem:[#allocation2 + $0x850] sm:$0x7] %v2922_v31  ;;  %2982 = vst [vmem:[#allocation2 + $0x840] sm:$0x7] %v2920_v26  ;;  %3543 = vrot.lane.b32.xlu1 %v13829_v57, %s8671_s22  ;;  %vm13882_vm2 = vcmask 457728  }
 0x60c   :  { %3537 = vrot.lane.b32.xlu0 %v13874_v9, %s8671_s22 }
 0x60d   :  { %v3045_v56 = vpop.permute.xlu1 %3044  ;;  %v3039_v25 = vpop.permute.xlu0 %3038 }
 0x60e   :  { %v3075_v6 = vsel %vm13875_vm1, %v3043_v13, %v3045_v56  ;;  %3138 = vst.msk [vmem:[#allocation2 + $0x858] sm:$0x38] %vm13876_vm9, %v3045_v56  ;;  %v3073_v32 = vsel %vm13877_vm8, %v3039_v25, %v3041_v46  ;;  %v4544_v52 = vld [vmem:[#allocation2 + $0x848] sm:$0xff]  ;;  %vm13885_vm1 = vmmov %vm13878_vm6 }
 0x60f   :  { %3137 = vst [vmem:[#allocation2 + $0x850] sm:$0x38] %v3075_v6  ;;  %3135 = vst [vmem:[#allocation2 + $0x840] sm:$0x38] %v3073_v32  ;;  %2897 = vrot.lane.b32.xlu1 %v13829_v57, %s8672_s23  ;;  %5558 = vmatprep.subr.mxu0 %v4544_v52 }
 0x610   :  { %2895 = vrot.lane.b32.xlu0 %v13830_v16, %s8672_s23  ;;  %vm13886_vm9 = vmmov %vm13885_vm1 }
 0x611   :  { %v2399_v37 = vpop.permute.xlu1 %2398  ;;  %v2397_v60 = vpop.permute.xlu0 %2396  ;;  %vm13887_vm8 = vmmov %vm13881_vm0 }
 0x612   :  { %v2430_v21 = vsel %vm13878_vm6, %v2397_v60, %v2399_v37  ;;  %vm13888_vm6 = vmmov %vm13881_vm0 }
 0x613   :  { %2516 = vst [vmem:[#allocation2 + $0x828] ss:$-28 sps:$4 sm:$0x83] %v2430_v21   ;;  %3050 = vrot.lane.b32.xlu1 %v13879_v17, %s8673_s24 }
 0x614   :  { %3048 = vrot.lane.b32.xlu0 %v13880_v34, %s8673_s24 }
 0x615   :  { %v2584_v47 = vpop.permute.xlu1 %2583  ;;  %v2582_v24 = vpop.permute.xlu0 %2581  ;;  %v4546_v50 = vld [vmem:[#allocation2 + $0x858] sm:$0xff] }
 0x616   :  { %v2615_v30 = vsel %vm13881_vm0, %v2582_v24, %v2584_v47  ;;  %5629 = vmatprep.subr.mxu1 %v4546_v50  ;;  %v4545_v51 = vld [vmem:[#allocation2 + $0x850] sm:$0xff]  ;;  %v4543_v10 = vld [vmem:[#allocation2 + $0x840] sm:$0xff]  ;;  %vm13889_vm0 = vmmov %vm13882_vm2 }
 0x617   :  { %2677 = vst [vmem:[#allocation2 + $0x828] sm:$0x1c] %v2615_v30  ;;  %2899 = vrot.lane.b32.xlu1 %v13834_v18, %s8672_s23  ;;  %5630 = vmatpush1.msra.mxu1 %v4545_v51 }
 0x618   :  { %2893 = vrot.lane.b32.xlu0 %v13835_v62, %s8672_s23  ;;  %5559 = vmatpush1.msra.mxu0 %v4543_v10 }
 0x619   :  { %v2737_v16 = vpop.permute.xlu1 %2736  ;;  %v2735_v54 = vpop.permute.xlu0 %2734 }
 0x61a   :  { %v2768_v48 = vsel %vm13882_vm2, %v2735_v54, %v2737_v16  ;;  %vm13890_vm2 = vmmov %vm13889_vm0 }
 0x61b   :  { %2830 = vst [vmem:[#allocation2 + $0x828] sm:$0xe0] %v2768_v48  ;;  %3052 = vrot.lane.b32.xlu1 %v13883_v40, %s8673_s24 }
 0x61c   :  { %3046 = vrot.lane.b32.xlu0 %v13884_v43, %s8673_s24 }
 0x61d   :  { %v2401_v8 = vpop.permute.xlu1 %2400  ;;  %v2395_v2 = vpop.permute.xlu0 %2394 }
 0x61e   :  { %v2431_v18 = vsel %vm13885_vm1, %v2399_v37, %v2401_v8  ;;  %2518 = vst.msk [vmem:[#allocation2 + $0x818] sm:$0x80] %vm1114_vm11, %v2401_v8  ;;  %v2429_v19 = vsel %vm13886_vm9, %v2395_v2, %v2397_v60  ;;  %vm13891_vm1 = vcmask 654336   ;;  %vm13892_vm9 = vcmask 646144  }
 0x61f   :  { %2522 = vst.msk [vmem:[#allocation2 + $0x838] sm:$0x3] %vm1119_vm12, %v2401_v8  ;;  %2517 = vst [vmem:[#allocation2 + $0x830] ss:$-28 sps:$4 sm:$0x83] %v2431_v18   ;;  %2406 = vrot.lane.b32.xlu1 %v13836_v33, %s8674_s25 }
 0x620   :  { %2515 = vst [vmem:[#allocation2 + $0x820] ss:$-28 sps:$4 sm:$0x83] %v2429_v19   ;;  %2404 = vrot.lane.b32.xlu0 %v13837_v38, %s8674_s25  ;;  %v4529_v19 = vld [vmem:[#allocation2 + $0x7d0] sm:$0xff] }
 0x621   :  { %v2586_v36 = vpop.permute.xlu1 %2585  ;;  %v2580_v63 = vpop.permute.xlu0 %2579 }
 0x622   :  { %v2616_v49 = vsel %vm13887_vm8, %v2584_v47, %v2586_v36  ;;  %2679 = vst.msk [vmem:[#allocation2 + $0x838] sm:$0x1c] %vm1333_vm14, %v2586_v36  ;;  %v2614_v29 = vsel %vm13888_vm6, %v2580_v63, %v2582_v24  ;;  %v4540_v13 = vld [vmem:[#allocation2 + $0x828] sm:$0xff]  ;;  %vm13893_vm8 = vcmask 637952   ;;  %vm13894_vm6 = vmmov %vm13891_vm1  ;;  %v4527_v36 = vld [vmem:[#allocation2 + $0x7c0] sm:$0xff] }
 0x623   :  { %2678 = vst [vmem:[#allocation2 + $0x830] sm:$0x1c] %v2616_v49  ;;  %2676 = vst [vmem:[#allocation2 + $0x820] sm:$0x1c] %v2614_v29  ;;  %2591 = vrot.lane.b32.xlu1 %v13838_v28, %s8675_s1  ;;  %5560 = vmatprep.subr.mxu0 %v4540_v13  ;;  %v4524_v49 = vld [vmem:[#allocation2 + $0x7a8] sm:$0xff]  ;;  %v4526_v29 = vld [vmem:[#allocation2 + $0x7b8] sm:$0xff]  ;;  %v11923_v13 = vpop.f32.mrf.mxu0 }
 0x624   :  { %2589 = vrot.lane.b32.xlu0 %v13839_v53, %s8675_s1 }
 0x625   :  { %v2739_v33 = vpop.permute.xlu1 %2738  ;;  %v2733_v38 = vpop.permute.xlu0 %2732 }
 0x626   :  { %v2769_v46 = vsel %vm13889_vm0, %v2737_v16, %v2739_v33  ;;  %2832 = vst.msk [vmem:[#allocation2 + $0x838] sm:$0xe0] %vm1519_vm3, %v2739_v33  ;;  %v2767_v22 = vsel %vm13890_vm2, %v2733_v38, %v2735_v54  ;;  %vm13895_vm0 = vmmov %vm13891_vm1  ;;  %v4523_v33 = vld [vmem:[#allocation2 + $0x7a0] sm:$0xff]  ;;  %v4520_v38 = vld [vmem:[#allocation2 + $0x788] sm:$0xff] }
 0x627   :  { %2831 = vst [vmem:[#allocation2 + $0x830] sm:$0xe0] %v2769_v46  ;;  %2829 = vst [vmem:[#allocation2 + $0x820] sm:$0xe0] %v2767_v22  ;;  %2744 = vrot.lane.b32.xlu1 %v13842_v39, %s8676_s26  ;;  %v4522_v46 = vld [vmem:[#allocation2 + $0x798] sm:$0xff] }
 0x628   :  { %2742 = vrot.lane.b32.xlu0 %v13843_v44, %s8676_s26  ;;  %vm13896_vm2 = vmmov %vm13892_vm9 }
 0x629   :  { %v1908_v28 = vpop.permute.xlu1 %1907  ;;  %v1906_v20 = vpop.permute.xlu0 %1905 }
 0x62a   :  { %v1939_v53 = vsel %vm13891_vm1, %v1906_v20, %v1908_v28  ;;  %vm13897_vm1 = vmmov %vm13896_vm2 }
 0x62b   :  { %2025 = vst [vmem:[#allocation2 + $0x808] ss:$-28 sps:$4 sm:$0xc1] %v1939_v53   ;;  %2408 = vrot.lane.b32.xlu1 %v13845_v14, %s8674_s25  ;;  %v4519_v53 = vld [vmem:[#allocation2 + $0x780] sm:$0xff] }
 0x62c   :  { %2402 = vrot.lane.b32.xlu0 %v13846_v55, %s8674_s25 }
 0x62d   :  { %v2093_v61 = vpop.permute.xlu1 %2092  ;;  %v2091_v59 = vpop.permute.xlu0 %2090  ;;  %v4542_v42 = vld [vmem:[#allocation2 + $0x838] sm:$0xff] }
 0x62e   :  { %v2124_v3 = vsel %vm13892_vm9, %v2091_v59, %v2093_v61  ;;  %5631 = vmatprep.subr.mxu1 %v4542_v42  ;;  %v4541_v39 = vld [vmem:[#allocation2 + $0x830] sm:$0xff]  ;;  %v4539_v31 = vld [vmem:[#allocation2 + $0x820] sm:$0xff]  ;;  %vm13898_vm9 = vmmov %vm13893_vm8 }
 0x62f   :  { %2186 = vst [vmem:[#allocation2 + $0x808] sm:$0xe] %v2124_v3  ;;  %2593 = vrot.lane.b32.xlu1 %v13848_v23, %s8675_s1  ;;  %5632 = vmatpush1.msra.mxu1 %v4541_v39 }
 0x630   :  { %2587 = vrot.lane.b32.xlu0 %v13849_v1, %s8675_s1  ;;  %5561 = vmatpush1.msra.mxu0 %v4539_v31  ;;  %v11938_v31 = vpop.f32.mrf.mxu1 }
 0x631   :  { %v2246_v44 = vpop.permute.xlu1 %2245  ;;  %v2244_v14 = vpop.permute.xlu0 %2243 }
 0x632   :  { %v2277_v55 = vsel %vm13893_vm8, %v2244_v14, %v2246_v44  ;;  %vm13899_vm8 = vcmask 202756  }
 0x633   :  { %2339 = vst [vmem:[#allocation2 + $0x808] sm:$0x70] %v2277_v55  ;;  %2746 = vrot.lane.b32.xlu1 %v13851_v35, %s8676_s26 }
 0x634   :  { %2740 = vrot.lane.b32.xlu0 %v13852_v0, %s8676_s26 }
 0x635   :  { %v1910_v26 = vpop.permute.xlu1 %1909  ;;  %v1904_v56 = vpop.permute.xlu0 %1903 }
 0x636   :  { %v1940_v23 = vsel %vm13894_vm6, %v1908_v28, %v1910_v26  ;;  %2027 = vst.msk [vmem:[#allocation2 + $0x7f8] sm:$0xc0] %vm539_vm4, %v1910_v26  ;;  %v1938_v1 = vsel %vm13895_vm0, %v1904_v56, %v1906_v20  ;;  %vm13900_vm6 = vmmov %vm13898_vm9  ;;  %vm13901_vm0 = vcmask 818176   ;;  %v4521_v28 = vld [vmem:[#allocation2 + $0x790] sm:$0xff]  ;;  %v11952_v56 = vpop.f32.mrf.mxu1 }
 0x637   :  { %2031 = vst.msk [vmem:[#allocation2 + $0x818] sm:$0x1] %vm544_vm5, %v1910_v26  ;;  %2026 = vst [vmem:[#allocation2 + $0x810] ss:$-28 sps:$4 sm:$0xc1] %v1940_v23   ;;  %1915 = vrot.lane.b32.xlu1 %v13855_v27, %s8677_s27 }
 0x638   :  { %2024 = vst [vmem:[#allocation2 + $0x800] ss:$-28 sps:$4 sm:$0xc1] %v1938_v1   ;;  %1913 = vrot.lane.b32.xlu0 %v13856_v7, %s8677_s27 }
 0x639   :  { %v2095_v35 = vpop.permute.xlu1 %2094  ;;  %v2089_v0 = vpop.permute.xlu0 %2088 }
 0x63a   :  { %v2125_v25 = vsel %vm13896_vm2, %v2093_v61, %v2095_v35  ;;  %2188 = vst.msk [vmem:[#allocation2 + $0x818] sm:$0xe] %vm758_vm7, %v2095_v35  ;;  %v2123_v6 = vsel %vm13897_vm1, %v2089_v0, %v2091_v59  ;;  %v4536_v32 = vld [vmem:[#allocation2 + $0x808] sm:$0xff]  ;;  %vm13902_vm2 = vmmov %vm13901_vm0  ;;  %vm13903_vm1 = vcmask 201731   ;;  %v11930_v59 = vpop.f32.mrf.mxu0  ;;  %v11958_v35 = vpop.f32.mrf.mxu1 }
 0x63b   :  { %2187 = vst [vmem:[#allocation2 + $0x810] sm:$0xe] %v2125_v25  ;;  %2185 = vst [vmem:[#allocation2 + $0x800] sm:$0xe] %v2123_v6  ;;  %2100 = vrot.lane.b32.xlu1 %v13859_v4, %s8678_s28  ;;  %5562 = vmatprep.subr.mxu0 %v4536_v32 }
 0x63c   :  { %2098 = vrot.lane.b32.xlu0 %v13860_v15, %s8678_s28 }
 0x63d   :  { %v2248_v27 = vpop.permute.xlu1 %2247  ;;  %v2242_v7 = vpop.permute.xlu0 %2241 }
 0x63e   :  { %v2278_v52 = vsel %vm13898_vm9, %v2246_v44, %v2248_v27  ;;  %2341 = vst.msk [vmem:[#allocation2 + $0x818] sm:$0x70] %vm13899_vm8, %v2248_v27  ;;  %v2276_v37 = vsel %vm13900_vm6, %v2242_v7, %v2244_v14  ;;  %vm13904_vm9 = vmmov %vm13901_vm0  ;;  %vm13905_vm8 = vcmask 228352   ;;  %v11940_v44 = vpop.f32.mrf.mxu0  ;;  %v11970_v27 = vpop.f32.mrf.mxu1 }
 0x63f   :  { %2340 = vst [vmem:[#allocation2 + $0x810] sm:$0x70] %v2278_v52  ;;  %2338 = vst [vmem:[#allocation2 + $0x800] sm:$0x70] %v2276_v37  ;;  %2253 = vrot.lane.b32.xlu1 %v13864_v5, %s8679_s3 }
 0x640   :  { %2251 = vrot.lane.b32.xlu0 %v13835_v62, %s8679_s3  ;;  %vm13906_vm6 = vmmov %vm13905_vm8  ;;  %v11954_v23 = vpop.f32.mrf.mxu0 }
 0x641   :  { %v1755_v4 = vpop.permute.xlu1 %1754  ;;  %v1753_v60 = vpop.permute.xlu0 %1752 }
 0x642   :  { %v1786_v15 = vsel %vm13901_vm0, %v1753_v60, %v1755_v4  ;;  %vm13907_vm0 = vcmask 198656   ;;  %v11963_v6 = vpop.f32.mrf.mxu0 }
 0x643   :  { %1848 = vst [vmem:[#allocation2 + $0x7e8] sm:$0x38] %v1786_v15  ;;  %1917 = vrot.lane.b32.xlu1 %v13866_v41, %s8677_s27 }
 0x644   :  { %1911 = vrot.lane.b32.xlu0 %v13867_v11, %s8677_s27 }
 0x645   :  { %v1757_v21 = vpop.permute.xlu1 %1756  ;;  %v1751_v47 = vpop.permute.xlu0 %1750  ;;  %v4538_v24 = vld [vmem:[#allocation2 + $0x818] sm:$0xff] }
 0x646   :  { %v1787_v50 = vsel %vm13902_vm2, %v1755_v4, %v1757_v21  ;;  %1850 = vst.msk [vmem:[#allocation2 + $0x7f8] sm:$0x38] %vm13903_vm1, %v1757_v21  ;;  %v1785_v62 = vsel %vm13904_vm9, %v1751_v47, %v1753_v60  ;;  %5633 = vmatprep.subr.mxu1 %v4538_v24  ;;  %v4537_v5 = vld [vmem:[#allocation2 + $0x810] sm:$0xff]  ;;  %v4535_v30 = vld [vmem:[#allocation2 + $0x800] sm:$0xff]  ;;  %vm13908_vm2 = vmmov %vm13906_vm6  ;;  %vm13909_vm1 = vcmask 1042432   ;;  %v11974_v4 = vpop.f32.mrf.mxu0  ;;  %v11981_v21 = vpop.f32.mrf.mxu1 }
 0x647   :  { %1849 = vst [vmem:[#allocation2 + $0x7f0] sm:$0x38] %v1787_v50  ;;  %1847 = vst [vmem:[#allocation2 + $0x7e0] sm:$0x38] %v1785_v62  ;;  %2102 = vrot.lane.b32.xlu1 %v13869_v45, %s8678_s28  ;;  %5634 = vmatpush1.msra.mxu1 %v4537_v5 }
 0x648   :  { %2096 = vrot.lane.b32.xlu0 %v13870_v12, %s8678_s28  ;;  %5563 = vmatpush1.msra.mxu0 %v4535_v30  ;;  %vm13910_vm9 = vmmov %vm13909_vm1  ;;  %v11983_v47 = vpop.f32.mrf.mxu0  ;;  %v11992_v30 = vpop.f32.mrf.mxu1 }
 0x649   :  { %v4186_v41 = vpop.permute.xlu1 %4185 }
 0x64a   :  { %v4184_v11 = vpop.permute.xlu0 %4183  ;;  %v4532_v51 = vld [vmem:[#allocation2 + $0x7e8] sm:$0xff] }
 0x64b   :  { %v4212_v10 = vsel %vm13905_vm8, %v4184_v11, %v4186_v41  ;;  %2255 = vrot.lane.b32.xlu1 %v13829_v57, %s8679_s3  ;;  %5564 = vmatprep.subr.mxu0 %v4532_v51  ;;  %v4528_v57 = vld [vmem:[#allocation2 + $0x7c8] sm:$0xff]  ;;  %vm13911_vm8 = vmmov %vm13909_vm1 }
 0x64c   :  { %4275 = vst [vmem:[#allocation2 + $0x9e8] sm:$0x7] %v4212_v10  ;;  %2249 = vrot.lane.b32.xlu0 %v13874_v9, %s8679_s3  ;;  %v4530_v9 = vld [vmem:[#allocation2 + $0x7d8] sm:$0xff] }
 0x64d   :  { %v4188_v16 = vpop.permute.xlu1 %4187  ;;  %v4534_v45 = vld [vmem:[#allocation2 + $0x7f8] sm:$0xff] }
 0x64e   :  { %v4213_v54 = vsel %vm13906_vm6, %v4186_v41, %v4188_v16  ;;  %4277 = vst.msk [vmem:[#allocation2 + $0x9f8] sm:$0x7] %vm13907_vm0, %v4188_v16  ;;  %v4182_v12 = vpop.permute.xlu0 %4181  ;;  %5635 = vmatprep.subr.mxu1 %v4534_v45  ;;  %v4533_v48 = vld [vmem:[#allocation2 + $0x7f0] sm:$0xff]  ;;  %v4531_v8 = vld [vmem:[#allocation2 + $0x7e0] sm:$0xff]  ;;  %vm13912_vm6 = vmmov %vm13909_vm1  ;;  %vm13913_vm0 = vcmask 236544   ;;  %v11994_v41 = vpop.f32.mrf.mxu0 }
 0x64f   :  { %4276 = vst [vmem:[#allocation2 + $0x9f0] sm:$0x7] %v4213_v54  ;;  %v4211_v2 = vsel %vm13908_vm2, %v4182_v12, %v4184_v11  ;;  %1762 = vrot.lane.b32.xlu1 %v13879_v17, %s8664_s16  ;;  %5636 = vmatpush1.msra.mxu1 %v4533_v48  ;;  %vm13916_vm2 = vcmask 433152   ;;  %v11999_v16 = vpop.f32.mrf.mxu1 }
 0x650   :  { %4274 = vst [vmem:[#allocation2 + $0x9e0] sm:$0x7] %v4211_v2  ;;  %1760 = vrot.lane.b32.xlu0 %v13880_v34, %s8664_s16  ;;  %5565 = vmatpush1.msra.mxu0 %v4531_v8  ;;  %v4525_v34 = vld [vmem:[#allocation2 + $0x7b0] sm:$0xff]  ;;  %v12003_v45 = vpop.f32.mrf.mxu0 }
 0x651   :  { %5566 = vmatprep.subr.mxu0 %v4528_v57  ;;  %5637 = vmatprep.subr.mxu1 %v4530_v9  ;;  %v3695_v18 = vpop.permute.xlu1 %3694  ;;  %v12005_v48 = vpop.f32.mrf.mxu1 }
 0x652   :  { %5638 = vmatpush1.msra.mxu1 %v4529_v19  ;;  %v3693_v63 = vpop.permute.xlu0 %3692  ;;  %5567 = vmatpush1.msra.mxu0 %v4527_v36 }
 0x653   :  { %v3721_v17 = vsel %vm3698_vm15, %v3693_v63, %v3695_v18  ;;  %5568 = vmatprep.subr.mxu0 %v4524_v49  ;;  %5639 = vmatprep.subr.mxu1 %v4526_v29  ;;  %v4596_v42 = vld [vmem:[#allocation2 + $0x9e8] sm:$0x7]  ;;  %v12014_v36 = vpop.f32.mrf.mxu1 }
 0x654   :  { %3812 = vst [vmem:[#allocation2 + $0x9c8] ss:$-28 sps:$4 sm:$0x83] %v3721_v17   ;;  %1764 = vrot.lane.b32.xlu1 %v13883_v40, %s8664_s16  ;;  %5640 = vmatpush1.msra.mxu1 %v4525_v34 }
 0x655   :  { %1758 = vrot.lane.b32.xlu0 %v13884_v43, %s8664_s16  ;;  %5569 = vmatpush1.msra.mxu0 %v4523_v33  ;;  %v3880_v22 = vpop.permute.xlu1 %3879  ;;  %v4598_v61 = vld [vmem:[#allocation2 + $0x9f8] sm:$0x7]  ;;  %v11933_v43 = vld [vmem:[#allocation3] sm:$0xff]  ;;  %v12021_v29 = vpop.f32.mrf.mxu1 }
 0x656   :  { %5570 = vmatprep.subr.mxu0 %v4520_v38  ;;  %5641 = vmatprep.subr.mxu1 %v4522_v46  ;;  %v3878_v20 = vpop.permute.xlu0 %3877  ;;  %v4597_v39 = vld [vmem:[#allocation2 + $0x9f0] sm:$0x7] }
 0x657   :  { %5642 = vmatpush1.msra.mxu1 %v4521_v28  ;;  %v3906_v40 = vsel %vm3883_vm10, %v3878_v20, %v3880_v22  ;;  %5571 = vmatpush1.msra.mxu0 %v4519_v53  ;;  %v4595_v3 = vld [vmem:[#allocation2 + $0x9e0] sm:$0x7] }
 0x658   :  { %3969 = vst [vmem:[#allocation2 + $0x9c8] sm:$0x1c] %v3906_v40  ;;  %8014 = vmatmul.mubr.msk.f32.vlgmr.msra.gmra.mxu0 %vm4599_vm13, %v11933_v43  ;;  %8018 = vmatprep.subr.msk.mxu0 %vm13909_vm1, %v4596_v42  ;;  %vm13917_vm1 = vcmask 424960  }
 0x659   :  { %8021 = vmatprep.subr.msk.mxu1 %vm13910_vm9, %v4598_v61  ;;  %8017 = vmatmul.mubr.msk.f32.vlgmr.msra.gmra.mxu1 %vm4599_vm13, %v11933_v43  ;;  %v4033_v14 = vpop.permute.xlu1 %4032  ;;  %vm13918_vm9 = vcmask 261120  }
 0x65a   :  { %8019 = vmatpush1.msk.msra.mxu0 %vm13911_vm8, %v4595_v3  ;;  %8022 = vmatpush1.msk.msra.mxu1 %vm13912_vm6, %v4597_v39  ;;  %v4031_v55 = vpop.permute.xlu0 %4030  ;;  %vm13919_vm8 = vmmov %vm13916_vm2 }
 0x65b   :  { %v4059_v26 = vsel %vm13913_vm0, %v4031_v55, %v4033_v14  ;;  %5872 = vrot.lane.b32.xlu1 %v11938_v31, %s8656_s17  ;;  %5870 = vrot.lane.b32.xlu0 %v11930_v59, %s8656_s17  ;;  %vm13920_vm6 = vmmov %vm13916_vm2 }
 0x65c   :  { %4122 = vst [vmem:[#allocation2 + $0x9c8] sm:$0xe0] %v4059_v26  ;;  %5758 = vmatprep.mubr.f32.mxu0 %v8680_v58  ;;  %5829 = vmatprep.mubr.f32.mxu1 %v8680_v58 }
 0x65d   :  { %v3697_v1 = vpop.permute.xlu1 %3696 }
 0x65e   :  { %v3722_v0 = vsel %vm3698_vm15, %v3695_v18, %v3697_v1  ;;  %3814 = vst.msk [vmem:[#allocation2 + $0x9b8] sm:$0x80] %vm1114_vm11, %v3697_v1  ;;  %v3691_v25 = vpop.permute.xlu0 %3690  ;;  %v12012_v18 = vpop.f32.mrf.mxu0 }
 0x65f   :  { %3818 = vst.msk [vmem:[#allocation2 + $0x9d8] sm:$0x3] %vm1119_vm12, %v3697_v1  ;;  %3813 = vst [vmem:[#allocation2 + $0x9d0] ss:$-28 sps:$4 sm:$0x83] %v3722_v0   ;;  %v3720_v32 = vsel %vm3698_vm15, %v3691_v25, %v3693_v63  ;;  %5874 = vrot.lane.b32.xlu0 %v11952_v56, %s8656_s17  ;;  %5878 = vrot.lane.b32.xlu1 %v11954_v23, %s8656_s17 }
 0x660   :  { %3811 = vst [vmem:[#allocation2 + $0x9c0] ss:$-28 sps:$4 sm:$0x83] %v3720_v32   ;;  %vm13914_vm15 = vmmov %vm13913_vm0 }
 0x661   :  { %v3882_v7 = vpop.permute.xlu1 %3881 }
 0x662   :  { %v3907_v52 = vsel %vm3883_vm10, %v3880_v22, %v3882_v7  ;;  %3971 = vst.msk [vmem:[#allocation2 + $0x9d8] sm:$0x1c] %vm1333_vm14, %v3882_v7  ;;  %v3876_v37 = vpop.permute.xlu0 %3875 }
 0x663   :  { %3970 = vst [vmem:[#allocation2 + $0x9d0] sm:$0x1c] %v3907_v52  ;;  %v3905_v60 = vsel %vm3883_vm10, %v3876_v37, %v3878_v20  ;;  %v4592_v15 = vld [vmem:[#allocation2 + $0x9c8] sm:$0xff]  ;;  %5880 = vrot.lane.b32.xlu0 %v11958_v35, %s8656_s17  ;;  %5882 = vrot.lane.b32.xlu1 %v11970_v27, %s8656_s17  ;;  %vm13915_vm10 = vmmov %vm13913_vm0 }
 0x664   :  { %3968 = vst [vmem:[#allocation2 + $0x9c0] sm:$0x1c] %v3905_v60  ;;  %5708 = vmatprep.subr.mxu0 %v4592_v15  ;;  %vm13921_vm0 = vmmov %vm13917_vm1 }
 0x665   :  { %v4035_v24 = vpop.permute.xlu1 %4034 }
 0x666   :  { %v4060_v50 = vsel %vm13914_vm15, %v4033_v14, %v4035_v24  ;;  %4124 = vst.msk [vmem:[#allocation2 + $0x9d8] sm:$0xe0] %vm1519_vm3, %v4035_v24  ;;  %v4029_v62 = vpop.permute.xlu0 %4028  ;;  %vm13922_vm15 = vmmov %vm13921_vm0 }
 0x667   :  { %4123 = vst [vmem:[#allocation2 + $0x9d0] sm:$0xe0] %v4060_v50  ;;  %v4058_v5 = vsel %vm13915_vm10, %v4029_v62, %v4031_v55  ;;  %5888 = vrot.lane.b32.xlu1 %v11981_v21, %s8656_s17  ;;  %5886 = vrot.lane.b32.xlu0 %v11974_v4, %s8656_s17  ;;  %vm13923_vm10 = vmmov %vm13918_vm9 }
 0x668   :  { %4121 = vst [vmem:[#allocation2 + $0x9c0] sm:$0xe0] %v4058_v5 }
 0x669   :  { %v3204_v11 = vpop.permute.xlu1 %3203 }
 0x66a   :  { %v3202_v51 = vpop.permute.xlu0 %3201 }
 0x66b   :  { %v3230_v10 = vsel %vm13916_vm2, %v3202_v51, %v3204_v11  ;;  %5890 = vrot.lane.b32.xlu0 %v11992_v30, %s8656_s17  ;;  %5894 = vrot.lane.b32.xlu1 %v11994_v41, %s8656_s17  ;;  %vm13924_vm2 = vcmask 202756  }
 0x66c   :  { %3321 = vst [vmem:[#allocation2 + $0x9a8] ss:$-28 sps:$4 sm:$0xc1] %v3230_v10  }
 0x66d   :  { %v3389_v54 = vpop.permute.xlu1 %3388  ;;  %v4594_v12 = vld [vmem:[#allocation2 + $0x9d8] sm:$0xff] }
 0x66e   :  { %v3387_v8 = vpop.permute.xlu0 %3386  ;;  %5779 = vmatprep.subr.mxu1 %v4594_v12  ;;  %v4593_v2 = vld [vmem:[#allocation2 + $0x9d0] sm:$0xff] }
 0x66f   :  { %v3415_v57 = vsel %vm13917_vm1, %v3387_v8, %v3389_v54  ;;  %v4591_v9 = vld [vmem:[#allocation2 + $0x9c0] sm:$0xff]  ;;  %5780 = vmatpush1.msra.mxu1 %v4593_v2  ;;  %5896 = vrot.lane.b32.xlu0 %v11999_v16, %s8656_s17  ;;  %vm13925_vm1 = vmmov %vm13918_vm9 }
 0x670   :  { %3478 = vst [vmem:[#allocation2 + $0x9a8] sm:$0xe] %v3415_v57  ;;  %5709 = vmatpush1.msra.mxu0 %v4591_v9  ;;  %5898 = vrot.lane.b32.xlu1 %v12005_v48, %s8656_s17 }
 0x671   :  { %v3542_v19 = vpop.permute.xlu1 %3541 }
 0x672   :  { %v3540_v63 = vpop.permute.xlu0 %3539 }
 0x673   :  { %v3568_v49 = vsel %vm13918_vm9, %v3540_v63, %v3542_v19  ;;  %5902 = vrot.lane.b32.xlu0 %v12012_v18, %s8656_s17  ;;  %vm13926_vm9 = vcmask 449536  }
 0x674   :  { %3631 = vst [vmem:[#allocation2 + $0x9a8] sm:$0x70] %v3568_v49  ;;  %5904 = vrot.lane.b32.xlu1 %v12014_v36, %s8656_s17 }
 0x675   :  { %v3206_v17 = vpop.permute.xlu1 %3205 }
 0x676   :  { %v3231_v34 = vsel %vm13919_vm8, %v3204_v11, %v3206_v17  ;;  %3323 = vst.msk [vmem:[#allocation2 + $0x998] sm:$0xc0] %vm539_vm4, %v3206_v17  ;;  %v3200_v33 = vpop.permute.xlu0 %3199  ;;  %vm13927_vm8 = vcmask 441344  }
 0x677   :  { %3327 = vst.msk [vmem:[#allocation2 + $0x9b8] sm:$0x1] %vm544_vm5, %v3206_v17  ;;  %3322 = vst [vmem:[#allocation2 + $0x9b0] ss:$-28 sps:$4 sm:$0xc1] %v3231_v34   ;;  %v3229_v38 = vsel %vm13920_vm6, %v3200_v33, %v3202_v51  ;;  %5906 = vrot.lane.b32.xlu0 %v12021_v29, %s8656_s17 }
 0x678   :  { %3320 = vst [vmem:[#allocation2 + $0x9a0] ss:$-28 sps:$4 sm:$0xc1] %v3229_v38   ;;  %vm13928_vm6 = vmmov %vm13926_vm9 }
 0x679   :  { %v3391_v46 = vpop.permute.xlu1 %3390 }
 0x67a   :  { %v3416_v22 = vsel %vm13921_vm0, %v3389_v54, %v3391_v46  ;;  %3480 = vst.msk [vmem:[#allocation2 + $0x9b8] sm:$0xe] %vm758_vm7, %v3391_v46  ;;  %v3385_v28 = vpop.permute.xlu0 %3384  ;;  %vm13929_vm0 = vcmask 198656  }
 0x67b   :  { %3479 = vst [vmem:[#allocation2 + $0x9b0] sm:$0xe] %v3416_v22  ;;  %v3414_v20 = vsel %vm13922_vm15, %v3385_v28, %v3387_v8  ;;  %v4588_v53 = vld [vmem:[#allocation2 + $0x9a8] sm:$0xff]  ;;  %vm13930_vm15 = vmmov %vm13928_vm6 }
 0x67c   :  { %3477 = vst [vmem:[#allocation2 + $0x9a0] sm:$0xe] %v3414_v20  ;;  %5710 = vmatprep.subr.mxu0 %v4588_v53 }
 0x67d   :  { %v3544_v61 = vpop.permute.xlu1 %3543 }
 0x67e   :  { %v3569_v40 = vsel %vm13923_vm10, %v3542_v19, %v3544_v61  ;;  %3633 = vst.msk [vmem:[#allocation2 + $0x9b8] sm:$0x70] %vm13924_vm2, %v3544_v61  ;;  %v3538_v42 = vpop.permute.xlu0 %3537  ;;  %vm13931_vm10 = vmmov %vm13927_vm8  ;;  %vm13932_vm2 = vcmask 201731  }
 0x67f   :  { %3632 = vst [vmem:[#allocation2 + $0x9b0] sm:$0x70] %v3569_v40  ;;  %v3567_v3 = vsel %vm13925_vm1, %v3538_v42, %v3540_v63  ;;  %vm13933_vm1 = vmmov %vm13927_vm8 }
 0x680   :  { %3630 = vst [vmem:[#allocation2 + $0x9a0] sm:$0x70] %v3567_v3 }
 0x681   :  { %v2898_v39 = vpop.permute.xlu1 %2897 }
 0x682   :  { %v2896_v14 = vpop.permute.xlu0 %2895 }
 0x683   :  { %v2924_v55 = vsel %vm13926_vm9, %v2896_v14, %v2898_v39  ;;  %vm13934_vm9 = vcmask 629760  }
 0x684   :  { %2987 = vst [vmem:[#allocation2 + $0x988] sm:$0x7] %v2924_v55 }
 0x685   :  { %v3051_v26 = vpop.permute.xlu1 %3050  ;;  %v4590_v1 = vld [vmem:[#allocation2 + $0x9b8] sm:$0xff] }
 0x686   :  { %v3049_v0 = vpop.permute.xlu0 %3048  ;;  %5781 = vmatprep.subr.mxu1 %v4590_v1  ;;  %v4589_v25 = vld [vmem:[#allocation2 + $0x9b0] sm:$0xff] }
 0x687   :  { %v3077_v32 = vsel %vm13927_vm8, %v3049_v0, %v3051_v26  ;;  %v4587_v7 = vld [vmem:[#allocation2 + $0x9a0] sm:$0xff]  ;;  %5782 = vmatpush1.msra.mxu1 %v4589_v25  ;;  %vm13935_vm8 = vcmask 621568  }
 0x688   :  { %3140 = vst [vmem:[#allocation2 + $0x988] sm:$0x38] %v3077_v32  ;;  %5711 = vmatpush1.msra.mxu0 %v4587_v7 }
 0x689   :  { %v2900_v52 = vpop.permute.xlu1 %2899 }
 0x68a   :  { %v2925_v37 = vsel %vm13928_vm6, %v2898_v39, %v2900_v52  ;;  %2989 = vst.msk [vmem:[#allocation2 + $0x998] sm:$0x7] %vm13929_vm0, %v2900_v52  ;;  %v2894_v60 = vpop.permute.xlu0 %2893  ;;  %vm13936_vm6 = vcmask 457728   ;;  %vm13937_vm0 = vmmov %vm13934_vm9 }
 0x68b   :  { %2988 = vst [vmem:[#allocation2 + $0x990] sm:$0x7] %v2925_v37  ;;  %v2923_v15 = vsel %vm13930_vm15, %v2894_v60, %v2896_v14  ;;  %vm13938_vm15 = vmmov %vm13937_vm0 }
 0x68c   :  { %2986 = vst [vmem:[#allocation2 + $0x980] sm:$0x7] %v2923_v15 }
 0x68d   :  { %v3053_v24 = vpop.permute.xlu1 %3052 }
 0x68e   :  { %v3078_v50 = vsel %vm13931_vm10, %v3051_v26, %v3053_v24  ;;  %3142 = vst.msk [vmem:[#allocation2 + $0x998] sm:$0x38] %vm13932_vm2, %v3053_v24  ;;  %v3047_v62 = vpop.permute.xlu0 %3046  ;;  %vm13939_vm10 = vmmov %vm13935_vm8 }
 0x68f   :  { %3141 = vst [vmem:[#allocation2 + $0x990] sm:$0x38] %v3078_v50  ;;  %v3076_v5 = vsel %vm13933_vm1, %v3047_v62, %v3049_v0  ;;  %v4584_v11 = vld [vmem:[#allocation2 + $0x988] sm:$0xff]  ;;  %vm13940_vm2 = vmmov %vm13935_vm8  ;;  %vm13944_vm1 = vcmask 646144  }
 0x690   :  { %3139 = vst [vmem:[#allocation2 + $0x980] sm:$0x38] %v3076_v5  ;;  %5712 = vmatprep.subr.mxu0 %v4584_v11 }
 0x691   :  { %v2407_v51 = vpop.permute.xlu1 %2406 }
 0x692   :  { %v2405_v10 = vpop.permute.xlu0 %2404 }
 0x693   :  { %v2433_v54 = vsel %vm13934_vm9, %v2405_v10, %v2407_v51 }
 0x694   :  { %2524 = vst [vmem:[#allocation2 + $0x968] ss:$-28 sps:$4 sm:$0x83] %v2433_v54  }
 0x695   :  { %v2592_v12 = vpop.permute.xlu1 %2591  ;;  %v4586_v8 = vld [vmem:[#allocation2 + $0x998] sm:$0xff] }
 0x696   :  { %v2590_v2 = vpop.permute.xlu0 %2589  ;;  %5783 = vmatprep.subr.mxu1 %v4586_v8  ;;  %v4585_v57 = vld [vmem:[#allocation2 + $0x990] sm:$0xff] }
 0x697   :  { %v2618_v9 = vsel %vm13935_vm8, %v2590_v2, %v2592_v12  ;;  %v4583_v19 = vld [vmem:[#allocation2 + $0x980] sm:$0xff]  ;;  %5784 = vmatpush1.msra.mxu1 %v4585_v57 }
 0x698   :  { %2681 = vst [vmem:[#allocation2 + $0x968] sm:$0x1c] %v2618_v9  ;;  %5713 = vmatpush1.msra.mxu0 %v4583_v19  ;;  %v12045_v63 = vpop.f32.mrf.mxu1 }
 0x699   :  { %v2745_v49 = vpop.permute.xlu1 %2744  ;;  %v12047_v17 = vpop.f32.mrf.mxu0  ;;  %5912 = vrot.lane.b32.xlu0 %v12045_v63, %s8656_s17 }
 0x69a   :  { %v2743_v34 = vpop.permute.xlu0 %2742  ;;  %v12056_v22 = vpop.f32.mrf.mxu1 }
 0x69b   :  { %v2771_v33 = vsel %vm13936_vm6, %v2743_v34, %v2745_v49  ;;  %v12052_v38 = vpop.f32.mrf.mxu0 }
 0x69c   :  { %2834 = vst [vmem:[#allocation2 + $0x968] sm:$0xe0] %v2771_v33  ;;  %5910 = vrot.lane.b32.xlu1 %v12052_v38, %s8656_s17 }
 0x69d   :  { %v2409_v46 = vpop.permute.xlu1 %2408 }
 0x69e   :  { %v2434_v28 = vsel %vm13937_vm0, %v2407_v51, %v2409_v46  ;;  %2526 = vst.msk [vmem:[#allocation2 + $0x958] sm:$0x80] %vm1114_vm11, %v2409_v46  ;;  %v2403_v20 = vpop.permute.xlu0 %2402  ;;  %vm13941_vm11 = vmmov %vm13936_vm6 }
 0x69f   :  { %2530 = vst.msk [vmem:[#allocation2 + $0x978] sm:$0x3] %vm1119_vm12, %v2409_v46  ;;  %2525 = vst [vmem:[#allocation2 + $0x970] ss:$-28 sps:$4 sm:$0x83] %v2434_v28   ;;  %v2432_v53 = vsel %vm13938_vm15, %v2403_v20, %v2405_v10 }
 0x6a0   :  { %2523 = vst [vmem:[#allocation2 + $0x960] ss:$-28 sps:$4 sm:$0x83] %v2432_v53   ;;  %5914 = vrot.lane.b32.xlu1 %v12056_v22, %s8656_s17  ;;  %vm13942_vm12 = vmmov %vm13936_vm6 }
 0x6a1   :  { %v2594_v61 = vpop.permute.xlu1 %2593  ;;  %vm13948_vm6 = vmmov %vm13944_vm1 }
 0x6a2   :  { %v2619_v40 = vsel %vm13939_vm10, %v2592_v12, %v2594_v61  ;;  %2683 = vst.msk [vmem:[#allocation2 + $0x978] sm:$0x1c] %vm1333_vm14, %v2594_v61  ;;  %v2588_v42 = vpop.permute.xlu0 %2587  ;;  %vm13943_vm14 = vcmask 654336   ;;  %vm13949_vm0 = vmmov %vm13944_vm1 }
 0x6a3   :  { %2682 = vst [vmem:[#allocation2 + $0x970] sm:$0x1c] %v2619_v40  ;;  %v2617_v3 = vsel %vm13940_vm2, %v2588_v42, %v2590_v2  ;;  %v4580_v39 = vld [vmem:[#allocation2 + $0x968] sm:$0xff]  ;;  %vm13946_vm9 = vmmov %vm13943_vm14  ;;  %vm13955_vm2 = vcmask 201731  }
 0x6a4   :  { %2680 = vst [vmem:[#allocation2 + $0x960] sm:$0x1c] %v2617_v3  ;;  %5714 = vmatprep.subr.mxu0 %v4580_v39  ;;  %vm13947_vm8 = vmmov %vm13946_vm9 }
 0x6a5   :  { %v2747_v14 = vpop.permute.xlu1 %2746 }
 0x6a6   :  { %v2772_v55 = vsel %vm13941_vm11, %v2745_v49, %v2747_v14  ;;  %2836 = vst.msk [vmem:[#allocation2 + $0x978] sm:$0xe0] %vm1519_vm3, %v2747_v14  ;;  %v2741_v26 = vpop.permute.xlu0 %2740  ;;  %vm13945_vm3 = vcmask 637952  }
 0x6a7   :  { %2835 = vst [vmem:[#allocation2 + $0x970] sm:$0xe0] %v2772_v55  ;;  %v2770_v1 = vsel %vm13942_vm12, %v2741_v26, %v2743_v34  ;;  %vm13952_vm15 = vmmov %vm13945_vm3 }
 0x6a8   :  { %2833 = vst [vmem:[#allocation2 + $0x960] sm:$0xe0] %v2770_v1 }
 0x6a9   :  { %v1916_v0 = vpop.permute.xlu1 %1915 }
 0x6aa   :  { %v1914_v25 = vpop.permute.xlu0 %1913 }
 0x6ab   :  { %v1942_v32 = vsel %vm13943_vm14, %v1914_v25, %v1916_v0 }
 0x6ac   :  { %2033 = vst [vmem:[#allocation2 + $0x948] ss:$-28 sps:$4 sm:$0xc1] %v1942_v32   ;;  %v4568_v32 = vld [vmem:[#allocation2 + $0x908] sm:$0xff] }
 0x6ad   :  { %v2101_v7 = vpop.permute.xlu1 %2100  ;;  %v4582_v52 = vld [vmem:[#allocation2 + $0x978] sm:$0xff] }
 0x6ae   :  { %v2099_v37 = vpop.permute.xlu0 %2098  ;;  %5785 = vmatprep.subr.mxu1 %v4582_v52  ;;  %v4581_v60 = vld [vmem:[#allocation2 + $0x970] sm:$0xff]  ;;  %v4567_v52 = vld [vmem:[#allocation2 + $0x900] sm:$0xff] }
 0x6af   :  { %v2127_v15 = vsel %vm13944_vm1, %v2099_v37, %v2101_v7  ;;  %v4579_v24 = vld [vmem:[#allocation2 + $0x960] sm:$0xff]  ;;  %5786 = vmatpush1.msra.mxu1 %v4581_v60  ;;  %v4564_v60 = vld [vmem:[#allocation2 + $0x8e8] sm:$0xff] }
 0x6b0   :  { %2190 = vst [vmem:[#allocation2 + $0x948] sm:$0xe] %v2127_v15  ;;  %5715 = vmatpush1.msra.mxu0 %v4579_v24  ;;  %v4565_v15 = vld [vmem:[#allocation2 + $0x8f0] sm:$0xff]  ;;  %v4563_v24 = vld [vmem:[#allocation2 + $0x8e0] sm:$0xff] }
 0x6b1   :  { %v2254_v50 = vpop.permute.xlu1 %2253 }
 0x6b2   :  { %v2252_v62 = vpop.permute.xlu0 %2251 }
 0x6b3   :  { %v2280_v5 = vsel %vm13945_vm3, %v2252_v62, %v2254_v50 }
 0x6b4   :  { %2343 = vst [vmem:[#allocation2 + $0x948] sm:$0x70] %v2280_v5  ;;  %v4561_v5 = vld [vmem:[#allocation2 + $0x8d0] sm:$0xff] }
 0x6b5   :  { %v1918_v11 = vpop.permute.xlu1 %1917 }
 0x6b6   :  { %v1943_v51 = vsel %vm13946_vm9, %v1916_v0, %v1918_v11  ;;  %2035 = vst.msk [vmem:[#allocation2 + $0x938] sm:$0xc0] %vm539_vm4, %v1918_v11  ;;  %v1912_v10 = vpop.permute.xlu0 %1911  ;;  %vm13950_vm4 = vmmov %vm13945_vm3 }
 0x6b7   :  { %2039 = vst.msk [vmem:[#allocation2 + $0x958] sm:$0x1] %vm544_vm5, %v1918_v11  ;;  %2034 = vst [vmem:[#allocation2 + $0x950] ss:$-28 sps:$4 sm:$0xc1] %v1943_v51   ;;  %v1941_v54 = vsel %vm13947_vm8, %v1912_v10, %v1914_v25  ;;  %vm13951_vm5 = vcmask 202756  }
 0x6b8   :  { %2032 = vst [vmem:[#allocation2 + $0x940] ss:$-28 sps:$4 sm:$0xc1] %v1941_v54   ;;  %v4570_v25 = vld [vmem:[#allocation2 + $0x918] sm:$0xff]  ;;  %v4559_v11 = vld [vmem:[#allocation2 + $0x8c0] sm:$0xff] }
 0x6b9   :  { %v2103_v12 = vpop.permute.xlu1 %2102 }
 0x6ba   :  { %v2128_v8 = vsel %vm13948_vm6, %v2101_v7, %v2103_v12  ;;  %2192 = vst.msk [vmem:[#allocation2 + $0x958] sm:$0xe] %vm758_vm7, %v2103_v12  ;;  %v2097_v2 = vpop.permute.xlu0 %2096  ;;  %vm13953_vm7 = vcmask 818176   ;;  %v4569_v7 = vld [vmem:[#allocation2 + $0x910] sm:$0xff] }
 0x6bb   :  { %2191 = vst [vmem:[#allocation2 + $0x950] sm:$0xe] %v2128_v8  ;;  %v2126_v57 = vsel %vm13949_vm0, %v2097_v2, %v2099_v37  ;;  %v4576_v9 = vld [vmem:[#allocation2 + $0x948] sm:$0xff]  ;;  %vm13954_vm10 = vmmov %vm13953_vm7  ;;  %v4566_v37 = vld [vmem:[#allocation2 + $0x8f8] sm:$0xff]  ;;  %v8681_v8 = vmov 0  }
 0x6bc   :  { %2189 = vst [vmem:[#allocation2 + $0x940] sm:$0xe] %v2126_v57  ;;  %5716 = vmatprep.subr.mxu0 %v4576_v9  ;;  %vm13956_vm11 = vmmov %vm13953_vm7  ;;  %8500 = vset.pattern.permute.xlu0 %v8681_v8 }
 0x6bd   :  { %v2256_v19 = vpop.permute.xlu1 %2255 }
 0x6be   :  { %v2281_v49 = vsel %vm13950_vm4, %v2254_v50, %v2256_v19  ;;  %2345 = vst.msk [vmem:[#allocation2 + $0x958] sm:$0x70] %vm13951_vm5, %v2256_v19  ;;  %v2250_v34 = vpop.permute.xlu0 %2249  ;;  %v4562_v50 = vld [vmem:[#allocation2 + $0x8d8] sm:$0xff] }
 0x6bf   :  { %2344 = vst [vmem:[#allocation2 + $0x950] sm:$0x70] %v2281_v49  ;;  %v2279_v33 = vsel %vm13952_vm15, %v2250_v34, %v2252_v62  ;;  %v4560_v62 = vld [vmem:[#allocation2 + $0x8c8] sm:$0xff] }
 0x6c0   :  { %2342 = vst [vmem:[#allocation2 + $0x940] sm:$0x70] %v2279_v33 }
 0x6c1   :  { %v1763_v46 = vpop.permute.xlu1 %1762 }
 0x6c2   :  { %v1761_v28 = vpop.permute.xlu0 %1760 }
 0x6c3   :  { %v1789_v20 = vsel %vm13953_vm7, %v1761_v28, %v1763_v46 }
 0x6c4   :  { %1852 = vst [vmem:[#allocation2 + $0x928] sm:$0x38] %v1789_v20 }
 0x6c5   :  { %v4578_v53 = vld [vmem:[#allocation2 + $0x958] sm:$0xff] }
 0x6c6   :  { %v1765_v61 = vpop.permute.xlu1 %1764  ;;  %5787 = vmatprep.subr.mxu1 %v4578_v53  ;;  %v4577_v40 = vld [vmem:[#allocation2 + $0x950] sm:$0xff] }
 0x6c7   :  { %v1790_v42 = vsel %vm13954_vm10, %v1763_v46, %v1765_v61  ;;  %1854 = vst.msk [vmem:[#allocation2 + $0x938] sm:$0x38] %vm13955_vm2, %v1765_v61  ;;  %v1759_v3 = vpop.permute.xlu0 %1758  ;;  %v4575_v39 = vld [vmem:[#allocation2 + $0x940] sm:$0xff]  ;;  %5788 = vmatpush1.msra.mxu1 %v4577_v40 }
 0x6c8   :  { %1853 = vst [vmem:[#allocation2 + $0x930] sm:$0x38] %v1790_v42  ;;  %v1788_v14 = vsel %vm13956_vm11, %v1759_v3, %v1761_v28  ;;  %5717 = vmatpush1.msra.mxu0 %v4575_v39  ;;  %v6188_v42 = vld [vmem:[#allocation5] sm:$0xff] }
 0x6c9   :  { %1851 = vst [vmem:[#allocation2 + $0x920] sm:$0x38] %v1788_v14 }
 0x6cb   :  { %v4572_v55 = vld [vmem:[#allocation2 + $0x928] sm:$0xff] }
 0x6cc   :  { %5718 = vmatprep.subr.mxu0 %v4572_v55 }
 0x6cd   :  { %v12105_v2 = vpop.permute.xlu0 %5870 }
 0x6ce   :  { %v4574_v26 = vld [vmem:[#allocation2 + $0x938] sm:$0xff] }
 0x6cf   :  { %5789 = vmatprep.subr.mxu1 %v4574_v26  ;;  %v4573_v1 = vld [vmem:[#allocation2 + $0x930] sm:$0xff] }
 0x6d0   :  { %v4571_v0 = vld [vmem:[#allocation2 + $0x920] sm:$0xff]  ;;  %5790 = vmatpush1.msra.mxu1 %v4573_v1 }
 0x6d1   :  { %5719 = vmatpush1.msra.mxu0 %v4571_v0  ;;  %5791 = vmatprep.subr.mxu1 %v4570_v25  ;;  %v12111_v19 = vpop.permute.xlu0 %5874 }
 0x6d2   :  { %5720 = vmatprep.subr.mxu0 %v4568_v32  ;;  %5792 = vmatpush1.msra.mxu1 %v4569_v7 }
 0x6d3   :  { %5721 = vmatpush1.msra.mxu0 %v4567_v52  ;;  %5793 = vmatprep.subr.mxu1 %v4566_v37 }
 0x6d4   :  { %5722 = vmatprep.subr.mxu0 %v4564_v60  ;;  %5794 = vmatpush1.msra.mxu1 %v4565_v15 }
 0x6d5   :  { %5723 = vmatpush1.msra.mxu0 %v4563_v24  ;;  %5795 = vmatprep.subr.mxu1 %v4562_v50  ;;  %v5881_v33 = vpop.permute.xlu0 %5880 }
 0x6d6   :  { %5724 = vmatprep.subr.mxu0 %v4560_v62  ;;  %5796 = vmatpush1.msra.mxu1 %v4561_v5 }
 0x6d7   :  { %5725 = vmatpush1.msra.mxu0 %v4559_v11  ;;  %8023 = vmatmul.mubr.msk.f32.vlgmr.msra.gmra.mxu1 %vm4599_vm13, %v11933_v43 }
 0x6d8   :  { %8020 = vmatmul.mubr.msk.f32.vlgmr.msra.gmra.mxu0 %vm4599_vm13, %v11933_v43  ;;  %v5873_v43 = vpop.permute.xlu1 %5872  ;;  %vm13957_vm13 = vcmask 1039360  }
 0x6d9   :  { %v12129_v53 = vpop.permute.xlu0 %5886  ;;  %vm13958_vm12 = vmmov %vm13957_vm13 }
 0x6da   :  { %v5933_v55 = vsel %vm13958_vm12, %v12105_v2, %v5873_v43  ;;  %vm13959_vm14 = vmmov %vm13958_vm12 }
 0x6db   :  { %v12165_v32 = vmax.f32 %v11930_v59, %v5933_v55  ;;  %vm13960_vm1 = vmmov %vm13958_vm12 }
 0x6dc   :  { %v12107_v57 = vpop.permute.xlu1 %5878  ;;  %v5934_v7 = vsel %vm13960_vm1, %v5873_v43, %v12111_v19  ;;  %vm13961_vm3 = vmmov %vm13960_vm1 }
 0x6dd   :  { %v12139_v40 = vpop.permute.xlu0 %5890  ;;  %v5936_v14 = vsel %vm13957_vm13, %v12107_v57, %v5881_v33  ;;  %v12183_v59 = vmax.f32 %v11938_v31, %v5934_v7  ;;  %vm13962_vm9 = vmmov %vm13960_vm1 }
 0x6de   :  { %v12154_v26 = vmax.f32 %v11954_v23, %v5936_v14  ;;  %vm13963_vm8 = vmmov %vm13960_vm1 }
 0x6df   :  { %vm13964_vm6 = vmmov %vm13960_vm1 }
 0x6e0   :  { %v12121_v46 = vpop.permute.xlu1 %5882  ;;  %vm13965_vm0 = vmmov %vm13960_vm1 }
 0x6e1   :  { %v5897_v3 = vpop.permute.xlu0 %5896  ;;  %vm13966_vm4 = vmmov %vm13965_vm0 }
 0x6e2   :  { %vm13967_vm5 = vmmov %vm13965_vm0 }
 0x6e3   :  { %vm13968_vm15 = vmmov %vm13965_vm0 }
 0x6e4   :  { %v5889_v20 = vpop.permute.xlu1 %5888  ;;  %vm13969_vm7 = vmmov %vm13965_vm0 }
 0x6e5   :  { %v12156_v0 = vpop.permute.xlu0 %5902  ;;  %v5939_v25 = vsel %vm13959_vm14, %v12129_v53, %v5889_v20  ;;  %v5940_v5 = vsel %vm13964_vm6, %v5889_v20, %v12139_v40  ;;  %vm13970_vm10 = vmmov %vm13965_vm0 }
 0x6e6   :  { %v12170_v23 = vmax.f32 %v11974_v4, %v5939_v25  ;;  %v5937_v4 = vsel %vm13962_vm9, %v5881_v33, %v12121_v46  ;;  %v6665_v25 = vld [vmem:[#allocation7 + $0x78] sm:$0xff]  ;;  %vm13971_vm2 = vmmov %vm13965_vm0 }
 0x6e7   :  { %v12199_v31 = vmax.f32 %v11958_v35, %v5937_v4  ;;  %v12215_v35 = vmax.f32 %v11981_v21, %v5940_v5  ;;  %v6679_v4 = vld [vmem:[#allocation7 + $0xe8] sm:$0xff]  ;;  %vm13972_vm11 = vmmov %vm13965_vm0 }
 0x6e8   :  { %v12135_v61 = vpop.permute.xlu1 %5894  ;;  %vm13973_vm13 = vmmov %vm13965_vm0 }
 0x6e9   :  { %v5942_v37 = vsel %vm13961_vm3, %v12135_v61, %v5897_v3  ;;  %v12178_v60 = vpop.permute.xlu0 %5906  ;;  %vm13974_vm12 = vmmov %vm13965_vm0 }
 0x6ea   :  { %v12188_v15 = vmax.f32 %v11994_v41, %v5942_v37  ;;  %v6680_v37 = vld [vmem:[#allocation7 + $0xf0] sm:$0xff]  ;;  %vm13975_vm14 = vmmov %vm13965_vm0 }
 0x6eb   :  { %vm13976_vm1 = vmmov %vm13965_vm0 }
 0x6ec   :  { %v12145_v39 = vpop.permute.xlu1 %5898  ;;  %vm13977_vm3 = vmmov %vm13965_vm0 }
 0x6ed   :  { %v5943_v33 = vsel %vm13966_vm4, %v5897_v3, %v12145_v39  ;;  %vm13978_vm9 = vmmov %vm13965_vm0 }
 0x6ee   :  { %vm13980_vm6 = vmmov %vm13965_vm0 }
 0x6f0   :  { %v5905_v1 = vpop.permute.xlu1 %5904 }
 0x6f1   :  { %v5945_v24 = vsel %vm13963_vm8, %v12156_v0, %v5905_v1  ;;  %v5946_v21 = vsel %vm13968_vm15, %v5905_v1, %v12178_v60  ;;  %v6681_v1 = vld [vmem:[#allocation7 + $0xf8] sm:$0xff]  ;;  %vm13979_vm8 = vmmov %vm13965_vm0 }
 0x6f2   :  { %v12204_v41 = vmax.f32 %v12012_v18, %v5945_v24  ;;  %8027 = vmatprep.subr.mxu0 %v6681_v1 }
 0x6f3   :  { %8028 = vmatpush3.msra.mxu0 %v6665_v25 }
 0x6f4   :  { %8029 = vmatprep.subr.mxu0 %v6680_v37 }
 0x70b   :  { %v5913_v50 = vpop.permute.xlu0 %5912 }
 0x70e   :  { %v12172_v52 = vpop.permute.xlu1 %5910 }
 0x70f   :  { %v5948_v11 = vsel %vm13965_vm0, %v12172_v52, %v5913_v50  ;;  %vm13981_vm0 = vcmask 850944  }
 0x710   :  { %v12220_v18 = vmax.f32 %v12052_v38, %v5948_v11  ;;  %v12241_v38 = vmax.f32 %v12014_v36, %v5946_v21  ;;  %v6678_v11 = vld [vmem:[#allocation7 + $0xe0] sm:$0xff]  ;;  %v6677_v21 = vld [vmem:[#allocation7 + $0xd8] sm:$0xff]  ;;  %vm13982_vm4 = vmmov %vm13981_vm0 }
 0x711   :  { %vm13984_vm15 = vmmov %vm13981_vm0 }
 0x712   :  { %v12194_v62 = vpop.permute.xlu1 %5914 }
 0x713   :  { %v5949_v14 = vsel %vm13969_vm7, %v5913_v50, %v12194_v62  ;;  %v6663_v50 = vld [vmem:[#allocation7 + $0x68] sm:$0xff]  ;;  %vm13985_vm7 = vmmov %vm13981_vm0 }
 0x718   :  { %v12091_v51 = vpop.f32.mrf.mxu0 }
 0x719   :  { %v12093_v10 = vpop.f32.mrf.mxu1 }
 0x71a   :  { %v12095_v54 = vpop.f32.mrf.mxu0  ;;  %5920 = vrot.lane.b32.xlu1 %v12093_v10, %s8656_s17 }
 0x71b   :  { %5918 = vrot.lane.b32.xlu0 %v12095_v54, %s8656_s17  ;;  %v12101_v12 = vpop.f32.mrf.mxu1 }
 0x71f   :  { %5922 = vrot.lane.b32.xlu0 %v12101_v12, %s8656_s17 }
 0x78c   :  { %v5921_v8 = vpop.permute.xlu1 %5920 }
 0x78d   :  { %v12210_v43 = vpop.permute.xlu0 %5918 }
 0x78e   :  { %v5951_v20 = vsel %vm13967_vm5, %v12210_v43, %v5921_v8  ;;  %vm13983_vm5 = vmmov %vm13981_vm0 }
 0x78f   :  { %v12234_v3 = vmax.f32 %v12095_v54, %v5951_v20  ;;  %v12250_v54 = vmax.f32 %v12045_v63, %v5949_v14  ;;  %v6664_v63 = vld [vmem:[#allocation7 + $0x70] sm:$0xff] }
 0x790   :  { %8030 = vmatpush3.msra.mxu0 %v6664_v63  ;;  %v6660_v63 = vld [vmem:[#allocation7 + $0x50] sm:$0xff] }
 0x791   :  { %8031 = vmatprep.subr.mxu0 %v6679_v4 }
 0x792   :  { %8032 = vmatpush3.msra.mxu0 %v6663_v50  ;;  %v6675_v50 = vld [vmem:[#allocation7 + $0xc8] sm:$0xff] }
 0x793   :  { %8033 = vmatprep.subr.mxu0 %v6678_v11 }
 0x797   :  { %v12109_v9 = vpop.f32.mrf.mxu1 }
 0x798   :  { %v12113_v49 = vpop.f32.mrf.mxu0  ;;  %5928 = vrot.lane.b32.xlu0 %v12109_v9, %s8656_s17 }
 0x799   :  { %v12125_v28 = vpop.f32.mrf.mxu1 }
 0x79a   :  { %v12117_v34 = vpop.f32.mrf.mxu0 }
 0x79b   :  { %5926 = vrot.lane.b32.xlu1 %v12117_v34, %s8656_s17 }
 0x79c   :  { %5868 = vrot.lane.b32.xlu0 %v11923_v13, %s8656_s17 }
 0x79f   :  { %5930 = vrot.lane.b32.xlu1 %v12125_v28, %s8656_s17 }
 0x7a0   :  { %5884 = vrot.lane.b32.xlu0 %v11963_v6, %s8656_s17 }
 0x7a3   :  { %5876 = vrot.lane.b32.xlu1 %v11940_v44, %s8656_s17 }
 0x7a4   :  { %5900 = vrot.lane.b32.xlu0 %v12003_v45, %s8656_s17 }
 0x7a7   :  { %5892 = vrot.lane.b32.xlu1 %v11983_v47, %s8656_s17 }
 0x7a8   :  { %5916 = vrot.lane.b32.xlu0 %v12091_v51, %s8656_s17 }
 0x7ab   :  { %5908 = vrot.lane.b32.xlu1 %v12047_v17, %s8656_s17 }
 0x7ac   :  { %6191 = vperm.xlu0 %8500, %v6188_v42   ;;  %v12229_v42 = vmax.f32 %v11999_v16, %v5943_v33  ;;  %v12245_v16 = vpop.permute.xlu0 %5922  ;;  %v6662_v33 = vld [vmem:[#allocation7 + $0x60] sm:$0xff] }
 0x7ad   :  { %v5952_v55 = vsel %vm13970_vm10, %v5921_v8, %v12245_v16  ;;  %8034 = vmatpush3.msra.mxu0 %v6662_v33  ;;  %v6658_v33 = vld [vmem:[#allocation7 + $0x40] sm:$0xff]  ;;  %vm13986_vm10 = vmmov %vm13981_vm0 }
 0x7ae   :  { %v12257_v36 = vmax.f32 %v12093_v10, %v5952_v55  ;;  %8035 = vmatprep.subr.mxu0 %v6677_v21  ;;  %v6661_v55 = vld [vmem:[#allocation7 + $0x58] sm:$0xff] }
 0x7af   :  { %5924 = vrot.lane.b32.xlu1 %v12113_v49, %s8656_s17  ;;  %8036 = vmatpush3.msra.mxu0 %v6661_v55  ;;  %v6673_v21 = vld [vmem:[#allocation7 + $0xb8] sm:$0xff] }
 0x7b0   :  { %6062 = vrot.lane.b32.xlu0 %v12154_v26, %s8660_s12  ;;  %v6713_v55 = vld [vmem:[#allocation7 + $0x1f8] sm:$0xff] }
 0x7b1   :  { %8062 = vmatprep.subr.mxu1 %v6713_v55  ;;  %v6694_v55 = vld [vmem:[#allocation7 + $0x160] sm:$0xff] }
 0x7b3   :  { %6054 = vrot.lane.b32.xlu1 %v12165_v32, %s8660_s12 }
 0x7b4   :  { %6070 = vrot.lane.b32.xlu0 %v12170_v23, %s8660_s12 }
 0x7b7   :  { %6056 = vrot.lane.b32.xlu1 %v12183_v59, %s8660_s12 }
 0x7b8   :  { %6078 = vrot.lane.b32.xlu0 %v12188_v15, %s8660_s12 }
 0x7bb   :  { %6064 = vrot.lane.b32.xlu1 %v12199_v31, %s8660_s12 }
 0x7bc   :  { %6086 = vrot.lane.b32.xlu0 %v12204_v41, %s8660_s12 }
 0x7bf   :  { %6072 = vrot.lane.b32.xlu1 %v12215_v35, %s8660_s12 }
 0x7c0   :  { %6094 = vrot.lane.b32.xlu0 %v12220_v18, %s8660_s12 }
 0x7c3   :  { %6080 = vrot.lane.b32.xlu1 %v12229_v42, %s8660_s12 }
 0x7c4   :  { %6102 = vrot.lane.b32.xlu0 %v12234_v3, %s8660_s12 }
 0x7c7   :  { %6088 = vrot.lane.b32.xlu1 %v12241_v38, %s8660_s12 }
 0x7cb   :  { %6096 = vrot.lane.b32.xlu1 %v12250_v54, %s8660_s12 }
 0x7cf   :  { %6104 = vrot.lane.b32.xlu1 %v12257_v36, %s8660_s12 }
 0x80a   :  { %v5929_v7 = vpop.permute.xlu0 %5928 }
 0x80d   :  { %v12261_v24 = vpop.permute.xlu1 %5926 }
 0x80e   :  { %v5954_v10 = vsel %vm13971_vm2, %v12261_v24, %v5929_v7  ;;  %v5869_v5 = vpop.permute.xlu0 %5868  ;;  %vm13987_vm2 = vmmov %vm13981_vm0 }
 0x80f   :  { %v12266_v8 = vmax.f32 %v12117_v34, %v5954_v10  ;;  %v5932_v20 = vsel %vm13972_vm11, %v5869_v5, %v12105_v2  ;;  %v6676_v34 = vld [vmem:[#allocation7 + $0xd0] sm:$0xff]  ;;  %v6659_v10 = vld [vmem:[#allocation7 + $0x48] sm:$0xff]  ;;  %v6674_v5 = vld [vmem:[#allocation7 + $0xc0] sm:$0xff] }
 0x810   :  { %v12277_v37 = vmax.f32 %v11923_v13, %v5932_v20  ;;  %8037 = vmatprep.subr.mxu0 %v6676_v34  ;;  %v6697_v34 = vld [vmem:[#allocation7 + $0x178] sm:$0xff]  ;;  %vm13988_vm11 = vmmov %vm13981_vm0 }
 0x811   :  { %6110 = vrot.lane.b32.xlu0 %v12266_v8, %s8660_s12  ;;  %v12272_v14 = vpop.permute.xlu1 %5930  ;;  %8038 = vmatpush3.msra.mxu0 %v6660_v63 }
 0x812   :  { %v5955_v1 = vsel %vm13973_vm13, %v5929_v7, %v12272_v14  ;;  %v5885_v25 = vpop.permute.xlu0 %5884  ;;  %8039 = vmatprep.subr.mxu0 %v6675_v50  ;;  %8063 = vmatpush3.msra.mxu1 %v6697_v34  ;;  %v6712_v50 = vld [vmem:[#allocation7 + $0x1f0] sm:$0xff]  ;;  %v6653_v34 = vld [vmem:[#allocation7 + $0x18] sm:$0xff]  ;;  %vm13989_vm13 = vmmov %vm13981_vm0 }
 0x813   :  { %v12280_v2 = vmax.f32 %v12109_v9, %v5955_v1  ;;  %v5938_v4 = vsel %vm13974_vm12, %v5885_v25, %v12129_v53  ;;  %8040 = vmatpush3.msra.mxu0 %v6659_v10  ;;  %8064 = vmatprep.subr.mxu1 %v6712_v50  ;;  %v6671_v10 = vld [vmem:[#allocation7 + $0xa8] sm:$0xff]  ;;  %vm13990_vm12 = vmmov %vm13981_vm0 }
 0x814   :  { %v12291_v11 = vmax.f32 %v11963_v6, %v5938_v4  ;;  %8041 = vmatprep.subr.mxu0 %v6674_v5  ;;  %v6657_v6 = vld [vmem:[#allocation7 + $0x38] sm:$0xff]  ;;  %v6672_v4 = vld [vmem:[#allocation7 + $0xb0] sm:$0xff]  ;;  %v6655_v5 = vld [vmem:[#allocation7 + $0x28] sm:$0xff] }
 0x815   :  { %6052 = vrot.lane.b32.xlu0 %v12277_v37, %s8660_s12  ;;  %6112 = vrot.lane.b32.xlu1 %v12280_v2, %s8660_s12  ;;  %v5877_v7 = vpop.permute.xlu1 %5876 }
 0x816   :  { %v5935_v13 = vsel %vm13975_vm14, %v5877_v7, %v12107_v57  ;;  %v5901_v9 = vpop.permute.xlu0 %5900  ;;  %8042 = vmatpush3.msra.mxu0 %v6658_v33  ;;  %v6696_v7 = vld [vmem:[#allocation7 + $0x170] sm:$0xff]  ;;  %v6695_v33 = vld [vmem:[#allocation7 + $0x168] sm:$0xff]  ;;  %vm13991_vm14 = vmmov %vm13981_vm0 }
 0x817   :  { %v12294_v53 = vmax.f32 %v11940_v44, %v5935_v13  ;;  %v5944_v20 = vsel %vm13976_vm1, %v5901_v9, %v12156_v0  ;;  %8043 = vmatprep.subr.mxu0 %v6673_v21  ;;  %8065 = vmatpush3.msra.mxu1 %v6696_v7  ;;  %v6710_v21 = vld [vmem:[#allocation7 + $0x1e0] sm:$0xff]  ;;  %v6667_v7 = vld [vmem:[#allocation7 + $0x88] sm:$0xff]  ;;  %vm13992_vm1 = vmmov %vm13981_vm0 }
 0x818   :  { %v12305_v25 = vmax.f32 %v12003_v45, %v5944_v20  ;;  %8044 = vmatpush3.msra.mxu0 %v6657_v6  ;;  %v6670_v20 = vld [vmem:[#allocation7 + $0xa0] sm:$0xff] }
 0x819   :  { %6068 = vrot.lane.b32.xlu0 %v12291_v11, %s8660_s12  ;;  %6060 = vrot.lane.b32.xlu1 %v12294_v53, %s8660_s12  ;;  %v5893_v57 = vpop.permute.xlu1 %5892 }
 0x81a   :  { %v5941_v44 = vsel %vm13977_vm3, %v5893_v57, %v12135_v61  ;;  %v5917_v1 = vpop.permute.xlu0 %5916  ;;  %v6656_v61 = vld [vmem:[#allocation7 + $0x30] sm:$0xff]  ;;  %8045 = vmatprep.subr.mxu0 %v6672_v4  ;;  %v6012_v57 = vmax.f32 %v11952_v56, %v12111_v19  ;;  %v6013_v19 = vmax.f32 %v11970_v27, %v12121_v46  ;;  %v6651_v27 = vld [vmem:[#allocation7 + $0x8] sm:$0xff]  ;;  %vm13993_vm3 = vmmov %vm13981_vm0 }
 0x81b   :  { %v12308_v0 = vmax.f32 %v11983_v47, %v5941_v44  ;;  %v5950_v63 = vsel %vm13978_vm9, %v5917_v1, %v12210_v43  ;;  %v6711_v43 = vld [vmem:[#allocation7 + $0x1e8] sm:$0xff]  ;;  %8046 = vmatpush3.msra.mxu0 %v6656_v61  ;;  %v6669_v44 = vld [vmem:[#allocation7 + $0x98] sm:$0xff]  ;;  %v6668_v4 = vld [vmem:[#allocation7 + $0x90] sm:$0xff] }
 0x81c   :  { %v12319_v13 = vmax.f32 %v12091_v51, %v5950_v63  ;;  %8047 = vmatprep.subr.mxu0 %v6671_v10  ;;  %8066 = vmatprep.subr.mxu1 %v6711_v43  ;;  %v6654_v51 = vld [vmem:[#allocation7 + $0x20] sm:$0xff]  ;;  %v6709_v1 = vld [vmem:[#allocation7 + $0x1d8] sm:$0xff]  ;;  %v6708_v56 = vld [vmem:[#allocation7 + $0x1d0] sm:$0xff] }
 0x81d   :  { %6084 = vrot.lane.b32.xlu0 %v12305_v25, %s8660_s12  ;;  %6076 = vrot.lane.b32.xlu1 %v12308_v0, %s8660_s12  ;;  %v5909_v45 = vpop.permute.xlu1 %5908  ;;  %v6693_v63 = vld [vmem:[#allocation7 + $0x158] sm:$0xff]  ;;  %v6692_v61 = vld [vmem:[#allocation7 + $0x150] sm:$0xff]  ;;  %v6691_v46 = vld [vmem:[#allocation7 + $0x148] sm:$0xff] }
 0x81e   :  { %v5947_v47 = vsel %vm13979_vm8, %v5909_v45, %v12172_v52  ;;  %8048 = vmatpush3.msra.mxu0 %v6655_v5  ;;  %8067 = vmatpush3.msra.mxu1 %v6695_v33  ;;  %v6652_v45 = vld [vmem:[#allocation7 + $0x10] sm:$0xff]  ;;  %v6666_v5 = vld [vmem:[#allocation7 + $0x80] sm:$0xff]  ;;  %vm13994_vm9 = vmmov %vm13981_vm0 }
 0x81f   :  { %v12322_v9 = vmax.f32 %v12047_v17, %v5947_v47  ;;  %8049 = vmatprep.subr.mxu0 %v6670_v20  ;;  %8068 = vmatprep.subr.mxu1 %v6710_v21  ;;  %v6707_v47 = vld [vmem:[#allocation7 + $0x1c8] sm:$0xff]  ;;  %v6706_v33 = vld [vmem:[#allocation7 + $0x1c0] sm:$0xff]  ;;  %vm13995_vm8 = vmmov %vm13981_vm0 }
 0x820   :  { %8050 = vmatpush3.msra.mxu0 %v6654_v51  ;;  %8069 = vmatpush3.msra.mxu1 %v6694_v55  ;;  %v6650_v21 = vld [vmem:[#allocation7] sm:$0xff]  ;;  %v6018_v51 = vmax.f32 %v12101_v12, %v12245_v16  ;;  %v6688_v12 = vld [vmem:[#allocation7 + $0x130] sm:$0xff]  ;;  %v6247_v16 = vlaneseq }
 0x821   :  { %6100 = vrot.lane.b32.xlu0 %v12319_v13, %s8660_s12  ;;  %6092 = vrot.lane.b32.xlu1 %v12322_v9, %s8660_s12  ;;  %v5925_v52 = vpop.permute.xlu1 %5924 }
 0x822   :  { %v5953_v17 = vsel %vm13980_vm6, %v5925_v52, %v12261_v24  ;;  %8051 = vmatprep.subr.mxu0 %v6669_v44  ;;  %8070 = vmatprep.subr.mxu1 %v6709_v1  ;;  %v6690_v52 = vld [vmem:[#allocation7 + $0x140] sm:$0xff]  ;;  %v6704_v1 = vld [vmem:[#allocation7 + $0x1b0] sm:$0xff]  ;;  %vm13996_vm6 = vmmov %vm13981_vm0 }
 0x823   :  { %v12333_v6 = vmax.f32 %v12113_v49, %v5953_v17  ;;  %v6014_v49 = vmax.f32 %v11992_v30, %v12139_v40  ;;  %8052 = vmatpush3.msra.mxu0 %v6653_v34  ;;  %8071 = vmatpush3.msra.mxu1 %v6693_v63  ;;  %v6015_v30 = vmax.f32 %v12005_v48, %v12145_v39  ;;  %v6745_v39 = vld [vmem:[#allocation7 + $0x2f8] sm:$0xff]  ;;  %v6703_v63 = vld [vmem:[#allocation7 + $0x1a8] sm:$0xff] }
 0x824   :  { %8053 = vmatprep.subr.mxu0 %v6668_v4  ;;  %8072 = vmatprep.subr.mxu1 %v6708_v56  ;;  %v6016_v40 = vmax.f32 %v12021_v29, %v12178_v60  ;;  %v6705_v29 = vld [vmem:[#allocation7 + $0x1b8] sm:$0xff]  ;;  %v6017_v60 = vmax.f32 %v12056_v22, %v12194_v62  ;;  %v6019_v4 = vmax.f32 %v12125_v28, %v12272_v14  ;;  %v6686_v28 = vld [vmem:[#allocation7 + $0x120] sm:$0xff] }
 0x825   :  { %6058 = vrot.lane.b32.xlu0 %v6012_v57, %s8660_s12  ;;  %6108 = vrot.lane.b32.xlu1 %v12333_v6, %s8660_s12  ;;  %v12338_v24 = vpop.permute.xlu1 %6054  ;;  %v6689_v57 = vld [vmem:[#allocation7 + $0x138] sm:$0xff] }
 0x826   :  { %8054 = vmatpush3.msra.mxu0 %v6652_v45  ;;  %8073 = vmatpush3.msra.mxu1 %v6692_v61  ;;  %v6687_v61 = vld [vmem:[#allocation7 + $0x128] sm:$0xff] }
 0x827   :  { %v12344_v50 = vpop.permute.xlu0 %6191  ;;  %8055 = vmatprep.subr.mxu0 %v6667_v7  ;;  %8074 = vmatprep.subr.mxu1 %v6707_v47  ;;  %v6702_v7 = vld [vmem:[#allocation7 + $0x1a0] sm:$0xff] }
 0x828   :  { %8056 = vmatpush3.msra.mxu0 %v6651_v27  ;;  %8075 = vmatpush3.msra.mxu1 %v6691_v46  ;;  %v12395_v46 = vshrl.u32 %v6247_v16, 7 }
 0x829   :  { %6074 = vrot.lane.b32.xlu0 %v6014_v49, %s8660_s12  ;;  %6066 = vrot.lane.b32.xlu1 %v6013_v19, %s8660_s12  ;;  %v12348_v10 = vpop.permute.xlu1 %6056 }
 0x82a   :  { %v6117_v20 = vsel %vm13981_vm0, %v12338_v24, %v12348_v10  ;;  %8057 = vmatprep.subr.mxu0 %v6666_v5  ;;  %8076 = vmatprep.subr.mxu1 %v6706_v33 }
 0x82b   :  { %v12354_v43 = vpop.permute.xlu0 %6062  ;;  %v6165_v55 = vmax.f32 %v12165_v32, %v6117_v20  ;;  %8058 = vmatpush3.msra.mxu0 %v6650_v21  ;;  %8077 = vmatpush3.msra.mxu1 %v6690_v52  ;;  %v8682_v32 = vmov 1983009808   ;;  %v6685_v21 = vld [vmem:[#allocation7 + $0x118] sm:$0xff]  ;;  %v6700_v52 = vld [vmem:[#allocation7 + $0x190] sm:$0xff] }
 0x82c   :  { %8078 = vmatprep.subr.mxu1 %v6705_v29  ;;  %8097 = vmatprep.subr.mxu0 %v6745_v39  ;;  %v6245_v62 = vunpack.c.l.s4 %v8682_v32 }
 0x82d   :  { %6090 = vrot.lane.b32.xlu0 %v6016_v40, %s8660_s12  ;;  %6082 = vrot.lane.b32.xlu1 %v6015_v30, %s8660_s12  ;;  %v12361_v48 = vpop.permute.xlu1 %6064  ;;  %v12383_v56 = vadd.f32 %v12344_v50, %v6165_v55  ;;  %v6699_v55 = vld [vmem:[#allocation7 + $0x188] sm:$0xff] }
 0x82e   :  { %v6120_v44 = vsel %vm13982_vm4, %v12354_v43, %v12361_v48  ;;  %8079 = vmatpush3.msra.mxu1 %v6689_v57  ;;  %v6246_v14 = vunpack.c.0.s8 %v6245_v62  ;;  %v6698_v62 = vld [vmem:[#allocation7 + $0x180] sm:$0xff]  ;;  %vm13997_vm4 = vmmov %vm13981_vm0 }
 0x82f   :  { %v12368_v17 = vpop.permute.xlu0 %6070  ;;  %v6168_v19 = vmax.f32 %v12154_v26, %v6120_v44  ;;  %8080 = vmatprep.subr.mxu1 %v6704_v1  ;;  %v6219_v30 = vmax.f32 %v12383_v56, 0.0 }
 0x830   :  { %8081 = vmatpush3.msra.mxu1 %v6688_v12  ;;  %v12414_v57 = vsub.s32 %v6246_v14, %v12395_v46  ;;  %v6683_v12 = vld [vmem:[#allocation7 + $0x108] sm:$0xff] }
 0x831   :  { %6106 = vrot.lane.b32.xlu0 %v6018_v51, %s8660_s12  ;;  %6098 = vrot.lane.b32.xlu1 %v6017_v60, %s8660_s12  ;;  %v12375_v22 = vpop.permute.xlu1 %6072  ;;  %v6198_v40 = vadd.f32 %v12344_v50, %v6168_v19  ;;  %v6684_v51 = vld [vmem:[#allocation7 + $0x110] sm:$0xff] }
 0x832   :  { %v6123_v34 = vsel %vm13983_vm5, %v12368_v17, %v12375_v22  ;;  %8082 = vmatprep.subr.mxu1 %v6703_v63  ;;  %v6682_v63 = vld [vmem:[#allocation7 + $0x100] sm:$0xff]  ;;  %vm13998_vm5 = vmmov %vm13981_vm0 }
 0x833   :  { %v6171_v49 = vmax.f32 %v12170_v23, %v6123_v34  ;;  %v12387_v45 = vpop.permute.xlu0 %6078  ;;  %8083 = vmatpush3.msra.mxu1 %v6687_v61  ;;  %v6701_v23 = vld [vmem:[#allocation7 + $0x198] sm:$0xff] }
 0x834   :  { %8084 = vmatprep.subr.mxu1 %v6702_v7 }
 0x835   :  { %v12390_v47 = vadd.f32 %v12344_v50, %v6171_v49  ;;  %6114 = vrot.lane.b32.xlu1 %v6019_v4, %s8660_s12  ;;  %v12393_v27 = vpop.permute.xlu1 %6080  ;;  %8085 = vmatpush3.msra.mxu1 %v6686_v28  ;;  %v6777_v4 = vld [vmem:[#allocation7 + $0x3f8] sm:$0xff] }
 0x836   :  { %v6126_v26 = vsel %vm13984_vm15, %v12387_v45, %v12393_v27  ;;  %8086 = vmatprep.subr.mxu1 %v6701_v23  ;;  %vm13999_vm15 = vmmov %vm13981_vm0 }
 0x837   :  { %v6225_v5 = vmax.f32 %v12390_v47, 0.0  ;;  %v6174_v33 = vmax.f32 %v12188_v15, %v6126_v26  ;;  %v12404_v20 = vpop.permute.xlu0 %6086  ;;  %8087 = vmatpush3.msra.mxu1 %v6685_v21  ;;  %v6222_v15 = vmax.f32 %v6198_v40, 0.0 }
 0x838   :  { %8088 = vmatprep.subr.mxu1 %v6700_v52 }
 0x839   :  { %v6379_v29 = vcombine.high %v6219_v30, %v6225_v5  ;;  %v6204_v39 = vadd.f32 %v12344_v50, %v6174_v33  ;;  %v12411_v60 = vpop.permute.xlu1 %6088  ;;  %8089 = vmatpush3.msra.mxu1 %v6684_v51 }
 0x83a   :  { %v6129_v32 = vsel %vm13985_vm7, %v12404_v20, %v12411_v60  ;;  %8090 = vmatprep.subr.mxu1 %v6699_v55  ;;  %vm14000_vm7 = vmmov %vm13981_vm0 }
 0x83b   :  { %v6228_v44 = vmax.f32 %v6204_v39, 0.0  ;;  %v12416_v1 = vpop.permute.xlu0 %6094  ;;  %8091 = vmatpush3.msra.mxu1 %v6683_v12  ;;  %v12424_v19 = vrot.slane %v6379_v29, %v12414_v57  ;;  %v6177_v61 = vmax.f32 %v12204_v41, %v6129_v32 }
 0x83c   :  { %8092 = vmatprep.subr.mxu1 %v6698_v62  ;;  %v8683_v62 = vmov 1934713408  }
 0x83d   :  { %v6395_v16 = vcombine.high %v6222_v15, %v6228_v44  ;;  %v12421_v34 = vpop.permute.xlu1 %6096  ;;  %8093 = vmatpush3.msra.mxu1 %v6682_v63  ;;  %v6207_v40 = vadd.f32 %v12344_v50, %v6177_v61 }
 0x83e   :  { %8132 = vmatprep.subr.mxu1 %v6777_v4  ;;  %v6132_v39 = vsel %vm13987_vm2, %v12416_v1, %v12421_v34  ;;  %vm14002_vm2 = vmmov %vm13981_vm0 }
 0x83f   :  { %v12427_v49 = vrot.slane %v6395_v16, %v12414_v57  ;;  %v12430_v7 = vpop.permute.xlu0 %6102  ;;  %v6231_v21 = vmax.f32 %v6207_v40, 0.0  ;;  %v6180_v55 = vmax.f32 %v12220_v18, %v6132_v39  ;;  %v6309_v16 = vunpack.c.l.s4 %v8683_v62 }
 0x840   :  { %v6394_v40 = vcombine.low %v6222_v15, %v6228_v44 }
 0x841   :  { %v12432_v28 = vpop.permute.xlu1 %6104  ;;  %v6458_v14 = vcombine.low %v12424_v19, %v12427_v49  ;;  %v6459_v23 = vcombine.high %v12424_v19, %v12427_v49  ;;  %v6310_v39 = vunpack.c.0.s8 %v6309_v16 }
 0x842   :  { %v6135_v26 = vsel %vm13986_vm10, %v12430_v7, %v12432_v28  ;;  %v12472_v16 = vrot.slane %v6394_v40, %v12414_v57  ;;  %vm14001_vm10 = vmmov %vm13981_vm0 }
 0x843   :  { %v6183_v41 = vmax.f32 %v12234_v3, %v6135_v26  ;;  %v6210_v3 = vadd.f32 %v12344_v50, %v6180_v55  ;;  %v6378_v55 = vcombine.low %v6219_v30, %v6225_v5 }
 0x845   :  { %v6213_v33 = vadd.f32 %v12344_v50, %v6183_v41 }
 0x847   :  { %v6237_v52 = vmax.f32 %v6213_v33, 0.0 }
 0x849   :  { %v6411_v29 = vcombine.high %v6231_v21, %v6237_v52  ;;  %v6410_v62 = vcombine.low %v6231_v21, %v6237_v52 }
 0x84b   :  { %v6418_v52 = vrot.slane %v6410_v62, %v12414_v57 }
 0x883   :  { %v12447_v51 = vpop.permute.xlu0 %6110 }
 0x887   :  { %v6053_v12 = vpop.permute.xlu0 %6052  ;;  %v12450_v32 = vpop.permute.xlu1 %6112 }
 0x888   :  { %v6116_v63 = vsel %vm13988_vm11, %v6053_v12, %v12338_v24  ;;  %v6138_v4 = vsel %vm13989_vm13, %v12447_v51, %v12450_v32  ;;  %v6234_v24 = vmax.f32 %v6210_v3, 0.0  ;;  %vm14003_vm11 = vmmov %vm13981_vm0  ;;  %vm8684_vm13 = vmmov 0  }
 0x889   :  { %v6164_v61 = vmax.f32 %v12277_v37, %v6116_v63  ;;  %v6186_v26 = vmax.f32 %v12266_v8, %v6138_v4  ;;  %v6386_v63 = vrot.slane %v6378_v55, %v12414_v57 }
 0x88b   :  { %v6216_v18 = vadd.f32 %v12344_v50, %v6186_v26  ;;  %v6069_v41 = vpop.permute.xlu0 %6068  ;;  %v6061_v33 = vpop.permute.xlu1 %6060  ;;  %v6194_v8 = vadd.f32 %v12344_v50, %v6164_v61 }
 0x88c   :  { %v6122_v12 = vsel %vm13990_vm12, %v6069_v41, %v12368_v17  ;;  %v6119_v37 = vsel %vm13991_vm14, %v6061_v33, %v12354_v43  ;;  %vm14004_vm12 = vcmask 261120   ;;  %vm7966_vm14 = vcmask 80896  }
 0x88d   :  { %v6240_v15 = vmax.f32 %v6216_v18, 0.0  ;;  %v6170_v44 = vmax.f32 %v12291_v11, %v6122_v12  ;;  %v6167_v47 = vmax.f32 %v12294_v53, %v6119_v37  ;;  %v12482_v11 = vsub.s32 %v6310_v39, %v12395_v46 }
 0x88e   :  { %v6218_v53 = vmax.f32 %v6194_v8, 0.0  ;;  %v12502_v12 = vrot.slane %v6411_v29, %v12414_v57 }
 0x88f   :  { %v6426_v56 = vcombine.low %v6234_v24, %v6240_v15  ;;  %v6427_v30 = vcombine.high %v6234_v24, %v6240_v15  ;;  %v6200_v5 = vadd.f32 %v12344_v50, %v6170_v44  ;;  %v6085_v3 = vpop.permute.xlu0 %6084  ;;  %v6077_v17 = vpop.permute.xlu1 %6076  ;;  %v6197_v26 = vadd.f32 %v12344_v50, %v6167_v47 }
 0x890   :  { %v6128_v43 = vsel %vm13992_vm1, %v6085_v3, %v12404_v20  ;;  %v6125_v21 = vsel %vm13993_vm3, %v6077_v17, %v12387_v45  ;;  %v6442_v20 = vcombine.low %v6386_v63, %v12472_v16 }
 0x891   :  { %v6434_v4 = vrot.slane %v6426_v56, %v12414_v57  ;;  %v6224_v61 = vmax.f32 %v6200_v5, 0.0  ;;  %v6176_v40 = vmax.f32 %v12305_v25, %v6128_v43  ;;  %v6173_v18 = vmax.f32 %v12308_v0, %v6125_v21 }
 0x892   :  { %v12491_v41 = vrot.slane %v6427_v30, %v12414_v57  ;;  %v6443_v0 = vcombine.high %v6386_v63, %v12472_v16  ;;  %v6221_v15 = vmax.f32 %v6197_v26, 0.0  ;;  %v12508_v47 = vrot.slane %v6442_v20, %v12482_v11 }
 0x893   :  { %v12493_v45 = vcombine.high %v6218_v53, %v6224_v61  ;;  %v6101_v46 = vpop.permute.xlu0 %6100  ;;  %v6093_v33 = vpop.permute.xlu1 %6092  ;;  %v6474_v39 = vcombine.low %v6418_v52, %v6434_v4  ;;  %v6203_v55 = vadd.f32 %v12344_v50, %v6173_v18  ;;  %v6206_v37 = vadd.f32 %v12344_v50, %v6176_v40 }
 0x894   :  { %v6134_v24 = vsel %vm13994_vm9, %v6101_v46, %v12430_v7  ;;  %v6131_v25 = vsel %vm13995_vm8, %v6093_v33, %v12416_v1  ;;  %v6475_v29 = vcombine.high %v6418_v52, %v6434_v4  ;;  %v6490_v30 = vcombine.low %v12502_v12, %v12491_v41 }
 0x895   :  { %v6182_v62 = vmax.f32 %v12319_v13, %v6134_v24  ;;  %v6179_v8 = vmax.f32 %v12322_v9, %v6131_v25  ;;  %v6227_v44 = vmax.f32 %v6203_v55, 0.0  ;;  %v12511_v7 = vrot.slane %v6474_v39, %v12482_v11 }
 0x896   :  { %v6491_v13 = vcombine.high %v12502_v12, %v12491_v41  ;;  %v6242_v9 = vcombine.low %v6218_v53, %v6224_v61  ;;  %v6230_v63 = vmax.f32 %v6206_v37, 0.0  ;;  %v12529_v20 = vrot.slane %v6475_v29, %v12482_v11  ;;  %v6725_v41 = vld [vmem:[#allocation7 + $0x258] sm:$0xff] }
 0x897   :  { %v6212_v1 = vadd.f32 %v12344_v50, %v6182_v62  ;;  %v6059_v16 = vpop.permute.xlu0 %6058  ;;  %v6109_v56 = vpop.permute.xlu1 %6108  ;;  %v6259_v5 = vcombine.high %v6221_v15, %v6227_v44  ;;  %v6209_v21 = vadd.f32 %v12344_v50, %v6179_v8  ;;  %v6258_v4 = vcombine.low %v6221_v15, %v6227_v44 }
 0x898   :  { %v6118_v3 = vsel %vm13996_vm6, %v12348_v10, %v6059_v16  ;;  %v6137_v17 = vsel %vm13981_vm0, %v6109_v56, %v12447_v51  ;;  %v6506_v40 = vcombine.low %v12508_v47, %v12511_v7  ;;  %v12539_v33 = vrot.slane %v6242_v9, %v12414_v57 }
 0x899   :  { %v6236_v43 = vmax.f32 %v6212_v1, 0.0  ;;  %v6185_v52 = vmax.f32 %v12333_v6, %v6137_v17  ;;  %v6166_v26 = vmax.f32 %v12183_v59, %v6118_v3  ;;  %v12536_v59 = vrot.slane %v6443_v0, %v12482_v11 }
 0x89a   :  { %7105 = vmatprep.mubr.f32.mxu0 %v6506_v40  ;;  %v6233_v39 = vmax.f32 %v6209_v21, 0.0  ;;  %v12545_v24 = vrot.slane %v6458_v14, %v12482_v11  ;;  %v12548_v25 = vrot.slane %v6258_v4, %v12414_v57  ;;  %v12554_v44 = vrot.slane %v6490_v30, %v12482_v11 }
 0x89b   :  { %v6275_v53 = vcombine.high %v6230_v63, %v6236_v43  ;;  %v6215_v61 = vadd.f32 %v12344_v50, %v6185_v52  ;;  %v6075_v18 = vpop.permute.xlu0 %6074  ;;  %v6067_v10 = vpop.permute.xlu1 %6066  ;;  %v6274_v51 = vcombine.low %v6230_v63, %v6236_v43  ;;  %v6509_v14 = vcombine.high %v12536_v59, %v12529_v20 }
 0x89c   :  { %v6124_v46 = vsel %vm13997_vm4, %v12375_v22, %v6075_v18  ;;  %v6121_v6 = vsel %vm13998_vm5, %v12361_v48, %v6067_v10  ;;  %v6196_v22 = vadd.f32 %v12344_v50, %v6166_v26  ;;  %v6306_v3 = vcombine.low %v12539_v33, %v12548_v25 }
 0x89d   :  { %v6239_v55 = vmax.f32 %v6215_v61, 0.0  ;;  %v6172_v48 = vmax.f32 %v12215_v35, %v6124_v46  ;;  %v6169_v0 = vmax.f32 %v12199_v31, %v6121_v6  ;;  %v12559_v1 = vrot.slane %v6274_v51, %v12414_v57 }
 0x89e   :  { %v6220_v17 = vmax.f32 %v6196_v22, 0.0  ;;  %v12581_v43 = vrot.slane %v6259_v5, %v12414_v57  ;;  %v12594_v51 = vrot.slane %v6275_v53, %v12414_v57  ;;  %v6314_v6 = vrot.slane %v6306_v3, %v12482_v11 }
 0x89f   :  { %v6290_v37 = vcombine.low %v6233_v39, %v6239_v55  ;;  %v6291_v62 = vcombine.high %v6233_v39, %v6239_v55  ;;  %v6091_v8 = vpop.permute.xlu0 %6090  ;;  %v6083_v15 = vpop.permute.xlu1 %6082  ;;  %v6202_v16 = vadd.f32 %v12344_v50, %v6172_v48  ;;  %v6199_v29 = vadd.f32 %v12344_v50, %v6169_v0 }
 0x8a0   :  { %v6130_v35 = vsel %vm13999_vm15, %v12411_v60, %v6091_v8  ;;  %v6127_v31 = vsel %vm14000_vm7, %v12393_v27, %v6083_v15  ;;  %v6510_v60 = vcombine.low %v12545_v24, %v12554_v44  ;;  %v12578_v27 = vrot.slane %v12493_v45, %v12414_v57 }
 0x8a1   :  { %v12567_v56 = vrot.slane %v6290_v37, %v12414_v57  ;;  %v6178_v30 = vmax.f32 %v12241_v38, %v6130_v35  ;;  %v6175_v9 = vmax.f32 %v12229_v42, %v6127_v31  ;;  %v6226_v63 = vmax.f32 %v6202_v16, 0.0  ;;  %v6729_v37 = vld [vmem:[#allocation7 + $0x278] sm:$0xff]  ;;  %v6744_v35 = vld [vmem:[#allocation7 + $0x2f0] sm:$0xff] }
 0x8a2   :  { %v6223_v61 = vmax.f32 %v6199_v29, 0.0  ;;  %v12597_v46 = vrot.slane %v6291_v62, %v12414_v57  ;;  %v6511_v19 = vcombine.high %v12545_v24, %v12554_v44  ;;  %v6323_v49 = vcombine.high %v12578_v27, %v12581_v43  ;;  %v6958_v24 = vld [vmem:[#allocation7 + $0x9a0] sm:$0xff] }
 0x8a3   :  { %v6338_v38 = vcombine.low %v12559_v1, %v12567_v56  ;;  %v6205_v42 = vadd.f32 %v12344_v50, %v6175_v9  ;;  %v6107_v21 = vpop.permute.xlu0 %6106  ;;  %v6099_v52 = vpop.permute.xlu1 %6098  ;;  %v6515_v4 = vcombine.high %v6220_v17, %v6226_v63  ;;  %v6208_v26 = vadd.f32 %v12344_v50, %v6178_v30  ;;  %v6998_v44 = vld [vmem:[#allocation7 + $0xae0] sm:$0xff] }
 0x8a4   :  { %v6136_v40 = vsel %vm14001_vm10, %v12432_v28, %v6107_v21  ;;  %v6133_v45 = vsel %vm14002_vm2, %v12421_v34, %v6099_v52  ;;  %v6514_v28 = vcombine.low %v6220_v17, %v6226_v63  ;;  %v6322_v30 = vcombine.low %v12578_v27, %v12581_v43  ;;  %v6743_v17 = vld [vmem:[#allocation7 + $0x2e8] sm:$0xff]  ;;  %v6740_v27 = vld [vmem:[#allocation7 + $0x2d0] sm:$0xff] }
 0x8a5   :  { %v6229_v18 = vmax.f32 %v6205_v42, 0.0  ;;  %v6184_v5 = vmax.f32 %v12257_v36, %v6136_v40  ;;  %v6181_v10 = vmax.f32 %v12250_v54, %v6133_v45  ;;  %v6346_v39 = vrot.slane %v6338_v38, %v12482_v11  ;;  %v6727_v38 = vld [vmem:[#allocation7 + $0x268] sm:$0xff]  ;;  %v6726_v45 = vld [vmem:[#allocation7 + $0x260] sm:$0xff] }
 0x8a6   :  { %v6232_v0 = vmax.f32 %v6208_v26, 0.0  ;;  %v12612_v31 = vrot.slane %v6515_v4, %v12414_v57  ;;  %v12618_v9 = vrot.slane %v6514_v28, %v12414_v57  ;;  %v6354_v42 = vcombine.low %v12594_v51, %v12597_v46  ;;  %v6742_v26 = vld [vmem:[#allocation7 + $0x2e0] sm:$0xff] }
 0x8a7   :  { %v6530_v55 = vcombine.low %v6223_v61, %v6229_v18  ;;  %v6531_v22 = vcombine.high %v6223_v61, %v6229_v18  ;;  %v6214_v34 = vadd.f32 %v12344_v50, %v6184_v5  ;;  %v6115_v48 = vpop.permute.xlu1 %6114  ;;  %v6370_v36 = vcombine.low %v6314_v6, %v6346_v39 }
 0x8a8   :  { %v6139_v54 = vsel %vm14003_vm11, %v12450_v32, %v6115_v48  ;;  %v6371_v53 = vcombine.high %v6314_v6, %v6346_v39  ;;  %v6211_v16 = vadd.f32 %v12344_v50, %v6181_v10  ;;  %v6728_v32 = vld [vmem:[#allocation7 + $0x270] sm:$0xff]  ;;  %v12634_v61 = vrot.slane %v6322_v30, %v12482_v11  ;;  %v6741_v10 = vld [vmem:[#allocation7 + $0x2d8] sm:$0xff] }
 0x8a9   :  { %v12605_v62 = vrot.slane %v6530_v55, %v12414_v57  ;;  %v12608_v8 = vrot.slane %v6531_v22, %v12414_v57  ;;  %v6238_v15 = vmax.f32 %v6214_v34, 0.0  ;;  %v6187_v29 = vmax.f32 %v12280_v2, %v6139_v54  ;;  %7106 = vmatmul.mubr.f32.vlgmr.msra.gmra.mxu0 %v6370_v36  ;;  %v6739_v36 = vld [vmem:[#allocation7 + $0x2c8] sm:$0xff] }
 0x8aa   :  { %7175 = vmatprep.mubr.f32.mxu1 %v6371_v53  ;;  %8098 = vmatpush3.msra.mxu0 %v6729_v37  ;;  %v6235_v4 = vmax.f32 %v6211_v16, 0.0  ;;  %v12637_v18 = vrot.slane %v6354_v42, %v12482_v11  ;;  %v12643_v5 = vrot.slane %v6491_v13, %v12482_v11 }
 0x8ab   :  { %v6547_v3 = vcombine.high %v6232_v0, %v6238_v15  ;;  %v6217_v63 = vadd.f32 %v12344_v50, %v6187_v29  ;;  %8099 = vmatprep.subr.mxu0 %v6744_v35  ;;  %v6594_v2 = vcombine.low %v12612_v31, %v12608_v8  ;;  %v6578_v21 = vcombine.low %v12618_v9, %v12605_v62  ;;  %v6738_v35 = vld [vmem:[#allocation7 + $0x2c0] sm:$0xff] }
 0x8ac   :  { %v6546_v52 = vcombine.low %v6232_v0, %v6238_v15  ;;  %8100 = vmatpush3.msra.mxu0 %v6728_v32  ;;  %v12631_v50 = vrot.slane %v6459_v23, %v12482_v11  ;;  %v6355_v23 = vcombine.high %v12594_v51, %v12597_v46  ;;  %v6595_v6 = vcombine.high %v12612_v31, %v12608_v8  ;;  %v6724_v0 = vld [vmem:[#allocation7 + $0x250] sm:$0xff]  ;;  %v6723_v15 = vld [vmem:[#allocation7 + $0x248] sm:$0xff]  ;;  %v6722_v31 = vld [vmem:[#allocation7 + $0x240] sm:$0xff] }
 0x8ad   :  { %v6241_v40 = vmax.f32 %v6217_v63, 0.0  ;;  %8101 = vmatprep.subr.mxu0 %v6743_v17  ;;  %v6375_v12 = vcombine.high %v12634_v61, %v12637_v18  ;;  %v6374_v13 = vcombine.low %v12634_v61, %v12637_v18  ;;  %v12663_v51 = vrot.slane %v6323_v49, %v12482_v11  ;;  %v6737_v17 = vld [vmem:[#allocation7 + $0x2b8] sm:$0xff]  ;;  %v6776_v49 = vld [vmem:[#allocation7 + $0x3f0] sm:$0xff]  ;;  %v6894_v61 = vld [vmem:[#allocation7 + $0x7a0] sm:$0xff] }
 0x8ae   :  { %8102 = vmatpush3.msra.mxu0 %v6727_v38  ;;  %v12658_v55 = vrot.slane %v6546_v52, %v12414_v57  ;;  %v6512_v43 = vcombine.low %v12631_v50, %v12643_v5  ;;  %v12666_v46 = vrot.slane %v6355_v23, %v12482_v11  ;;  %v6561_v22 = vrot.slane %v6547_v3, %v12414_v57  ;;  %v6721_v52 = vld [vmem:[#allocation7 + $0x238] sm:$0xff]  ;;  %v6934_v18 = vld [vmem:[#allocation7 + $0x8e0] sm:$0xff] }
 0x8af   :  { %v6562_v39 = vcombine.low %v6235_v4, %v6241_v40  ;;  %v6563_v28 = vcombine.high %v6235_v4, %v6241_v40  ;;  %8103 = vmatprep.subr.mxu0 %v6742_v26  ;;  %v6513_v54 = vcombine.high %v12631_v50, %v12643_v5  ;;  %v6586_v29 = vrot.slane %v6578_v21, %v12482_v11  ;;  %v6761_v4 = vld [vmem:[#allocation7 + $0x378] sm:$0xff]  ;;  %v6736_v26 = vld [vmem:[#allocation7 + $0x2b0] sm:$0xff] }
 0x8b0   :  { %8104 = vmatpush3.msra.mxu0 %v6726_v45  ;;  %v6377_v53 = vcombine.high %v12663_v51, %v12666_v46  ;;  %v6376_v37 = vcombine.low %v12663_v51, %v12666_v46  ;;  %v12690_v63 = vrot.slane %v6594_v2, %v12482_v11  ;;  %v12693_v38 = vrot.slane %v6595_v6, %v12482_v11  ;;  %v6720_v6 = vld [vmem:[#allocation7 + $0x230] sm:$0xff]  ;;  %v6990_v51 = vld [vmem:[#allocation7 + $0xaa0] sm:$0xff] }
 0x8b1   :  { %v12670_v34 = vrot.slane %v6562_v39, %v12414_v57  ;;  %v6577_v48 = vrot.slane %v6563_v28, %v12414_v57  ;;  %8105 = vmatprep.subr.mxu0 %v6741_v10  ;;  %v6508_v23 = vcombine.low %v12536_v59, %v12529_v20  ;;  %v6760_v39 = vld [vmem:[#allocation7 + $0x370] sm:$0xff]  ;;  %v6735_v28 = vld [vmem:[#allocation7 + $0x2a8] sm:$0xff]  ;;  %v6862_v20 = vld [vmem:[#allocation7 + $0x6a0] sm:$0xff] }
 0x8b2   :  { %8106 = vmatpush3.msra.mxu0 %v6725_v41  ;;  %v6775_v41 = vld [vmem:[#allocation7 + $0x3e8] sm:$0xff]  ;;  %v6902_v59 = vld [vmem:[#allocation7 + $0x7e0] sm:$0xff] }
 0x8b3   :  { %v6610_v8 = vcombine.low %v12658_v55, %v12670_v34  ;;  %8107 = vmatprep.subr.mxu0 %v6740_v27  ;;  %v6626_v16 = vcombine.low %v6561_v22, %v6577_v48  ;;  %v6627_v57 = vcombine.high %v6561_v22, %v6577_v48  ;;  %v6719_v27 = vld [vmem:[#allocation7 + $0x228] sm:$0xff]  ;;  %v6734_v48 = vld [vmem:[#allocation7 + $0x2a0] sm:$0xff] }
 0x8b4   :  { %8108 = vmatpush3.msra.mxu0 %v6724_v0  ;;  %v6759_v22 = vld [vmem:[#allocation7 + $0x368] sm:$0xff]  ;;  %v6774_v0 = vld [vmem:[#allocation7 + $0x3e0] sm:$0xff] }
 0x8b5   :  { %8109 = vmatprep.subr.mxu0 %v6739_v36  ;;  %v6618_v32 = vrot.slane %v6610_v8, %v12482_v11  ;;  %v12684_v30 = vrot.slane %v6626_v16, %v12482_v11  ;;  %v12687_v3 = vrot.slane %v6627_v57, %v12482_v11  ;;  %v6718_v36 = vld [vmem:[#allocation7 + $0x220] sm:$0xff]  ;;  %v6773_v16 = vld [vmem:[#allocation7 + $0x3d8] sm:$0xff] }
 0x8b6   :  { %8110 = vmatpush3.msra.mxu0 %v6723_v15  ;;  %v6758_v8 = vld [vmem:[#allocation7 + $0x360] sm:$0xff]  ;;  %v6733_v15 = vld [vmem:[#allocation7 + $0x298] sm:$0xff] }
 0x8b7   :  { %8111 = vmatprep.subr.mxu0 %v6738_v35  ;;  %v6642_v42 = vcombine.low %v6586_v29, %v6618_v32  ;;  %v6643_v21 = vcombine.high %v6586_v29, %v6618_v32  ;;  %v6647_v40 = vcombine.high %v12690_v63, %v12684_v30  ;;  %v6646_v45 = vcombine.low %v12690_v63, %v12684_v30  ;;  %v6717_v57 = vld [vmem:[#allocation7 + $0x218] sm:$0xff]  ;;  %v6772_v29 = vld [vmem:[#allocation7 + $0x3d0] sm:$0xff]  ;;  %v6926_v30 = vld [vmem:[#allocation7 + $0x8a0] sm:$0xff] }
 0x8b8   :  { %8112 = vmatpush3.msra.mxu0 %v6722_v31  ;;  %v6649_v2 = vcombine.high %v12693_v38, %v12687_v3  ;;  %v6648_v10 = vcombine.low %v12693_v38, %v12687_v3  ;;  %v6757_v35 = vld [vmem:[#allocation7 + $0x358] sm:$0xff]  ;;  %v6732_v31 = vld [vmem:[#allocation7 + $0x290] sm:$0xff]  ;;  %v6966_v63 = vld [vmem:[#allocation7 + $0x9e0] sm:$0xff] }
 0x8b9   :  { %8113 = vmatprep.subr.mxu0 %v6737_v17  ;;  %7176 = vmatmul.mubr.f32.vlgmr.msra.gmra.mxu1 %v6642_v42  ;;  %v6716_v32 = vld [vmem:[#allocation7 + $0x210] sm:$0xff]  ;;  %v6339_v42 = vcombine.high %v12559_v1, %v12567_v56  ;;  %v6769_v56 = vld [vmem:[#allocation7 + $0x3b8] sm:$0xff]  ;;  %v7030_v46 = vld [vmem:[#allocation7 + $0xbe0] sm:$0xff] }
 0x8ba   :  { %8114 = vmatpush3.msra.mxu0 %v6721_v52  ;;  %7245 = vmatprep.mubr.f32.mxu0 %v6643_v21  ;;  %v6756_v17 = vld [vmem:[#allocation7 + $0x350] sm:$0xff]  ;;  %v6731_v52 = vld [vmem:[#allocation7 + $0x288] sm:$0xff] }
 0x8bb   :  { %8133 = vmatpush3.msra.mxu1 %v6761_v4  ;;  %8115 = vmatprep.subr.mxu0 %v6736_v26  ;;  %v6771_v21 = vld [vmem:[#allocation7 + $0x3c8] sm:$0xff]  ;;  %v12710_v1 = vrot.slane %v6339_v42, %v12482_v11  ;;  %v6805_v42 = vld [vmem:[#allocation7 + $0x4d8] sm:$0xff]  ;;  %v7004_v3 = vld [vmem:[#allocation7 + $0xb10] sm:$0xff] }
 0x8bc   :  { %8134 = vmatprep.subr.mxu1 %v6776_v49  ;;  %7315 = vmatprep.mubr.f32.mxu1 %v6508_v23  ;;  %v6715_v4 = vld [vmem:[#allocation7 + $0x208] sm:$0xff]  ;;  %v6307_v49 = vcombine.high %v12539_v33, %v12548_v25  ;;  %v6730_v23 = vld [vmem:[#allocation7 + $0x280] sm:$0xff]  ;;  %v6809_v33 = vld [vmem:[#allocation7 + $0x4f8] sm:$0xff] }
 0x8bd   :  { %8116 = vmatpush3.msra.mxu0 %v6720_v6  ;;  %8135 = vmatpush3.msra.mxu1 %v6760_v39  ;;  %v6755_v26 = vld [vmem:[#allocation7 + $0x348] sm:$0xff]  ;;  %v6770_v6 = vld [vmem:[#allocation7 + $0x3c0] sm:$0xff]  ;;  %v6753_v25 = vld [vmem:[#allocation7 + $0x338] sm:$0xff] }
 0x8be   :  { %8117 = vmatprep.subr.mxu0 %v6735_v28  ;;  %8136 = vmatprep.subr.mxu1 %v6775_v41  ;;  %v6714_v39 = vld [vmem:[#allocation7 + $0x200] sm:$0xff]  ;;  %v6507_v41 = vcombine.high %v12508_v47, %v12511_v7  ;;  %v6767_v47 = vld [vmem:[#allocation7 + $0x3a8] sm:$0xff] }
 0x8bf   :  { %8118 = vmatpush3.msra.mxu0 %v6719_v27  ;;  %8137 = vmatpush3.msra.mxu1 %v6759_v22  ;;  %v6754_v28 = vld [vmem:[#allocation7 + $0x340] sm:$0xff]  ;;  %v12715_v27 = vrot.slane %v6307_v49, %v12482_v11  ;;  %v6793_v22 = vld [vmem:[#allocation7 + $0x478] sm:$0xff]  ;;  %v6807_v7 = vld [vmem:[#allocation7 + $0x4e8] sm:$0xff] }
 0x8c0   :  { %8119 = vmatprep.subr.mxu0 %v6734_v48  ;;  %8138 = vmatprep.subr.mxu1 %v6774_v0  ;;  %v6768_v0 = vld [vmem:[#allocation7 + $0x3b0] sm:$0xff]  ;;  %v7019_v38 = vld [vmem:[#allocation7 + $0xb88] sm:$0xff] }
 0x8c1   :  { %8120 = vmatpush3.msra.mxu0 %v6718_v36  ;;  %8139 = vmatpush3.msra.mxu1 %v6758_v8  ;;  %v6373_v48 = vcombine.high %v12715_v27, %v12710_v1  ;;  %v6808_v36 = vld [vmem:[#allocation7 + $0x4f0] sm:$0xff] }
 0x8c2   :  { %8121 = vmatprep.subr.mxu0 %v6733_v15  ;;  %8140 = vmatprep.subr.mxu1 %v6773_v16  ;;  %v6752_v8 = vld [vmem:[#allocation7 + $0x330] sm:$0xff]  ;;  %v6751_v16 = vld [vmem:[#allocation7 + $0x328] sm:$0xff] }
 0x8c3   :  { %8122 = vmatpush3.msra.mxu0 %v6717_v57  ;;  %8141 = vmatpush3.msra.mxu1 %v6757_v35  ;;  %v6792_v15 = vld [vmem:[#allocation7 + $0x470] sm:$0xff]  ;;  %v6791_v57 = vld [vmem:[#allocation7 + $0x468] sm:$0xff]  ;;  %v6766_v35 = vld [vmem:[#allocation7 + $0x3a0] sm:$0xff] }
 0x8c4   :  { %8123 = vmatprep.subr.mxu0 %v6732_v31  ;;  %8142 = vmatprep.subr.mxu1 %v6772_v29  ;;  %v6806_v31 = vld [vmem:[#allocation7 + $0x4e0] sm:$0xff]  ;;  %v6748_v49 = vld [vmem:[#allocation7 + $0x310] sm:$0xff] }
 0x8c5   :  { %8124 = vmatpush3.msra.mxu0 %v6716_v32  ;;  %8143 = vmatpush3.msra.mxu1 %v6756_v17  ;;  %v6750_v29 = vld [vmem:[#allocation7 + $0x320] sm:$0xff]  ;;  %v6765_v17 = vld [vmem:[#allocation7 + $0x398] sm:$0xff] }
 0x8c6   :  { %8125 = vmatprep.subr.mxu0 %v6731_v52  ;;  %8144 = vmatprep.subr.mxu1 %v6771_v21  ;;  %v6790_v32 = vld [vmem:[#allocation7 + $0x460] sm:$0xff]  ;;  %v6749_v52 = vld [vmem:[#allocation7 + $0x318] sm:$0xff] }
 0x8c7   :  { %8126 = vmatpush3.msra.mxu0 %v6715_v4  ;;  %8145 = vmatpush3.msra.mxu1 %v6755_v26  ;;  %v6789_v21 = vld [vmem:[#allocation7 + $0x458] sm:$0xff]  ;;  %v6764_v4 = vld [vmem:[#allocation7 + $0x390] sm:$0xff] }
 0x8c8   :  { %8127 = vmatprep.subr.mxu0 %v6730_v23  ;;  %8146 = vmatprep.subr.mxu1 %v6770_v6  ;;  %v6804_v26 = vld [vmem:[#allocation7 + $0x4d0] sm:$0xff]  ;;  %v6611_v6 = vcombine.high %v12658_v55, %v12670_v34  ;;  %v6801_v34 = vld [vmem:[#allocation7 + $0x4b8] sm:$0xff] }
 0x8c9   :  { %8128 = vmatpush3.msra.mxu0 %v6714_v39  ;;  %8147 = vmatpush3.msra.mxu1 %v6754_v28  ;;  %v6788_v23 = vld [vmem:[#allocation7 + $0x450] sm:$0xff]  ;;  %v6763_v39 = vld [vmem:[#allocation7 + $0x388] sm:$0xff] }
 0x8ca   :  { %7246 = vmatmul.mubr.f32.vlgmr.msra.gmra.mxu0 %v6507_v41  ;;  %8148 = vmatprep.subr.mxu1 %v6769_v56  ;;  %v6803_v28 = vld [vmem:[#allocation7 + $0x4c8] sm:$0xff]  ;;  %v12724_v55 = vrot.slane %v6611_v6, %v12482_v11  ;;  %v6780_v6 = vld [vmem:[#allocation7 + $0x410] sm:$0xff] }
 0x8cb   :  { %8167 = vmatprep.subr.mxu0 %v6809_v33  ;;  %8149 = vmatpush3.msra.mxu1 %v6753_v25  ;;  %v6747_v56 = vld [vmem:[#allocation7 + $0x308] sm:$0xff]  ;;  %v6579_v33 = vcombine.high %v12618_v9, %v12605_v62  ;;  %v6762_v25 = vld [vmem:[#allocation7 + $0x380] sm:$0xff]  ;;  %v6841_v62 = vld [vmem:[#allocation7 + $0x5f8] sm:$0xff] }
 0x8cc   :  { %8168 = vmatpush3.msra.mxu0 %v6793_v22  ;;  %7385 = vmatprep.mubr.f32.mxu0 %v6373_v48  ;;  %v6787_v41 = vld [vmem:[#allocation7 + $0x448] sm:$0xff]  ;;  %v6802_v22 = vld [vmem:[#allocation7 + $0x4c0] sm:$0xff]  ;;  %v6785_v9 = vld [vmem:[#allocation7 + $0x438] sm:$0xff] }
 0x8cd   :  { %8150 = vmatprep.subr.mxu1 %v6768_v0  ;;  %8169 = vmatprep.subr.mxu0 %v6808_v36  ;;  %v6746_v48 = vld [vmem:[#allocation7 + $0x300] sm:$0xff]  ;;  %v6372_v36 = vcombine.low %v12715_v27, %v12710_v1  ;;  %v6799_v1 = vld [vmem:[#allocation7 + $0x4a8] sm:$0xff] }
 0x8ce   :  { %8151 = vmatpush3.msra.mxu1 %v6752_v8  ;;  %8170 = vmatpush3.msra.mxu0 %v6792_v15  ;;  %v6786_v0 = vld [vmem:[#allocation7 + $0x440] sm:$0xff]  ;;  %v12729_v8 = vrot.slane %v6579_v33, %v12482_v11  ;;  %v6825_v15 = vld [vmem:[#allocation7 + $0x578] sm:$0xff]  ;;  %v6839_v27 = vld [vmem:[#allocation7 + $0x5e8] sm:$0xff] }
 0x8cf   :  { %8152 = vmatprep.subr.mxu1 %v6767_v47  ;;  %8171 = vmatprep.subr.mxu0 %v6807_v7  ;;  %v6800_v7 = vld [vmem:[#allocation7 + $0x4b0] sm:$0xff]  ;;  %v6783_v11 = vld [vmem:[#allocation7 + $0x428] sm:$0xff] }
 0x8d0   :  { %8153 = vmatpush3.msra.mxu1 %v6751_v16  ;;  %8172 = vmatpush3.msra.mxu0 %v6791_v57  ;;  %v6645_v47 = vcombine.high %v12729_v8, %v12724_v55  ;;  %v6840_v16 = vld [vmem:[#allocation7 + $0x5f0] sm:$0xff]  ;;  %v6819_v33 = vld [vmem:[#allocation7 + $0x548] sm:$0xff] }
 0x8d1   :  { %8154 = vmatprep.subr.mxu1 %v6766_v35  ;;  %8173 = vmatprep.subr.mxu0 %v6806_v31  ;;  %v6784_v57 = vld [vmem:[#allocation7 + $0x430] sm:$0xff]  ;;  %v6823_v31 = vld [vmem:[#allocation7 + $0x568] sm:$0xff] }
 0x8d2   :  { %8155 = vmatpush3.msra.mxu1 %v6750_v29  ;;  %8174 = vmatpush3.msra.mxu0 %v6790_v32  ;;  %v6824_v35 = vld [vmem:[#allocation7 + $0x570] sm:$0xff]  ;;  %v6798_v29 = vld [vmem:[#allocation7 + $0x4a0] sm:$0xff] }
 0x8d3   :  { %8156 = vmatprep.subr.mxu1 %v6765_v17  ;;  %8175 = vmatprep.subr.mxu0 %v6805_v42  ;;  %v6838_v32 = vld [vmem:[#allocation7 + $0x5e0] sm:$0xff] }
 0x8d4   :  { %8157 = vmatpush3.msra.mxu1 %v6749_v52  ;;  %8176 = vmatpush3.msra.mxu0 %v6789_v21  ;;  %v6782_v17 = vld [vmem:[#allocation7 + $0x420] sm:$0xff]  ;;  %v6797_v52 = vld [vmem:[#allocation7 + $0x498] sm:$0xff] }
 0x8d5   :  { %8158 = vmatprep.subr.mxu1 %v6764_v4  ;;  %8177 = vmatprep.subr.mxu0 %v6804_v26  ;;  %v6822_v42 = vld [vmem:[#allocation7 + $0x560] sm:$0xff]  ;;  %v6837_v21 = vld [vmem:[#allocation7 + $0x5d8] sm:$0xff] }
 0x8d6   :  { %8159 = vmatpush3.msra.mxu1 %v6748_v49  ;;  %8178 = vmatpush3.msra.mxu0 %v6788_v23  ;;  %v6781_v4 = vld [vmem:[#allocation7 + $0x418] sm:$0xff]  ;;  %v6796_v49 = vld [vmem:[#allocation7 + $0x490] sm:$0xff] }
 0x8d7   :  { %8160 = vmatprep.subr.mxu1 %v6763_v39  ;;  %8179 = vmatprep.subr.mxu0 %v6803_v28  ;;  %v6821_v26 = vld [vmem:[#allocation7 + $0x558] sm:$0xff]  ;;  %v6836_v23 = vld [vmem:[#allocation7 + $0x5d0] sm:$0xff]  ;;  %v6795_v28 = vld [vmem:[#allocation7 + $0x488] sm:$0xff] }
 0x8d8   :  { %8161 = vmatpush3.msra.mxu1 %v6747_v56  ;;  %8180 = vmatpush3.msra.mxu0 %v6787_v41  ;;  %v6820_v39 = vld [vmem:[#allocation7 + $0x550] sm:$0xff]  ;;  %v6835_v56 = vld [vmem:[#allocation7 + $0x5c8] sm:$0xff] }
 0x8d9   :  { %8162 = vmatprep.subr.mxu1 %v6762_v25  ;;  %8181 = vmatprep.subr.mxu0 %v6802_v22  ;;  %v6779_v41 = vld [vmem:[#allocation7 + $0x408] sm:$0xff]  ;;  %v6794_v25 = vld [vmem:[#allocation7 + $0x480] sm:$0xff] }
 0x8da   :  { %8163 = vmatpush3.msra.mxu1 %v6746_v48  ;;  %8182 = vmatpush3.msra.mxu0 %v6786_v0  ;;  %v6834_v22 = vld [vmem:[#allocation7 + $0x5c0] sm:$0xff] }
 0x8db   :  { %7316 = vmatmul.mubr.f32.vlgmr.msra.gmra.mxu1 %v6372_v36  ;;  %8183 = vmatprep.subr.mxu0 %v6801_v34  ;;  %v6778_v48 = vld [vmem:[#allocation7 + $0x400] sm:$0xff]  ;;  %v6833_v34 = vld [vmem:[#allocation7 + $0x5b8] sm:$0xff]  ;;  %v6644_v36 = vcombine.low %v12729_v8, %v12724_v55  ;;  %v6871_v55 = vld [vmem:[#allocation7 + $0x6e8] sm:$0xff] }
 0x8dc   :  { %8202 = vmatprep.subr.mxu1 %v6841_v62  ;;  %8184 = vmatpush3.msra.mxu0 %v6785_v9  ;;  %v6818_v0 = vld [vmem:[#allocation7 + $0x540] sm:$0xff]  ;;  %v6873_v62 = vld [vmem:[#allocation7 + $0x6f8] sm:$0xff]  ;;  %v6815_v8 = vld [vmem:[#allocation7 + $0x528] sm:$0xff] }
 0x8dd   :  { %8203 = vmatpush3.msra.mxu1 %v6825_v15  ;;  %7455 = vmatprep.mubr.f32.mxu1 %v6645_v47  ;;  %v6817_v9 = vld [vmem:[#allocation7 + $0x538] sm:$0xff]  ;;  %v6832_v47 = vld [vmem:[#allocation7 + $0x5b0] sm:$0xff] }
 0x8de   :  { %8185 = vmatprep.subr.mxu0 %v6800_v7  ;;  %8204 = vmatprep.subr.mxu1 %v6840_v16  ;;  %v6857_v15 = vld [vmem:[#allocation7 + $0x678] sm:$0xff]  ;;  %v6872_v7 = vld [vmem:[#allocation7 + $0x6f0] sm:$0xff] }
 0x8df   :  { %8186 = vmatpush3.msra.mxu0 %v6784_v57  ;;  %8205 = vmatpush3.msra.mxu1 %v6824_v35  ;;  %v6816_v16 = vld [vmem:[#allocation7 + $0x530] sm:$0xff]  ;;  %v6831_v35 = vld [vmem:[#allocation7 + $0x5a8] sm:$0xff] }
 0x8e0   :  { %8187 = vmatprep.subr.mxu0 %v6799_v1  ;;  %8206 = vmatprep.subr.mxu1 %v6839_v27  ;;  %v6856_v57 = vld [vmem:[#allocation7 + $0x670] sm:$0xff]  ;;  %v6855_v1 = vld [vmem:[#allocation7 + $0x668] sm:$0xff]  ;;  %v6830_v27 = vld [vmem:[#allocation7 + $0x5a0] sm:$0xff] }
 0x8e1   :  { %8188 = vmatpush3.msra.mxu0 %v6783_v11  ;;  %8207 = vmatpush3.msra.mxu1 %v6823_v31  ;;  %v6870_v11 = vld [vmem:[#allocation7 + $0x6e0] sm:$0xff] }
 0x8e2   :  { %8189 = vmatprep.subr.mxu0 %v6798_v29  ;;  %8208 = vmatprep.subr.mxu1 %v6838_v32  ;;  %v6814_v31 = vld [vmem:[#allocation7 + $0x520] sm:$0xff]  ;;  %v6829_v32 = vld [vmem:[#allocation7 + $0x598] sm:$0xff] }
 0x8e3   :  { %8190 = vmatpush3.msra.mxu0 %v6782_v17  ;;  %8209 = vmatpush3.msra.mxu1 %v6822_v42  ;;  %v6854_v29 = vld [vmem:[#allocation7 + $0x660] sm:$0xff]  ;;  %v6869_v17 = vld [vmem:[#allocation7 + $0x6d8] sm:$0xff] }
 0x8e4   :  { %8191 = vmatprep.subr.mxu0 %v6797_v52  ;;  %8210 = vmatprep.subr.mxu1 %v6837_v21  ;;  %v6853_v42 = vld [vmem:[#allocation7 + $0x658] sm:$0xff]  ;;  %v6828_v52 = vld [vmem:[#allocation7 + $0x590] sm:$0xff] }
 0x8e5   :  { %8192 = vmatpush3.msra.mxu0 %v6781_v4  ;;  %8211 = vmatpush3.msra.mxu1 %v6821_v26  ;;  %v6868_v21 = vld [vmem:[#allocation7 + $0x6d0] sm:$0xff] }
 0x8e6   :  { %8193 = vmatprep.subr.mxu0 %v6796_v49  ;;  %8212 = vmatprep.subr.mxu1 %v6836_v23  ;;  %v6812_v4 = vld [vmem:[#allocation7 + $0x510] sm:$0xff]  ;;  %v6827_v49 = vld [vmem:[#allocation7 + $0x588] sm:$0xff] }
 0x8e7   :  { %8194 = vmatpush3.msra.mxu0 %v6780_v6  ;;  %8213 = vmatpush3.msra.mxu1 %v6820_v39  ;;  %v6852_v26 = vld [vmem:[#allocation7 + $0x650] sm:$0xff]  ;;  %v6867_v23 = vld [vmem:[#allocation7 + $0x6c8] sm:$0xff] }
 0x8e8   :  { %8195 = vmatprep.subr.mxu0 %v6795_v28  ;;  %8214 = vmatprep.subr.mxu1 %v6835_v56  ;;  %v6811_v6 = vld [vmem:[#allocation7 + $0x508] sm:$0xff]  ;;  %v6826_v28 = vld [vmem:[#allocation7 + $0x580] sm:$0xff] }
 0x8e9   :  { %8196 = vmatpush3.msra.mxu0 %v6779_v41  ;;  %8215 = vmatpush3.msra.mxu1 %v6819_v33  ;;  %v6851_v39 = vld [vmem:[#allocation7 + $0x648] sm:$0xff]  ;;  %v6866_v56 = vld [vmem:[#allocation7 + $0x6c0] sm:$0xff] }
 0x8ea   :  { %8197 = vmatprep.subr.mxu0 %v6794_v25  ;;  %8216 = vmatprep.subr.mxu1 %v6834_v22  ;;  %v6810_v41 = vld [vmem:[#allocation7 + $0x500] sm:$0xff]  ;;  %v6865_v25 = vld [vmem:[#allocation7 + $0x6b8] sm:$0xff] }
 0x8eb   :  { %8198 = vmatpush3.msra.mxu0 %v6778_v48  ;;  %8217 = vmatpush3.msra.mxu1 %v6818_v0  ;;  %v6850_v33 = vld [vmem:[#allocation7 + $0x640] sm:$0xff]  ;;  %v6905_v22 = vld [vmem:[#allocation7 + $0x7f8] sm:$0xff] }
 0x8ec   :  { %7386 = vmatmul.mubr.f32.vlgmr.msra.gmra.mxu0 %v6644_v36  ;;  %8218 = vmatprep.subr.mxu1 %v6833_v34  ;;  %v6849_v48 = vld [vmem:[#allocation7 + $0x638] sm:$0xff]  ;;  %v6864_v34 = vld [vmem:[#allocation7 + $0x6b0] sm:$0xff] }
 0x8ed   :  { %8237 = vmatprep.subr.mxu0 %v6873_v62  ;;  %8219 = vmatpush3.msra.mxu1 %v6817_v9  ;;  %v6889_v0 = vld [vmem:[#allocation7 + $0x778] sm:$0xff]  ;;  %v6904_v36 = vld [vmem:[#allocation7 + $0x7f0] sm:$0xff] }
 0x8ee   :  { %8238 = vmatpush3.msra.mxu0 %v6857_v15  ;;  %7525 = vmatprep.mubr.f32.mxu0 %v6510_v60  ;;  %v6813_v60 = vld [vmem:[#allocation7 + $0x518] sm:$0xff]  ;;  %v6848_v62 = vld [vmem:[#allocation7 + $0x630] sm:$0xff]  ;;  %v6863_v15 = vld [vmem:[#allocation7 + $0x6a8] sm:$0xff] }
 0x8ef   :  { %8220 = vmatprep.subr.mxu1 %v6832_v47  ;;  %8239 = vmatprep.subr.mxu0 %v6872_v7  ;;  %v6888_v9 = vld [vmem:[#allocation7 + $0x770] sm:$0xff]  ;;  %v6903_v47 = vld [vmem:[#allocation7 + $0x7e8] sm:$0xff] }
 0x8f0   :  { %8221 = vmatpush3.msra.mxu1 %v6816_v16  ;;  %8240 = vmatpush3.msra.mxu0 %v6856_v57  ;;  %v6847_v7 = vld [vmem:[#allocation7 + $0x628] sm:$0xff]  ;;  %v6886_v57 = vld [vmem:[#allocation7 + $0x760] sm:$0xff] }
 0x8f1   :  { %8222 = vmatprep.subr.mxu1 %v6831_v35  ;;  %8241 = vmatprep.subr.mxu0 %v6871_v55  ;;  %v6887_v16 = vld [vmem:[#allocation7 + $0x768] sm:$0xff]  ;;  %v6861_v35 = vld [vmem:[#allocation7 + $0x698] sm:$0xff] }
 0x8f2   :  { %8223 = vmatpush3.msra.mxu1 %v6815_v8  ;;  %8242 = vmatpush3.msra.mxu0 %v6855_v1  ;;  %v6901_v55 = vld [vmem:[#allocation7 + $0x7d8] sm:$0xff]  ;;  %v6860_v1 = vld [vmem:[#allocation7 + $0x690] sm:$0xff] }
 0x8f3   :  { %8224 = vmatprep.subr.mxu1 %v6830_v27  ;;  %8243 = vmatprep.subr.mxu0 %v6870_v11  ;;  %v6885_v8 = vld [vmem:[#allocation7 + $0x758] sm:$0xff]  ;;  %v6900_v27 = vld [vmem:[#allocation7 + $0x7d0] sm:$0xff] }
 0x8f4   :  { %8225 = vmatpush3.msra.mxu1 %v6814_v31  ;;  %8244 = vmatpush3.msra.mxu0 %v6854_v29  ;;  %v6844_v11 = vld [vmem:[#allocation7 + $0x610] sm:$0xff]  ;;  %v6859_v29 = vld [vmem:[#allocation7 + $0x688] sm:$0xff] }
 0x8f5   :  { %8226 = vmatprep.subr.mxu1 %v6829_v32  ;;  %8245 = vmatprep.subr.mxu0 %v6869_v17  ;;  %v6884_v31 = vld [vmem:[#allocation7 + $0x750] sm:$0xff]  ;;  %v6899_v32 = vld [vmem:[#allocation7 + $0x7c8] sm:$0xff] }
 0x8f6   :  { %8227 = vmatpush3.msra.mxu1 %v6813_v60  ;;  %8246 = vmatpush3.msra.mxu0 %v6853_v42  ;;  %v6843_v17 = vld [vmem:[#allocation7 + $0x608] sm:$0xff]  ;;  %v6858_v42 = vld [vmem:[#allocation7 + $0x680] sm:$0xff] }
 0x8f7   :  { %8228 = vmatprep.subr.mxu1 %v6828_v52  ;;  %8247 = vmatprep.subr.mxu0 %v6868_v21  ;;  %v6883_v60 = vld [vmem:[#allocation7 + $0x748] sm:$0xff]  ;;  %v6898_v52 = vld [vmem:[#allocation7 + $0x7c0] sm:$0xff] }
 0x8f8   :  { %8229 = vmatpush3.msra.mxu1 %v6812_v4  ;;  %8248 = vmatpush3.msra.mxu0 %v6852_v26  ;;  %v6842_v21 = vld [vmem:[#allocation7 + $0x600] sm:$0xff]  ;;  %v6897_v26 = vld [vmem:[#allocation7 + $0x7b8] sm:$0xff] }
 0x8f9   :  { %8230 = vmatprep.subr.mxu1 %v6827_v49  ;;  %8249 = vmatprep.subr.mxu0 %v6867_v23  ;;  %v6882_v4 = vld [vmem:[#allocation7 + $0x740] sm:$0xff]  ;;  %v6937_v49 = vld [vmem:[#allocation7 + $0x8f8] sm:$0xff] }
 0x8fa   :  { %8231 = vmatpush3.msra.mxu1 %v6811_v6  ;;  %8250 = vmatpush3.msra.mxu0 %v6851_v39  ;;  %v6881_v23 = vld [vmem:[#allocation7 + $0x738] sm:$0xff]  ;;  %v6896_v39 = vld [vmem:[#allocation7 + $0x7b0] sm:$0xff] }
 0x8fb   :  { %8232 = vmatprep.subr.mxu1 %v6826_v28  ;;  %8251 = vmatprep.subr.mxu0 %v6866_v56  ;;  %v6921_v6 = vld [vmem:[#allocation7 + $0x878] sm:$0xff]  ;;  %v6936_v28 = vld [vmem:[#allocation7 + $0x8f0] sm:$0xff] }
 0x8fc   :  { %8233 = vmatpush3.msra.mxu1 %v6810_v41  ;;  %8252 = vmatpush3.msra.mxu0 %v6850_v33  ;;  %v6880_v56 = vld [vmem:[#allocation7 + $0x730] sm:$0xff]  ;;  %v6895_v33 = vld [vmem:[#allocation7 + $0x7a8] sm:$0xff] }
 0x8fd   :  { %7456 = vmatmul.mubr.f32.vlgmr.msra.gmra.mxu1 %v6509_v14  ;;  %8253 = vmatprep.subr.mxu0 %v6865_v25  ;;  %v6846_v14 = vld [vmem:[#allocation7 + $0x620] sm:$0xff]  ;;  %v6920_v41 = vld [vmem:[#allocation7 + $0x870] sm:$0xff]  ;;  %v6935_v25 = vld [vmem:[#allocation7 + $0x8e8] sm:$0xff] }
 0x8fe   :  { %8272 = vmatprep.subr.mxu1 %v6905_v22  ;;  %8254 = vmatpush3.msra.mxu0 %v6849_v48  ;;  %v6879_v22 = vld [vmem:[#allocation7 + $0x728] sm:$0xff] }
 0x8ff   :  { %8273 = vmatpush3.msra.mxu1 %v6889_v0  ;;  %7595 = vmatprep.mubr.f32.mxu1 %v6375_v12  ;;  %v6845_v12 = vld [vmem:[#allocation7 + $0x618] sm:$0xff]  ;;  %v6919_v48 = vld [vmem:[#allocation7 + $0x868] sm:$0xff]  ;;  %v6918_v0 = vld [vmem:[#allocation7 + $0x860] sm:$0xff] }
 0x900   :  { %8255 = vmatprep.subr.mxu0 %v6864_v34  ;;  %8274 = vmatprep.subr.mxu1 %v6904_v36  ;;  %v6893_v34 = vld [vmem:[#allocation7 + $0x798] sm:$0xff] }
 0x901   :  { %8256 = vmatpush3.msra.mxu0 %v6848_v62  ;;  %8275 = vmatpush3.msra.mxu1 %v6888_v9  ;;  %v6933_v36 = vld [vmem:[#allocation7 + $0x8d8] sm:$0xff]  ;;  %v6892_v9 = vld [vmem:[#allocation7 + $0x790] sm:$0xff] }
 0x902   :  { %8257 = vmatprep.subr.mxu0 %v6863_v15  ;;  %8276 = vmatprep.subr.mxu1 %v6903_v47  ;;  %v6917_v62 = vld [vmem:[#allocation7 + $0x858] sm:$0xff]  ;;  %v6932_v15 = vld [vmem:[#allocation7 + $0x8d0] sm:$0xff] }
 0x903   :  { %8258 = vmatpush3.msra.mxu0 %v6847_v7  ;;  %8277 = vmatpush3.msra.mxu1 %v6887_v16  ;;  %v6876_v47 = vld [vmem:[#allocation7 + $0x710] sm:$0xff]  ;;  %v6891_v16 = vld [vmem:[#allocation7 + $0x788] sm:$0xff] }
 0x904   :  { %8259 = vmatprep.subr.mxu0 %v6862_v20  ;;  %8278 = vmatprep.subr.mxu1 %v6902_v59  ;;  %v6916_v7 = vld [vmem:[#allocation7 + $0x850] sm:$0xff]  ;;  %v6931_v20 = vld [vmem:[#allocation7 + $0x8c8] sm:$0xff] }
 0x905   :  { %8260 = vmatpush3.msra.mxu0 %v6846_v14  ;;  %8279 = vmatpush3.msra.mxu1 %v6886_v57  ;;  %v6875_v59 = vld [vmem:[#allocation7 + $0x708] sm:$0xff]  ;;  %v6890_v57 = vld [vmem:[#allocation7 + $0x780] sm:$0xff] }
 0x906   :  { %8261 = vmatprep.subr.mxu0 %v6861_v35  ;;  %8280 = vmatprep.subr.mxu1 %v6901_v55  ;;  %v6915_v14 = vld [vmem:[#allocation7 + $0x848] sm:$0xff]  ;;  %v6930_v35 = vld [vmem:[#allocation7 + $0x8c0] sm:$0xff] }
 0x907   :  { %8262 = vmatpush3.msra.mxu0 %v6845_v12  ;;  %8281 = vmatpush3.msra.mxu1 %v6885_v8  ;;  %v6874_v55 = vld [vmem:[#allocation7 + $0x700] sm:$0xff]  ;;  %v6929_v8 = vld [vmem:[#allocation7 + $0x8b8] sm:$0xff] }
 0x908   :  { %8263 = vmatprep.subr.mxu0 %v6860_v1  ;;  %8282 = vmatprep.subr.mxu1 %v6900_v27  ;;  %v6914_v12 = vld [vmem:[#allocation7 + $0x840] sm:$0xff]  ;;  %v6969_v1 = vld [vmem:[#allocation7 + $0x9f8] sm:$0xff] }
 0x909   :  { %8264 = vmatpush3.msra.mxu0 %v6844_v11  ;;  %8283 = vmatpush3.msra.mxu1 %v6884_v31  ;;  %v6913_v27 = vld [vmem:[#allocation7 + $0x838] sm:$0xff]  ;;  %v6928_v31 = vld [vmem:[#allocation7 + $0x8b0] sm:$0xff] }
 0x90a   :  { %8265 = vmatprep.subr.mxu0 %v6859_v29  ;;  %8284 = vmatprep.subr.mxu1 %v6899_v32  ;;  %v6953_v11 = vld [vmem:[#allocation7 + $0x978] sm:$0xff]  ;;  %v6968_v29 = vld [vmem:[#allocation7 + $0x9f0] sm:$0xff] }
 0x90b   :  { %8266 = vmatpush3.msra.mxu0 %v6843_v17  ;;  %8285 = vmatpush3.msra.mxu1 %v6883_v60  ;;  %v6912_v32 = vld [vmem:[#allocation7 + $0x830] sm:$0xff]  ;;  %v6927_v60 = vld [vmem:[#allocation7 + $0x8a8] sm:$0xff] }
 0x90c   :  { %8267 = vmatprep.subr.mxu0 %v6858_v42  ;;  %8286 = vmatprep.subr.mxu1 %v6898_v52  ;;  %v6952_v17 = vld [vmem:[#allocation7 + $0x970] sm:$0xff]  ;;  %v6967_v42 = vld [vmem:[#allocation7 + $0x9e8] sm:$0xff] }
 0x90d   :  { %8268 = vmatpush3.msra.mxu0 %v6842_v21  ;;  %8287 = vmatpush3.msra.mxu1 %v6882_v4  ;;  %v6911_v52 = vld [vmem:[#allocation7 + $0x828] sm:$0xff]  ;;  %v6950_v4 = vld [vmem:[#allocation7 + $0x960] sm:$0xff] }
 0x90e   :  { %7526 = vmatmul.mubr.f32.vlgmr.msra.gmra.mxu0 %v6374_v13  ;;  %8288 = vmatprep.subr.mxu1 %v6897_v26  ;;  %v6878_v13 = vld [vmem:[#allocation7 + $0x720] sm:$0xff]  ;;  %v6951_v21 = vld [vmem:[#allocation7 + $0x968] sm:$0xff]  ;;  %v6925_v26 = vld [vmem:[#allocation7 + $0x898] sm:$0xff] }
 0x90f   :  { %8307 = vmatprep.subr.mxu0 %v6937_v49  ;;  %8289 = vmatpush3.msra.mxu1 %v6881_v23  ;;  %v6965_v49 = vld [vmem:[#allocation7 + $0x9d8] sm:$0xff] }
 0x910   :  { %8308 = vmatpush3.msra.mxu0 %v6921_v6  ;;  %7665 = vmatprep.mubr.f32.mxu0 %v6647_v40  ;;  %v6877_v40 = vld [vmem:[#allocation7 + $0x718] sm:$0xff]  ;;  %v6924_v6 = vld [vmem:[#allocation7 + $0x890] sm:$0xff] }
 0x911   :  { %8290 = vmatprep.subr.mxu1 %v6896_v39  ;;  %8309 = vmatprep.subr.mxu0 %v6936_v28  ;;  %v6949_v23 = vld [vmem:[#allocation7 + $0x958] sm:$0xff]  ;;  %v6964_v39 = vld [vmem:[#allocation7 + $0x9d0] sm:$0xff] }
 0x912   :  { %8291 = vmatpush3.msra.mxu1 %v6880_v56  ;;  %8310 = vmatpush3.msra.mxu0 %v6920_v41  ;;  %v6908_v28 = vld [vmem:[#allocation7 + $0x810] sm:$0xff]  ;;  %v6923_v41 = vld [vmem:[#allocation7 + $0x888] sm:$0xff] }
 0x913   :  { %8292 = vmatprep.subr.mxu1 %v6895_v33  ;;  %8311 = vmatprep.subr.mxu0 %v6935_v25  ;;  %v6948_v56 = vld [vmem:[#allocation7 + $0x950] sm:$0xff]  ;;  %v6963_v33 = vld [vmem:[#allocation7 + $0x9c8] sm:$0xff] }
 0x914   :  { %8293 = vmatpush3.msra.mxu1 %v6879_v22  ;;  %8312 = vmatpush3.msra.mxu0 %v6919_v48  ;;  %v6907_v25 = vld [vmem:[#allocation7 + $0x808] sm:$0xff]  ;;  %v6922_v48 = vld [vmem:[#allocation7 + $0x880] sm:$0xff] }
 0x915   :  { %8294 = vmatprep.subr.mxu1 %v6894_v61  ;;  %8313 = vmatprep.subr.mxu0 %v6934_v18  ;;  %v6947_v22 = vld [vmem:[#allocation7 + $0x948] sm:$0xff]  ;;  %v6962_v61 = vld [vmem:[#allocation7 + $0x9c0] sm:$0xff] }
 0x916   :  { %8295 = vmatpush3.msra.mxu1 %v6878_v13  ;;  %8314 = vmatpush3.msra.mxu0 %v6918_v0  ;;  %v6906_v18 = vld [vmem:[#allocation7 + $0x800] sm:$0xff]  ;;  %v6961_v0 = vld [vmem:[#allocation7 + $0x9b8] sm:$0xff] }
 0x917   :  { %8296 = vmatprep.subr.mxu1 %v6893_v34  ;;  %8315 = vmatprep.subr.mxu0 %v6933_v36  ;;  %v6946_v13 = vld [vmem:[#allocation7 + $0x940] sm:$0xff]  ;;  %v7001_v34 = vld [vmem:[#allocation7 + $0xaf8] sm:$0xff] }
 0x918   :  { %8297 = vmatpush3.msra.mxu1 %v6877_v40  ;;  %8316 = vmatpush3.msra.mxu0 %v6917_v62  ;;  %v6945_v36 = vld [vmem:[#allocation7 + $0x938] sm:$0xff]  ;;  %v6960_v62 = vld [vmem:[#allocation7 + $0x9b0] sm:$0xff] }
 0x919   :  { %8298 = vmatprep.subr.mxu1 %v6892_v9  ;;  %8317 = vmatprep.subr.mxu0 %v6932_v15  ;;  %v6985_v40 = vld [vmem:[#allocation7 + $0xa78] sm:$0xff]  ;;  %v7000_v9 = vld [vmem:[#allocation7 + $0xaf0] sm:$0xff] }
 0x91a   :  { %8299 = vmatpush3.msra.mxu1 %v6876_v47  ;;  %8318 = vmatpush3.msra.mxu0 %v6916_v7  ;;  %v6944_v15 = vld [vmem:[#allocation7 + $0x930] sm:$0xff]  ;;  %v6959_v7 = vld [vmem:[#allocation7 + $0x9a8] sm:$0xff] }
 0x91b   :  { %8300 = vmatprep.subr.mxu1 %v6891_v16  ;;  %8319 = vmatprep.subr.mxu0 %v6931_v20  ;;  %v6984_v47 = vld [vmem:[#allocation7 + $0xa70] sm:$0xff]  ;;  %v6999_v16 = vld [vmem:[#allocation7 + $0xae8] sm:$0xff] }
 0x91c   :  { %8301 = vmatpush3.msra.mxu1 %v6875_v59  ;;  %8320 = vmatpush3.msra.mxu0 %v6915_v14  ;;  %v6943_v20 = vld [vmem:[#allocation7 + $0x928] sm:$0xff]  ;;  %v6982_v14 = vld [vmem:[#allocation7 + $0xa60] sm:$0xff] }
 0x91d   :  { %8302 = vmatprep.subr.mxu1 %v6890_v57  ;;  %8321 = vmatprep.subr.mxu0 %v6930_v35  ;;  %v6983_v59 = vld [vmem:[#allocation7 + $0xa68] sm:$0xff]  ;;  %v6957_v57 = vld [vmem:[#allocation7 + $0x998] sm:$0xff] }
 0x91e   :  { %8303 = vmatpush3.msra.mxu1 %v6874_v55  ;;  %8322 = vmatpush3.msra.mxu0 %v6914_v12  ;;  %v6997_v35 = vld [vmem:[#allocation7 + $0xad8] sm:$0xff]  ;;  %v6956_v12 = vld [vmem:[#allocation7 + $0x990] sm:$0xff] }
 0x91f   :  { %7596 = vmatmul.mubr.f32.vlgmr.msra.gmra.mxu1 %v6646_v45  ;;  %8323 = vmatprep.subr.mxu0 %v6929_v8  ;;  %v6910_v45 = vld [vmem:[#allocation7 + $0x820] sm:$0xff]  ;;  %v6981_v55 = vld [vmem:[#allocation7 + $0xa58] sm:$0xff]  ;;  %v6996_v8 = vld [vmem:[#allocation7 + $0xad0] sm:$0xff] }
 0x920   :  { %8342 = vmatprep.subr.mxu1 %v6969_v1  ;;  %8324 = vmatpush3.msra.mxu0 %v6913_v27  ;;  %v6940_v1 = vld [vmem:[#allocation7 + $0x910] sm:$0xff] }
 0x921   :  { %8343 = vmatpush3.msra.mxu1 %v6953_v11  ;;  %7735 = vmatprep.mubr.f32.mxu1 %v6512_v43  ;;  %v6909_v43 = vld [vmem:[#allocation7 + $0x818] sm:$0xff]  ;;  %v6980_v27 = vld [vmem:[#allocation7 + $0xa50] sm:$0xff]  ;;  %v6955_v11 = vld [vmem:[#allocation7 + $0x988] sm:$0xff] }
 0x922   :  { %8325 = vmatprep.subr.mxu0 %v6928_v31  ;;  %8344 = vmatprep.subr.mxu1 %v6968_v29  ;;  %v6995_v31 = vld [vmem:[#allocation7 + $0xac8] sm:$0xff] }
 0x923   :  { %8326 = vmatpush3.msra.mxu0 %v6912_v32  ;;  %8345 = vmatpush3.msra.mxu1 %v6952_v17  ;;  %v6939_v29 = vld [vmem:[#allocation7 + $0x908] sm:$0xff]  ;;  %v6954_v17 = vld [vmem:[#allocation7 + $0x980] sm:$0xff] }
 0x924   :  { %8327 = vmatprep.subr.mxu0 %v6927_v60  ;;  %8346 = vmatprep.subr.mxu1 %v6967_v42  ;;  %v6979_v32 = vld [vmem:[#allocation7 + $0xa48] sm:$0xff]  ;;  %v6994_v60 = vld [vmem:[#allocation7 + $0xac0] sm:$0xff] }
 0x925   :  { %8328 = vmatpush3.msra.mxu0 %v6911_v52  ;;  %8347 = vmatpush3.msra.mxu1 %v6951_v21  ;;  %v6938_v42 = vld [vmem:[#allocation7 + $0x900] sm:$0xff]  ;;  %v6993_v21 = vld [vmem:[#allocation7 + $0xab8] sm:$0xff] }
 0x926   :  { %8329 = vmatprep.subr.mxu0 %v6926_v30  ;;  %8348 = vmatprep.subr.mxu1 %v6966_v63  ;;  %v6978_v52 = vld [vmem:[#allocation7 + $0xa40] sm:$0xff]  ;;  %v7033_v30 = vld [vmem:[#allocation7 + $0xbf8] sm:$0xff] }
 0x927   :  { %8330 = vmatpush3.msra.mxu0 %v6910_v45  ;;  %8349 = vmatpush3.msra.mxu1 %v6950_v4  ;;  %v6977_v63 = vld [vmem:[#allocation7 + $0xa38] sm:$0xff]  ;;  %v6992_v4 = vld [vmem:[#allocation7 + $0xab0] sm:$0xff] }
 0x928   :  { %8331 = vmatprep.subr.mxu0 %v6925_v26  ;;  %8350 = vmatprep.subr.mxu1 %v6965_v49  ;;  %v7017_v45 = vld [vmem:[#allocation7 + $0xb78] sm:$0xff]  ;;  %v7032_v26 = vld [vmem:[#allocation7 + $0xbf0] sm:$0xff] }
 0x929   :  { %8332 = vmatpush3.msra.mxu0 %v6909_v43  ;;  %8351 = vmatpush3.msra.mxu1 %v6949_v23  ;;  %v6976_v49 = vld [vmem:[#allocation7 + $0xa30] sm:$0xff]  ;;  %v6991_v23 = vld [vmem:[#allocation7 + $0xaa8] sm:$0xff] }
 0x92a   :  { %8333 = vmatprep.subr.mxu0 %v6924_v6  ;;  %8352 = vmatprep.subr.mxu1 %v6964_v39  ;;  %v7016_v43 = vld [vmem:[#allocation7 + $0xb70] sm:$0xff]  ;;  %v7031_v6 = vld [vmem:[#allocation7 + $0xbe8] sm:$0xff] }
 0x92b   :  { %8334 = vmatpush3.msra.mxu0 %v6908_v28  ;;  %8353 = vmatpush3.msra.mxu1 %v6948_v56  ;;  %v6975_v39 = vld [vmem:[#allocation7 + $0xa28] sm:$0xff]  ;;  %v7014_v56 = vld [vmem:[#allocation7 + $0xb60] sm:$0xff] }
 0x92c   :  { %8335 = vmatprep.subr.mxu0 %v6923_v41  ;;  %8354 = vmatprep.subr.mxu1 %v6963_v33  ;;  %v7015_v28 = vld [vmem:[#allocation7 + $0xb68] sm:$0xff]  ;;  %v6989_v41 = vld [vmem:[#allocation7 + $0xa98] sm:$0xff] }
 0x92d   :  { %8336 = vmatpush3.msra.mxu0 %v6907_v25  ;;  %8355 = vmatpush3.msra.mxu1 %v6947_v22  ;;  %v7029_v33 = vld [vmem:[#allocation7 + $0xbd8] sm:$0xff]  ;;  %v6988_v22 = vld [vmem:[#allocation7 + $0xa90] sm:$0xff] }
 0x92e   :  { %8337 = vmatprep.subr.mxu0 %v6922_v48  ;;  %8356 = vmatprep.subr.mxu1 %v6962_v61  ;;  %v7013_v25 = vld [vmem:[#allocation7 + $0xb58] sm:$0xff]  ;;  %v7028_v48 = vld [vmem:[#allocation7 + $0xbd0] sm:$0xff] }
 0x92f   :  { %8338 = vmatpush3.msra.mxu0 %v6906_v18  ;;  %8357 = vmatpush3.msra.mxu1 %v6946_v13  ;;  %v6972_v61 = vld [vmem:[#allocation7 + $0xa10] sm:$0xff]  ;;  %v6987_v13 = vld [vmem:[#allocation7 + $0xa88] sm:$0xff] }
 0x930   :  { %7666 = vmatmul.mubr.f32.vlgmr.msra.gmra.mxu0 %v6511_v19  ;;  %8358 = vmatprep.subr.mxu1 %v6961_v0  ;;  %v6942_v19 = vld [vmem:[#allocation7 + $0x920] sm:$0xff]  ;;  %v7012_v18 = vld [vmem:[#allocation7 + $0xb50] sm:$0xff]  ;;  %v7027_v0 = vld [vmem:[#allocation7 + $0xbc8] sm:$0xff] }
 0x931   :  { %8377 = vmatprep.subr.mxu0 %v7001_v34  ;;  %8359 = vmatpush3.msra.mxu1 %v6945_v36  ;;  %v6971_v34 = vld [vmem:[#allocation7 + $0xa08] sm:$0xff] }
 0x932   :  { %8378 = vmatpush3.msra.mxu0 %v6985_v40  ;;  %7805 = vmatprep.mubr.f32.mxu0 %v6377_v53  ;;  %v6941_v53 = vld [vmem:[#allocation7 + $0x918] sm:$0xff]  ;;  %v7011_v36 = vld [vmem:[#allocation7 + $0xb48] sm:$0xff]  ;;  %v6986_v40 = vld [vmem:[#allocation7 + $0xa80] sm:$0xff] }
 0x933   :  { %8360 = vmatprep.subr.mxu1 %v6960_v62  ;;  %8379 = vmatprep.subr.mxu0 %v7000_v9  ;;  %v7026_v62 = vld [vmem:[#allocation7 + $0xbc0] sm:$0xff] }
 0x934   :  { %8361 = vmatpush3.msra.mxu1 %v6944_v15  ;;  %8380 = vmatpush3.msra.mxu0 %v6984_v47  ;;  %v6970_v9 = vld [vmem:[#allocation7 + $0xa00] sm:$0xff]  ;;  %v7025_v47 = vld [vmem:[#allocation7 + $0xbb8] sm:$0xff] }
 0x935   :  { %8362 = vmatprep.subr.mxu1 %v6959_v7  ;;  %8381 = vmatprep.subr.mxu0 %v6999_v16  ;;  %v7010_v15 = vld [vmem:[#allocation7 + $0xb40] sm:$0xff]  ;;  %v7009_v7 = vld [vmem:[#allocation7 + $0xb38] sm:$0xff]  ;;  %v7024_v16 = vld [vmem:[#allocation7 + $0xbb0] sm:$0xff] }
 0x936   :  { %8363 = vmatpush3.msra.mxu1 %v6943_v20  ;;  %8382 = vmatpush3.msra.mxu0 %v6983_v59  ;;  %v7008_v20 = vld [vmem:[#allocation7 + $0xb30] sm:$0xff]  ;;  %v7023_v59 = vld [vmem:[#allocation7 + $0xba8] sm:$0xff] }
 0x937   :  { %8364 = vmatprep.subr.mxu1 %v6958_v24  ;;  %8383 = vmatprep.subr.mxu0 %v6998_v44  ;;  %v7007_v24 = vld [vmem:[#allocation7 + $0xb28] sm:$0xff]  ;;  %v7022_v44 = vld [vmem:[#allocation7 + $0xba0] sm:$0xff] }
 0x938   :  { %8365 = vmatpush3.msra.mxu1 %v6942_v19  ;;  %8384 = vmatpush3.msra.mxu0 %v6982_v14  ;;  %v7006_v19 = vld [vmem:[#allocation7 + $0xb20] sm:$0xff]  ;;  %v7021_v14 = vld [vmem:[#allocation7 + $0xb98] sm:$0xff] }
 0x939   :  { %8366 = vmatprep.subr.mxu1 %v6957_v57  ;;  %8385 = vmatprep.subr.mxu0 %v6997_v35  ;;  %v7005_v57 = vld [vmem:[#allocation7 + $0xb18] sm:$0xff]  ;;  %v7020_v35 = vld [vmem:[#allocation7 + $0xb90] sm:$0xff] }
 0x93a   :  { %8367 = vmatpush3.msra.mxu1 %v6941_v53  ;;  %8386 = vmatpush3.msra.mxu0 %v6981_v55  ;;  %v7018_v53 = vld [vmem:[#allocation7 + $0xb80] sm:$0xff] }
 0x93b   :  { %8368 = vmatprep.subr.mxu1 %v6956_v12  ;;  %8387 = vmatprep.subr.mxu0 %v6996_v8  ;;  %v7002_v55 = vld [vmem:[#allocation7 + $0xb00] sm:$0xff]  ;;  %v7884_v8 = vld [vmem:[#allocation10 + $0x10] sm:$0xff] }
 0x93c   :  { %8369 = vmatpush3.msra.mxu1 %v6940_v1  ;;  %8388 = vmatpush3.msra.mxu0 %v6980_v27  ;;  %v7885_v12 = vld [vmem:[#allocation10 + $0x18] sm:$0xff]  ;;  %v7883_v1 = vld [vmem:[#allocation10 + $0x8] sm:$0xff]  ;;  %v7882_v27 = vld [vmem:[#allocation10] sm:$0xff] }
 0x93d   :  { %8370 = vmatprep.subr.mxu1 %v6955_v11  ;;  %8389 = vmatprep.subr.mxu0 %v6995_v31 }
 0x93e   :  { %8371 = vmatpush3.msra.mxu1 %v6939_v29  ;;  %8390 = vmatpush3.msra.mxu0 %v6979_v32 }
 0x93f   :  { %8372 = vmatprep.subr.mxu1 %v6954_v17  ;;  %8391 = vmatprep.subr.mxu0 %v6994_v60 }
 0x940   :  { %8373 = vmatpush3.msra.mxu1 %v6938_v42  ;;  %8392 = vmatpush3.msra.mxu0 %v6978_v52 }
 0x941   :  { %7736 = vmatmul.mubr.f32.vlgmr.msra.gmra.mxu1 %v6376_v37  ;;  %8393 = vmatprep.subr.mxu0 %v6993_v21  ;;  %v6974_v37 = vld [vmem:[#allocation7 + $0xa20] sm:$0xff] }
 0x942   :  { %8412 = vmatprep.subr.mxu1 %v7033_v30  ;;  %8394 = vmatpush3.msra.mxu0 %v6977_v63  ;;  %v8024_v30 = vld [vmem:[#allocation8] ss:$0 sm:$0xff] }
 0x943   :  { %8413 = vmatpush3.msra.mxu1 %v7017_v45  ;;  %7875 = vmatprep.mubr.f32.mxu1 %v6649_v2  ;;  %v6973_v2 = vld [vmem:[#allocation7 + $0xa18] sm:$0xff] }
 0x944   :  { %8395 = vmatprep.subr.mxu0 %v6992_v4  ;;  %8414 = vmatprep.subr.mxu1 %v7032_v26 }
 0x945   :  { %8396 = vmatpush3.msra.mxu0 %v6976_v49  ;;  %8415 = vmatpush3.msra.mxu1 %v7016_v43 }
 0x946   :  { %8397 = vmatprep.subr.mxu0 %v6991_v23  ;;  %8416 = vmatprep.subr.mxu1 %v7031_v6 }
 0x947   :  { %8398 = vmatpush3.msra.mxu0 %v6975_v39  ;;  %8417 = vmatpush3.msra.mxu1 %v7015_v28 }
 0x948   :  { %8399 = vmatprep.subr.mxu0 %v6990_v51  ;;  %8418 = vmatprep.subr.mxu1 %v7030_v46 }
 0x949   :  { %8400 = vmatpush3.msra.mxu0 %v6974_v37  ;;  %8419 = vmatpush3.msra.mxu1 %v7014_v56 }
 0x94a   :  { %8401 = vmatprep.subr.mxu0 %v6989_v41  ;;  %8420 = vmatprep.subr.mxu1 %v7029_v33 }
 0x94b   :  { %8402 = vmatpush3.msra.mxu0 %v6973_v2  ;;  %8421 = vmatpush3.msra.mxu1 %v7013_v25 }
 0x94c   :  { %8403 = vmatprep.subr.mxu0 %v6988_v22  ;;  %8422 = vmatprep.subr.mxu1 %v7028_v48 }
 0x94d   :  { %8404 = vmatpush3.msra.mxu0 %v6972_v61  ;;  %8423 = vmatpush3.msra.mxu1 %v7012_v18 }
 0x94e   :  { %8405 = vmatprep.subr.mxu0 %v6987_v13  ;;  %8424 = vmatprep.subr.mxu1 %v7027_v0 }
 0x94f   :  { %8406 = vmatpush3.msra.mxu0 %v6971_v34  ;;  %8425 = vmatpush3.msra.mxu1 %v7011_v36 }
 0x950   :  { %8407 = vmatprep.subr.mxu0 %v6986_v40  ;;  %8426 = vmatprep.subr.mxu1 %v7026_v62 }
 0x951   :  { %8408 = vmatpush3.msra.mxu0 %v6970_v9  ;;  %8427 = vmatpush3.msra.mxu1 %v7010_v15 }
 0x952   :  { %7806 = vmatmul.mubr.f32.vlgmr.msra.gmra.mxu0 %v6648_v10  ;;  %8428 = vmatprep.subr.mxu1 %v7025_v47  ;;  %v7003_v10 = vld [vmem:[#allocation7 + $0xb08] sm:$0xff] }
 0x953   :  { %8429 = vmatpush3.msra.mxu1 %v7009_v7  ;;  %8452 = vmatprep.subr.mxu0 %v8680_v58 }
 0x954   :  { %8430 = vmatprep.subr.mxu1 %v7024_v16  ;;  %8453 = vmatpush3.msra.mxu0 %v7885_v12 }
 0x955   :  { %8431 = vmatpush3.msra.mxu1 %v7008_v20  ;;  %8460 = vmatprep.mubr.msk.f32.mxu0 %vm8684_vm13, %v8680_v58 }
 0x956   :  { %8432 = vmatprep.subr.mxu1 %v7023_v59  ;;  %8454 = vmatprep.subr.mxu0 %v8680_v58 }
 0x957   :  { %8433 = vmatpush3.msra.mxu1 %v7007_v24  ;;  %8455 = vmatpush3.msra.mxu0 %v7884_v8 }
 0x958   :  { %8434 = vmatprep.subr.mxu1 %v7022_v44  ;;  %8456 = vmatprep.subr.mxu0 %v8680_v58  ;;  %v8025_v44 = vld [vmem:[#allocation11] ss:$0 sm:$0xff] }
 0x959   :  { %8435 = vmatpush3.msra.mxu1 %v7006_v19  ;;  %8457 = vmatpush3.msra.mxu0 %v7883_v1 }
 0x95a   :  { %8436 = vmatprep.subr.mxu1 %v7021_v14  ;;  %8458 = vmatprep.subr.mxu0 %v8680_v58 }
 0x95b   :  { %8437 = vmatpush3.msra.mxu1 %v7005_v57  ;;  %8459 = vmatpush3.msra.mxu0 %v7882_v27 }
 0x95c   :  { %8438 = vmatprep.subr.mxu1 %v7020_v35 }
 0x95d   :  { %8439 = vmatpush3.msra.mxu1 %v7004_v3 }
 0x95e   :  { %8440 = vmatprep.subr.mxu1 %v7019_v38 }
 0x95f   :  { %8441 = vmatpush3.msra.mxu1 %v7003_v10 }
 0x960   :  { %8442 = vmatprep.subr.mxu1 %v7018_v53 }
 0x961   :  { %8443 = vmatpush3.msra.mxu1 %v7002_v55 }
 0x962   :  { %7876 = vmatmul.mubr.f32.vlgmr.msra.gmra.mxu1 %v6513_v54 }
 0x969   :  { %v8059_v11 = vpop.f32.mrf.mxu0 }
 0x96b   :  { %v8060_v50 = vpop.f32.mrf.mxu0 }
 0x96c   :  { %v8061_v21 = vadd.f32 %v8060_v50, %v8059_v11 }
 0x96e   :  { %v7108_v26 = vadd.f32 %v8061_v21, %v8024_v30 }
 0x979   :  { %v8094_v5 = vpop.f32.mrf.mxu1 }
 0x97b   :  { %v8095_v31 = vpop.f32.mrf.mxu1 }
 0x97c   :  { %v8096_v45 = vadd.f32 %v8095_v31, %v8094_v5 }
 0x97e   :  { %v7178_v23 = vadd.f32 %v8096_v45, %v7108_v26 }
 0x98a   :  { %v8129_v54 = vpop.f32.mrf.mxu0 }
 0x98c   :  { %v8130_v29 = vpop.f32.mrf.mxu0 }
 0x98d   :  { %v8131_v49 = vadd.f32 %v8130_v29, %v8129_v54 }
 0x98f   :  { %v7248_v28 = vadd.f32 %v8131_v49, %v7178_v23 }
 0x99b   :  { %v8164_v32 = vpop.f32.mrf.mxu1 }
 0x99d   :  { %v8165_v60 = vpop.f32.mrf.mxu1 }
 0x99e   :  { %v8166_v6 = vadd.f32 %v8165_v60, %v8164_v32 }
 0x9a0   :  { %v7318_v37 = vadd.f32 %v8166_v6, %v7248_v28 }
 0x9ac   :  { %v8199_v17 = vpop.f32.mrf.mxu0 }
 0x9ae   :  { %v8200_v42 = vpop.f32.mrf.mxu0 }
 0x9af   :  { %v8201_v51 = vadd.f32 %v8200_v42, %v8199_v17 }
 0x9b1   :  { %v7388_v2 = vadd.f32 %v8201_v51, %v7318_v37 }
 0x9bd   :  { %v8234_v52 = vpop.f32.mrf.mxu1 }
 0x9bf   :  { %v8235_v4 = vpop.f32.mrf.mxu1 }
 0x9c0   :  { %v8236_v56 = vadd.f32 %v8235_v4, %v8234_v52 }
 0x9c2   :  { %v7458_v48 = vadd.f32 %v8236_v56, %v7388_v2 }
 0x9ce   :  { %v8269_v63 = vpop.f32.mrf.mxu0 }
 0x9d0   :  { %v8270_v58 = vpop.f32.mrf.mxu0 }
 0x9d1   :  { %v8271_v25 = vadd.f32 %v8270_v58, %v8269_v63 }
 0x9d3   :  { %v7528_v13 = vadd.f32 %v8271_v25, %v7458_v48 }
 0x9df   :  { %v8304_v43 = vpop.f32.mrf.mxu1 }
 0x9e1   :  { %v8305_v46 = vpop.f32.mrf.mxu1 }
 0x9e2   :  { %v8306_v61 = vadd.f32 %v8305_v46, %v8304_v43 }
 0x9e4   :  { %v7598_v36 = vadd.f32 %v8306_v61, %v7528_v13 }
 0x9f0   :  { %v8339_v39 = vpop.f32.mrf.mxu0 }
 0x9f2   :  { %v8340_v41 = vpop.f32.mrf.mxu0 }
 0x9f3   :  { %v8341_v0 = vadd.f32 %v8340_v41, %v8339_v39 }
 0x9f5   :  { %v7668_v62 = vadd.f32 %v8341_v0, %v7598_v36 }
 0xa01   :  { %v8374_v33 = vpop.f32.mrf.mxu1 }
 0xa03   :  { %v8375_v18 = vpop.f32.mrf.mxu1 }
 0xa04   :  { %v8376_v40 = vadd.f32 %v8375_v18, %v8374_v33 }
 0xa06   :  { %v7738_v47 = vadd.f32 %v8376_v40, %v7668_v62 }
 0xa12   :  { %v8409_v22 = vpop.f32.mrf.mxu0 }
 0xa14   :  { %v8410_v34 = vpop.f32.mrf.mxu0 }
 0xa15   :  { %v8411_v9 = vadd.f32 %v8410_v34, %v8409_v22 }
 0xa17   :  { %v7808_v16 = vadd.f32 %v8411_v9, %v7738_v47 }
 0xa22   :  { %v8444_v15 = vpop.f32.mrf.mxu1 }
 0xa24   :  { %v8445_v7 = vpop.f32.mrf.mxu1 }
 0xa25   :  { %v8446_v20 = vadd.f32 %v8445_v7, %v8444_v15 }
 0xa27   :  { %v7878_v59 = vadd.f32 %v8446_v20, %v7808_v16 }
 0xa29   :  { %v7881_v24 = vmax.f32 %v7878_v59, 0.0 }
 0xa2b   :  { %8461 = vmatmul.mubr.msk.f32.vlgmr.msra.gmra.mxu0 %vm14004_vm12, %v7881_v24 }
 0xaeb   :  { %v7962_v19 = vpop.f32.mrf.mxu0 }
 0xaec   :  { %v7963_v14 = vadd.f32 %v8025_v44, %v7962_v19 }
 0xaed   :  { %v8462_v57 = vpop.f32.mrf.mxu0 }
 0xaee   :  { %7967 = vst.msk [vmem:[%s12790_s7] sm:$0xff] %vm7966_vm14, %v7963_v14 }
 0xaef   :  { %7972 = vsyncpa [#allocation4], 1 }
 0xaf0   :  { %7973 = vsyncpa [#allocation6], 1 }
 0xaf1   :  { %7974 = vsyncpa [#allocation9], 1 }
 0xaf2   :  { %7975 = vsyncpa [#allocation12], 1 }

</bundles_post_ra>
